<compile_context>
chip_gen: v7x
topology: tpu7x:2x2x1
jax: 0.10.0
libtpu: 0.0.40
codegen_flags: <defaults>
</compile_context>

<pallas_src>
import functools

import jax
import jax.numpy as jnp
from jax.experimental import pallas as pl
from jax.experimental.pallas import tpu as pltpu

IN_FEATURES = 363791      # hardcoded in the PyTorch module
N_SPLITS = 2              # leading parallel axis (one K-half per TensorCore on v7x)
TILES_PER_SPLIT = 3       # K tiles per split -> 6 K tiles total


def _cdiv(a, b):
    return -(-a // b)


def _tiling(K, n_splits=N_SPLITS, tiles_per_split=TILES_PER_SPLIT):
    """Static tiling: tk is a lane-aligned (multiple-of-128) K tile size such that
    n_splits * tiles_per_split tiles cover K with minimal padding."""
    n_k_total = n_splits * tiles_per_split
    tk = _cdiv(_cdiv(K, n_k_total), 128) * 128
    return tk, n_k_total


def _make_kernel(K, tk, n_k_per_split, n_k_total):
    """Per-tile kernel: acc[b, c] += sum_k x[b, k] * w[c, k]."""
    first_masked = K // tk                 # first K tile that overruns K
    needs_mask = n_k_total * tk != K       # any padded lanes at all?

    def kernel(x_ref, w_ref, o_ref, acc_ref):
        p = pl.program_id(0)               # which K half (parallel across cores)
        k = pl.program_id(1)               # K tile within the half (reduction)
        kg = p * n_k_per_split + k         # global K-tile index

        @pl.when(k == 0)
        def _():
            acc_ref[...] = jnp.zeros_like(acc_ref)

        def accumulate(x_blk):
            # (B, tk) x (C, tk) -> (B, C), contracting the lane (K) axis.
            acc_ref[...] += jnp.einsum(
                "bk,ck->bc", x_blk, w_ref[...],
                preferred_element_type=jnp.float32,
            )

        if needs_mask:
            @pl.when(kg < first_masked)    # fully in-bounds tiles: no mask cost
            def _():
                accumulate(x_ref[...])

            @pl.when(kg >= first_masked)   # straddling / fully padded tile(s)
            def _():
                lane = jax.lax.broadcasted_iota(jnp.int32, x_ref.shape, 1)
                x_blk = jnp.where(kg * tk + lane < K, x_ref[...], 0.0)
                accumulate(x_blk)
        else:
            accumulate(x_ref[...])

        @pl.when(k == n_k_per_split - 1)
        def _():
            o_ref[0] = acc_ref[...]

    return kernel


def pack_weight(weight_ck, *, n_splits=N_SPLITS, tiles_per_split=TILES_PER_SPLIT):
    """One-time packing (outside jit) of the (C, K) weight: zero-pad K to a tile multiple."""
    c, k = weight_ck.shape
    tk, n_k_total = _tiling(k, n_splits, tiles_per_split)
    k_pad = n_k_total * tk
    return jnp.zeros((c, k_pad), weight_ck.dtype).at[:, :k].set(weight_ck)


@functools.partial(jax.jit, static_argnames=("n_splits", "tiles_per_split"))
def base_model_forward(x, w_packed, bias, *, n_splits=N_SPLITS,
                       tiles_per_split=TILES_PER_SPLIT):
    """x: (B, K) f32; w_packed: (C, Kpad) from pack_weight; bias: (C,).

    Returns sigmoid(x @ W.T + b).  Dropout is identity at inference time.
    """
    B, K = x.shape
    C, k_pad = w_packed.shape
    tk, n_k_total = _tiling(K, n_splits, tiles_per_split)
    assert k_pad == n_k_total * tk, "weight must be packed with pack_weight()"
    n_k_per_split = tiles_per_split
    x_last_block = _cdiv(K, tk) - 1        # last in-bounds K block of x

    def x_index_map(p, k):
        # Clamp so any fully-out-of-range pad tile re-reads the last valid block;
        # its contribution is masked to zero in the kernel.
        return (0, jnp.minimum(p * n_k_per_split + k, x_last_block))

    def w_index_map(p, k):
        return (0, p * n_k_per_split + k)

    partials = pl.pallas_call(
        _make_kernel(K, tk, n_k_per_split, n_k_total),
        out_shape=jax.ShapeDtypeStruct((n_splits, B, C), jnp.float32),
        grid_spec=pltpu.PrefetchScalarGridSpec(
            num_scalar_prefetch=0,
            grid=(n_splits, n_k_per_split),
            in_specs=[
                pl.BlockSpec((B, tk), x_index_map),   # x tile, K on lanes
                pl.BlockSpec((C, tk), w_index_map),   # weight tile, K on lanes
            ],
            out_specs=pl.BlockSpec((1, B, C), lambda p, k: (p, 0, 0)),
            scratch_shapes=[pltpu.VMEM((B, C), jnp.float32)],
        ),
        compiler_params=pltpu.CompilerParams(
            dimension_semantics=("parallel", "arbitrary"),
            vmem_limit_bytes=32 * 1024 * 1024,
        ),
    )(x, w_packed)

    # Tiny epilogue on a (B, C) result: combine per-core partials, add bias, sigmoid.
    z = partials.sum(axis=0) + bias[None, :]
    return jax.nn.sigmoid(z).astype(x.dtype)


if __name__ == "__main__":
    key = jax.random.PRNGKey(0)
    k_x, k_w, k_b = jax.random.split(key, 3)

    batch = 2
    channels = 4
    dropout_rate = 0.5  # unused at inference time (nn.Dropout is identity in eval)

    bound = IN_FEATURES ** -0.5
    x = jax.random.normal(k_x, (batch, IN_FEATURES), jnp.float32)
    # PyTorch nn.Linear stores weight as (out_features, in_features) = (C, K);
    # that is exactly the layout the kernel wants (K on the lane axis).
    weight = jax.random.uniform(k_w, (channels, IN_FEATURES), jnp.float32,
                                minval=-bound, maxval=bound)
    bias = jax.random.uniform(k_b, (channels,), jnp.float32,
                              minval=-bound, maxval=bound)

    w_packed = pack_weight(weight)   # one-time packing, outside the jitted forward

    out = base_model_forward(x, w_packed, bias)
    out = jax.block_until_ready(out)

    # Reference check in plain JAX (high-precision matmul).
    ref = jax.nn.sigmoid(
        jnp.dot(x, weight.T, precision=jax.lax.Precision.HIGHEST) + bias)
    assert out.shape == (batch, channels)
    assert jnp.allclose(out, ref, atol=1e-3, rtol=1e-3), "mismatch vs reference"

    print("KERNEL_OK")
</pallas_src>

<mosaic_0001>
module attributes {stable_mosaic.version = 11 : i64} {
  func.func @kernel(%arg0: i32, %arg1: i32, %arg2: memref<2x60672xf32, #tpu.memory_space<vmem>>, %arg3: memref<4x60672xf32, #tpu.memory_space<vmem>>, %arg4: memref<1x2x4xf32, #tpu.memory_space<vmem>>, %arg5: memref<2x4xf32, #tpu.memory_space<vmem>>) attributes {dimension_semantics = [#tpu.dimension_semantics<parallel>, #tpu.dimension_semantics<arbitrary>], iteration_bounds = array<i64: 2, 3>, scalar_prefetch = 0 : i64, scratch_operands = 1 : i64, tpu.core_type = #tpu.core_type<tc>, window_params = [{transform_indices = @transform_0, window_bounds = array<i64: 2, 60672>}, {transform_indices = @transform_1, window_bounds = array<i64: 4, 60672>}, {transform_indices = @transform_2, window_bounds = array<i64: 1, 2, 4>}]} {
    %c3_i32 = arith.constant 3 : i32
    %0 = arith.muli %arg0, %c3_i32 : i32
    %1 = arith.addi %0, %arg1 : i32
    %c0_i32 = arith.constant 0 : i32
    %2 = arith.cmpi eq, %arg1, %c0_i32 : i32
    %3 = arith.extui %2 : i1 to i32
    %c0_i32_0 = arith.constant 0 : i32
    %4 = arith.cmpi ne, %3, %c0_i32_0 : i32
    scf.if %4 {
      %cst = arith.constant 0.000000e+00 : f32
      %14 = vector.broadcast %cst : f32 to vector<2x4xf32>
      %c0 = arith.constant 0 : index
      %c0_5 = arith.constant 0 : index
      %15 = vector.load %arg5[%c0, %c0_5] : memref<2x4xf32, #tpu.memory_space<vmem>>, vector<2x4xf32>
      tpu.vector_store %arg5[%c0, %c0_5], %14 {strides = array<i32>} : memref<2x4xf32, #tpu.memory_space<vmem>>, vector<2x4xf32>,
    } else {
    }
    %c5_i32 = arith.constant 5 : i32
    %5 = arith.cmpi slt, %1, %c5_i32 : i32
    %6 = arith.extui %5 : i1 to i32
    %c0_i32_1 = arith.constant 0 : i32
    %7 = arith.cmpi ne, %6, %c0_i32_1 : i32
    scf.if %7 {
      %c0 = arith.constant 0 : index
      %c0_5 = arith.constant 0 : index
      %14 = vector.load %arg2[%c0, %c0_5] : memref<2x60672xf32, #tpu.memory_space<vmem>>, vector<2x60672xf32>
      %c0_6 = arith.constant 0 : index
      %c0_7 = arith.constant 0 : index
      %15 = vector.load %arg5[%c0_6, %c0_7] : memref<2x4xf32, #tpu.memory_space<vmem>>, vector<2x4xf32>
      %c0_8 = arith.constant 0 : index
      %c0_9 = arith.constant 0 : index
      %16 = vector.load %arg3[%c0_8, %c0_9] : memref<4x60672xf32, #tpu.memory_space<vmem>>, vector<4x60672xf32>
      "tpu.trace_start"() <{level = 10 : i32, message = "bk,ck->bc"}> : () -> ()
      %cst = arith.constant dense<0.000000e+00> : vector<2x4xf32>
      %17 = tpu.matmul %14, %16, %cst {dimension_numbers = #tpu.dot_dimension_numbers<[1], [1], [0], [0], [0, 0, 1, 0], [], []>} : vector<2x60672xf32>, vector<4x60672xf32>, vector<2x4xf32> -> vector<2x4xf32>
      "tpu.trace_stop"() : () -> ()
      %18 = arith.addf %15, %17 : vector<2x4xf32>
      %c0_10 = arith.constant 0 : index
      %c0_11 = arith.constant 0 : index
      %19 = vector.load %arg5[%c0_10, %c0_11] : memref<2x4xf32, #tpu.memory_space<vmem>>, vector<2x4xf32>
      tpu.vector_store %arg5[%c0_10, %c0_11], %18 {strides = array<i32>} : memref<2x4xf32, #tpu.memory_space<vmem>>, vector<2x4xf32>,
    } else {
    }
    %c5_i32_2 = arith.constant 5 : i32
    %8 = arith.cmpi sge, %1, %c5_i32_2 : i32
    %9 = arith.extui %8 : i1 to i32
    %c0_i32_3 = arith.constant 0 : i32
    %10 = arith.cmpi ne, %9, %c0_i32_3 : i32
    scf.if %10 {
      %14 = tpu.iota {dimensions = array<i32: 1>} : vector<2x60672xi32>
      %c60672_i32 = arith.constant 60672 : i32
      %15 = arith.muli %1, %c60672_i32 : i32
      %16 = vector.broadcast %15 : i32 to vector<2x60672xi32>
      %17 = arith.addi %16, %14 : vector<2x60672xi32>
      %c363791_i32 = arith.constant 363791 : i32
      %18 = vector.broadcast %c363791_i32 : i32 to vector<2x60672xi32>
      %19 = arith.cmpi slt, %17, %18 : vector<2x60672xi32>
      %c0 = arith.constant 0 : index
      %c0_5 = arith.constant 0 : index
      %20 = vector.load %arg2[%c0, %c0_5] : memref<2x60672xf32, #tpu.memory_space<vmem>>, vector<2x60672xf32>
      %cst = arith.constant 0.000000e+00 : f32
      %21 = vector.broadcast %cst : f32 to vector<2x60672xf32>
      %22 = arith.select %19, %20, %21 : vector<2x60672xi1>, vector<2x60672xf32>
      %c0_6 = arith.constant 0 : index
      %c0_7 = arith.constant 0 : index
      %23 = vector.load %arg5[%c0_6, %c0_7] : memref<2x4xf32, #tpu.memory_space<vmem>>, vector<2x4xf32>
      %c0_8 = arith.constant 0 : index
      %c0_9 = arith.constant 0 : index
      %24 = vector.load %arg3[%c0_8, %c0_9] : memref<4x60672xf32, #tpu.memory_space<vmem>>, vector<4x60672xf32>
      "tpu.trace_start"() <{level = 10 : i32, message = "bk,ck->bc"}> : () -> ()
      %cst_10 = arith.constant dense<0.000000e+00> : vector<2x4xf32>
      %25 = tpu.matmul %22, %24, %cst_10 {dimension_numbers = #tpu.dot_dimension_numbers<[1], [1], [0], [0], [0, 0, 1, 0], [], []>} : vector<2x60672xf32>, vector<4x60672xf32>, vector<2x4xf32> -> vector<2x4xf32>
      "tpu.trace_stop"() : () -> ()
      %26 = arith.addf %23, %25 : vector<2x4xf32>
      %c0_11 = arith.constant 0 : index
      %c0_12 = arith.constant 0 : index
      %27 = vector.load %arg5[%c0_11, %c0_12] : memref<2x4xf32, #tpu.memory_space<vmem>>, vector<2x4xf32>
      tpu.vector_store %arg5[%c0_11, %c0_12], %26 {strides = array<i32>} : memref<2x4xf32, #tpu.memory_space<vmem>>, vector<2x4xf32>,
    } else {
    }
    %c2_i32 = arith.constant 2 : i32
    %11 = arith.cmpi eq, %arg1, %c2_i32 : i32
    %12 = arith.extui %11 : i1 to i32
    %c0_i32_4 = arith.constant 0 : i32
    %13 = arith.cmpi ne, %12, %c0_i32_4 : i32
    scf.if %13 {
      %c0 = arith.constant 0 : index
      %c0_5 = arith.constant 0 : index
      %14 = vector.load %arg5[%c0, %c0_5] : memref<2x4xf32, #tpu.memory_space<vmem>>, vector<2x4xf32>
      %c0_6 = arith.constant 0 : index
      %c0_7 = arith.constant 0 : index
      %c0_8 = arith.constant 0 : index
      %15 = vector.load %arg4[%c0_6, %c0_7, %c0_8] : memref<1x2x4xf32, #tpu.memory_space<vmem>>, vector<1x2x4xf32>
      %16 = vector.shape_cast %15 : vector<1x2x4xf32> to vector<2x4xf32>
      %17 = vector.shape_cast %14 : vector<2x4xf32> to vector<1x2x4xf32>
      tpu.vector_store %arg4[%c0_6, %c0_7, %c0_8], %17 {strides = array<i32>} : memref<1x2x4xf32, #tpu.memory_space<vmem>>, vector<1x2x4xf32>,
    } else {
    }
    return
  }
  func.func @transform_0(%arg0: i32, %arg1: i32) -> (i32, i32) {
    %c3_i32 = arith.constant 3 : i32
    %0 = arith.muli %arg0, %c3_i32 : i32
    %1 = arith.addi %0, %arg1 : i32
    %c5_i32 = arith.constant 5 : i32
    %2 = arith.minsi %1, %c5_i32 : i32
    %c0_i32 = arith.constant 0 : i32
    %c0_i32_0 = arith.constant 0 : i32
    return %c0_i32, %2 : i32, i32
  }
  func.func @transform_1(%arg0: i32, %arg1: i32) -> (i32, i32) {
    %c3_i32 = arith.constant 3 : i32
    %0 = arith.muli %arg0, %c3_i32 : i32
    %1 = arith.addi %0, %arg1 : i32
    %c0_i32 = arith.constant 0 : i32
    %c0_i32_0 = arith.constant 0 : i32
    return %c0_i32, %1 : i32, i32
  }
  func.func @transform_2(%arg0: i32, %arg1: i32) -> (i32, i32, i32) {
    %c0_i32 = arith.constant 0 : i32
    %c0_i32_0 = arith.constant 0 : i32
    %c0_i32_1 = arith.constant 0 : i32
    return %arg0, %c0_i32, %c0_i32_0 : i32, i32, i32
  }
}

</mosaic_0001>

<bundles_post_ra>
// kernel: base_model_forward.1
= control target key start
LH: loop header
LB: loop body
LE: loop exit
PB: predicated region body
PF: predicated region fallthrough
CT: control target
= control target key end

     0   :  { %7 = vsyncpa [#allocation4], 0  ;;  %s47969_s0 = inlined_call_operand.hbm [shape: f32[2,363791], index: 0, kind: input, shape index: {}]   ;;  %s47970_s1 = inlined_call_operand.hbm [shape: f32[4,364032], index: 1, kind: input, shape index: {}]   ;;  %s47971_s2 = inlined_call_operand.vmem [shape: f32[2,2,4], index: 2, kind: output, shape index: {}]  }
   0x1   :  { %9 = vsyncpa [#allocation4 + $0x1], 0 }
   0x2   :  { %10 = vsyncpa [#allocation6], 0 }
   0x3   :  { %12 = vsyncpa [#allocation6 + $0x1], 0  ;;  %s44281_s9 = smov 0   ;;  %s44283_s10 = smov 0  }
   0x4   :  { %s44285_s11 = smov 0   ;;  %s44287_s12 = smov 0  }
   0x5   :  { %s44289_s13 = smov 0   ;;  %s44291_s14 = smov 0  }
   0x6   :  { %s44293_s15 = smov 0   ;;  %s44295_s16 = smov 0  }
   0x7   :  { %s44297_s17 = smov 0   ;;  %s44299_s18 = smov 0  }
   0x8   :  { %s44301_s19 = smov 0  }
   0x9 LB: > { %s27_s20 = sadd.s32 1, %s44251_s17  ;;  %s30_s21 = sadd.s32 1, %s44255_s18  ;;  %s44259_s19 = sphi %s44301_s19, %s18_s19   ;;  %s44255_s18 = sphi %s44299_s18, %s47998_s18   ;;  %s44251_s17 = sphi %s44297_s17, %s47997_s17   ;;  %s44247_s16 = sphi %s44295_s16, %s47996_s16   ;;  %s44243_s15 = sphi %s44293_s15, %s47995_s15   ;;  %s44239_s14 = sphi %s44291_s14, %s47994_s14   ;;  %s44235_s13 = sphi %s44289_s13, %s47993_s13   ;;  %s44231_s12 = sphi %s44287_s12, %s47992_s12   ;;  %s44227_s11 = sphi %s44285_s11, %s47991_s11   ;;  %s44223_s10 = sphi %s44283_s10, %s47990_s10   ;;  %s44219_s9 = sphi %s44281_s9, %s47989_s9  }
   0xa   : > { %p28_p0 = scmp.ge.s32.totalorder %s27_s20, 3  ;;  %s42805_s22 = sadd.s32 4294967295, %s44259_s19  }
   0xb   : > { %s34_s23 = smul.u32 3, %s44255_s18  ;;  %p52_p1 = scmp.ne.s32.totalorder %s44239_s14, %s44235_s13 }
   0xc   : > { %s48000_s20 = smov (%p28_p0, %s27_s20), 0  ;;  %s48002_s21 = smov (!%p28_p0, %s30_s21), %s44255_s18 }
   0xd   : > { %47977 = sst [smem:[#allocation9_spill]] %s48000_s20  ;;  %s44344_s24 = sadd.s32 %s44251_s17, %s34_s23 }
   0xe   : > { %p32_p2 = scmp.ge.s32.totalorder %s48002_s21, 2  ;;  %p36_p3 = scmp.lt.s32.totalorder %s44344_s24, 5 }
   0xf   : > { %p53_p4 = scmp.eq.s32.totalorder %s44259_s19, 0  ;;  %p58_p5 = scmp.ne.s32.totalorder %s44235_s13, %s44231_s12 }
  0x10   : > { %s48004_s21 = smov (%p32_p2, %s48002_s21), 0  ;;  %p44364_p7 = scmp.eq.s32.totalorder %s42805_s22, 0 }
  0x11   : > { %47978 = sst [smem:[#allocation10_spill]] %s48004_s21  ;;  %s38_s26 = smul.u32 3, %s48004_s21 }
  0x12   : > { %s44355_s25 = scalar_select %p36_p3, %s44344_s24, 5 }
  0x13   : > { %p44360_p6 = por %p53_p4, %p52_p1  ;;  %s75_s29 = sadd.s32 1, %s44227_s11 }
  0x14   : > { %s39_s30 = sadd.s32 %s38_s26, %s48000_s20  ;;  %p82_p8 = scmp.ne.s32.totalorder %s44227_s11, %s44223_s10 }
  0x15   : > { %p40_p9 = scmp.lt.s32.totalorder %s39_s30, 5  ;;  %p44374_p10 = por %p44364_p7, %p58_p5 }
  0x16   : > { %s72_s4 = ssub.s32 %s44344_s24, %s39_s30  ;;  %p44381_p11 = por %p82_p8, %p53_p4 }
  0x17   : > { %s47981_s3 = scalar_select %p44374_p10, 1, 0 }
  0x18   : > { %s47982_s5 = scalar_select %p44381_p11, 1, 0 }
  0x19   : > { %s48006_s30 = smov (!%p40_p9, %s39_s30), 5  ;;  %p73_p12 = scmp.eq.s32.totalorder %s72_s4, 0 }
  0x1a   : > { %p88_p13 = scmp.ne.s32.totalorder %s44223_s10, %s44219_s9  ;;  %s42_s6 = ssub.s32 %s44355_s25, %s48006_s30 }
  0x1b   : > { %s45_s7 = sadd.s32 1, %s44239_s14  ;;  %p43_p0 = scmp.eq.s32.totalorder %s42_s6, 0 }
  0x1c   : > { %p44391_p1 = por %p88_p13, %p44364_p7  ;;  %p42808_p2 = scmp.ge.s32.totalorder %s44259_s19, 6 }
  0x1d   : > { %s44396_s12 = scalar_select %p73_p12, %s44227_s11, %s75_s29  }
  0x1e   : > { %s47983_s8 = scalar_select %p44391_p1, 1, 0 }
  0x1f   : > { %s44399_s22 = scalar_select %p43_p0, %s44239_s14, %s45_s7  }
  0x20   : > { %134 = sbr.rel (%p42808_p2) target bundleno = 99 (0x63), region = 16 }
  0x27   : > { %137 = sbr.rel (!%p44360_p6) target bundleno = 73 (0x49), region = 20  ;;  %s138_s9 = sand.u32 (%p44360_p6), 1, %s44239_s14  }
  0x28   : > { %s147_s23 = smul.u32 (%p44360_p6), 474, %s44355_s25  ;;  %s44409_s4 = scalar_lea.sflag (%p44360_p6), [#allocation4], %s138_s9 }
  0x29   : > { %s43301_s26 = smul.u32 (%p44360_p6), 948, %s138_s9 }
  0x2a   : > { %s148_s28 = ssub.s32 (%p44360_p6), 2843, %s147_s23 }
  0x2b   : > { %p149_p3 = scmp.lt.s32.totalorder (%p44360_p6), %s148_s28, 474  ;;  %s142_s6 = scalar_lea.vmem (%p44360_p6), [#allocation3], %s43301_s26 }
  0x2e   : > { %s48008_s28 = smov (!%p149_p3, %s148_s28), 474 }
  0x2f   : > { %s44406_s30 = sshll.u32 %s48008_s28, 5 }
  0x30   : > { %s153_s29 = ssub.s32 15168, %s44406_s30 }
  0x31   : > { %154 = vsyncadd %s44409_s4, %s153_s29  ;;  %p42810_p4 = scmp.ne.s32.totalorder %s44406_s30, 0  ;;  %s43299_s27 = smul.u32 15168, %s44355_s25 }
  0x32   : > { %s160_s7 = sshll.u32 %s142_s6, 4  ;;  %s44113_s25 = scalar_lea.hbm %s47969_s0, 90976  ;;  %s161_s7 = int_to_ptr.vmem [resolvable:$true] %s160_s7 }
  0x33   : > { %s44417_s20 = scalar_lea.hbm %s47969_s0, %s43299_s27 }
  0x34   : > { %s44109_s9 = scalar_lea.hbm %s44417_s20, %s44406_s30  ;;  %p44114_p8 = scmp.lt.u32.totalorder %s44417_s20, %s47969_s0 }
  0x35   : > { %p44110_p5 = scmp.ne.s32.totalorder %s44417_s20, %s44109_s9  ;;  %p44115_p9 = scmp.lt.u32.totalorder %s44113_s25, %s44109_s9 }
  0x36   : > { %p44117_p13 = scmp.lt.u32.totalorder %s44109_s9, %s44417_s20 }
  0x37   : > { %p44111_p6 = pnand %p44110_p5, %p42810_p4  ;;  %p44116_p12 = por %p44115_p9, %p44114_p8 }
  0x39   : > { %p44112_p7 = pneg %p44111_p6  ;;  %p44118_p0 = por %p44117_p13, %p44116_p12 }
  0x3b   : > { %p44119_p2 = pnand %p44118_p0, %p44112_p7 }
  0x3d   : > { %44122 = shalt.err (!%p44119_p2)
}
  0x3e   : > { %s44123_s21 = scalar_lea.vmem %s161_s7, %s44406_s30  ;;  %s44261_s27 = smov [#allocation3]  }
  0x3f   : > { %p44124_p3 = scmp.ne.s32.totalorder %s161_s7, %s44123_s21  ;;  %s44127_s23 = sshll.u32 %s44261_s27, 4  ;;  %s44128_s23 = int_to_ptr.vmem [resolvable:$false] %s44127_s23 }
  0x40   : > { %s44129_s26 = scalar_lea.vmem %s44128_s23, 30336  ;;  %p44130_p1 = scmp.lt.s32.totalorder %s161_s7, %s44128_s23 }
  0x41   : > { %p44125_p5 = pnand %p44124_p3, %p42810_p4  ;;  %p44131_p10 = scmp.lt.s32.totalorder %s44129_s26, %s44123_s21 }
  0x43   : > { %p44126_p6 = pneg %p44125_p5  ;;  %p44132_p11 = por %p44131_p10, %p44130_p1 }
  0x45   : > { %p44133_p8 = pnand %p44132_p11, %p44126_p6 }
  0x47   : > { %44136 = shalt.err (!%p44133_p8)
}
  0x48   : > { %163 = dma.hbm_to_vmem [thread:$0]  (%p42810_p4), %s44417_s20, %s44406_s30, %s161_s7, %s44409_s4  }
  0x49 PF: > { %s167_s9 = sand.u32 1, %s44227_s11   ;;  %s43300_s28 = smul.u32 30336, %s44344_s24 }
  0x4a   : > { %s43302_s25 = smul.u32 1896, %s167_s9  ;;  %s168_s20 = scalar_lea.sflag [#allocation6], %s167_s9 }
  0x4b   : > { %s44445_s21 = scalar_lea.hbm %s47970_s1, %s43300_s28  ;;  %p47984_p11 = scmp.ne.s32.totalorder %s47982_s5, 0 }
  0x4c   : > { %s171_s27 = scalar_lea.vmem [#allocation5], %s43302_s25  ;;  %s44137_s30 = scalar_lea.hbm %s44445_s21, 30336 }
  0x4d   : > { %s181_s23 = sshll.u32 %s171_s27, 4  ;;  %p44138_p10 = scmp.ne.s32.totalorder %s44445_s21, %s44137_s30  ;;  %s182_s23 = int_to_ptr.vmem [resolvable:$true] %s181_s23 }
  0x4e   : > { %s44141_s7 = scalar_lea.hbm %s47970_s1, 182016  ;;  %p44142_p7 = scmp.lt.u32.totalorder %s44445_s21, %s47970_s1 }
  0x4f   : > { %p44139_p1 = pnand %p44138_p10, %p47984_p11  ;;  %p44143_p9 = scmp.lt.u32.totalorder %s44141_s7, %s44137_s30 }
  0x50   : > { %p44145_p13 = scmp.lt.u32.totalorder %s44137_s30, %s44445_s21 }
  0x51   : > { %p44140_p4 = pneg %p44139_p1  ;;  %p44144_p12 = por %p44143_p9, %p44142_p7 }
  0x53   : > { %p44146_p0 = por %p44145_p13, %p44144_p12 }
  0x55   : > { %p44147_p2 = pnand %p44146_p0, %p44140_p4 }
  0x57   : > { %44150 = shalt.err (!%p44147_p2)
}
  0x58   : > { %s44151_s9 = scalar_lea.vmem %s182_s23, 30336  ;;  %s44262_s25 = smov [#allocation5]  }
  0x59   : > { %p44152_p3 = scmp.ne.s32.totalorder %s182_s23, %s44151_s9  ;;  %s44155_s29 = sshll.u32 %s44262_s25, 4  ;;  %s44156_s29 = int_to_ptr.vmem [resolvable:$false] %s44155_s29 }
  0x5a   : > { %s44157_s6 = scalar_lea.vmem %s44156_s29, 60672  ;;  %p44158_p8 = scmp.lt.s32.totalorder %s182_s23, %s44156_s29 }
  0x5b   : > { %p44153_p5 = pnand %p44152_p3, %p47984_p11  ;;  %p44159_p10 = scmp.lt.s32.totalorder %s44157_s6, %s44151_s9 }
  0x5d   : > { %p44154_p6 = pneg %p44153_p5  ;;  %p44160_p1 = por %p44159_p10, %p44158_p8 }
  0x5f   : > { %p44161_p7 = pnand %p44160_p1, %p44154_p6 }
  0x61   : > { %44164 = shalt.err (!%p44161_p7)
}
  0x62   : > { %43305 = dma.hbm_to_vmem [thread:$0]  (%p47984_p11), %s44445_s21, 30336, %s182_s23, %s168_s20  }
  0x63 PF: > { %p42815_p4 = scmp.ge.s32.totalorder %s44259_s19, 1  ;;  %p186_p9 = scmp.lt.s32.totalorder %s44259_s19, 7 }
  0x65   : > { %p187_p12 = pnand %p42815_p4, %p186_p9 }
  0x66   : > { %s192_s27 = sand.u32 (!%p187_p12), 1, %s44235_s13   ;;  %p47985_p13 = scmp.ne.s32.totalorder (!%p187_p12), %s47981_s3, 0 }
  0x67   : > { %190 = sbr.rel (%p187_p12) target bundleno = 1656 (0x678), region = 28  ;;  %s193_s24 = scalar_lea.sflag (!%p187_p12), [#allocation4], %s192_s27 }
  0x68   : > { %s43303_s30 = smul.u32 (!%p187_p12), 948, %s192_s27 }
  0x6a   : > { %s44467_s4 = scalar_lea.vmem (!%p187_p12), [#allocation3], %s43303_s30 }
  0x6e   : > { %44210 = dma.done.wait (%p47985_p13), %s193_s24, 15168  }
  0x6f   : > { %44212 = vsyncadd (%p47985_p13), %s193_s24, 4294952128  ;;  %s201_s5 = sand.u32 1, %s44223_s10   ;;  %p47986_p11 = scmp.ne.s32.totalorder %s47983_s8, 0 }
  0x70   : > { %s43304_s21 = smul.u32 1896, %s201_s5  ;;  %s202_s23 = scalar_lea.sflag [#allocation6], %s201_s5 }
  0x72   : > { %s44474_s20 = scalar_lea.vmem [#allocation5], %s43304_s21 }
  0x73   : > { %44214 = dma.done.wait (%p47986_p11), %s202_s23, 30336  }
  0x74   : > { %44216 = vsyncadd (%p47986_p11), %s202_s23, 4294936960  ;;  %p242_p0 = scmp.lt.s32.totalorder %s44247_s16, 1  ;;  %s246_s7 = smul.u32 3, %s44247_s16 }
  0x75   : > { %p42817_p2 = scmp.ne.s32.totalorder %s44243_s15, 0 }
  0x76   : > { %s48010_s16 = smov (!%p242_p0, %s44247_s16), 1  ;;  %s44484_s3 = sadd.s32 %s44243_s15, %s246_s7  ;;  %vm252_vm0 = vcmask (!%p42817_p2), 25600   ;;  %v44263_v0 = vmov (!%p42817_p2), 0.0  }
  0x77   : > { %s42816_s26 = sshll.u32 %s48010_s16, 1  ;;  %251 = sbr.rel (%p42817_p2) target bundleno = 126 (0x7e), region = 40  ;;  %253 = vst.msk [vmem:[#allocation2] sm:$0x3] (!%p42817_p2), %vm252_vm0, %v44263_v0 }
  0x78   : > { %s44489_s25 = scalar_lea.vmem %s47971_s2, %s42816_s26 }
  0x7e PF: > { %p42818_p3 = scmp.ge.s32.totalorder %s44484_s3, 5 }
  0x7f   : > { %v378_v1 = vld [vmem:[%s44474_s20] sm:$0xff] (!%p42818_p3)  ;;  %v379_v2 = vld [vmem:[%s44474_s20 + $0x8] sm:$0xff] (!%p42818_p3)  ;;  %v738_v4 = vlaneseq (!%p42818_p3)  ;;  %v44264_v7 = vmov (!%p42818_p3), 1983009808   ;;  %v380_v9 = vld [vmem:[%s44474_s20 + $0x10] sm:$0xff] (!%p42818_p3)  ;;  %vm20524_vm1 = vcmask (!%p42818_p3), 25600  }
  0x80   : > { %257 = sbr.rel (%p42818_p3) target bundleno = 828 (0x33c), region = 44  ;;  %v258_v3 = vld [vmem:[%s44467_s4] sm:$0xff] (!%p42818_p3)  ;;  %v3459_v5 = vcombine.high (!%p42818_p3), %v378_v1, %v378_v1  ;;  %v3460_v6 = vcombine.high (!%p42818_p3), %v379_v2, %v379_v2  ;;  %v736_v8 = vunpack.c.l.s4 (!%p42818_p3), %v44264_v7  ;;  %v259_v11 = vld [vmem:[%s44467_s4 + $0x8] sm:$0xff] (!%p42818_p3)  ;;  %v3461_v13 = vcombine.high (!%p42818_p3), %v380_v9, %v380_v9  ;;  %v260_v18 = vld [vmem:[%s44467_s4 + $0x10] sm:$0xff] (!%p42818_p3) }
  0x81   : > { %v381_v10 = vld [vmem:[%s44474_s20 + $0x18] sm:$0xff] (!%p42818_p3)  ;;  %v739_v12 = vshrl.u32 (!%p42818_p3), %v738_v4, 7  ;;  %v734_v16 = vcombine.high (!%p42818_p3), %v258_v3, %v258_v3  ;;  %v751_v17 = vcombine.high (!%p42818_p3), %v259_v11, %v259_v11  ;;  %v768_v20 = vcombine.high (!%p42818_p3), %v260_v18, %v260_v18  ;;  %v382_v24 = vld [vmem:[%s44474_s20 + $0x20] sm:$0xff] (!%p42818_p3)  ;;  %v383_v26 = vld [vmem:[%s44474_s20 + $0x28] sm:$0xff] (!%p42818_p3) }
  0x82   : > { %v3462_v14 = vcombine.high (!%p42818_p3), %v381_v10, %v381_v10  ;;  %3933 = vmatprep.subr.mxu0 (!%p42818_p3), %v3459_v5  ;;  %4003 = vmatprep.subr.mxu1 (!%p42818_p3), %v3460_v6  ;;  %v737_v15 = vunpack.c.0.s8 (!%p42818_p3), %v736_v8  ;;  %v261_v27 = vld [vmem:[%s44467_s4 + $0x18] sm:$0xff] (!%p42818_p3)  ;;  %v3463_v31 = vcombine.high (!%p42818_p3), %v382_v24, %v382_v24  ;;  %v3464_v32 = vcombine.high (!%p42818_p3), %v383_v26, %v383_v26  ;;  %v262_v39 = vld [vmem:[%s44467_s4 + $0x20] sm:$0xff] (!%p42818_p3)  ;;  %v263_v49 = vld [vmem:[%s44467_s4 + $0x28] sm:$0xff] (!%p42818_p3) }
  0x83   : > { %3934 = vmatpush1.xpose.msra.mxu0 (!%p42818_p3), %v378_v1  ;;  %4004 = vmatpush1.xpose.msra.mxu1 (!%p42818_p3), %v379_v2  ;;  %v384_v34 = vld [vmem:[%s44474_s20 + $0x30] sm:$0xff] (!%p42818_p3)  ;;  %v385_v37 = vld [vmem:[%s44474_s20 + $0x38] sm:$0xff] (!%p42818_p3)  ;;  %v785_v38 = vcombine.high (!%p42818_p3), %v261_v27, %v261_v27  ;;  %v386_v44 = vld [vmem:[%s44474_s20 + $0x40] sm:$0xff] (!%p42818_p3)  ;;  %v802_v48 = vcombine.high (!%p42818_p3), %v262_v39, %v262_v39  ;;  %v819_v58 = vcombine.high (!%p42818_p3), %v263_v49, %v263_v49 }
  0x84   : > { %v44500_v19 = vsub.s32 (!%p42818_p3), %v737_v15, %v739_v12  ;;  %4073 = vmatprep.subr.mxu0 (!%p42818_p3), %v3461_v13  ;;  %4143 = vmatprep.subr.mxu1 (!%p42818_p3), %v3462_v14  ;;  %v3465_v40 = vcombine.high (!%p42818_p3), %v384_v34, %v384_v34  ;;  %v3466_v42 = vcombine.high (!%p42818_p3), %v385_v37, %v385_v37  ;;  %v387_v47 = vld [vmem:[%s44474_s20 + $0x48] sm:$0xff] (!%p42818_p3)  ;;  %v388_v54 = vld [vmem:[%s44474_s20 + $0x50] sm:$0xff] (!%p42818_p3)  ;;  %v389_v57 = vld [vmem:[%s44474_s20 + $0x58] sm:$0xff] (!%p42818_p3) }
  0x85   : > { %v3467_v50 = vcombine.high (!%p42818_p3), %v386_v44, %v386_v44  ;;  %v3468_v52 = vcombine.high (!%p42818_p3), %v387_v47, %v387_v47  ;;  %v264_v59 = vld [vmem:[%s44467_s4 + $0x30] sm:$0xff] (!%p42818_p3)  ;;  %v3469_v60 = vcombine.high (!%p42818_p3), %v388_v54, %v388_v54  ;;  %v3470_v62 = vcombine.high (!%p42818_p3), %v389_v57, %v389_v57  ;;  %v390_v0 = vld [vmem:[%s44474_s20 + $0x60] sm:$0xff] (!%p42818_p3) }
  0x86   : > { %v741_v21 = vrot.slane (!%p42818_p3), %v258_v3, %v44500_v19  ;;  %v748_v22 = vrot.slane (!%p42818_p3), %v734_v16, %v44500_v19  ;;  %v758_v23 = vrot.slane (!%p42818_p3), %v259_v11, %v44500_v19  ;;  %v765_v25 = vrot.slane (!%p42818_p3), %v751_v17, %v44500_v19  ;;  %v391_v3 = vld [vmem:[%s44474_s20 + $0x68] sm:$0xff] (!%p42818_p3)  ;;  %v265_v5 = vld [vmem:[%s44467_s4 + $0x38] sm:$0xff] (!%p42818_p3) }
  0x87   : > { %v775_v33 = vrot.slane %v260_v18, %v44500_v19  ;;  %v782_v36 = vrot.slane %v768_v20, %v44500_v19  ;;  %v792_v43 = vrot.slane %v261_v27, %v44500_v19  ;;  %v799_v46 = vrot.slane %v785_v38, %v44500_v19  ;;  %v393_v13 = vld [vmem:[%s44474_s20 + $0x78] sm:$0xff] }
  0x88   : > { %v749_v28 = vcombine.high %v741_v21, %v741_v21  ;;  %v750_v29 = vcombine.high %v748_v22, %v748_v22  ;;  %v766_v30 = vcombine.high %v758_v23, %v758_v23  ;;  %v767_v35 = vcombine.high %v765_v25, %v765_v25  ;;  %v266_v15 = vld [vmem:[%s44467_s4 + $0x40] sm:$0xff] }
  0x89   : > { %v783_v41 = vcombine.high %v775_v33, %v775_v33  ;;  %v784_v45 = vcombine.high %v782_v36, %v782_v36  ;;  %v800_v51 = vcombine.high %v792_v43, %v792_v43  ;;  %v809_v53 = vrot.slane %v262_v39, %v44500_v19 }
  0x8a   : > { %3997 = vmatprep.mubr.f32.mxu0 %v749_v28  ;;  %4067 = vmatprep.mubr.f32.mxu1 %v750_v29  ;;  %v801_v55 = vcombine.high %v799_v46, %v799_v46  ;;  %v816_v56 = vrot.slane %v802_v48, %v44500_v19  ;;  %v826_v63 = vrot.slane %v263_v49, %v44500_v19 }
  0x8b   : > { %3998 = vmatmul.mubr.f32.vlgmr.msra.gmra.mrb[0].mxu0 %v741_v21  ;;  %4068 = vmatmul.mubr.f32.vlgmr.msra.gmra.mrb[0].mxu1 %v748_v22  ;;  %v817_v61 = vcombine.high %v809_v53, %v809_v53  ;;  %v833_v2 = vrot.slane %v819_v58, %v44500_v19  ;;  %v836_v4 = vcombine.high %v264_v59, %v264_v59  ;;  %v394_v21 = vld [vmem:[%s44474_s20 + $0x80] sm:$0xff] }
  0x8c   : > { %4074 = vmatpush1.xpose.msra.mxu0 %v380_v9  ;;  %4144 = vmatpush1.xpose.msra.mxu1 %v381_v10  ;;  %v818_v1 = vcombine.high %v816_v56, %v816_v56  ;;  %v3471_v6 = vcombine.high %v390_v0, %v390_v0  ;;  %v834_v7 = vcombine.high %v826_v63, %v826_v63  ;;  %v392_v10 = vld [vmem:[%s44474_s20 + $0x70] sm:$0xff] }
  0x8d   : > { %4137 = vmatprep.mubr.f32.mxu0 %v766_v30  ;;  %4213 = vmatprep.subr.mxu0 %v3463_v31  ;;  %v3472_v8 = vcombine.high %v391_v3, %v391_v3  ;;  %v843_v9 = vrot.slane %v264_v59, %v44500_v19  ;;  %v835_v11 = vcombine.high %v833_v2, %v833_v2  ;;  %v396_v31 = vld [vmem:[%s44474_s20 + $0x90] sm:$0xff] }
  0x8e   : > { %4207 = vmatprep.mubr.f32.mxu1 %v767_v35  ;;  %4283 = vmatprep.subr.mxu1 %v3464_v32  ;;  %v850_v12 = vrot.slane %v836_v4, %v44500_v19  ;;  %v853_v14 = vcombine.high %v265_v5, %v265_v5  ;;  %v3473_v16 = vcombine.high %v392_v10, %v392_v10 }
  0x8f   : > { %4138 = vmatmul.mubr.f32.vlgmr.msra.gmra.mrb[2].mxu0 %v758_v23  ;;  %4208 = vmatmul.mubr.f32.vlgmr.msra.gmra.mrb[2].mxu1 %v765_v25  ;;  %v851_v17 = vcombine.high %v843_v9, %v843_v9  ;;  %v3474_v18 = vcombine.high %v393_v13, %v393_v13  ;;  %v860_v20 = vrot.slane %v265_v5, %v44500_v19 }
  0x90   : > { %4214 = vmatpush1.xpose.msra.mxu0 %v382_v24  ;;  %4284 = vmatpush1.xpose.msra.mxu1 %v383_v26  ;;  %v852_v22 = vcombine.high %v850_v12, %v850_v12  ;;  %v867_v23 = vrot.slane %v853_v14, %v44500_v19  ;;  %v395_v24 = vld [vmem:[%s44474_s20 + $0x88] sm:$0xff]  ;;  %v870_v25 = vcombine.high %v266_v15, %v266_v15 }
  0x91   : > { %4277 = vmatprep.mubr.f32.mxu0 %v783_v41  ;;  %4353 = vmatprep.subr.mxu0 %v3465_v40  ;;  %v267_v26 = vld [vmem:[%s44467_s4 + $0x48] sm:$0xff]  ;;  %v3475_v27 = vcombine.high %v394_v21, %v394_v21  ;;  %v868_v28 = vcombine.high %v860_v20, %v860_v20  ;;  %v3476_v29 = vcombine.high %v395_v24, %v395_v24 }
  0x92   : > { %4347 = vmatprep.mubr.f32.mxu1 %v784_v45  ;;  %4423 = vmatprep.subr.mxu1 %v3466_v42  ;;  %v877_v30 = vrot.slane %v266_v15, %v44500_v19  ;;  %v869_v32 = vcombine.high %v867_v23, %v867_v23  ;;  %v887_v35 = vcombine.high %v267_v26, %v267_v26  ;;  %v398_v41 = vld [vmem:[%s44474_s20 + $0xa0] sm:$0xff] }
  0x93   : > { %4278 = vmatmul.mubr.f32.vlgmr.msra.gmra.mrb[4].mxu0 %v775_v33  ;;  %4348 = vmatmul.mubr.f32.vlgmr.msra.gmra.mrb[4].mxu1 %v782_v36  ;;  %v884_v33 = vrot.slane %v870_v25, %v44500_v19  ;;  %v268_v36 = vld [vmem:[%s44467_s4 + $0x50] sm:$0xff]  ;;  %v894_v40 = vrot.slane %v267_v26, %v44500_v19 }
  0x94   : > { %4354 = vmatpush1.xpose.msra.mxu0 %v384_v34  ;;  %4424 = vmatpush1.xpose.msra.mxu1 %v385_v37  ;;  %v397_v34 = vld [vmem:[%s44474_s20 + $0x98] sm:$0xff]  ;;  %v3477_v37 = vcombine.high %v396_v31, %v396_v31  ;;  %v885_v38 = vcombine.high %v877_v30, %v877_v30  ;;  %v904_v45 = vcombine.high %v268_v36, %v268_v36 }
  0x95   : > { %4417 = vmatprep.mubr.f32.mxu0 %v800_v51  ;;  %4493 = vmatprep.subr.mxu0 %v3467_v50  ;;  %v3478_v39 = vcombine.high %v397_v34, %v397_v34  ;;  %v886_v42 = vcombine.high %v884_v33, %v884_v33  ;;  %v902_v48 = vcombine.high %v894_v40, %v894_v40  ;;  %v400_v51 = vld [vmem:[%s44474_s20 + $0xb0] sm:$0xff] }
  0x96   : > { %4487 = vmatprep.mubr.f32.mxu1 %v801_v55  ;;  %4563 = vmatprep.subr.mxu1 %v3468_v52  ;;  %v911_v50 = vrot.slane %v268_v36, %v44500_v19 }
  0x97   : > { %4418 = vmatmul.mubr.f32.vlgmr.msra.gmra.mrb[6].mxu0 %v792_v43  ;;  %4488 = vmatmul.mubr.f32.vlgmr.msra.gmra.mrb[6].mxu1 %v799_v46  ;;  %v901_v43 = vrot.slane %v887_v35, %v44500_v19  ;;  %v269_v46 = vld [vmem:[%s44467_s4 + $0x58] sm:$0xff] }
  0x98   : > { %4494 = vmatpush1.xpose.msra.mxu0 %v386_v44  ;;  %4564 = vmatpush1.xpose.msra.mxu1 %v387_v47  ;;  %v399_v44 = vld [vmem:[%s44474_s20 + $0xa8] sm:$0xff]  ;;  %v3479_v47 = vcombine.high %v398_v41, %v398_v41  ;;  %v921_v55 = vcombine.high %v269_v46, %v269_v46  ;;  %v919_v58 = vcombine.high %v911_v50, %v911_v50 }
  0x99   : > { %4557 = vmatprep.mubr.f32.mxu0 %v817_v61  ;;  %4633 = vmatprep.subr.mxu0 %v3469_v60  ;;  %v3480_v49 = vcombine.high %v399_v44, %v399_v44  ;;  %v903_v52 = vcombine.high %v901_v43, %v901_v43  ;;  %v928_v60 = vrot.slane %v269_v46, %v44500_v19  ;;  %v402_v61 = vld [vmem:[%s44474_s20 + $0xc0] sm:$0xff] }
  0x9a   : > { %4627 = vmatprep.mubr.f32.mxu1 %v818_v1  ;;  %4703 = vmatprep.subr.mxu1 %v3470_v62 }
  0x9b   : > { %4558 = vmatmul.mubr.f32.vlgmr.msra.gmra.mrb[8].mxu0 %v809_v53  ;;  %4628 = vmatmul.mubr.f32.vlgmr.msra.gmra.mrb[8].mxu1 %v816_v56  ;;  %v918_v53 = vrot.slane %v904_v45, %v44500_v19  ;;  %v270_v56 = vld [vmem:[%s44467_s4 + $0x60] sm:$0xff]  ;;  %v936_v4 = vcombine.high %v928_v60, %v928_v60 }
  0x9c   : > { %4634 = vmatpush1.xpose.msra.mxu0 %v388_v54  ;;  %4704 = vmatpush1.xpose.msra.mxu1 %v389_v57  ;;  %v401_v54 = vld [vmem:[%s44474_s20 + $0xb8] sm:$0xff]  ;;  %v3481_v57 = vcombine.high %v400_v51, %v400_v51  ;;  %v938_v1 = vcombine.high %v270_v56, %v270_v56 }
  0x9d   : > { %4697 = vmatprep.mubr.f32.mxu0 %v834_v7  ;;  %4773 = vmatprep.subr.mxu0 %v3471_v6  ;;  %v3482_v59 = vcombine.high %v401_v54, %v401_v54  ;;  %v920_v62 = vcombine.high %v918_v53, %v918_v53  ;;  %v945_v6 = vrot.slane %v270_v56, %v44500_v19  ;;  %v404_v7 = vld [vmem:[%s44474_s20 + $0xd0] sm:$0xff] }
  0x9e   : > { %4767 = vmatprep.mubr.f32.mxu1 %v835_v11  ;;  %4843 = vmatprep.subr.mxu1 %v3472_v8 }
  0x9f   : > { %4698 = vmatmul.mubr.f32.vlgmr.msra.gmra.mrb[10].mxu0 %v826_v63  ;;  %4768 = vmatmul.mubr.f32.vlgmr.msra.gmra.mrb[10].mxu1 %v833_v2  ;;  %v935_v63 = vrot.slane %v921_v55, %v44500_v19  ;;  %v271_v2 = vld [vmem:[%s44467_s4 + $0x68] sm:$0xff]  ;;  %v953_v14 = vcombine.high %v945_v6, %v945_v6 }
  0xa0   : > { %4774 = vmatpush1.xpose.msra.mxu0 %v390_v0  ;;  %4844 = vmatpush1.xpose.msra.mxu1 %v391_v3  ;;  %v403_v0 = vld [vmem:[%s44474_s20 + $0xc8] sm:$0xff]  ;;  %v3483_v3 = vcombine.high %v402_v61, %v402_v61  ;;  %v955_v11 = vcombine.high %v271_v2, %v271_v2 }
  0xa1   : > { %4837 = vmatprep.mubr.f32.mxu0 %v851_v17  ;;  %4913 = vmatprep.subr.mxu0 %v3473_v16  ;;  %v3484_v5 = vcombine.high %v403_v0, %v403_v0  ;;  %v937_v8 = vcombine.high %v935_v63, %v935_v63  ;;  %v962_v16 = vrot.slane %v271_v2, %v44500_v19  ;;  %v406_v17 = vld [vmem:[%s44474_s20 + $0xe0] sm:$0xff] }
  0xa2   : > { %4907 = vmatprep.mubr.f32.mxu1 %v852_v22  ;;  %4983 = vmatprep.subr.mxu1 %v3474_v18 }
  0xa3   : > { %4838 = vmatmul.mubr.f32.vlgmr.msra.gmra.mrb[12].mxu0 %v843_v9  ;;  %4908 = vmatmul.mubr.f32.vlgmr.msra.gmra.mrb[12].mxu1 %v850_v12  ;;  %v952_v9 = vrot.slane %v938_v1, %v44500_v19  ;;  %v272_v12 = vld [vmem:[%s44467_s4 + $0x70] sm:$0xff]  ;;  %v970_v25 = vcombine.high %v962_v16, %v962_v16 }
  0xa4   : > { %4914 = vmatpush1.xpose.msra.mxu0 %v392_v10  ;;  %4984 = vmatpush1.xpose.msra.mxu1 %v393_v13  ;;  %v405_v10 = vld [vmem:[%s44474_s20 + $0xd8] sm:$0xff]  ;;  %v3485_v13 = vcombine.high %v404_v7, %v404_v7  ;;  %v972_v22 = vcombine.high %v272_v12, %v272_v12 }
  0xa5   : > { %4977 = vmatprep.mubr.f32.mxu0 %v868_v28  ;;  %5053 = vmatprep.subr.mxu0 %v3475_v27  ;;  %v3486_v15 = vcombine.high %v405_v10, %v405_v10  ;;  %v954_v18 = vcombine.high %v952_v9, %v952_v9  ;;  %v979_v27 = vrot.slane %v272_v12, %v44500_v19  ;;  %v408_v28 = vld [vmem:[%s44474_s20 + $0xf0] sm:$0xff] }
  0xa6   : > { %5047 = vmatprep.mubr.f32.mxu1 %v869_v32  ;;  %5123 = vmatprep.subr.mxu1 %v3476_v29 }
  0xa7   : > { %4978 = vmatmul.mubr.f32.vlgmr.msra.gmra.mrb[14].mxu0 %v860_v20  ;;  %5048 = vmatmul.mubr.f32.vlgmr.msra.gmra.mrb[14].mxu1 %v867_v23  ;;  %v969_v20 = vrot.slane %v955_v11, %v44500_v19  ;;  %v273_v23 = vld [vmem:[%s44467_s4 + $0x78] sm:$0xff]  ;;  %v987_v35 = vcombine.high %v979_v27, %v979_v27 }
  0xa8   : > { %5054 = vmatpush1.xpose.msra.mxu0 %v394_v21  ;;  %5124 = vmatpush1.xpose.msra.mxu1 %v395_v24  ;;  %v407_v21 = vld [vmem:[%s44474_s20 + $0xe8] sm:$0xff]  ;;  %v3487_v24 = vcombine.high %v406_v17, %v406_v17  ;;  %v989_v32 = vcombine.high %v273_v23, %v273_v23 }
  0xa9   : > { %5117 = vmatprep.mubr.f32.mxu0 %v885_v38  ;;  %5193 = vmatprep.subr.mxu0 %v3477_v37  ;;  %v3488_v26 = vcombine.high %v407_v21, %v407_v21  ;;  %v971_v29 = vcombine.high %v969_v20, %v969_v20  ;;  %v996_v37 = vrot.slane %v273_v23, %v44500_v19  ;;  %v410_v38 = vld [vmem:[%s44474_s20 + $0x100] sm:$0xff] }
  0xaa   : > { %5187 = vmatprep.mubr.f32.mxu1 %v886_v42  ;;  %5263 = vmatprep.subr.mxu1 %v3478_v39 }
  0xab   : > { %5118 = vmatmul.mubr.f32.vlgmr.msra.gmra.mrb[16].mxu0 %v877_v30  ;;  %5188 = vmatmul.mubr.f32.vlgmr.msra.gmra.mrb[16].mxu1 %v884_v33  ;;  %v986_v30 = vrot.slane %v972_v22, %v44500_v19  ;;  %v274_v33 = vld [vmem:[%s44467_s4 + $0x80] sm:$0xff]  ;;  %v1004_v45 = vcombine.high %v996_v37, %v996_v37 }
  0xac   : > { %5194 = vmatpush1.xpose.msra.mxu0 %v396_v31  ;;  %5264 = vmatpush1.xpose.msra.mxu1 %v397_v34  ;;  %v409_v31 = vld [vmem:[%s44474_s20 + $0xf8] sm:$0xff]  ;;  %v3489_v34 = vcombine.high %v408_v28, %v408_v28  ;;  %v1006_v42 = vcombine.high %v274_v33, %v274_v33 }
  0xad   : > { %5257 = vmatprep.mubr.f32.mxu0 %v902_v48  ;;  %5333 = vmatprep.subr.mxu0 %v3479_v47  ;;  %v3490_v36 = vcombine.high %v409_v31, %v409_v31  ;;  %v988_v39 = vcombine.high %v986_v30, %v986_v30  ;;  %v1013_v47 = vrot.slane %v274_v33, %v44500_v19  ;;  %v412_v48 = vld [vmem:[%s44474_s20 + $0x110] sm:$0xff] }
  0xae   : > { %5327 = vmatprep.mubr.f32.mxu1 %v903_v52  ;;  %5403 = vmatprep.subr.mxu1 %v3480_v49 }
  0xaf   : > { %5258 = vmatmul.mubr.f32.vlgmr.msra.gmra.mrb[18].mxu0 %v894_v40  ;;  %5328 = vmatmul.mubr.f32.vlgmr.msra.gmra.mrb[18].mxu1 %v901_v43  ;;  %v1003_v40 = vrot.slane %v989_v32, %v44500_v19  ;;  %v275_v43 = vld [vmem:[%s44467_s4 + $0x88] sm:$0xff]  ;;  %v1021_v55 = vcombine.high %v1013_v47, %v1013_v47 }
  0xb0   : > { %5334 = vmatpush1.xpose.msra.mxu0 %v398_v41  ;;  %5404 = vmatpush1.xpose.msra.mxu1 %v399_v44  ;;  %v411_v41 = vld [vmem:[%s44474_s20 + $0x108] sm:$0xff]  ;;  %v3491_v44 = vcombine.high %v410_v38, %v410_v38  ;;  %v1023_v52 = vcombine.high %v275_v43, %v275_v43 }
  0xb1   : > { %5397 = vmatprep.mubr.f32.mxu0 %v919_v58  ;;  %5473 = vmatprep.subr.mxu0 %v3481_v57  ;;  %v3492_v46 = vcombine.high %v411_v41, %v411_v41  ;;  %v1005_v49 = vcombine.high %v1003_v40, %v1003_v40  ;;  %v1030_v57 = vrot.slane %v275_v43, %v44500_v19  ;;  %v414_v58 = vld [vmem:[%s44474_s20 + $0x120] sm:$0xff] }
  0xb2   : > { %5467 = vmatprep.mubr.f32.mxu1 %v920_v62  ;;  %5543 = vmatprep.subr.mxu1 %v3482_v59 }
  0xb3   : > { %5398 = vmatmul.mubr.f32.vlgmr.msra.gmra.mrb[20].mxu0 %v911_v50  ;;  %5468 = vmatmul.mubr.f32.vlgmr.msra.gmra.mrb[20].mxu1 %v918_v53  ;;  %v1020_v50 = vrot.slane %v1006_v42, %v44500_v19  ;;  %v276_v53 = vld [vmem:[%s44467_s4 + $0x90] sm:$0xff]  ;;  %v1038_v1 = vcombine.high %v1030_v57, %v1030_v57 }
  0xb4   : > { %5474 = vmatpush1.xpose.msra.mxu0 %v400_v51  ;;  %5544 = vmatpush1.xpose.msra.mxu1 %v401_v54  ;;  %v413_v51 = vld [vmem:[%s44474_s20 + $0x118] sm:$0xff]  ;;  %v3493_v54 = vcombine.high %v412_v48, %v412_v48  ;;  %v1040_v62 = vcombine.high %v276_v53, %v276_v53 }
  0xb5   : > { %5537 = vmatprep.mubr.f32.mxu0 %v936_v4  ;;  %5613 = vmatprep.subr.mxu0 %v3483_v3  ;;  %v3494_v56 = vcombine.high %v413_v51, %v413_v51  ;;  %v1022_v59 = vcombine.high %v1020_v50, %v1020_v50  ;;  %v1047_v3 = vrot.slane %v276_v53, %v44500_v19  ;;  %v416_v4 = vld [vmem:[%s44474_s20 + $0x130] sm:$0xff] }
  0xb6   : > { %5607 = vmatprep.mubr.f32.mxu1 %v937_v8  ;;  %5683 = vmatprep.subr.mxu1 %v3484_v5 }
  0xb7   : > { %5538 = vmatmul.mubr.f32.vlgmr.msra.gmra.mrb[22].mxu0 %v928_v60  ;;  %5608 = vmatmul.mubr.f32.vlgmr.msra.gmra.mrb[22].mxu1 %v935_v63  ;;  %v1037_v60 = vrot.slane %v1023_v52, %v44500_v19  ;;  %v277_v63 = vld [vmem:[%s44467_s4 + $0x98] sm:$0xff]  ;;  %v1055_v11 = vcombine.high %v1047_v3, %v1047_v3 }
  0xb8   : > { %5614 = vmatpush1.xpose.msra.mxu0 %v402_v61  ;;  %5684 = vmatpush1.xpose.msra.mxu1 %v403_v0  ;;  %v415_v61 = vld [vmem:[%s44474_s20 + $0x128] sm:$0xff]  ;;  %v3495_v0 = vcombine.high %v414_v58, %v414_v58  ;;  %v1057_v8 = vcombine.high %v277_v63, %v277_v63 }
  0xb9   : > { %5677 = vmatprep.mubr.f32.mxu0 %v953_v14  ;;  %5753 = vmatprep.subr.mxu0 %v3485_v13  ;;  %v3496_v2 = vcombine.high %v415_v61, %v415_v61  ;;  %v1039_v5 = vcombine.high %v1037_v60, %v1037_v60  ;;  %v1064_v13 = vrot.slane %v277_v63, %v44500_v19  ;;  %v418_v14 = vld [vmem:[%s44474_s20 + $0x140] sm:$0xff] }
  0xba   : > { %5747 = vmatprep.mubr.f32.mxu1 %v954_v18  ;;  %5823 = vmatprep.subr.mxu1 %v3486_v15 }
  0xbb   : > { %5678 = vmatmul.mubr.f32.vlgmr.msra.gmra.mrb[24].mxu0 %v945_v6  ;;  %5748 = vmatmul.mubr.f32.vlgmr.msra.gmra.mrb[24].mxu1 %v952_v9  ;;  %v1054_v6 = vrot.slane %v1040_v62, %v44500_v19  ;;  %v278_v9 = vld [vmem:[%s44467_s4 + $0xa0] sm:$0xff]  ;;  %v1072_v22 = vcombine.high %v1064_v13, %v1064_v13 }
  0xbc   : > { %5754 = vmatpush1.xpose.msra.mxu0 %v404_v7  ;;  %5824 = vmatpush1.xpose.msra.mxu1 %v405_v10  ;;  %v417_v7 = vld [vmem:[%s44474_s20 + $0x138] sm:$0xff]  ;;  %v3497_v10 = vcombine.high %v416_v4, %v416_v4  ;;  %v1074_v18 = vcombine.high %v278_v9, %v278_v9 }
  0xbd   : > { %5817 = vmatprep.mubr.f32.mxu0 %v970_v25  ;;  %5893 = vmatprep.subr.mxu0 %v3487_v24  ;;  %v3498_v12 = vcombine.high %v417_v7, %v417_v7  ;;  %v1056_v15 = vcombine.high %v1054_v6, %v1054_v6  ;;  %v1081_v24 = vrot.slane %v278_v9, %v44500_v19  ;;  %v420_v25 = vld [vmem:[%s44474_s20 + $0x150] sm:$0xff] }
  0xbe   : > { %5887 = vmatprep.mubr.f32.mxu1 %v971_v29  ;;  %5963 = vmatprep.subr.mxu1 %v3488_v26 }
  0xbf   : > { %5818 = vmatmul.mubr.f32.vlgmr.msra.gmra.mrb[26].mxu0 %v962_v16  ;;  %5888 = vmatmul.mubr.f32.vlgmr.msra.gmra.mrb[26].mxu1 %v969_v20  ;;  %v1071_v16 = vrot.slane %v1057_v8, %v44500_v19  ;;  %v279_v20 = vld [vmem:[%s44467_s4 + $0xa8] sm:$0xff]  ;;  %v1089_v32 = vcombine.high %v1081_v24, %v1081_v24 }
  0xc0   : > { %5894 = vmatpush1.xpose.msra.mxu0 %v406_v17  ;;  %5964 = vmatpush1.xpose.msra.mxu1 %v407_v21  ;;  %v419_v17 = vld [vmem:[%s44474_s20 + $0x148] sm:$0xff]  ;;  %v3499_v21 = vcombine.high %v418_v14, %v418_v14  ;;  %v1091_v29 = vcombine.high %v279_v20, %v279_v20 }
  0xc1   : > { %5957 = vmatprep.mubr.f32.mxu0 %v987_v35  ;;  %6033 = vmatprep.subr.mxu0 %v3489_v34  ;;  %v3500_v23 = vcombine.high %v419_v17, %v419_v17  ;;  %v1073_v26 = vcombine.high %v1071_v16, %v1071_v16  ;;  %v1098_v34 = vrot.slane %v279_v20, %v44500_v19  ;;  %v422_v35 = vld [vmem:[%s44474_s20 + $0x160] sm:$0xff] }
  0xc2   : > { %6027 = vmatprep.mubr.f32.mxu1 %v988_v39  ;;  %6103 = vmatprep.subr.mxu1 %v3490_v36 }
  0xc3   : > { %5958 = vmatmul.mubr.f32.vlgmr.msra.gmra.mrb[28].mxu0 %v979_v27  ;;  %6028 = vmatmul.mubr.f32.vlgmr.msra.gmra.mrb[28].mxu1 %v986_v30  ;;  %v1088_v27 = vrot.slane %v1074_v18, %v44500_v19  ;;  %v280_v30 = vld [vmem:[%s44467_s4 + $0xb0] sm:$0xff]  ;;  %v1106_v42 = vcombine.high %v1098_v34, %v1098_v34 }
  0xc4   : > { %6034 = vmatpush1.xpose.msra.mxu0 %v408_v28  ;;  %6104 = vmatpush1.xpose.msra.mxu1 %v409_v31  ;;  %v421_v28 = vld [vmem:[%s44474_s20 + $0x158] sm:$0xff]  ;;  %v3501_v31 = vcombine.high %v420_v25, %v420_v25  ;;  %v1108_v39 = vcombine.high %v280_v30, %v280_v30 }
  0xc5   : > { %6097 = vmatprep.mubr.f32.mxu0 %v1004_v45  ;;  %6173 = vmatprep.subr.mxu0 %v3491_v44  ;;  %v3502_v33 = vcombine.high %v421_v28, %v421_v28  ;;  %v1090_v36 = vcombine.high %v1088_v27, %v1088_v27  ;;  %v1115_v44 = vrot.slane %v280_v30, %v44500_v19  ;;  %v424_v45 = vld [vmem:[%s44474_s20 + $0x170] sm:$0xff] }
  0xc6   : > { %6167 = vmatprep.mubr.f32.mxu1 %v1005_v49  ;;  %6243 = vmatprep.subr.mxu1 %v3492_v46 }
  0xc7   : > { %6098 = vmatmul.mubr.f32.vlgmr.msra.gmra.mrb[30].mxu0 %v996_v37  ;;  %6168 = vmatmul.mubr.f32.vlgmr.msra.gmra.mrb[30].mxu1 %v1003_v40  ;;  %v1105_v37 = vrot.slane %v1091_v29, %v44500_v19  ;;  %v281_v40 = vld [vmem:[%s44467_s4 + $0xb8] sm:$0xff]  ;;  %v1123_v52 = vcombine.high %v1115_v44, %v1115_v44 }
  0xc8   : > { %6174 = vmatpush1.xpose.msra.mxu0 %v410_v38  ;;  %6244 = vmatpush1.xpose.msra.mxu1 %v411_v41  ;;  %v423_v38 = vld [vmem:[%s44474_s20 + $0x168] sm:$0xff]  ;;  %v3503_v41 = vcombine.high %v422_v35, %v422_v35  ;;  %v1125_v49 = vcombine.high %v281_v40, %v281_v40 }
  0xc9   : > { %6237 = vmatprep.mubr.f32.mxu0 %v1021_v55  ;;  %6313 = vmatprep.subr.mxu0 %v3493_v54  ;;  %v3504_v43 = vcombine.high %v423_v38, %v423_v38  ;;  %v1107_v46 = vcombine.high %v1105_v37, %v1105_v37  ;;  %v1132_v54 = vrot.slane %v281_v40, %v44500_v19  ;;  %v426_v55 = vld [vmem:[%s44474_s20 + $0x180] sm:$0xff] }
  0xca   : > { %6307 = vmatprep.mubr.f32.mxu1 %v1022_v59  ;;  %6383 = vmatprep.subr.mxu1 %v3494_v56 }
  0xcb   : > { %6238 = vmatmul.mubr.f32.vlgmr.msra.gmra.mrb[32].mxu0 %v1013_v47  ;;  %6308 = vmatmul.mubr.f32.vlgmr.msra.gmra.mrb[32].mxu1 %v1020_v50  ;;  %v1122_v47 = vrot.slane %v1108_v39, %v44500_v19  ;;  %v282_v50 = vld [vmem:[%s44467_s4 + $0xc0] sm:$0xff]  ;;  %v1140_v62 = vcombine.high %v1132_v54, %v1132_v54 }
  0xcc   : > { %6314 = vmatpush1.xpose.msra.mxu0 %v412_v48  ;;  %6384 = vmatpush1.xpose.msra.mxu1 %v413_v51  ;;  %v425_v48 = vld [vmem:[%s44474_s20 + $0x178] sm:$0xff]  ;;  %v3505_v51 = vcombine.high %v424_v45, %v424_v45  ;;  %v1142_v59 = vcombine.high %v282_v50, %v282_v50 }
  0xcd   : > { %6377 = vmatprep.mubr.f32.mxu0 %v1038_v1  ;;  %6453 = vmatprep.subr.mxu0 %v3495_v0  ;;  %v3506_v53 = vcombine.high %v425_v48, %v425_v48  ;;  %v1124_v56 = vcombine.high %v1122_v47, %v1122_v47  ;;  %v1149_v0 = vrot.slane %v282_v50, %v44500_v19  ;;  %v428_v1 = vld [vmem:[%s44474_s20 + $0x190] sm:$0xff] }
  0xce   : > { %6447 = vmatprep.mubr.f32.mxu1 %v1039_v5  ;;  %6523 = vmatprep.subr.mxu1 %v3496_v2 }
  0xcf   : > { %6378 = vmatmul.mubr.f32.vlgmr.msra.gmra.mrb[34].mxu0 %v1030_v57  ;;  %6448 = vmatmul.mubr.f32.vlgmr.msra.gmra.mrb[34].mxu1 %v1037_v60  ;;  %v1139_v57 = vrot.slane %v1125_v49, %v44500_v19  ;;  %v283_v60 = vld [vmem:[%s44467_s4 + $0xc8] sm:$0xff]  ;;  %v1157_v8 = vcombine.high %v1149_v0, %v1149_v0 }
  0xd0   : > { %6454 = vmatpush1.xpose.msra.mxu0 %v414_v58  ;;  %6524 = vmatpush1.xpose.msra.mxu1 %v415_v61  ;;  %v427_v58 = vld [vmem:[%s44474_s20 + $0x188] sm:$0xff]  ;;  %v3507_v61 = vcombine.high %v426_v55, %v426_v55  ;;  %v1159_v5 = vcombine.high %v283_v60, %v283_v60 }
  0xd1   : > { %6517 = vmatprep.mubr.f32.mxu0 %v1055_v11  ;;  %6593 = vmatprep.subr.mxu0 %v3497_v10  ;;  %v3508_v63 = vcombine.high %v427_v58, %v427_v58  ;;  %v1141_v2 = vcombine.high %v1139_v57, %v1139_v57  ;;  %v1166_v10 = vrot.slane %v283_v60, %v44500_v19  ;;  %v430_v11 = vld [vmem:[%s44474_s20 + $0x1a0] sm:$0xff] }
  0xd2   : > { %6587 = vmatprep.mubr.f32.mxu1 %v1056_v15  ;;  %6663 = vmatprep.subr.mxu1 %v3498_v12 }
  0xd3   : > { %6518 = vmatmul.mubr.f32.vlgmr.msra.gmra.mrb[36].mxu0 %v1047_v3  ;;  %6588 = vmatmul.mubr.f32.vlgmr.msra.gmra.mrb[36].mxu1 %v1054_v6  ;;  %v1156_v3 = vrot.slane %v1142_v59, %v44500_v19  ;;  %v284_v6 = vld [vmem:[%s44467_s4 + $0xd0] sm:$0xff]  ;;  %v1174_v18 = vcombine.high %v1166_v10, %v1166_v10 }
  0xd4   : > { %6594 = vmatpush1.xpose.msra.mxu0 %v416_v4  ;;  %6664 = vmatpush1.xpose.msra.mxu1 %v417_v7  ;;  %v429_v4 = vld [vmem:[%s44474_s20 + $0x198] sm:$0xff]  ;;  %v3509_v7 = vcombine.high %v428_v1, %v428_v1  ;;  %v1176_v15 = vcombine.high %v284_v6, %v284_v6 }
  0xd5   : > { %6657 = vmatprep.mubr.f32.mxu0 %v1072_v22  ;;  %6733 = vmatprep.subr.mxu0 %v3499_v21  ;;  %v3510_v9 = vcombine.high %v429_v4, %v429_v4  ;;  %v1158_v12 = vcombine.high %v1156_v3, %v1156_v3  ;;  %v1183_v21 = vrot.slane %v284_v6, %v44500_v19  ;;  %v432_v22 = vld [vmem:[%s44474_s20 + $0x1b0] sm:$0xff] }
  0xd6   : > { %6727 = vmatprep.mubr.f32.mxu1 %v1073_v26  ;;  %6803 = vmatprep.subr.mxu1 %v3500_v23 }
  0xd7   : > { %6658 = vmatmul.mubr.f32.vlgmr.msra.gmra.mrb[38].mxu0 %v1064_v13  ;;  %6728 = vmatmul.mubr.f32.vlgmr.msra.gmra.mrb[38].mxu1 %v1071_v16  ;;  %v1173_v13 = vrot.slane %v1159_v5, %v44500_v19  ;;  %v285_v16 = vld [vmem:[%s44467_s4 + $0xd8] sm:$0xff]  ;;  %v1191_v29 = vcombine.high %v1183_v21, %v1183_v21 }
  0xd8   : > { %6734 = vmatpush1.xpose.msra.mxu0 %v418_v14  ;;  %6804 = vmatpush1.xpose.msra.mxu1 %v419_v17  ;;  %v431_v14 = vld [vmem:[%s44474_s20 + $0x1a8] sm:$0xff]  ;;  %v3511_v17 = vcombine.high %v430_v11, %v430_v11  ;;  %v1193_v26 = vcombine.high %v285_v16, %v285_v16 }
  0xd9   : > { %6797 = vmatprep.mubr.f32.mxu0 %v1089_v32  ;;  %6873 = vmatprep.subr.mxu0 %v3501_v31  ;;  %v3512_v20 = vcombine.high %v431_v14, %v431_v14  ;;  %v1175_v23 = vcombine.high %v1173_v13, %v1173_v13  ;;  %v1200_v31 = vrot.slane %v285_v16, %v44500_v19  ;;  %v434_v32 = vld [vmem:[%s44474_s20 + $0x1c0] sm:$0xff] }
  0xda   : > { %6867 = vmatprep.mubr.f32.mxu1 %v1090_v36  ;;  %6943 = vmatprep.subr.mxu1 %v3502_v33 }
  0xdb   : > { %6798 = vmatmul.mubr.f32.vlgmr.msra.gmra.mrb[40].mxu0 %v1081_v24  ;;  %6868 = vmatmul.mubr.f32.vlgmr.msra.gmra.mrb[40].mxu1 %v1088_v27  ;;  %v1190_v24 = vrot.slane %v1176_v15, %v44500_v19  ;;  %v286_v27 = vld [vmem:[%s44467_s4 + $0xe0] sm:$0xff]  ;;  %v1208_v39 = vcombine.high %v1200_v31, %v1200_v31 }
  0xdc   : > { %6874 = vmatpush1.xpose.msra.mxu0 %v420_v25  ;;  %6944 = vmatpush1.xpose.msra.mxu1 %v421_v28  ;;  %v433_v25 = vld [vmem:[%s44474_s20 + $0x1b8] sm:$0xff]  ;;  %v3513_v28 = vcombine.high %v432_v22, %v432_v22  ;;  %v1210_v36 = vcombine.high %v286_v27, %v286_v27 }
  0xdd   : > { %6937 = vmatprep.mubr.f32.mxu0 %v1106_v42  ;;  %7013 = vmatprep.subr.mxu0 %v3503_v41  ;;  %v3514_v30 = vcombine.high %v433_v25, %v433_v25  ;;  %v1192_v33 = vcombine.high %v1190_v24, %v1190_v24  ;;  %v1217_v41 = vrot.slane %v286_v27, %v44500_v19  ;;  %v436_v42 = vld [vmem:[%s44474_s20 + $0x1d0] sm:$0xff] }
  0xde   : > { %7007 = vmatprep.mubr.f32.mxu1 %v1107_v46  ;;  %7083 = vmatprep.subr.mxu1 %v3504_v43 }
  0xdf   : > { %6938 = vmatmul.mubr.f32.vlgmr.msra.gmra.mrb[42].mxu0 %v1098_v34  ;;  %7008 = vmatmul.mubr.f32.vlgmr.msra.gmra.mrb[42].mxu1 %v1105_v37  ;;  %v1207_v34 = vrot.slane %v1193_v26, %v44500_v19  ;;  %v287_v37 = vld [vmem:[%s44467_s4 + $0xe8] sm:$0xff]  ;;  %v1225_v49 = vcombine.high %v1217_v41, %v1217_v41 }
  0xe0   : > { %7014 = vmatpush1.xpose.msra.mxu0 %v422_v35  ;;  %7084 = vmatpush1.xpose.msra.mxu1 %v423_v38  ;;  %v435_v35 = vld [vmem:[%s44474_s20 + $0x1c8] sm:$0xff]  ;;  %v3515_v38 = vcombine.high %v434_v32, %v434_v32  ;;  %v1227_v46 = vcombine.high %v287_v37, %v287_v37 }
  0xe1   : > { %7077 = vmatprep.mubr.f32.mxu0 %v1123_v52  ;;  %7153 = vmatprep.subr.mxu0 %v3505_v51  ;;  %v3516_v40 = vcombine.high %v435_v35, %v435_v35  ;;  %v1209_v43 = vcombine.high %v1207_v34, %v1207_v34  ;;  %v1234_v51 = vrot.slane %v287_v37, %v44500_v19  ;;  %v438_v52 = vld [vmem:[%s44474_s20 + $0x1e0] sm:$0xff] }
  0xe2   : > { %7147 = vmatprep.mubr.f32.mxu1 %v1124_v56  ;;  %7223 = vmatprep.subr.mxu1 %v3506_v53 }
  0xe3   : > { %7078 = vmatmul.mubr.f32.vlgmr.msra.gmra.mrb[44].mxu0 %v1115_v44  ;;  %7148 = vmatmul.mubr.f32.vlgmr.msra.gmra.mrb[44].mxu1 %v1122_v47  ;;  %v1224_v44 = vrot.slane %v1210_v36, %v44500_v19  ;;  %v288_v47 = vld [vmem:[%s44467_s4 + $0xf0] sm:$0xff]  ;;  %v1242_v59 = vcombine.high %v1234_v51, %v1234_v51 }
  0xe4   : > { %7154 = vmatpush1.xpose.msra.mxu0 %v424_v45  ;;  %7224 = vmatpush1.xpose.msra.mxu1 %v425_v48  ;;  %v437_v45 = vld [vmem:[%s44474_s20 + $0x1d8] sm:$0xff]  ;;  %v3517_v48 = vcombine.high %v436_v42, %v436_v42  ;;  %v1244_v56 = vcombine.high %v288_v47, %v288_v47 }
  0xe5   : > { %7217 = vmatprep.mubr.f32.mxu0 %v1140_v62  ;;  %7293 = vmatprep.subr.mxu0 %v3507_v61  ;;  %v3518_v50 = vcombine.high %v437_v45, %v437_v45  ;;  %v1226_v53 = vcombine.high %v1224_v44, %v1224_v44  ;;  %v1251_v61 = vrot.slane %v288_v47, %v44500_v19  ;;  %v440_v62 = vld [vmem:[%s44474_s20 + $0x1f0] sm:$0xff] }
  0xe6   : > { %7287 = vmatprep.mubr.f32.mxu1 %v1141_v2  ;;  %7363 = vmatprep.subr.mxu1 %v3508_v63 }
  0xe7   : > { %7218 = vmatmul.mubr.f32.vlgmr.msra.gmra.mrb[46].mxu0 %v1132_v54  ;;  %7288 = vmatmul.mubr.f32.vlgmr.msra.gmra.mrb[46].mxu1 %v1139_v57  ;;  %v1241_v54 = vrot.slane %v1227_v46, %v44500_v19  ;;  %v289_v57 = vld [vmem:[%s44467_s4 + $0xf8] sm:$0xff]  ;;  %v1259_v5 = vcombine.high %v1251_v61, %v1251_v61 }
  0xe8   : > { %7294 = vmatpush1.xpose.msra.mxu0 %v426_v55  ;;  %7364 = vmatpush1.xpose.msra.mxu1 %v427_v58  ;;  %v439_v55 = vld [vmem:[%s44474_s20 + $0x1e8] sm:$0xff]  ;;  %v3519_v58 = vcombine.high %v438_v52, %v438_v52  ;;  %v1261_v2 = vcombine.high %v289_v57, %v289_v57 }
  0xe9   : > { %7357 = vmatprep.mubr.f32.mxu0 %v1157_v8  ;;  %7433 = vmatprep.subr.mxu0 %v3509_v7  ;;  %v3520_v60 = vcombine.high %v439_v55, %v439_v55  ;;  %v1243_v63 = vcombine.high %v1241_v54, %v1241_v54  ;;  %v1268_v7 = vrot.slane %v289_v57, %v44500_v19  ;;  %v442_v8 = vld [vmem:[%s44474_s20 + $0x200] sm:$0xff] }
  0xea   : > { %7427 = vmatprep.mubr.f32.mxu1 %v1158_v12  ;;  %7503 = vmatprep.subr.mxu1 %v3510_v9 }
  0xeb   : > { %7358 = vmatmul.mubr.f32.vlgmr.msra.gmra.mrb[48].mxu0 %v1149_v0  ;;  %7428 = vmatmul.mubr.f32.vlgmr.msra.gmra.mrb[48].mxu1 %v1156_v3  ;;  %v1258_v0 = vrot.slane %v1244_v56, %v44500_v19  ;;  %v290_v3 = vld [vmem:[%s44467_s4 + $0x100] sm:$0xff]  ;;  %v1276_v15 = vcombine.high %v1268_v7, %v1268_v7 }
  0xec   : > { %7434 = vmatpush1.xpose.msra.mxu0 %v428_v1  ;;  %7504 = vmatpush1.xpose.msra.mxu1 %v429_v4  ;;  %v441_v1 = vld [vmem:[%s44474_s20 + $0x1f8] sm:$0xff]  ;;  %v3521_v4 = vcombine.high %v440_v62, %v440_v62  ;;  %v1278_v12 = vcombine.high %v290_v3, %v290_v3 }
  0xed   : > { %7497 = vmatprep.mubr.f32.mxu0 %v1174_v18  ;;  %7573 = vmatprep.subr.mxu0 %v3511_v17  ;;  %v3522_v6 = vcombine.high %v441_v1, %v441_v1  ;;  %v1260_v9 = vcombine.high %v1258_v0, %v1258_v0  ;;  %v1285_v17 = vrot.slane %v290_v3, %v44500_v19  ;;  %v444_v18 = vld [vmem:[%s44474_s20 + $0x210] sm:$0xff] }
  0xee   : > { %7567 = vmatprep.mubr.f32.mxu1 %v1175_v23  ;;  %7643 = vmatprep.subr.mxu1 %v3512_v20 }
  0xef   : > { %7498 = vmatmul.mubr.f32.vlgmr.msra.gmra.mrb[50].mxu0 %v1166_v10  ;;  %7568 = vmatmul.mubr.f32.vlgmr.msra.gmra.mrb[50].mxu1 %v1173_v13  ;;  %v1275_v10 = vrot.slane %v1261_v2, %v44500_v19  ;;  %v291_v13 = vld [vmem:[%s44467_s4 + $0x108] sm:$0xff]  ;;  %v1293_v26 = vcombine.high %v1285_v17, %v1285_v17 }
  0xf0   : > { %7574 = vmatpush1.xpose.msra.mxu0 %v430_v11  ;;  %7644 = vmatpush1.xpose.msra.mxu1 %v431_v14  ;;  %v443_v11 = vld [vmem:[%s44474_s20 + $0x208] sm:$0xff]  ;;  %v3523_v14 = vcombine.high %v442_v8, %v442_v8  ;;  %v1295_v23 = vcombine.high %v291_v13, %v291_v13 }
  0xf1   : > { %7637 = vmatprep.mubr.f32.mxu0 %v1191_v29  ;;  %7713 = vmatprep.subr.mxu0 %v3513_v28  ;;  %v3524_v16 = vcombine.high %v443_v11, %v443_v11  ;;  %v1277_v20 = vcombine.high %v1275_v10, %v1275_v10  ;;  %v1302_v28 = vrot.slane %v291_v13, %v44500_v19  ;;  %v446_v29 = vld [vmem:[%s44474_s20 + $0x220] sm:$0xff] }
  0xf2   : > { %7707 = vmatprep.mubr.f32.mxu1 %v1192_v33  ;;  %7783 = vmatprep.subr.mxu1 %v3514_v30 }
  0xf3   : > { %7638 = vmatmul.mubr.f32.vlgmr.msra.gmra.mrb[52].mxu0 %v1183_v21  ;;  %7708 = vmatmul.mubr.f32.vlgmr.msra.gmra.mrb[52].mxu1 %v1190_v24  ;;  %v1292_v21 = vrot.slane %v1278_v12, %v44500_v19  ;;  %v292_v24 = vld [vmem:[%s44467_s4 + $0x110] sm:$0xff]  ;;  %v1310_v36 = vcombine.high %v1302_v28, %v1302_v28 }
  0xf4   : > { %7714 = vmatpush1.xpose.msra.mxu0 %v432_v22  ;;  %7784 = vmatpush1.xpose.msra.mxu1 %v433_v25  ;;  %v445_v22 = vld [vmem:[%s44474_s20 + $0x218] sm:$0xff]  ;;  %v3525_v25 = vcombine.high %v444_v18, %v444_v18  ;;  %v1312_v33 = vcombine.high %v292_v24, %v292_v24 }
  0xf5   : > { %7777 = vmatprep.mubr.f32.mxu0 %v1208_v39  ;;  %7853 = vmatprep.subr.mxu0 %v3515_v38  ;;  %v3526_v27 = vcombine.high %v445_v22, %v445_v22  ;;  %v1294_v30 = vcombine.high %v1292_v21, %v1292_v21  ;;  %v1319_v38 = vrot.slane %v292_v24, %v44500_v19  ;;  %v448_v39 = vld [vmem:[%s44474_s20 + $0x230] sm:$0xff] }
  0xf6   : > { %7847 = vmatprep.mubr.f32.mxu1 %v1209_v43  ;;  %7923 = vmatprep.subr.mxu1 %v3516_v40 }
  0xf7   : > { %7778 = vmatmul.mubr.f32.vlgmr.msra.gmra.mrb[54].mxu0 %v1200_v31  ;;  %7848 = vmatmul.mubr.f32.vlgmr.msra.gmra.mrb[54].mxu1 %v1207_v34  ;;  %v1309_v31 = vrot.slane %v1295_v23, %v44500_v19  ;;  %v293_v34 = vld [vmem:[%s44467_s4 + $0x118] sm:$0xff]  ;;  %v1327_v46 = vcombine.high %v1319_v38, %v1319_v38 }
  0xf8   : > { %7854 = vmatpush1.xpose.msra.mxu0 %v434_v32  ;;  %7924 = vmatpush1.xpose.msra.mxu1 %v435_v35  ;;  %v447_v32 = vld [vmem:[%s44474_s20 + $0x228] sm:$0xff]  ;;  %v3527_v35 = vcombine.high %v446_v29, %v446_v29  ;;  %v1329_v43 = vcombine.high %v293_v34, %v293_v34 }
  0xf9   : > { %7917 = vmatprep.mubr.f32.mxu0 %v1225_v49  ;;  %7993 = vmatprep.subr.mxu0 %v3517_v48  ;;  %v3528_v37 = vcombine.high %v447_v32, %v447_v32  ;;  %v1311_v40 = vcombine.high %v1309_v31, %v1309_v31  ;;  %v1336_v48 = vrot.slane %v293_v34, %v44500_v19  ;;  %v450_v49 = vld [vmem:[%s44474_s20 + $0x240] sm:$0xff] }
  0xfa   : > { %7987 = vmatprep.mubr.f32.mxu1 %v1226_v53  ;;  %8063 = vmatprep.subr.mxu1 %v3518_v50 }
  0xfb   : > { %7918 = vmatmul.mubr.f32.vlgmr.msra.gmra.mrb[56].mxu0 %v1217_v41  ;;  %7988 = vmatmul.mubr.f32.vlgmr.msra.gmra.mrb[56].mxu1 %v1224_v44  ;;  %v1326_v41 = vrot.slane %v1312_v33, %v44500_v19  ;;  %v294_v44 = vld [vmem:[%s44467_s4 + $0x120] sm:$0xff]  ;;  %v1344_v56 = vcombine.high %v1336_v48, %v1336_v48 }
  0xfc   : > { %7994 = vmatpush1.xpose.msra.mxu0 %v436_v42  ;;  %8064 = vmatpush1.xpose.msra.mxu1 %v437_v45  ;;  %v449_v42 = vld [vmem:[%s44474_s20 + $0x238] sm:$0xff]  ;;  %v3529_v45 = vcombine.high %v448_v39, %v448_v39  ;;  %v1346_v53 = vcombine.high %v294_v44, %v294_v44 }
  0xfd   : > { %8057 = vmatprep.mubr.f32.mxu0 %v1242_v59  ;;  %8133 = vmatprep.subr.mxu0 %v3519_v58  ;;  %v3530_v47 = vcombine.high %v449_v42, %v449_v42  ;;  %v1328_v50 = vcombine.high %v1326_v41, %v1326_v41  ;;  %v1353_v58 = vrot.slane %v294_v44, %v44500_v19  ;;  %v452_v59 = vld [vmem:[%s44474_s20 + $0x250] sm:$0xff] }
  0xfe   : > { %8127 = vmatprep.mubr.f32.mxu1 %v1243_v63  ;;  %8203 = vmatprep.subr.mxu1 %v3520_v60 }
  0xff   : > { %8058 = vmatmul.mubr.f32.vlgmr.msra.gmra.mrb[58].mxu0 %v1234_v51  ;;  %8128 = vmatmul.mubr.f32.vlgmr.msra.gmra.mrb[58].mxu1 %v1241_v54  ;;  %v1343_v51 = vrot.slane %v1329_v43, %v44500_v19  ;;  %v295_v54 = vld [vmem:[%s44467_s4 + $0x128] sm:$0xff]  ;;  %v1361_v2 = vcombine.high %v1353_v58, %v1353_v58 }
 0x100   : > { %8134 = vmatpush1.xpose.msra.mxu0 %v438_v52  ;;  %8204 = vmatpush1.xpose.msra.mxu1 %v439_v55  ;;  %v451_v52 = vld [vmem:[%s44474_s20 + $0x248] sm:$0xff]  ;;  %v3531_v55 = vcombine.high %v450_v49, %v450_v49  ;;  %v1363_v63 = vcombine.high %v295_v54, %v295_v54 }
 0x101   : > { %8197 = vmatprep.mubr.f32.mxu0 %v1259_v5  ;;  %8273 = vmatprep.subr.mxu0 %v3521_v4  ;;  %v3532_v57 = vcombine.high %v451_v52, %v451_v52  ;;  %v1345_v60 = vcombine.high %v1343_v51, %v1343_v51  ;;  %v1370_v4 = vrot.slane %v295_v54, %v44500_v19  ;;  %v454_v5 = vld [vmem:[%s44474_s20 + $0x260] sm:$0xff] }
 0x102   : > { %8267 = vmatprep.mubr.f32.mxu1 %v1260_v9  ;;  %8343 = vmatprep.subr.mxu1 %v3522_v6 }
 0x103   : > { %8198 = vmatmul.mubr.f32.vlgmr.msra.gmra.mrb[60].mxu0 %v1251_v61  ;;  %8268 = vmatmul.mubr.f32.vlgmr.msra.gmra.mrb[60].mxu1 %v1258_v0  ;;  %v1360_v61 = vrot.slane %v1346_v53, %v44500_v19  ;;  %v296_v0 = vld [vmem:[%s44467_s4 + $0x130] sm:$0xff]  ;;  %v1378_v12 = vcombine.high %v1370_v4, %v1370_v4 }
 0x104   : > { %8274 = vmatpush1.xpose.msra.mxu0 %v440_v62  ;;  %8344 = vmatpush1.xpose.msra.mxu1 %v441_v1  ;;  %v453_v62 = vld [vmem:[%s44474_s20 + $0x258] sm:$0xff]  ;;  %v3533_v1 = vcombine.high %v452_v59, %v452_v59  ;;  %v1380_v9 = vcombine.high %v296_v0, %v296_v0 }
 0x105   : > { %8337 = vmatprep.mubr.f32.mxu0 %v1276_v15  ;;  %8413 = vmatprep.subr.mxu0 %v3523_v14  ;;  %v3534_v3 = vcombine.high %v453_v62, %v453_v62  ;;  %v1362_v6 = vcombine.high %v1360_v61, %v1360_v61  ;;  %v1387_v14 = vrot.slane %v296_v0, %v44500_v19  ;;  %v456_v15 = vld [vmem:[%s44474_s20 + $0x270] sm:$0xff] }
 0x106   : > { %8407 = vmatprep.mubr.f32.mxu1 %v1277_v20  ;;  %8483 = vmatprep.subr.mxu1 %v3524_v16 }
 0x107   : > { %8338 = vmatmul.mubr.f32.vlgmr.msra.gmra.mrb[62].mxu0 %v1268_v7  ;;  %8408 = vmatmul.mubr.f32.vlgmr.msra.gmra.mrb[62].mxu1 %v1275_v10  ;;  %v1377_v7 = vrot.slane %v1363_v63, %v44500_v19  ;;  %v297_v10 = vld [vmem:[%s44467_s4 + $0x138] sm:$0xff]  ;;  %v1395_v23 = vcombine.high %v1387_v14, %v1387_v14 }
 0x108   : > { %8414 = vmatpush1.xpose.msra.mxu0 %v442_v8  ;;  %8484 = vmatpush1.xpose.msra.mxu1 %v443_v11  ;;  %v455_v8 = vld [vmem:[%s44474_s20 + $0x268] sm:$0xff]  ;;  %v3535_v11 = vcombine.high %v454_v5, %v454_v5  ;;  %v1397_v20 = vcombine.high %v297_v10, %v297_v10 }
 0x109   : > { %8477 = vmatprep.mubr.f32.mxu0 %v1293_v26  ;;  %8553 = vmatprep.subr.mxu0 %v3525_v25  ;;  %v3536_v13 = vcombine.high %v455_v8, %v455_v8  ;;  %v1379_v16 = vcombine.high %v1377_v7, %v1377_v7  ;;  %v1404_v25 = vrot.slane %v297_v10, %v44500_v19  ;;  %v458_v26 = vld [vmem:[%s44474_s20 + $0x280] sm:$0xff] }
 0x10a   : > { %8547 = vmatprep.mubr.f32.mxu1 %v1294_v30  ;;  %8623 = vmatprep.subr.mxu1 %v3526_v27 }
 0x10b   : > { %8478 = vmatmul.mubr.f32.vlgmr.msra.gmra.mrb[64].mxu0 %v1285_v17  ;;  %8548 = vmatmul.mubr.f32.vlgmr.msra.gmra.mrb[64].mxu1 %v1292_v21  ;;  %v1394_v17 = vrot.slane %v1380_v9, %v44500_v19  ;;  %v298_v21 = vld [vmem:[%s44467_s4 + $0x140] sm:$0xff]  ;;  %v1412_v33 = vcombine.high %v1404_v25, %v1404_v25 }
 0x10c   : > { %8554 = vmatpush1.xpose.msra.mxu0 %v444_v18  ;;  %8624 = vmatpush1.xpose.msra.mxu1 %v445_v22  ;;  %v457_v18 = vld [vmem:[%s44474_s20 + $0x278] sm:$0xff]  ;;  %v3537_v22 = vcombine.high %v456_v15, %v456_v15  ;;  %v1414_v30 = vcombine.high %v298_v21, %v298_v21 }
 0x10d   : > { %8617 = vmatprep.mubr.f32.mxu0 %v1310_v36  ;;  %8693 = vmatprep.subr.mxu0 %v3527_v35  ;;  %v3538_v24 = vcombine.high %v457_v18, %v457_v18  ;;  %v1396_v27 = vcombine.high %v1394_v17, %v1394_v17  ;;  %v1421_v35 = vrot.slane %v298_v21, %v44500_v19  ;;  %v460_v36 = vld [vmem:[%s44474_s20 + $0x290] sm:$0xff] }
 0x10e   : > { %8687 = vmatprep.mubr.f32.mxu1 %v1311_v40  ;;  %8763 = vmatprep.subr.mxu1 %v3528_v37 }
 0x10f   : > { %8618 = vmatmul.mubr.f32.vlgmr.msra.gmra.mrb[66].mxu0 %v1302_v28  ;;  %8688 = vmatmul.mubr.f32.vlgmr.msra.gmra.mrb[66].mxu1 %v1309_v31  ;;  %v1411_v28 = vrot.slane %v1397_v20, %v44500_v19  ;;  %v299_v31 = vld [vmem:[%s44467_s4 + $0x148] sm:$0xff]  ;;  %v1429_v43 = vcombine.high %v1421_v35, %v1421_v35 }
 0x110   : > { %8694 = vmatpush1.xpose.msra.mxu0 %v446_v29  ;;  %8764 = vmatpush1.xpose.msra.mxu1 %v447_v32  ;;  %v459_v29 = vld [vmem:[%s44474_s20 + $0x288] sm:$0xff]  ;;  %v3539_v32 = vcombine.high %v458_v26, %v458_v26  ;;  %v1431_v40 = vcombine.high %v299_v31, %v299_v31 }
 0x111   : > { %8757 = vmatprep.mubr.f32.mxu0 %v1327_v46  ;;  %8833 = vmatprep.subr.mxu0 %v3529_v45  ;;  %v3540_v34 = vcombine.high %v459_v29, %v459_v29  ;;  %v1413_v37 = vcombine.high %v1411_v28, %v1411_v28  ;;  %v1438_v45 = vrot.slane %v299_v31, %v44500_v19  ;;  %v462_v46 = vld [vmem:[%s44474_s20 + $0x2a0] sm:$0xff] }
 0x112   : > { %8827 = vmatprep.mubr.f32.mxu1 %v1328_v50  ;;  %8903 = vmatprep.subr.mxu1 %v3530_v47 }
 0x113   : > { %8758 = vmatmul.mubr.f32.vlgmr.msra.gmra.mrb[68].mxu0 %v1319_v38  ;;  %8828 = vmatmul.mubr.f32.vlgmr.msra.gmra.mrb[68].mxu1 %v1326_v41  ;;  %v1428_v38 = vrot.slane %v1414_v30, %v44500_v19  ;;  %v300_v41 = vld [vmem:[%s44467_s4 + $0x150] sm:$0xff]  ;;  %v1446_v53 = vcombine.high %v1438_v45, %v1438_v45 }
 0x114   : > { %8834 = vmatpush1.xpose.msra.mxu0 %v448_v39  ;;  %8904 = vmatpush1.xpose.msra.mxu1 %v449_v42  ;;  %v461_v39 = vld [vmem:[%s44474_s20 + $0x298] sm:$0xff]  ;;  %v3541_v42 = vcombine.high %v460_v36, %v460_v36  ;;  %v1448_v50 = vcombine.high %v300_v41, %v300_v41 }
 0x115   : > { %8897 = vmatprep.mubr.f32.mxu0 %v1344_v56  ;;  %8973 = vmatprep.subr.mxu0 %v3531_v55  ;;  %v3542_v44 = vcombine.high %v461_v39, %v461_v39  ;;  %v1430_v47 = vcombine.high %v1428_v38, %v1428_v38  ;;  %v1455_v55 = vrot.slane %v300_v41, %v44500_v19  ;;  %v464_v56 = vld [vmem:[%s44474_s20 + $0x2b0] sm:$0xff] }
 0x116   : > { %8967 = vmatprep.mubr.f32.mxu1 %v1345_v60  ;;  %9043 = vmatprep.subr.mxu1 %v3532_v57 }
 0x117   : > { %8898 = vmatmul.mubr.f32.vlgmr.msra.gmra.mrb[70].mxu0 %v1336_v48  ;;  %8968 = vmatmul.mubr.f32.vlgmr.msra.gmra.mrb[70].mxu1 %v1343_v51  ;;  %v1445_v48 = vrot.slane %v1431_v40, %v44500_v19  ;;  %v301_v51 = vld [vmem:[%s44467_s4 + $0x158] sm:$0xff]  ;;  %v1463_v63 = vcombine.high %v1455_v55, %v1455_v55 }
 0x118   : > { %8974 = vmatpush1.xpose.msra.mxu0 %v450_v49  ;;  %9044 = vmatpush1.xpose.msra.mxu1 %v451_v52  ;;  %v463_v49 = vld [vmem:[%s44474_s20 + $0x2a8] sm:$0xff]  ;;  %v3543_v52 = vcombine.high %v462_v46, %v462_v46  ;;  %v1465_v60 = vcombine.high %v301_v51, %v301_v51 }
 0x119   : > { %9037 = vmatprep.mubr.f32.mxu0 %v1361_v2  ;;  %9113 = vmatprep.subr.mxu0 %v3533_v1  ;;  %v3544_v54 = vcombine.high %v463_v49, %v463_v49  ;;  %v1447_v57 = vcombine.high %v1445_v48, %v1445_v48  ;;  %v1472_v1 = vrot.slane %v301_v51, %v44500_v19  ;;  %v466_v2 = vld [vmem:[%s44474_s20 + $0x2c0] sm:$0xff] }
 0x11a   : > { %9107 = vmatprep.mubr.f32.mxu1 %v1362_v6  ;;  %9183 = vmatprep.subr.mxu1 %v3534_v3 }
 0x11b   : > { %9038 = vmatmul.mubr.f32.vlgmr.msra.gmra.mrb[72].mxu0 %v1353_v58  ;;  %9108 = vmatmul.mubr.f32.vlgmr.msra.gmra.mrb[72].mxu1 %v1360_v61  ;;  %v1462_v58 = vrot.slane %v1448_v50, %v44500_v19  ;;  %v302_v61 = vld [vmem:[%s44467_s4 + $0x160] sm:$0xff]  ;;  %v1480_v9 = vcombine.high %v1472_v1, %v1472_v1 }
 0x11c   : > { %9114 = vmatpush1.xpose.msra.mxu0 %v452_v59  ;;  %9184 = vmatpush1.xpose.msra.mxu1 %v453_v62  ;;  %v465_v59 = vld [vmem:[%s44474_s20 + $0x2b8] sm:$0xff]  ;;  %v3545_v62 = vcombine.high %v464_v56, %v464_v56  ;;  %v1482_v6 = vcombine.high %v302_v61, %v302_v61 }
 0x11d   : > { %9177 = vmatprep.mubr.f32.mxu0 %v1378_v12  ;;  %9253 = vmatprep.subr.mxu0 %v3535_v11  ;;  %v3546_v0 = vcombine.high %v465_v59, %v465_v59  ;;  %v1464_v3 = vcombine.high %v1462_v58, %v1462_v58  ;;  %v1489_v11 = vrot.slane %v302_v61, %v44500_v19  ;;  %v468_v12 = vld [vmem:[%s44474_s20 + $0x2d0] sm:$0xff] }
 0x11e   : > { %9247 = vmatprep.mubr.f32.mxu1 %v1379_v16  ;;  %9323 = vmatprep.subr.mxu1 %v3536_v13 }
 0x11f   : > { %9178 = vmatmul.mubr.f32.vlgmr.msra.gmra.mrb[74].mxu0 %v1370_v4  ;;  %9248 = vmatmul.mubr.f32.vlgmr.msra.gmra.mrb[74].mxu1 %v1377_v7  ;;  %v1479_v4 = vrot.slane %v1465_v60, %v44500_v19  ;;  %v303_v7 = vld [vmem:[%s44467_s4 + $0x168] sm:$0xff]  ;;  %v1497_v20 = vcombine.high %v1489_v11, %v1489_v11 }
 0x120   : > { %9254 = vmatpush1.xpose.msra.mxu0 %v454_v5  ;;  %9324 = vmatpush1.xpose.msra.mxu1 %v455_v8  ;;  %v467_v5 = vld [vmem:[%s44474_s20 + $0x2c8] sm:$0xff]  ;;  %v3547_v8 = vcombine.high %v466_v2, %v466_v2  ;;  %v1499_v16 = vcombine.high %v303_v7, %v303_v7 }
 0x121   : > { %9317 = vmatprep.mubr.f32.mxu0 %v1395_v23  ;;  %9393 = vmatprep.subr.mxu0 %v3537_v22  ;;  %v3548_v10 = vcombine.high %v467_v5, %v467_v5  ;;  %v1481_v13 = vcombine.high %v1479_v4, %v1479_v4  ;;  %v1506_v22 = vrot.slane %v303_v7, %v44500_v19  ;;  %v470_v23 = vld [vmem:[%s44474_s20 + $0x2e0] sm:$0xff] }
 0x122   : > { %9387 = vmatprep.mubr.f32.mxu1 %v1396_v27  ;;  %9463 = vmatprep.subr.mxu1 %v3538_v24 }
 0x123   : > { %9318 = vmatmul.mubr.f32.vlgmr.msra.gmra.mrb[76].mxu0 %v1387_v14  ;;  %9388 = vmatmul.mubr.f32.vlgmr.msra.gmra.mrb[76].mxu1 %v1394_v17  ;;  %v1496_v14 = vrot.slane %v1482_v6, %v44500_v19  ;;  %v304_v17 = vld [vmem:[%s44467_s4 + $0x170] sm:$0xff]  ;;  %v1514_v30 = vcombine.high %v1506_v22, %v1506_v22 }
 0x124   : > { %9394 = vmatpush1.xpose.msra.mxu0 %v456_v15  ;;  %9464 = vmatpush1.xpose.msra.mxu1 %v457_v18  ;;  %v469_v15 = vld [vmem:[%s44474_s20 + $0x2d8] sm:$0xff]  ;;  %v3549_v18 = vcombine.high %v468_v12, %v468_v12  ;;  %v1516_v27 = vcombine.high %v304_v17, %v304_v17 }
 0x125   : > { %9457 = vmatprep.mubr.f32.mxu0 %v1412_v33  ;;  %9533 = vmatprep.subr.mxu0 %v3539_v32  ;;  %v3550_v21 = vcombine.high %v469_v15, %v469_v15  ;;  %v1498_v24 = vcombine.high %v1496_v14, %v1496_v14  ;;  %v1523_v32 = vrot.slane %v304_v17, %v44500_v19  ;;  %v472_v33 = vld [vmem:[%s44474_s20 + $0x2f0] sm:$0xff] }
 0x126   : > { %9527 = vmatprep.mubr.f32.mxu1 %v1413_v37  ;;  %9603 = vmatprep.subr.mxu1 %v3540_v34 }
 0x127   : > { %9458 = vmatmul.mubr.f32.vlgmr.msra.gmra.mrb[78].mxu0 %v1404_v25  ;;  %9528 = vmatmul.mubr.f32.vlgmr.msra.gmra.mrb[78].mxu1 %v1411_v28  ;;  %v1513_v25 = vrot.slane %v1499_v16, %v44500_v19  ;;  %v305_v28 = vld [vmem:[%s44467_s4 + $0x178] sm:$0xff]  ;;  %v1531_v40 = vcombine.high %v1523_v32, %v1523_v32 }
 0x128   : > { %9534 = vmatpush1.xpose.msra.mxu0 %v458_v26  ;;  %9604 = vmatpush1.xpose.msra.mxu1 %v459_v29  ;;  %v471_v26 = vld [vmem:[%s44474_s20 + $0x2e8] sm:$0xff]  ;;  %v3551_v29 = vcombine.high %v470_v23, %v470_v23  ;;  %v1533_v37 = vcombine.high %v305_v28, %v305_v28 }
 0x129   : > { %9597 = vmatprep.mubr.f32.mxu0 %v1429_v43  ;;  %9673 = vmatprep.subr.mxu0 %v3541_v42  ;;  %v3552_v31 = vcombine.high %v471_v26, %v471_v26  ;;  %v1515_v34 = vcombine.high %v1513_v25, %v1513_v25  ;;  %v1540_v42 = vrot.slane %v305_v28, %v44500_v19  ;;  %v474_v43 = vld [vmem:[%s44474_s20 + $0x300] sm:$0xff] }
 0x12a   : > { %9667 = vmatprep.mubr.f32.mxu1 %v1430_v47  ;;  %9743 = vmatprep.subr.mxu1 %v3542_v44 }
 0x12b   : > { %9598 = vmatmul.mubr.f32.vlgmr.msra.gmra.mrb[80].mxu0 %v1421_v35  ;;  %9668 = vmatmul.mubr.f32.vlgmr.msra.gmra.mrb[80].mxu1 %v1428_v38  ;;  %v1530_v35 = vrot.slane %v1516_v27, %v44500_v19  ;;  %v306_v38 = vld [vmem:[%s44467_s4 + $0x180] sm:$0xff]  ;;  %v1548_v50 = vcombine.high %v1540_v42, %v1540_v42 }
 0x12c   : > { %9674 = vmatpush1.xpose.msra.mxu0 %v460_v36  ;;  %9744 = vmatpush1.xpose.msra.mxu1 %v461_v39  ;;  %v473_v36 = vld [vmem:[%s44474_s20 + $0x2f8] sm:$0xff]  ;;  %v3553_v39 = vcombine.high %v472_v33, %v472_v33  ;;  %v1550_v47 = vcombine.high %v306_v38, %v306_v38 }
 0x12d   : > { %9737 = vmatprep.mubr.f32.mxu0 %v1446_v53  ;;  %9813 = vmatprep.subr.mxu0 %v3543_v52  ;;  %v3554_v41 = vcombine.high %v473_v36, %v473_v36  ;;  %v1532_v44 = vcombine.high %v1530_v35, %v1530_v35  ;;  %v1557_v52 = vrot.slane %v306_v38, %v44500_v19  ;;  %v476_v53 = vld [vmem:[%s44474_s20 + $0x310] sm:$0xff] }
 0x12e   : > { %9807 = vmatprep.mubr.f32.mxu1 %v1447_v57  ;;  %9883 = vmatprep.subr.mxu1 %v3544_v54 }
 0x12f   : > { %9738 = vmatmul.mubr.f32.vlgmr.msra.gmra.mrb[82].mxu0 %v1438_v45  ;;  %9808 = vmatmul.mubr.f32.vlgmr.msra.gmra.mrb[82].mxu1 %v1445_v48  ;;  %v1547_v45 = vrot.slane %v1533_v37, %v44500_v19  ;;  %v307_v48 = vld [vmem:[%s44467_s4 + $0x188] sm:$0xff]  ;;  %v1565_v60 = vcombine.high %v1557_v52, %v1557_v52 }
 0x130   : > { %9814 = vmatpush1.xpose.msra.mxu0 %v462_v46  ;;  %9884 = vmatpush1.xpose.msra.mxu1 %v463_v49  ;;  %v475_v46 = vld [vmem:[%s44474_s20 + $0x308] sm:$0xff]  ;;  %v3555_v49 = vcombine.high %v474_v43, %v474_v43  ;;  %v1567_v57 = vcombine.high %v307_v48, %v307_v48 }
 0x131   : > { %9877 = vmatprep.mubr.f32.mxu0 %v1463_v63  ;;  %9953 = vmatprep.subr.mxu0 %v3545_v62  ;;  %v3556_v51 = vcombine.high %v475_v46, %v475_v46  ;;  %v1549_v54 = vcombine.high %v1547_v45, %v1547_v45  ;;  %v1574_v62 = vrot.slane %v307_v48, %v44500_v19  ;;  %v478_v63 = vld [vmem:[%s44474_s20 + $0x320] sm:$0xff] }
 0x132   : > { %9947 = vmatprep.mubr.f32.mxu1 %v1464_v3  ;;  %10023 = vmatprep.subr.mxu1 %v3546_v0 }
 0x133   : > { %9878 = vmatmul.mubr.f32.vlgmr.msra.gmra.mrb[84].mxu0 %v1455_v55  ;;  %9948 = vmatmul.mubr.f32.vlgmr.msra.gmra.mrb[84].mxu1 %v1462_v58  ;;  %v1564_v55 = vrot.slane %v1550_v47, %v44500_v19  ;;  %v308_v58 = vld [vmem:[%s44467_s4 + $0x190] sm:$0xff]  ;;  %v1582_v6 = vcombine.high %v1574_v62, %v1574_v62 }
 0x134   : > { %9954 = vmatpush1.xpose.msra.mxu0 %v464_v56  ;;  %10024 = vmatpush1.xpose.msra.mxu1 %v465_v59  ;;  %v477_v56 = vld [vmem:[%s44474_s20 + $0x318] sm:$0xff]  ;;  %v3557_v59 = vcombine.high %v476_v53, %v476_v53  ;;  %v1584_v3 = vcombine.high %v308_v58, %v308_v58 }
 0x135   : > { %10017 = vmatprep.mubr.f32.mxu0 %v1480_v9  ;;  %10093 = vmatprep.subr.mxu0 %v3547_v8  ;;  %v3558_v61 = vcombine.high %v477_v56, %v477_v56  ;;  %v1566_v0 = vcombine.high %v1564_v55, %v1564_v55  ;;  %v1591_v8 = vrot.slane %v308_v58, %v44500_v19  ;;  %v480_v9 = vld [vmem:[%s44474_s20 + $0x330] sm:$0xff] }
 0x136   : > { %10087 = vmatprep.mubr.f32.mxu1 %v1481_v13  ;;  %10163 = vmatprep.subr.mxu1 %v3548_v10 }
 0x137   : > { %10018 = vmatmul.mubr.f32.vlgmr.msra.gmra.mrb[86].mxu0 %v1472_v1  ;;  %10088 = vmatmul.mubr.f32.vlgmr.msra.gmra.mrb[86].mxu1 %v1479_v4  ;;  %v1581_v1 = vrot.slane %v1567_v57, %v44500_v19  ;;  %v309_v4 = vld [vmem:[%s44467_s4 + $0x198] sm:$0xff]  ;;  %v1599_v16 = vcombine.high %v1591_v8, %v1591_v8 }
 0x138   : > { %10094 = vmatpush1.xpose.msra.mxu0 %v466_v2  ;;  %10164 = vmatpush1.xpose.msra.mxu1 %v467_v5  ;;  %v479_v2 = vld [vmem:[%s44474_s20 + $0x328] sm:$0xff]  ;;  %v3559_v5 = vcombine.high %v478_v63, %v478_v63  ;;  %v1601_v13 = vcombine.high %v309_v4, %v309_v4 }
 0x139   : > { %10157 = vmatprep.mubr.f32.mxu0 %v1497_v20  ;;  %10233 = vmatprep.subr.mxu0 %v3549_v18  ;;  %v3560_v7 = vcombine.high %v479_v2, %v479_v2  ;;  %v1583_v10 = vcombine.high %v1581_v1, %v1581_v1  ;;  %v1608_v18 = vrot.slane %v309_v4, %v44500_v19  ;;  %v482_v20 = vld [vmem:[%s44474_s20 + $0x340] sm:$0xff] }
 0x13a   : > { %10227 = vmatprep.mubr.f32.mxu1 %v1498_v24  ;;  %10303 = vmatprep.subr.mxu1 %v3550_v21 }
 0x13b   : > { %10158 = vmatmul.mubr.f32.vlgmr.msra.gmra.mrb[88].mxu0 %v1489_v11  ;;  %10228 = vmatmul.mubr.f32.vlgmr.msra.gmra.mrb[88].mxu1 %v1496_v14  ;;  %v1598_v11 = vrot.slane %v1584_v3, %v44500_v19  ;;  %v310_v14 = vld [vmem:[%s44467_s4 + $0x1a0] sm:$0xff]  ;;  %v1616_v27 = vcombine.high %v1608_v18, %v1608_v18 }
 0x13c   : > { %10234 = vmatpush1.xpose.msra.mxu0 %v468_v12  ;;  %10304 = vmatpush1.xpose.msra.mxu1 %v469_v15  ;;  %v481_v12 = vld [vmem:[%s44474_s20 + $0x338] sm:$0xff]  ;;  %v3561_v15 = vcombine.high %v480_v9, %v480_v9  ;;  %v1618_v24 = vcombine.high %v310_v14, %v310_v14 }
 0x13d   : > { %10297 = vmatprep.mubr.f32.mxu0 %v1514_v30  ;;  %10373 = vmatprep.subr.mxu0 %v3551_v29  ;;  %v3562_v17 = vcombine.high %v481_v12, %v481_v12  ;;  %v1600_v21 = vcombine.high %v1598_v11, %v1598_v11  ;;  %v1625_v29 = vrot.slane %v310_v14, %v44500_v19  ;;  %v484_v30 = vld [vmem:[%s44474_s20 + $0x350] sm:$0xff] }
 0x13e   : > { %10367 = vmatprep.mubr.f32.mxu1 %v1515_v34  ;;  %10443 = vmatprep.subr.mxu1 %v3552_v31 }
 0x13f   : > { %10298 = vmatmul.mubr.f32.vlgmr.msra.gmra.mrb[90].mxu0 %v1506_v22  ;;  %10368 = vmatmul.mubr.f32.vlgmr.msra.gmra.mrb[90].mxu1 %v1513_v25  ;;  %v1615_v22 = vrot.slane %v1601_v13, %v44500_v19  ;;  %v311_v25 = vld [vmem:[%s44467_s4 + $0x1a8] sm:$0xff]  ;;  %v1633_v37 = vcombine.high %v1625_v29, %v1625_v29 }
 0x140   : > { %10374 = vmatpush1.xpose.msra.mxu0 %v470_v23  ;;  %10444 = vmatpush1.xpose.msra.mxu1 %v471_v26  ;;  %v483_v23 = vld [vmem:[%s44474_s20 + $0x348] sm:$0xff]  ;;  %v3563_v26 = vcombine.high %v482_v20, %v482_v20  ;;  %v1635_v34 = vcombine.high %v311_v25, %v311_v25 }
 0x141   : > { %10437 = vmatprep.mubr.f32.mxu0 %v1531_v40  ;;  %10513 = vmatprep.subr.mxu0 %v3553_v39  ;;  %v3564_v28 = vcombine.high %v483_v23, %v483_v23  ;;  %v1617_v31 = vcombine.high %v1615_v22, %v1615_v22  ;;  %v1642_v39 = vrot.slane %v311_v25, %v44500_v19  ;;  %v486_v40 = vld [vmem:[%s44474_s20 + $0x360] sm:$0xff] }
 0x142   : > { %10507 = vmatprep.mubr.f32.mxu1 %v1532_v44  ;;  %10583 = vmatprep.subr.mxu1 %v3554_v41 }
 0x143   : > { %10438 = vmatmul.mubr.f32.vlgmr.msra.gmra.mrb[92].mxu0 %v1523_v32  ;;  %10508 = vmatmul.mubr.f32.vlgmr.msra.gmra.mrb[92].mxu1 %v1530_v35  ;;  %v1632_v32 = vrot.slane %v1618_v24, %v44500_v19  ;;  %v312_v35 = vld [vmem:[%s44467_s4 + $0x1b0] sm:$0xff]  ;;  %v1650_v47 = vcombine.high %v1642_v39, %v1642_v39 }
 0x144   : > { %10514 = vmatpush1.xpose.msra.mxu0 %v472_v33  ;;  %10584 = vmatpush1.xpose.msra.mxu1 %v473_v36  ;;  %v485_v33 = vld [vmem:[%s44474_s20 + $0x358] sm:$0xff]  ;;  %v3565_v36 = vcombine.high %v484_v30, %v484_v30  ;;  %v1652_v44 = vcombine.high %v312_v35, %v312_v35 }
 0x145   : > { %10577 = vmatprep.mubr.f32.mxu0 %v1548_v50  ;;  %10653 = vmatprep.subr.mxu0 %v3555_v49  ;;  %v3566_v38 = vcombine.high %v485_v33, %v485_v33  ;;  %v1634_v41 = vcombine.high %v1632_v32, %v1632_v32  ;;  %v1659_v49 = vrot.slane %v312_v35, %v44500_v19  ;;  %v488_v50 = vld [vmem:[%s44474_s20 + $0x370] sm:$0xff] }
 0x146   : > { %10647 = vmatprep.mubr.f32.mxu1 %v1549_v54  ;;  %10723 = vmatprep.subr.mxu1 %v3556_v51 }
 0x147   : > { %10578 = vmatmul.mubr.f32.vlgmr.msra.gmra.mrb[94].mxu0 %v1540_v42  ;;  %10648 = vmatmul.mubr.f32.vlgmr.msra.gmra.mrb[94].mxu1 %v1547_v45  ;;  %v1649_v42 = vrot.slane %v1635_v34, %v44500_v19  ;;  %v313_v45 = vld [vmem:[%s44467_s4 + $0x1b8] sm:$0xff]  ;;  %v1667_v57 = vcombine.high %v1659_v49, %v1659_v49 }
 0x148   : > { %10654 = vmatpush1.xpose.msra.mxu0 %v474_v43  ;;  %10724 = vmatpush1.xpose.msra.mxu1 %v475_v46  ;;  %v487_v43 = vld [vmem:[%s44474_s20 + $0x368] sm:$0xff]  ;;  %v3567_v46 = vcombine.high %v486_v40, %v486_v40  ;;  %v1669_v54 = vcombine.high %v313_v45, %v313_v45 }
 0x149   : > { %10717 = vmatprep.mubr.f32.mxu0 %v1565_v60  ;;  %10793 = vmatprep.subr.mxu0 %v3557_v59  ;;  %v3568_v48 = vcombine.high %v487_v43, %v487_v43  ;;  %v1651_v51 = vcombine.high %v1649_v42, %v1649_v42  ;;  %v1676_v59 = vrot.slane %v313_v45, %v44500_v19  ;;  %v490_v60 = vld [vmem:[%s44474_s20 + $0x380] sm:$0xff] }
 0x14a   : > { %10787 = vmatprep.mubr.f32.mxu1 %v1566_v0  ;;  %10863 = vmatprep.subr.mxu1 %v3558_v61  ;;  %v1683_v0 = vrot.slane %v1669_v54, %v44500_v19  ;;  %v318_v54 = vld [vmem:[%s44467_s4 + $0x1e0] sm:$0xff] }
 0x14b   : > { %10718 = vmatmul.mubr.f32.vlgmr.msra.gmra.mrb[96].mxu0 %v1557_v52  ;;  %10788 = vmatmul.mubr.f32.vlgmr.msra.gmra.mrb[96].mxu1 %v1564_v55  ;;  %v1666_v52 = vrot.slane %v1652_v44, %v44500_v19  ;;  %v314_v55 = vld [vmem:[%s44467_s4 + $0x1c0] sm:$0xff]  ;;  %v496_v44 = vld [vmem:[%s44474_s20 + $0x3b0] sm:$0xff] }
 0x14c   : > { %10794 = vmatpush1.xpose.msra.mxu0 %v476_v53  ;;  %10864 = vmatpush1.xpose.msra.mxu1 %v477_v56  ;;  %v489_v53 = vld [vmem:[%s44474_s20 + $0x378] sm:$0xff]  ;;  %v3569_v56 = vcombine.high %v488_v50, %v488_v50 }
 0x14d   : > { %10857 = vmatprep.mubr.f32.mxu0 %v1582_v6  ;;  %10933 = vmatprep.subr.mxu0 %v3559_v5  ;;  %v3570_v58 = vcombine.high %v489_v53, %v489_v53  ;;  %v315_v6 = vld [vmem:[%s44467_s4 + $0x1c8] sm:$0xff] }
 0x14e   : > { %10927 = vmatprep.mubr.f32.mxu1 %v1583_v10  ;;  %11003 = vmatprep.subr.mxu1 %v3560_v7  ;;  %v3571_v7 = vcombine.high %v490_v60, %v490_v60  ;;  %v1693_v10 = vrot.slane %v314_v55, %v44500_v19 }
 0x14f   : > { %10858 = vmatmul.mubr.f32.vlgmr.msra.gmra.mrb[98].mxu0 %v1574_v62  ;;  %10928 = vmatmul.mubr.f32.vlgmr.msra.gmra.mrb[98].mxu1 %v1581_v1  ;;  %v491_v1 = vld [vmem:[%s44474_s20 + $0x388] sm:$0xff] }
 0x150   : > { %10934 = vmatpush1.xpose.msra.mxu0 %v478_v63  ;;  %11004 = vmatpush1.xpose.msra.mxu1 %v479_v2  ;;  %v1668_v63 = vcombine.high %v1666_v52, %v1666_v52  ;;  %v1686_v2 = vcombine.high %v314_v55, %v314_v55 }
 0x151   : > { %10997 = vmatprep.mubr.f32.mxu0 %v1599_v16  ;;  %11073 = vmatprep.subr.mxu0 %v3561_v15  ;;  %v1685_v15 = vcombine.high %v1683_v0, %v1683_v0 }
 0x152   : > { %11067 = vmatprep.mubr.f32.mxu1 %v1600_v21  ;;  %11143 = vmatprep.subr.mxu1 %v3562_v17  ;;  %v1700_v16 = vrot.slane %v1686_v2, %v44500_v19  ;;  %v1703_v17 = vcombine.high %v315_v6, %v315_v6  ;;  %v1754_v2 = vcombine.high %v318_v54, %v318_v54 }
 0x153   : > { %10998 = vmatmul.mubr.f32.vlgmr.msra.gmra.mrb[100].mxu0 %v1591_v8  ;;  %11068 = vmatmul.mubr.f32.vlgmr.msra.gmra.mrb[100].mxu1 %v1598_v11  ;;  %v1684_v8 = vcombine.high %v1676_v59, %v1676_v59  ;;  %v492_v11 = vld [vmem:[%s44474_s20 + $0x390] sm:$0xff] }
 0x154   : > { %11074 = vmatpush1.xpose.msra.mxu0 %v480_v9  ;;  %11144 = vmatpush1.xpose.msra.mxu1 %v481_v12  ;;  %v3572_v9 = vcombine.high %v491_v1, %v491_v1  ;;  %v493_v12 = vld [vmem:[%s44474_s20 + $0x398] sm:$0xff] }
 0x155   : > { %11137 = vmatprep.mubr.f32.mxu0 %v1616_v27  ;;  %11213 = vmatprep.subr.mxu0 %v3563_v26  ;;  %v3574_v24 = vcombine.high %v493_v12, %v493_v12  ;;  %v1701_v26 = vcombine.high %v1693_v10, %v1693_v10  ;;  %v1710_v27 = vrot.slane %v315_v6, %v44500_v19  ;;  %v319_v6 = vld [vmem:[%s44467_s4 + $0x1e8] sm:$0xff] }
 0x156   : > { %11207 = vmatprep.mubr.f32.mxu1 %v1617_v31  ;;  %11283 = vmatprep.subr.mxu1 %v3564_v28  ;;  %v494_v28 = vld [vmem:[%s44474_s20 + $0x3a0] sm:$0xff]  ;;  %v1702_v31 = vcombine.high %v1700_v16, %v1700_v16 }
 0x157   : > { %11138 = vmatmul.mubr.f32.vlgmr.msra.gmra.mrb[102].mxu0 %v1608_v18  ;;  %11208 = vmatmul.mubr.f32.vlgmr.msra.gmra.mrb[102].mxu1 %v1615_v22  ;;  %v316_v22 = vld [vmem:[%s44467_s4 + $0x1d0] sm:$0xff] }
 0x158   : > { %11214 = vmatpush1.xpose.msra.mxu0 %v482_v20  ;;  %11284 = vmatpush1.xpose.msra.mxu1 %v483_v23  ;;  %v3573_v23 = vcombine.high %v492_v11, %v492_v11  ;;  %v1720_v34 = vcombine.high %v316_v22, %v316_v22 }
 0x159   : > { %11277 = vmatprep.mubr.f32.mxu0 %v1633_v37  ;;  %11353 = vmatprep.subr.mxu0 %v3565_v36 }
 0x15a   : > { %11347 = vmatprep.mubr.f32.mxu1 %v1634_v41  ;;  %11423 = vmatprep.subr.mxu1 %v3566_v38  ;;  %v317_v38 = vld [vmem:[%s44467_s4 + $0x1d8] sm:$0xff] }
 0x15b   : > { %11278 = vmatmul.mubr.f32.vlgmr.msra.gmra.mrb[104].mxu0 %v1625_v29  ;;  %11348 = vmatmul.mubr.f32.vlgmr.msra.gmra.mrb[104].mxu1 %v1632_v32  ;;  %v1717_v32 = vrot.slane %v1703_v17, %v44500_v19  ;;  %v501_v17 = vld [vmem:[%s44474_s20 + $0x3d8] sm:$0xff] }
 0x15c   : > { %11354 = vmatpush1.xpose.msra.mxu0 %v484_v30  ;;  %11424 = vmatpush1.xpose.msra.mxu1 %v485_v33  ;;  %v495_v33 = vld [vmem:[%s44474_s20 + $0x3a8] sm:$0xff] }
 0x15d   : > { %11417 = vmatprep.mubr.f32.mxu0 %v1650_v47  ;;  %11493 = vmatprep.subr.mxu0 %v3567_v46  ;;  %v1719_v47 = vcombine.high %v1717_v32, %v1717_v32 }
 0x15e   : > { %v3999_v61 = vpop.f32.mrb[0].mxu0  ;;  %v4069_v62 = vpop.f32.mrb[0].mxu1  ;;  %11487 = vmatprep.mubr.f32.mxu1 %v1651_v51  ;;  %11563 = vmatprep.subr.mxu1 %v3568_v48  ;;  %v1734_v48 = vrot.slane %v1720_v34, %v44500_v19  ;;  %v503_v34 = vld [vmem:[%s44474_s20 + $0x3e8] sm:$0xff] }
 0x15f   : > { %v4070_v3 = vadd.f32 %v4069_v62, %v3999_v61  ;;  %v4001_v4 = vpop.f32.mrb[1].mxu0  ;;  %11418 = vmatmul.mubr.f32.vlgmr.msra.gmra.mrb[106].mxu0 %v1642_v39  ;;  %v4071_v5 = vpop.f32.mrb[1].mxu1  ;;  %11488 = vmatmul.mubr.f32.vlgmr.msra.gmra.mrb[106].mxu1 %v1649_v42  ;;  %v3575_v39 = vcombine.high %v494_v28, %v494_v28  ;;  %v1718_v42 = vcombine.high %v1710_v27, %v1710_v27  ;;  %v499_v61 = vld [vmem:[%s44474_s20 + $0x3c8] sm:$0xff] }
 0x160   : > { %11494 = vmatpush1.xpose.msra.mxu0 %v486_v40  ;;  %11564 = vmatpush1.xpose.msra.mxu1 %v487_v43  ;;  %v44790_v40 = vrot.slane %v316_v22, %v44500_v19  ;;  %v3576_v43 = vcombine.high %v495_v33, %v495_v33 }
 0x161   : > { %11557 = vmatprep.mubr.f32.mxu0 %v1667_v57  ;;  %11633 = vmatprep.subr.mxu0 %v3569_v56  ;;  %v3577_v56 = vcombine.high %v496_v44, %v496_v44 }
 0x162   : > { %v4139_v13 = vpop.f32.mrb[2].mxu0  ;;  %v4209_v14 = vpop.f32.mrb[2].mxu1  ;;  %11627 = vmatprep.mubr.f32.mxu1 %v1668_v63  ;;  %11703 = vmatprep.subr.mxu1 %v3570_v58  ;;  %v1735_v55 = vcombine.high %v44790_v40, %v44790_v40 }
 0x163   : > { %v4140_v18 = vadd.f32 %v4139_v13, %v4070_v3  ;;  %v4141_v20 = vpop.f32.mrb[3].mxu0  ;;  %11558 = vmatmul.mubr.f32.vlgmr.msra.gmra.mrb[108].mxu0 %v1659_v49  ;;  %v4211_v21 = vpop.f32.mrb[3].mxu1  ;;  %11628 = vmatmul.mubr.f32.vlgmr.msra.gmra.mrb[108].mxu1 %v1666_v52  ;;  %v497_v49 = vld [vmem:[%s44474_s20 + $0x3b8] sm:$0xff] }
 0x164   : > { %11634 = vmatpush1.xpose.msra.mxu0 %v488_v50  ;;  %11704 = vmatpush1.xpose.msra.mxu1 %v489_v53  ;;  %v1737_v50 = vcombine.high %v317_v38, %v317_v38  ;;  %v3578_v58 = vcombine.high %v497_v49, %v497_v49 }
 0x165   : > { %v4210_v25 = vadd.f32 %v4209_v14, %v4140_v18  ;;  %11697 = vmatprep.mubr.f32.mxu0 %v1684_v8  ;;  %11773 = vmatprep.subr.mxu0 %v3571_v7  ;;  %v3580_v8 = vcombine.high %v499_v61, %v499_v61  ;;  %v1771_v18 = vcombine.high %v319_v6, %v319_v6 }
 0x166   : > { %v4279_v29 = vpop.f32.mrb[4].mxu0  ;;  %v4349_v30 = vpop.f32.mrb[4].mxu1  ;;  %11767 = vmatprep.mubr.f32.mxu1 %v1685_v15  ;;  %11843 = vmatprep.subr.mxu1 %v3572_v9 }
 0x167   : > { %v4280_v35 = vadd.f32 %v4279_v29, %v4210_v25  ;;  %v4281_v36 = vpop.f32.mrb[5].mxu0  ;;  %11698 = vmatmul.mubr.f32.vlgmr.msra.gmra.mrb[110].mxu0 %v1676_v59  ;;  %v4351_v37 = vpop.f32.mrb[5].mxu1  ;;  %11768 = vmatmul.mubr.f32.vlgmr.msra.gmra.mrb[110].mxu1 %v1683_v0  ;;  %v1744_v59 = vrot.slane %v317_v38, %v44500_v19  ;;  %v1736_v0 = vcombine.high %v1734_v48, %v1734_v48  ;;  %v502_v29 = vld [vmem:[%s44474_s20 + $0x3e0] sm:$0xff] }
 0x168   : > { %11774 = vmatpush1.xpose.msra.mxu0 %v490_v60  ;;  %11844 = vmatpush1.xpose.msra.mxu1 %v491_v1  ;;  %v498_v60 = vld [vmem:[%s44474_s20 + $0x3c0] sm:$0xff]  ;;  %v1751_v1 = vrot.slane %v1737_v50, %v44500_v19  ;;  %v44810_v25 = vrot.slane %v319_v6, %v44500_v19 }
 0x169   : > { %v4350_v41 = vadd.f32 %v4349_v30, %v4280_v35  ;;  %11837 = vmatprep.mubr.f32.mxu0 %v1701_v26  ;;  %11913 = vmatprep.subr.mxu0 %v3573_v23  ;;  %v3579_v7 = vcombine.high %v498_v60, %v498_v60  ;;  %v320_v23 = vld [vmem:[%s44467_s4 + $0x1f0] sm:$0xff] }
 0x16a   : > { %v4419_v45 = vpop.f32.mrb[6].mxu0  ;;  %v4489_v46 = vpop.f32.mrb[6].mxu1  ;;  %11907 = vmatprep.mubr.f32.mxu1 %v1702_v31  ;;  %11983 = vmatprep.subr.mxu1 %v3574_v24  ;;  %v1753_v15 = vcombine.high %v1751_v1, %v1751_v1  ;;  %v1788_v35 = vcombine.high %v320_v23, %v320_v23 }
 0x16b   : > { %v4420_v51 = vadd.f32 %v4419_v45, %v4350_v41  ;;  %v4421_v52 = vpop.f32.mrb[7].mxu0  ;;  %11838 = vmatmul.mubr.f32.vlgmr.msra.gmra.mrb[112].mxu0 %v1693_v10  ;;  %v4491_v53 = vpop.f32.mrb[7].mxu1  ;;  %11908 = vmatmul.mubr.f32.vlgmr.msra.gmra.mrb[112].mxu1 %v1700_v16  ;;  %v1752_v10 = vcombine.high %v1744_v59, %v1744_v59  ;;  %v1768_v16 = vrot.slane %v1754_v2, %v44500_v19  ;;  %v504_v45 = vld [vmem:[%s44474_s20 + $0x3f0] sm:$0xff]  ;;  %v507_v2 = vld [vmem:[%s44474_s20 + $0x408] sm:$0xff] }
 0x16c   : > { %11914 = vmatpush1.xpose.msra.mxu0 %v492_v11  ;;  %11984 = vmatpush1.xpose.msra.mxu1 %v493_v12  ;;  %v1761_v11 = vrot.slane %v318_v54, %v44500_v19  ;;  %v500_v12 = vld [vmem:[%s44474_s20 + $0x3d0] sm:$0xff]  ;;  %v3583_v41 = vcombine.high %v502_v29, %v502_v29  ;;  %v1802_v50 = vrot.slane %v1788_v35, %v44500_v19 }
 0x16d   : > { %v4490_v57 = vadd.f32 %v4489_v46, %v4420_v51  ;;  %11977 = vmatprep.mubr.f32.mxu0 %v1718_v42  ;;  %12053 = vmatprep.subr.mxu0 %v3575_v39  ;;  %v3581_v24 = vcombine.high %v500_v12, %v500_v12  ;;  %v321_v39 = vld [vmem:[%s44467_s4 + $0x1f8] sm:$0xff] }
 0x16e   : > { %v4559_v62 = vpop.f32.mrb[8].mxu0  ;;  %v4629_v63 = vpop.f32.mrb[8].mxu1  ;;  %12047 = vmatprep.mubr.f32.mxu1 %v1719_v47  ;;  %12123 = vmatprep.subr.mxu1 %v3576_v43  ;;  %v3584_v43 = vcombine.high %v503_v34, %v503_v34  ;;  %v505_v46 = vld [vmem:[%s44474_s20 + $0x3f8] sm:$0xff]  ;;  %v1805_v51 = vcombine.high %v321_v39, %v321_v39 }
 0x16f   : > { %v4560_v3 = vadd.f32 %v4559_v62, %v4490_v57  ;;  %v4561_v4 = vpop.f32.mrb[9].mxu0  ;;  %11978 = vmatmul.mubr.f32.vlgmr.msra.gmra.mrb[114].mxu0 %v1710_v27  ;;  %v4631_v5 = vpop.f32.mrb[9].mxu1  ;;  %12048 = vmatmul.mubr.f32.vlgmr.msra.gmra.mrb[114].mxu1 %v1717_v32  ;;  %v1769_v27 = vcombine.high %v1761_v11, %v1761_v11  ;;  %v1770_v32 = vcombine.high %v1768_v16, %v1768_v16 }
 0x170   : > { %12054 = vmatpush1.xpose.msra.mxu0 %v494_v28  ;;  %12124 = vmatpush1.xpose.msra.mxu1 %v495_v33  ;;  %v3582_v28 = vcombine.high %v501_v17, %v501_v17  ;;  %v1785_v33 = vrot.slane %v1771_v18, %v44500_v19  ;;  %v3586_v57 = vcombine.high %v505_v46, %v505_v46  ;;  %v509_v18 = vld [vmem:[%s44474_s20 + $0x418] sm:$0xff] }
 0x171   : > { %v4630_v9 = vadd.f32 %v4629_v63, %v4560_v3  ;;  %12117 = vmatprep.mubr.f32.mxu0 %v1735_v55  ;;  %12193 = vmatprep.subr.mxu0 %v3577_v56  ;;  %v322_v55 = vld [vmem:[%s44467_s4 + $0x200] sm:$0xff]  ;;  %v3585_v56 = vcombine.high %v504_v45, %v504_v45 }
 0x172   : > { %v4699_v13 = vpop.f32.mrb[10].mxu0  ;;  %v4769_v14 = vpop.f32.mrb[10].mxu1  ;;  %12187 = vmatprep.mubr.f32.mxu1 %v1736_v0  ;;  %12263 = vmatprep.subr.mxu1 %v3578_v58  ;;  %v1804_v0 = vcombine.high %v1802_v50, %v1802_v50  ;;  %v1822_v3 = vcombine.high %v322_v55, %v322_v55 }
 0x173   : > { %v4700_v20 = vadd.f32 %v4699_v13, %v4630_v9  ;;  %v4701_v21 = vpop.f32.mrb[11].mxu0  ;;  %12118 = vmatmul.mubr.f32.vlgmr.msra.gmra.mrb[116].mxu0 %v44790_v40  ;;  %v4771_v22 = vpop.f32.mrb[11].mxu1  ;;  %12188 = vmatmul.mubr.f32.vlgmr.msra.gmra.mrb[116].mxu1 %v1734_v48  ;;  %v1786_v40 = vcombine.high %v44810_v25, %v44810_v25  ;;  %v44830_v9 = vrot.slane %v322_v55, %v44500_v19  ;;  %v508_v13 = vld [vmem:[%s44474_s20 + $0x410] sm:$0xff] }
 0x174   : > { %12194 = vmatpush1.xpose.msra.mxu0 %v496_v44  ;;  %12264 = vmatpush1.xpose.msra.mxu1 %v497_v49  ;;  %v1795_v44 = vrot.slane %v320_v23, %v44500_v19  ;;  %v1787_v49 = vcombine.high %v1785_v33, %v1785_v33 }
 0x175   : > { %v4770_v26 = vadd.f32 %v4769_v14, %v4700_v20  ;;  %12257 = vmatprep.mubr.f32.mxu0 %v1752_v10  ;;  %12333 = vmatprep.subr.mxu0 %v3579_v7  ;;  %v323_v7 = vld [vmem:[%s44467_s4 + $0x208] sm:$0xff] }
 0x176   : > { %v4839_v30 = vpop.f32.mrb[12].mxu0  ;;  %v4909_v31 = vpop.f32.mrb[12].mxu1  ;;  %12327 = vmatprep.mubr.f32.mxu1 %v1753_v15  ;;  %12403 = vmatprep.subr.mxu1 %v3580_v8  ;;  %v1839_v20 = vcombine.high %v323_v7, %v323_v7 }
 0x177   : > { %v4840_v36 = vadd.f32 %v4839_v30, %v4770_v26  ;;  %v4841_v37 = vpop.f32.mrb[13].mxu0  ;;  %12258 = vmatmul.mubr.f32.vlgmr.msra.gmra.mrb[118].mxu0 %v1744_v59  ;;  %v4911_v38 = vpop.f32.mrb[13].mxu1  ;;  %12328 = vmatmul.mubr.f32.vlgmr.msra.gmra.mrb[118].mxu1 %v1751_v1  ;;  %v1803_v59 = vcombine.high %v1795_v44, %v1795_v44  ;;  %v1819_v1 = vrot.slane %v1805_v51, %v44500_v19  ;;  %v510_v30 = vld [vmem:[%s44474_s20 + $0x420] sm:$0xff]  ;;  %v513_v51 = vld [vmem:[%s44474_s20 + $0x438] sm:$0xff] }
 0x178   : > { %12334 = vmatpush1.xpose.msra.mxu0 %v498_v60  ;;  %12404 = vmatpush1.xpose.msra.mxu1 %v499_v61  ;;  %v1812_v60 = vrot.slane %v321_v39, %v44500_v19  ;;  %v506_v61 = vld [vmem:[%s44474_s20 + $0x400] sm:$0xff]  ;;  %v3589_v26 = vcombine.high %v508_v13, %v508_v13  ;;  %v1853_v35 = vrot.slane %v1839_v20, %v44500_v19 }
 0x179   : > { %v4910_v42 = vadd.f32 %v4909_v31, %v4840_v36  ;;  %12397 = vmatprep.mubr.f32.mxu0 %v1769_v27  ;;  %12473 = vmatprep.subr.mxu0 %v3581_v24  ;;  %v3587_v8 = vcombine.high %v506_v61, %v506_v61  ;;  %v324_v24 = vld [vmem:[%s44467_s4 + $0x210] sm:$0xff] }
 0x17a   : > { %v4979_v47 = vpop.f32.mrb[14].mxu0  ;;  %v5049_v48 = vpop.f32.mrb[14].mxu1  ;;  %12467 = vmatprep.mubr.f32.mxu1 %v1770_v32  ;;  %12543 = vmatprep.subr.mxu1 %v3582_v28  ;;  %v3590_v28 = vcombine.high %v509_v18, %v509_v18  ;;  %v511_v31 = vld [vmem:[%s44474_s20 + $0x428] sm:$0xff]  ;;  %v1856_v36 = vcombine.high %v324_v24, %v324_v24 }
 0x17b   : > { %v4980_v52 = vadd.f32 %v4979_v47, %v4910_v42  ;;  %v4981_v53 = vpop.f32.mrb[15].mxu0  ;;  %12398 = vmatmul.mubr.f32.vlgmr.msra.gmra.mrb[120].mxu0 %v1761_v11  ;;  %v5051_v54 = vpop.f32.mrb[15].mxu1  ;;  %12468 = vmatmul.mubr.f32.vlgmr.msra.gmra.mrb[120].mxu1 %v1768_v16  ;;  %v1820_v11 = vcombine.high %v1812_v60, %v1812_v60  ;;  %v1821_v16 = vcombine.high %v1819_v1, %v1819_v1 }
 0x17c   : > { %12474 = vmatpush1.xpose.msra.mxu0 %v500_v12  ;;  %12544 = vmatpush1.xpose.msra.mxu1 %v501_v17  ;;  %v3588_v12 = vcombine.high %v507_v2, %v507_v2  ;;  %v1836_v17 = vrot.slane %v1822_v3, %v44500_v19  ;;  %v3592_v42 = vcombine.high %v511_v31, %v511_v31  ;;  %v515_v3 = vld [vmem:[%s44474_s20 + $0x448] sm:$0xff] }
 0x17d   : > { %v5050_v58 = vadd.f32 %v5049_v48, %v4980_v52  ;;  %12537 = vmatprep.mubr.f32.mxu0 %v1786_v40  ;;  %12613 = vmatprep.subr.mxu0 %v3583_v41  ;;  %v325_v40 = vld [vmem:[%s44467_s4 + $0x218] sm:$0xff]  ;;  %v3591_v41 = vcombine.high %v510_v30, %v510_v30 }
 0x17e   : > { %v5119_v62 = vpop.f32.mrb[16].mxu0  ;;  %v5189_v63 = vpop.f32.mrb[16].mxu1  ;;  %12607 = vmatprep.mubr.f32.mxu1 %v1787_v49  ;;  %12683 = vmatprep.subr.mxu1 %v3584_v43  ;;  %v1855_v49 = vcombine.high %v1853_v35, %v1853_v35  ;;  %v1873_v52 = vcombine.high %v325_v40, %v325_v40 }
 0x17f   : > { %v5120_v4 = vadd.f32 %v5119_v62, %v5050_v58  ;;  %v5121_v5 = vpop.f32.mrb[17].mxu0  ;;  %12538 = vmatmul.mubr.f32.vlgmr.msra.gmra.mrb[122].mxu0 %v44810_v25  ;;  %v5191_v6 = vpop.f32.mrb[17].mxu1  ;;  %12608 = vmatmul.mubr.f32.vlgmr.msra.gmra.mrb[122].mxu1 %v1785_v33  ;;  %v1837_v25 = vcombine.high %v44830_v9, %v44830_v9  ;;  %v44850_v58 = vrot.slane %v325_v40, %v44500_v19  ;;  %v514_v62 = vld [vmem:[%s44474_s20 + $0x440] sm:$0xff] }
 0x180   : > { %12614 = vmatpush1.xpose.msra.mxu0 %v502_v29  ;;  %12684 = vmatpush1.xpose.msra.mxu1 %v503_v34  ;;  %v1846_v29 = vrot.slane %v323_v7, %v44500_v19  ;;  %v1838_v34 = vcombine.high %v1836_v17, %v1836_v17 }
 0x181   : > { %v5190_v10 = vadd.f32 %v5189_v63, %v5120_v4  ;;  %12677 = vmatprep.mubr.f32.mxu0 %v1803_v59  ;;  %12753 = vmatprep.subr.mxu0 %v3585_v56  ;;  %v326_v56 = vld [vmem:[%s44467_s4 + $0x220] sm:$0xff] }
 0x182   : > { %v5259_v14 = vpop.f32.mrb[18].mxu0  ;;  %v5329_v15 = vpop.f32.mrb[18].mxu1  ;;  %12747 = vmatprep.mubr.f32.mxu1 %v1804_v0  ;;  %12823 = vmatprep.subr.mxu1 %v3586_v57  ;;  %v1890_v4 = vcombine.high %v326_v56, %v326_v56 }
 0x183   : > { %v5260_v21 = vadd.f32 %v5259_v14, %v5190_v10  ;;  %v5261_v22 = vpop.f32.mrb[19].mxu0  ;;  %12678 = vmatmul.mubr.f32.vlgmr.msra.gmra.mrb[124].mxu0 %v1795_v44  ;;  %v5331_v23 = vpop.f32.mrb[19].mxu1  ;;  %12748 = vmatmul.mubr.f32.vlgmr.msra.gmra.mrb[124].mxu1 %v1802_v50  ;;  %v1854_v44 = vcombine.high %v1846_v29, %v1846_v29  ;;  %v1870_v50 = vrot.slane %v1856_v36, %v44500_v19  ;;  %v516_v14 = vld [vmem:[%s44474_s20 + $0x450] sm:$0xff]  ;;  %v519_v36 = vld [vmem:[%s44474_s20 + $0x468] sm:$0xff] }
 0x184   : > { %12754 = vmatpush1.xpose.msra.mxu0 %v504_v45  ;;  %12824 = vmatpush1.xpose.msra.mxu1 %v505_v46  ;;  %v1863_v45 = vrot.slane %v324_v24, %v44500_v19  ;;  %v512_v46 = vld [vmem:[%s44474_s20 + $0x430] sm:$0xff]  ;;  %v3595_v10 = vcombine.high %v514_v62, %v514_v62  ;;  %v1904_v20 = vrot.slane %v1890_v4, %v44500_v19 }
 0x185   : > { %v5330_v27 = vadd.f32 %v5329_v15, %v5260_v21  ;;  %12817 = vmatprep.mubr.f32.mxu0 %v1820_v11  ;;  %12893 = vmatprep.subr.mxu0 %v3587_v8  ;;  %v3593_v57 = vcombine.high %v512_v46, %v512_v46  ;;  %v327_v8 = vld [vmem:[%s44467_s4 + $0x228] sm:$0xff]  ;;  %v517_v15 = vld [vmem:[%s44474_s20 + $0x458] sm:$0xff] }
 0x186   : > { %v5399_v32 = vpop.f32.mrb[20].mxu0  ;;  %v5469_v33 = vpop.f32.mrb[20].mxu1  ;;  %12887 = vmatprep.mubr.f32.mxu1 %v1821_v16  ;;  %12963 = vmatprep.subr.mxu1 %v3588_v12  ;;  %v3596_v12 = vcombine.high %v515_v3, %v515_v3  ;;  %v1907_v21 = vcombine.high %v327_v8, %v327_v8 }
 0x187   : > { %v5400_v37 = vadd.f32 %v5399_v32, %v5330_v27  ;;  %v5401_v38 = vpop.f32.mrb[21].mxu0  ;;  %12818 = vmatmul.mubr.f32.vlgmr.msra.gmra.mrb[126].mxu0 %v1812_v60  ;;  %v5471_v39 = vpop.f32.mrb[21].mxu1  ;;  %12888 = vmatmul.mubr.f32.vlgmr.msra.gmra.mrb[126].mxu1 %v1819_v1  ;;  %v1871_v60 = vcombine.high %v1863_v45, %v1863_v45  ;;  %v1872_v1 = vcombine.high %v1870_v50, %v1870_v50 }
 0x188   : > { %12894 = vmatpush1.xpose.msra.mxu0 %v506_v61  ;;  %12964 = vmatpush1.xpose.msra.mxu1 %v507_v2  ;;  %v3594_v61 = vcombine.high %v513_v51, %v513_v51  ;;  %v1887_v2 = vrot.slane %v1873_v52, %v44500_v19  ;;  %v3598_v27 = vcombine.high %v517_v15, %v517_v15  ;;  %v521_v52 = vld [vmem:[%s44474_s20 + $0x478] sm:$0xff] }
 0x189   : > { %v5470_v43 = vadd.f32 %v5469_v33, %v5400_v37  ;;  %12957 = vmatprep.mubr.f32.mxu0 %v1837_v25  ;;  %13033 = vmatprep.subr.mxu0 %v3589_v26  ;;  %v328_v25 = vld [vmem:[%s44467_s4 + $0x230] sm:$0xff]  ;;  %v3597_v26 = vcombine.high %v516_v14, %v516_v14 }
 0x18a   : > { %v5539_v47 = vpop.f32.mrb[22].mxu0  ;;  %v5609_v48 = vpop.f32.mrb[22].mxu1  ;;  %13027 = vmatprep.mubr.f32.mxu1 %v1838_v34  ;;  %13103 = vmatprep.subr.mxu1 %v3590_v28  ;;  %v1906_v34 = vcombine.high %v1904_v20, %v1904_v20  ;;  %v1924_v37 = vcombine.high %v328_v25, %v328_v25 }
 0x18b   : > { %v5540_v53 = vadd.f32 %v5539_v47, %v5470_v43  ;;  %v5541_v54 = vpop.f32.mrb[23].mxu0  ;;  %12958 = vmatmul.mubr.f32.vlgmr.msra.gmra.mrb[128].mxu0 %v44830_v9  ;;  %v5611_v55 = vpop.f32.mrb[23].mxu1  ;;  %13028 = vmatmul.mubr.f32.vlgmr.msra.gmra.mrb[128].mxu1 %v1836_v17  ;;  %v1888_v9 = vcombine.high %v44850_v58, %v44850_v58  ;;  %v44870_v43 = vrot.slane %v328_v25, %v44500_v19  ;;  %v520_v47 = vld [vmem:[%s44474_s20 + $0x470] sm:$0xff]  ;;  %v525_v25 = vld [vmem:[%s44474_s20 + $0x498] sm:$0xff] }
 0x18c   : > { %13034 = vmatpush1.xpose.msra.mxu0 %v508_v13  ;;  %13104 = vmatpush1.xpose.msra.mxu1 %v509_v18  ;;  %v1897_v13 = vrot.slane %v326_v56, %v44500_v19  ;;  %v1889_v18 = vcombine.high %v1887_v2, %v1887_v2 }
 0x18d   : > { %v5610_v59 = vadd.f32 %v5609_v48, %v5540_v53  ;;  %13097 = vmatprep.mubr.f32.mxu0 %v1854_v44  ;;  %13173 = vmatprep.subr.mxu0 %v3591_v41  ;;  %v329_v41 = vld [vmem:[%s44467_s4 + $0x238] sm:$0xff] }
 0x18e   : > { %v5679_v63 = vpop.f32.mrb[24].mxu0  ;;  %v5749_v0 = vpop.f32.mrb[24].mxu1  ;;  %13167 = vmatprep.mubr.f32.mxu1 %v1855_v49  ;;  %13243 = vmatprep.subr.mxu1 %v3592_v42  ;;  %v1941_v53 = vcombine.high %v329_v41, %v329_v41 }
 0x18f   : > { %v5680_v5 = vadd.f32 %v5679_v63, %v5610_v59  ;;  %v5681_v6 = vpop.f32.mrb[25].mxu0  ;;  %13098 = vmatmul.mubr.f32.vlgmr.msra.gmra.mrb[130].mxu0 %v1846_v29  ;;  %v5751_v7 = vpop.f32.mrb[25].mxu1  ;;  %13168 = vmatmul.mubr.f32.vlgmr.msra.gmra.mrb[130].mxu1 %v1853_v35  ;;  %v1905_v29 = vcombine.high %v1897_v13, %v1897_v13  ;;  %v1921_v35 = vrot.slane %v1907_v21, %v44500_v19  ;;  %v522_v63 = vld [vmem:[%s44474_s20 + $0x480] sm:$0xff] }
 0x190   : > { %13174 = vmatpush1.xpose.msra.mxu0 %v510_v30  ;;  %13244 = vmatpush1.xpose.msra.mxu1 %v511_v31  ;;  %v1914_v30 = vrot.slane %v327_v8, %v44500_v19  ;;  %v518_v31 = vld [vmem:[%s44474_s20 + $0x460] sm:$0xff]  ;;  %v3601_v59 = vcombine.high %v520_v47, %v520_v47 }
 0x191   : > { %v5750_v11 = vadd.f32 %v5749_v0, %v5680_v5  ;;  %13237 = vmatprep.mubr.f32.mxu0 %v1871_v60  ;;  %13313 = vmatprep.subr.mxu0 %v3593_v57  ;;  %v3599_v42 = vcombine.high %v518_v31, %v518_v31  ;;  %v330_v57 = vld [vmem:[%s44467_s4 + $0x240] sm:$0xff]  ;;  %v331_v5 = vld [vmem:[%s44467_s4 + $0x248] sm:$0xff] }
 0x192   : > { %v5819_v16 = vpop.f32.mrb[26].mxu0  ;;  %v5889_v17 = vpop.f32.mrb[26].mxu1  ;;  %13307 = vmatprep.mubr.f32.mxu1 %v1872_v1  ;;  %13383 = vmatprep.subr.mxu1 %v3594_v61  ;;  %v3602_v61 = vcombine.high %v521_v52, %v521_v52  ;;  %v1958_v4 = vcombine.high %v330_v57, %v330_v57 }
 0x193   : > { %v5820_v22 = vadd.f32 %v5819_v16, %v5750_v11  ;;  %v5821_v23 = vpop.f32.mrb[27].mxu0  ;;  %13238 = vmatmul.mubr.f32.vlgmr.msra.gmra.mrb[132].mxu0 %v1863_v45  ;;  %v5891_v24 = vpop.f32.mrb[27].mxu1  ;;  %13308 = vmatmul.mubr.f32.vlgmr.msra.gmra.mrb[132].mxu1 %v1870_v50  ;;  %v1922_v45 = vcombine.high %v1914_v30, %v1914_v30  ;;  %v1923_v50 = vcombine.high %v1921_v35, %v1921_v35 }
 0x194   : > { %13314 = vmatpush1.xpose.msra.mxu0 %v512_v46  ;;  %13384 = vmatpush1.xpose.msra.mxu1 %v513_v51  ;;  %v3600_v46 = vcombine.high %v519_v36, %v519_v36  ;;  %v1938_v51 = vrot.slane %v1924_v37, %v44500_v19  ;;  %v44884_v11 = vrot.slane %v330_v57, %v44500_v19 }
 0x195   : > { %v5890_v28 = vadd.f32 %v5889_v17, %v5820_v22  ;;  %13377 = vmatprep.mubr.f32.mxu0 %v1888_v9  ;;  %13453 = vmatprep.subr.mxu0 %v3595_v10  ;;  %v523_v9 = vld [vmem:[%s44474_s20 + $0x488] sm:$0xff]  ;;  %v3603_v10 = vcombine.high %v522_v63, %v522_v63  ;;  %v1972_v21 = vrot.slane %v1958_v4, %v44500_v19  ;;  %v530_v4 = vld [vmem:[%s44474_s20 + $0x4c0] sm:$0xff] }
 0x196   : > { %v5959_v32 = vpop.f32.mrb[28].mxu0  ;;  %v6029_v33 = vpop.f32.mrb[28].mxu1  ;;  %13447 = vmatprep.mubr.f32.mxu1 %v1889_v18  ;;  %13523 = vmatprep.subr.mxu1 %v3596_v12  ;;  %v3604_v18 = vcombine.high %v523_v9, %v523_v9 }
 0x197   : > { %v5960_v38 = vadd.f32 %v5959_v32, %v5890_v28  ;;  %v5961_v39 = vpop.f32.mrb[29].mxu0  ;;  %13378 = vmatmul.mubr.f32.vlgmr.msra.gmra.mrb[134].mxu0 %v44850_v58  ;;  %v6031_v40 = vpop.f32.mrb[29].mxu1  ;;  %13448 = vmatmul.mubr.f32.vlgmr.msra.gmra.mrb[134].mxu1 %v1887_v2  ;;  %v1939_v58 = vcombine.high %v44870_v43, %v44870_v43  ;;  %v1940_v2 = vcombine.high %v1938_v51, %v1938_v51 }
 0x198   : > { %13454 = vmatpush1.xpose.msra.mxu0 %v514_v62  ;;  %13524 = vmatpush1.xpose.msra.mxu1 %v515_v3  ;;  %v1948_v62 = vrot.slane %v329_v41, %v44500_v19  ;;  %v1955_v3 = vrot.slane %v1941_v53, %v44500_v19  ;;  %v44894_v28 = vrot.slane %v331_v5, %v44500_v19  ;;  %v527_v41 = vld [vmem:[%s44474_s20 + $0x4a8] sm:$0xff] }
 0x199   : > { %v6030_v44 = vadd.f32 %v6029_v33, %v5960_v38  ;;  %13517 = vmatprep.mubr.f32.mxu0 %v1905_v29  ;;  %13593 = vmatprep.subr.mxu0 %v3597_v26  ;;  %v332_v26 = vld [vmem:[%s44467_s4 + $0x250] sm:$0xff] }
 0x19a   : > { %v6099_v48 = vpop.f32.mrb[30].mxu0  ;;  %v6169_v49 = vpop.f32.mrb[30].mxu1  ;;  %13587 = vmatprep.mubr.f32.mxu1 %v1906_v34  ;;  %13663 = vmatprep.subr.mxu1 %v3598_v27  ;;  %v1957_v17 = vcombine.high %v1955_v3, %v1955_v3  ;;  %v1973_v27 = vcombine.high %v44884_v11, %v44884_v11  ;;  %v1974_v34 = vcombine.high %v1972_v21, %v1972_v21 }
 0x19b   : > { %v6100_v54 = vadd.f32 %v6099_v48, %v6030_v44  ;;  %v6101_v55 = vpop.f32.mrb[31].mxu0  ;;  %13518 = vmatmul.mubr.f32.vlgmr.msra.gmra.mrb[136].mxu0 %v1897_v13  ;;  %v6171_v56 = vpop.f32.mrb[31].mxu1  ;;  %13588 = vmatmul.mubr.f32.vlgmr.msra.gmra.mrb[136].mxu1 %v1904_v20  ;;  %v1956_v13 = vcombine.high %v1948_v62, %v1948_v62  ;;  %v524_v20 = vld [vmem:[%s44474_s20 + $0x490] sm:$0xff]  ;;  %v1992_v37 = vcombine.high %v332_v26, %v332_v26 }
 0x19c   : > { %13594 = vmatpush1.xpose.msra.mxu0 %v516_v14  ;;  %13664 = vmatpush1.xpose.msra.mxu1 %v517_v15  ;;  %v1975_v14 = vcombine.high %v331_v5, %v331_v5  ;;  %v44903_v44 = vrot.slane %v332_v26, %v44500_v19  ;;  %v533_v26 = vld [vmem:[%s44474_s20 + $0x4d8] sm:$0xff] }
 0x19d   : > { %v6170_v60 = vadd.f32 %v6169_v49, %v6100_v54  ;;  %13657 = vmatprep.mubr.f32.mxu0 %v1922_v45  ;;  %13733 = vmatprep.subr.mxu0 %v3599_v42  ;;  %v333_v42 = vld [vmem:[%s44467_s4 + $0x258] sm:$0xff]  ;;  %v334_v54 = vld [vmem:[%s44467_s4 + $0x260] sm:$0xff] }
 0x19e   : > { %v6239_v0 = vpop.f32.mrb[32].mxu0  ;;  %v6309_v1 = vpop.f32.mrb[32].mxu1  ;;  %13727 = vmatprep.mubr.f32.mxu1 %v1923_v50  ;;  %13803 = vmatprep.subr.mxu1 %v3600_v46  ;;  %v3608_v50 = vcombine.high %v527_v41, %v527_v41  ;;  %v2009_v53 = vcombine.high %v333_v42, %v333_v42 }
 0x19f   : > { %v6240_v6 = vadd.f32 %v6239_v0, %v6170_v60  ;;  %v6241_v7 = vpop.f32.mrb[33].mxu0  ;;  %13658 = vmatmul.mubr.f32.vlgmr.msra.gmra.mrb[138].mxu0 %v1914_v30  ;;  %v6311_v8 = vpop.f32.mrb[33].mxu1  ;;  %13728 = vmatmul.mubr.f32.vlgmr.msra.gmra.mrb[138].mxu1 %v1921_v35  ;;  %v3605_v30 = vcombine.high %v524_v20, %v524_v20  ;;  %v3606_v35 = vcombine.high %v525_v25, %v525_v25 }
 0x1a0   : > { %13734 = vmatpush1.xpose.msra.mxu0 %v518_v31  ;;  %13804 = vmatpush1.xpose.msra.mxu1 %v519_v36  ;;  %v1989_v31 = vrot.slane %v1975_v14, %v44500_v19  ;;  %v526_v36 = vld [vmem:[%s44474_s20 + $0x4a0] sm:$0xff]  ;;  %v44913_v60 = vrot.slane %v333_v42, %v44500_v19  ;;  %v2023_v5 = vrot.slane %v2009_v53, %v44500_v19  ;;  %v536_v53 = vld [vmem:[%s44474_s20 + $0x4f0] sm:$0xff] }
 0x1a1   : > { %v6310_v12 = vadd.f32 %v6309_v1, %v6240_v6  ;;  %13797 = vmatprep.mubr.f32.mxu0 %v1939_v58  ;;  %13873 = vmatprep.subr.mxu0 %v3601_v59  ;;  %v3607_v46 = vcombine.high %v526_v36, %v526_v36  ;;  %v529_v58 = vld [vmem:[%s44474_s20 + $0x4b8] sm:$0xff]  ;;  %v2007_v59 = vcombine.high %v44903_v44, %v44903_v44 }
 0x1a2   : > { %v6379_v15 = vpop.f32.mrb[34].mxu0  ;;  %v6449_v16 = vpop.f32.mrb[34].mxu1  ;;  %13867 = vmatprep.mubr.f32.mxu1 %v1940_v2  ;;  %13943 = vmatprep.subr.mxu1 %v3602_v61  ;;  %v3611_v14 = vcombine.high %v530_v4, %v530_v4 }
 0x1a3   : > { %v6380_v22 = vadd.f32 %v6379_v15, %v6310_v12  ;;  %v6381_v23 = vpop.f32.mrb[35].mxu0  ;;  %13798 = vmatmul.mubr.f32.vlgmr.msra.gmra.mrb[140].mxu0 %v44870_v43  ;;  %v6451_v24 = vpop.f32.mrb[35].mxu1  ;;  %13868 = vmatmul.mubr.f32.vlgmr.msra.gmra.mrb[140].mxu1 %v1938_v51  ;;  %v1990_v43 = vcombine.high %v44894_v28, %v44894_v28  ;;  %v528_v51 = vld [vmem:[%s44474_s20 + $0x4b0] sm:$0xff]  ;;  %v44923_v12 = vrot.slane %v334_v54, %v44500_v19 }
 0x1a4   : > { %13874 = vmatpush1.xpose.msra.mxu0 %v520_v47  ;;  %13944 = vmatpush1.xpose.msra.mxu1 %v521_v52  ;;  %v1991_v47 = vcombine.high %v1989_v31, %v1989_v31  ;;  %v2006_v52 = vrot.slane %v1992_v37, %v44500_v19 }
 0x1a5   : > { %v6450_v29 = vadd.f32 %v6449_v16, %v6380_v22  ;;  %13937 = vmatprep.mubr.f32.mxu0 %v1956_v13  ;;  %14013 = vmatprep.subr.mxu0 %v3603_v10  ;;  %v335_v10 = vld [vmem:[%s44467_s4 + $0x268] sm:$0xff] }
 0x1a6   : > { %v6519_v32 = vpop.f32.mrb[36].mxu0  ;;  %v6589_v33 = vpop.f32.mrb[36].mxu1  ;;  %14007 = vmatprep.mubr.f32.mxu1 %v1957_v17  ;;  %14083 = vmatprep.subr.mxu1 %v3604_v18  ;;  %v2008_v2 = vcombine.high %v2006_v52, %v2006_v52  ;;  %v2025_v18 = vcombine.high %v2023_v5, %v2023_v5  ;;  %v2043_v22 = vcombine.high %v335_v10, %v335_v10 }
 0x1a7   : > { %v6520_v38 = vadd.f32 %v6519_v32, %v6450_v29  ;;  %v6521_v39 = vpop.f32.mrb[37].mxu0  ;;  %13938 = vmatmul.mubr.f32.vlgmr.msra.gmra.mrb[142].mxu0 %v1948_v62  ;;  %v6591_v40 = vpop.f32.mrb[37].mxu1  ;;  %14008 = vmatmul.mubr.f32.vlgmr.msra.gmra.mrb[142].mxu1 %v1955_v3  ;;  %v3609_v62 = vcombine.high %v528_v51, %v528_v51  ;;  %v3610_v3 = vcombine.high %v529_v58, %v529_v58 }
 0x1a8   : > { %14014 = vmatpush1.xpose.msra.mxu0 %v522_v63  ;;  %14084 = vmatpush1.xpose.msra.mxu1 %v523_v9  ;;  %v2026_v63 = vcombine.high %v334_v54, %v334_v54  ;;  %v531_v9 = vld [vmem:[%s44474_s20 + $0x4c8] sm:$0xff]  ;;  %v44933_v29 = vrot.slane %v335_v10, %v44500_v19  ;;  %v2057_v37 = vrot.slane %v2043_v22, %v44500_v19  ;;  %v337_v39 = vld [vmem:[%s44467_s4 + $0x278] sm:$0xff] }
 0x1a9   : > { %v6590_v45 = vadd.f32 %v6589_v33, %v6520_v38  ;;  %14077 = vmatprep.mubr.f32.mxu0 %v1973_v27  ;;  %14153 = vmatprep.subr.mxu0 %v3605_v30  ;;  %v336_v27 = vld [vmem:[%s44467_s4 + $0x270] sm:$0xff] }
 0x1aa   : > { %v6659_v48 = vpop.f32.mrb[38].mxu0  ;;  %v6729_v49 = vpop.f32.mrb[38].mxu1  ;;  %14147 = vmatprep.mubr.f32.mxu1 %v1974_v34  ;;  %14223 = vmatprep.subr.mxu1 %v3606_v35  ;;  %v2040_v15 = vrot.slane %v2026_v63, %v44500_v19  ;;  %v3614_v35 = vcombine.high %v533_v26, %v533_v26  ;;  %v2060_v38 = vcombine.high %v336_v27, %v336_v27  ;;  %v539_v10 = vld [vmem:[%s44474_s20 + $0x508] sm:$0xff] }
 0x1ab   : > { %v6660_v55 = vadd.f32 %v6659_v48, %v6590_v45  ;;  %v6661_v56 = vpop.f32.mrb[39].mxu0  ;;  %14078 = vmatmul.mubr.f32.vlgmr.msra.gmra.mrb[144].mxu0 %v44884_v11  ;;  %v6731_v57 = vpop.f32.mrb[39].mxu1  ;;  %14148 = vmatmul.mubr.f32.vlgmr.msra.gmra.mrb[144].mxu1 %v1972_v21  ;;  %v2024_v11 = vcombine.high %v44913_v60, %v44913_v60  ;;  %v532_v21 = vld [vmem:[%s44474_s20 + $0x4d0] sm:$0xff]  ;;  %v44943_v45 = vrot.slane %v336_v27, %v44500_v19 }
 0x1ac   : > { %14154 = vmatpush1.xpose.msra.mxu0 %v524_v20  ;;  %14224 = vmatpush1.xpose.msra.mxu1 %v525_v25  ;;  %v3612_v20 = vcombine.high %v531_v9, %v531_v9  ;;  %v2042_v32 = vcombine.high %v2040_v15, %v2040_v15  ;;  %v2077_v48 = vcombine.high %v337_v39, %v337_v39 }
 0x1ad   : > { %v6730_v61 = vadd.f32 %v6729_v49, %v6660_v55  ;;  %14217 = vmatprep.mubr.f32.mxu0 %v1990_v43  ;;  %14293 = vmatprep.subr.mxu0 %v3607_v46  ;;  %v535_v43 = vld [vmem:[%s44474_s20 + $0x4e8] sm:$0xff]  ;;  %v2074_v54 = vrot.slane %v2060_v38, %v44500_v19  ;;  %v3617_v63 = vcombine.high %v536_v53, %v536_v53  ;;  %v542_v38 = vld [vmem:[%s44474_s20 + $0x520] sm:$0xff] }
 0x1ae   : > { %v6799_v0 = vpop.f32.mrb[40].mxu0  ;;  %v6869_v1 = vpop.f32.mrb[40].mxu1  ;;  %14287 = vmatprep.mubr.f32.mxu1 %v1991_v47  ;;  %14363 = vmatprep.subr.mxu1 %v3608_v50 }
 0x1af   : > { %v6800_v6 = vadd.f32 %v6799_v0, %v6730_v61  ;;  %v6801_v7 = vpop.f32.mrb[41].mxu0  ;;  %14218 = vmatmul.mubr.f32.vlgmr.msra.gmra.mrb[146].mxu0 %v44894_v28  ;;  %v6871_v8 = vpop.f32.mrb[41].mxu1  ;;  %14288 = vmatmul.mubr.f32.vlgmr.msra.gmra.mrb[146].mxu1 %v1989_v31  ;;  %v2041_v28 = vcombine.high %v44923_v12, %v44923_v12  ;;  %v3613_v31 = vcombine.high %v532_v21, %v532_v21 }
 0x1b0   : > { %14294 = vmatpush1.xpose.msra.mxu0 %v526_v36  ;;  %14364 = vmatpush1.xpose.msra.mxu1 %v527_v41  ;;  %v534_v36 = vld [vmem:[%s44474_s20 + $0x4e0] sm:$0xff]  ;;  %v44953_v61 = vrot.slane %v337_v39, %v44500_v19  ;;  %v2091_v0 = vrot.slane %v2077_v48, %v44500_v19  ;;  %v3623_v48 = vcombine.high %v542_v38, %v542_v38 }
 0x1b1   : > { %v6870_v13 = vadd.f32 %v6869_v1, %v6800_v6  ;;  %14357 = vmatprep.mubr.f32.mxu0 %v2007_v59  ;;  %14433 = vmatprep.subr.mxu0 %v3609_v62  ;;  %v3615_v47 = vcombine.high %v534_v36, %v534_v36  ;;  %v338_v59 = vld [vmem:[%s44467_s4 + $0x280] sm:$0xff] }
 0x1b2   : > { %v6939_v16 = vpop.f32.mrb[42].mxu0  ;;  %v7009_v17 = vpop.f32.mrb[42].mxu1  ;;  %14427 = vmatprep.mubr.f32.mxu1 %v2008_v2  ;;  %14503 = vmatprep.subr.mxu1 %v3610_v3  ;;  %v2076_v3 = vcombine.high %v2074_v54, %v2074_v54  ;;  %v2094_v6 = vcombine.high %v338_v59, %v338_v59 }
 0x1b3   : > { %v6940_v23 = vadd.f32 %v6939_v16, %v6870_v13  ;;  %v6941_v24 = vpop.f32.mrb[43].mxu0  ;;  %14358 = vmatmul.mubr.f32.vlgmr.msra.gmra.mrb[148].mxu0 %v44903_v44  ;;  %v7011_v25 = vpop.f32.mrb[43].mxu1  ;;  %14428 = vmatmul.mubr.f32.vlgmr.msra.gmra.mrb[148].mxu1 %v2006_v52  ;;  %v2058_v44 = vcombine.high %v44933_v29, %v44933_v29  ;;  %v3616_v52 = vcombine.high %v535_v43, %v535_v43 }
 0x1b4   : > { %14434 = vmatpush1.xpose.msra.mxu0 %v528_v51  ;;  %14504 = vmatpush1.xpose.msra.mxu1 %v529_v58  ;;  %v2059_v51 = vcombine.high %v2057_v37, %v2057_v37  ;;  %v537_v58 = vld [vmem:[%s44474_s20 + $0x4f8] sm:$0xff]  ;;  %v44963_v13 = vrot.slane %v338_v59, %v44500_v19  ;;  %v2093_v16 = vcombine.high %v2091_v0, %v2091_v0 }
 0x1b5   : > { %v7010_v30 = vadd.f32 %v7009_v17, %v6940_v23  ;;  %14497 = vmatprep.mubr.f32.mxu0 %v2024_v11  ;;  %14573 = vmatprep.subr.mxu0 %v3611_v14  ;;  %v339_v11 = vld [vmem:[%s44467_s4 + $0x288] sm:$0xff]  ;;  %v2108_v22 = vrot.slane %v2094_v6, %v44500_v19  ;;  %v340_v24 = vld [vmem:[%s44467_s4 + $0x290] sm:$0xff] }
 0x1b6   : > { %v7079_v33 = vpop.f32.mrb[44].mxu0  ;;  %v7149_v34 = vpop.f32.mrb[44].mxu1  ;;  %14567 = vmatprep.mubr.f32.mxu1 %v2025_v18  ;;  %14643 = vmatprep.subr.mxu1 %v3612_v20  ;;  %v3620_v20 = vcombine.high %v539_v10, %v539_v10  ;;  %v2111_v23 = vcombine.high %v339_v11, %v339_v11  ;;  %v545_v59 = vld [vmem:[%s44474_s20 + $0x538] sm:$0xff] }
 0x1b7   : > { %v7080_v40 = vadd.f32 %v7079_v33, %v7010_v30  ;;  %v7081_v41 = vpop.f32.mrb[45].mxu0  ;;  %14498 = vmatmul.mubr.f32.vlgmr.msra.gmra.mrb[150].mxu0 %v44913_v60  ;;  %v7151_v42 = vpop.f32.mrb[45].mxu1  ;;  %14568 = vmatmul.mubr.f32.vlgmr.msra.gmra.mrb[150].mxu1 %v2023_v5  ;;  %v2075_v60 = vcombine.high %v44943_v45, %v44943_v45  ;;  %v538_v5 = vld [vmem:[%s44474_s20 + $0x500] sm:$0xff]  ;;  %v44973_v30 = vrot.slane %v339_v11, %v44500_v19 }
 0x1b8   : > { %14574 = vmatpush1.xpose.msra.mxu0 %v530_v4  ;;  %14644 = vmatpush1.xpose.msra.mxu1 %v531_v9  ;;  %v3618_v4 = vcombine.high %v537_v58, %v537_v58  ;;  %v2128_v33 = vcombine.high %v340_v24, %v340_v24  ;;  %v2125_v39 = vrot.slane %v2111_v23, %v44500_v19  ;;  %v548_v23 = vld [vmem:[%s44474_s20 + $0x550] sm:$0xff] }
 0x1b9   : > { %v7150_v46 = vadd.f32 %v7149_v34, %v7080_v40  ;;  %14637 = vmatprep.mubr.f32.mxu0 %v2041_v28  ;;  %14713 = vmatprep.subr.mxu0 %v3613_v31  ;;  %v541_v28 = vld [vmem:[%s44474_s20 + $0x518] sm:$0xff] }
 0x1ba   : > { %v7219_v49 = vpop.f32.mrb[46].mxu0  ;;  %v7289_v50 = vpop.f32.mrb[46].mxu1  ;;  %14707 = vmatprep.mubr.f32.mxu1 %v2042_v32  ;;  %14783 = vmatprep.subr.mxu1 %v3614_v35 }
 0x1bb   : > { %v7220_v55 = vadd.f32 %v7219_v49, %v7150_v46  ;;  %v7221_v56 = vpop.f32.mrb[47].mxu0  ;;  %14638 = vmatmul.mubr.f32.vlgmr.msra.gmra.mrb[152].mxu0 %v44923_v12  ;;  %v7291_v57 = vpop.f32.mrb[47].mxu1  ;;  %14708 = vmatmul.mubr.f32.vlgmr.msra.gmra.mrb[152].mxu1 %v2040_v15  ;;  %v2092_v12 = vcombine.high %v44953_v61, %v44953_v61  ;;  %v3619_v15 = vcombine.high %v538_v5, %v538_v5 }
 0x1bc   : > { %14714 = vmatpush1.xpose.msra.mxu0 %v532_v21  ;;  %14784 = vmatpush1.xpose.msra.mxu1 %v533_v26  ;;  %v540_v21 = vld [vmem:[%s44474_s20 + $0x510] sm:$0xff]  ;;  %v44983_v46 = vrot.slane %v340_v24, %v44500_v19  ;;  %v2142_v49 = vrot.slane %v2128_v33, %v44500_v19  ;;  %v3629_v33 = vcombine.high %v548_v23, %v548_v23 }
 0x1bd   : > { %v7290_v62 = vadd.f32 %v7289_v50, %v7220_v55  ;;  %14777 = vmatprep.mubr.f32.mxu0 %v2058_v44  ;;  %14853 = vmatprep.subr.mxu0 %v3615_v47  ;;  %v3621_v32 = vcombine.high %v540_v21, %v540_v21  ;;  %v341_v44 = vld [vmem:[%s44467_s4 + $0x298] sm:$0xff] }
 0x1be   : > { %v7359_v1 = vpop.f32.mrb[48].mxu0  ;;  %v7429_v2 = vpop.f32.mrb[48].mxu1  ;;  %14847 = vmatprep.mubr.f32.mxu1 %v2059_v51  ;;  %14923 = vmatprep.subr.mxu1 %v3616_v52  ;;  %v2127_v52 = vcombine.high %v2125_v39, %v2125_v39  ;;  %v2145_v55 = vcombine.high %v341_v44, %v341_v44 }
 0x1bf   : > { %v7360_v7 = vadd.f32 %v7359_v1, %v7290_v62  ;;  %v7361_v8 = vpop.f32.mrb[49].mxu0  ;;  %14778 = vmatmul.mubr.f32.vlgmr.msra.gmra.mrb[154].mxu0 %v44933_v29  ;;  %v7431_v9 = vpop.f32.mrb[49].mxu1  ;;  %14848 = vmatmul.mubr.f32.vlgmr.msra.gmra.mrb[154].mxu1 %v2057_v37  ;;  %v2109_v29 = vcombine.high %v44963_v13, %v44963_v13  ;;  %v3622_v37 = vcombine.high %v541_v28, %v541_v28 }
 0x1c0   : > { %14854 = vmatpush1.xpose.msra.mxu0 %v534_v36  ;;  %14924 = vmatpush1.xpose.msra.mxu1 %v535_v43  ;;  %v2110_v36 = vcombine.high %v2108_v22, %v2108_v22  ;;  %v543_v43 = vld [vmem:[%s44474_s20 + $0x528] sm:$0xff]  ;;  %v44993_v62 = vrot.slane %v341_v44, %v44500_v19  ;;  %v2144_v1 = vcombine.high %v2142_v49, %v2142_v49 }
 0x1c1   : > { %v7430_v14 = vadd.f32 %v7429_v2, %v7360_v7  ;;  %14917 = vmatprep.mubr.f32.mxu0 %v2075_v60  ;;  %14993 = vmatprep.subr.mxu0 %v3617_v63  ;;  %v342_v60 = vld [vmem:[%s44467_s4 + $0x2a0] sm:$0xff]  ;;  %v2159_v6 = vrot.slane %v2145_v55, %v44500_v19  ;;  %v343_v8 = vld [vmem:[%s44467_s4 + $0x2a8] sm:$0xff] }
 0x1c2   : > { %v7499_v17 = vpop.f32.mrb[50].mxu0  ;;  %v7569_v18 = vpop.f32.mrb[50].mxu1  ;;  %14987 = vmatprep.mubr.f32.mxu1 %v2076_v3  ;;  %15063 = vmatprep.subr.mxu1 %v3618_v4  ;;  %v3626_v4 = vcombine.high %v545_v59, %v545_v59  ;;  %v2162_v7 = vcombine.high %v342_v60, %v342_v60  ;;  %v551_v44 = vld [vmem:[%s44474_s20 + $0x568] sm:$0xff] }
 0x1c3   : > { %v7500_v25 = vadd.f32 %v7499_v17, %v7430_v14  ;;  %v7501_v26 = vpop.f32.mrb[51].mxu0  ;;  %14918 = vmatmul.mubr.f32.vlgmr.msra.gmra.mrb[156].mxu0 %v44943_v45  ;;  %v7571_v27 = vpop.f32.mrb[51].mxu1  ;;  %14988 = vmatmul.mubr.f32.vlgmr.msra.gmra.mrb[156].mxu1 %v2074_v54  ;;  %v2126_v45 = vcombine.high %v44973_v30, %v44973_v30  ;;  %v544_v54 = vld [vmem:[%s44474_s20 + $0x530] sm:$0xff]  ;;  %v45003_v14 = vrot.slane %v342_v60, %v44500_v19 }
 0x1c4   : > { %14994 = vmatpush1.xpose.msra.mxu0 %v536_v53  ;;  %15064 = vmatpush1.xpose.msra.mxu1 %v537_v58  ;;  %v3624_v53 = vcombine.high %v543_v43, %v543_v43  ;;  %v2179_v17 = vcombine.high %v343_v8, %v343_v8  ;;  %v2176_v24 = vrot.slane %v2162_v7, %v44500_v19  ;;  %v554_v7 = vld [vmem:[%s44474_s20 + $0x580] sm:$0xff] }
 0x1c5   : > { %v7570_v31 = vadd.f32 %v7569_v18, %v7500_v25  ;;  %15057 = vmatprep.mubr.f32.mxu0 %v2092_v12  ;;  %15133 = vmatprep.subr.mxu0 %v3619_v15  ;;  %v547_v12 = vld [vmem:[%s44474_s20 + $0x548] sm:$0xff] }
 0x1c6   : > { %v7639_v34 = vpop.f32.mrb[52].mxu0  ;;  %v7709_v35 = vpop.f32.mrb[52].mxu1  ;;  %15127 = vmatprep.mubr.f32.mxu1 %v2093_v16  ;;  %15203 = vmatprep.subr.mxu1 %v3620_v20 }
 0x1c7   : > { %v7640_v40 = vadd.f32 %v7639_v34, %v7570_v31  ;;  %v7641_v41 = vpop.f32.mrb[53].mxu0  ;;  %15058 = vmatmul.mubr.f32.vlgmr.msra.gmra.mrb[158].mxu0 %v44953_v61  ;;  %v7711_v42 = vpop.f32.mrb[53].mxu1  ;;  %15128 = vmatmul.mubr.f32.vlgmr.msra.gmra.mrb[158].mxu1 %v2091_v0  ;;  %v2143_v61 = vcombine.high %v44983_v46, %v44983_v46  ;;  %v3625_v0 = vcombine.high %v544_v54, %v544_v54 }
 0x1c8   : > { %15134 = vmatpush1.xpose.msra.mxu0 %v538_v5  ;;  %15204 = vmatpush1.xpose.msra.mxu1 %v539_v10  ;;  %v546_v5 = vld [vmem:[%s44474_s20 + $0x540] sm:$0xff]  ;;  %v45013_v31 = vrot.slane %v343_v8, %v44500_v19  ;;  %v2193_v34 = vrot.slane %v2179_v17, %v44500_v19  ;;  %v3635_v17 = vcombine.high %v554_v7, %v554_v7 }
 0x1c9   : > { %v7710_v47 = vadd.f32 %v7709_v35, %v7640_v40  ;;  %15197 = vmatprep.mubr.f32.mxu0 %v2109_v29  ;;  %15273 = vmatprep.subr.mxu0 %v3621_v32  ;;  %v3627_v16 = vcombine.high %v546_v5, %v546_v5  ;;  %v344_v29 = vld [vmem:[%s44467_s4 + $0x2b0] sm:$0xff] }
 0x1ca   : > { %v7779_v50 = vpop.f32.mrb[54].mxu0  ;;  %v7849_v51 = vpop.f32.mrb[54].mxu1  ;;  %15267 = vmatprep.mubr.f32.mxu1 %v2110_v36  ;;  %15343 = vmatprep.subr.mxu1 %v3622_v37  ;;  %v2178_v37 = vcombine.high %v2176_v24, %v2176_v24  ;;  %v2196_v40 = vcombine.high %v344_v29, %v344_v29 }
 0x1cb   : > { %v7780_v56 = vadd.f32 %v7779_v50, %v7710_v47  ;;  %v7781_v57 = vpop.f32.mrb[55].mxu0  ;;  %15198 = vmatmul.mubr.f32.vlgmr.msra.gmra.mrb[160].mxu0 %v44963_v13  ;;  %v7851_v58 = vpop.f32.mrb[55].mxu1  ;;  %15268 = vmatmul.mubr.f32.vlgmr.msra.gmra.mrb[160].mxu1 %v2108_v22  ;;  %v2160_v13 = vcombine.high %v44993_v62, %v44993_v62  ;;  %v3628_v22 = vcombine.high %v547_v12, %v547_v12 }
 0x1cc   : > { %15274 = vmatpush1.xpose.msra.mxu0 %v540_v21  ;;  %15344 = vmatpush1.xpose.msra.mxu1 %v541_v28  ;;  %v2161_v21 = vcombine.high %v2159_v6, %v2159_v6  ;;  %v549_v28 = vld [vmem:[%s44474_s20 + $0x558] sm:$0xff]  ;;  %v45023_v47 = vrot.slane %v344_v29, %v44500_v19  ;;  %v2195_v50 = vcombine.high %v2193_v34, %v2193_v34 }
 0x1cd   : > { %v7850_v63 = vadd.f32 %v7849_v51, %v7780_v56  ;;  %15337 = vmatprep.mubr.f32.mxu0 %v2126_v45  ;;  %15413 = vmatprep.subr.mxu0 %v3623_v48  ;;  %v345_v45 = vld [vmem:[%s44467_s4 + $0x2b8] sm:$0xff]  ;;  %v2210_v55 = vrot.slane %v2196_v40, %v44500_v19  ;;  %v346_v57 = vld [vmem:[%s44467_s4 + $0x2c0] sm:$0xff] }
 0x1ce   : > { %v7919_v2 = vpop.f32.mrb[56].mxu0  ;;  %v7989_v3 = vpop.f32.mrb[56].mxu1  ;;  %15407 = vmatprep.mubr.f32.mxu1 %v2127_v52  ;;  %15483 = vmatprep.subr.mxu1 %v3624_v53  ;;  %v3632_v53 = vcombine.high %v551_v44, %v551_v44  ;;  %v2213_v56 = vcombine.high %v345_v45, %v345_v45  ;;  %v557_v29 = vld [vmem:[%s44474_s20 + $0x598] sm:$0xff] }
 0x1cf   : > { %v7920_v9 = vadd.f32 %v7919_v2, %v7850_v63  ;;  %v7921_v10 = vpop.f32.mrb[57].mxu0  ;;  %15338 = vmatmul.mubr.f32.vlgmr.msra.gmra.mrb[162].mxu0 %v44973_v30  ;;  %v7991_v11 = vpop.f32.mrb[57].mxu1  ;;  %15408 = vmatmul.mubr.f32.vlgmr.msra.gmra.mrb[162].mxu1 %v2125_v39  ;;  %v2177_v30 = vcombine.high %v45003_v14, %v45003_v14  ;;  %v550_v39 = vld [vmem:[%s44474_s20 + $0x560] sm:$0xff]  ;;  %v45033_v63 = vrot.slane %v345_v45, %v44500_v19 }
 0x1d0   : > { %15414 = vmatpush1.xpose.msra.mxu0 %v542_v38  ;;  %15484 = vmatpush1.xpose.msra.mxu1 %v543_v43  ;;  %v3630_v38 = vcombine.high %v549_v28, %v549_v28  ;;  %v2230_v2 = vcombine.high %v346_v57, %v346_v57  ;;  %v2227_v8 = vrot.slane %v2213_v56, %v44500_v19  ;;  %v560_v56 = vld [vmem:[%s44474_s20 + $0x5b0] sm:$0xff] }
 0x1d1   : > { %v7990_v15 = vadd.f32 %v7989_v3, %v7920_v9  ;;  %15477 = vmatprep.mubr.f32.mxu0 %v2143_v61  ;;  %15553 = vmatprep.subr.mxu0 %v3625_v0  ;;  %v553_v61 = vld [vmem:[%s44474_s20 + $0x578] sm:$0xff] }
 0x1d2   : > { %v8059_v18 = vpop.f32.mrb[58].mxu0  ;;  %v8129_v20 = vpop.f32.mrb[58].mxu1  ;;  %15547 = vmatprep.mubr.f32.mxu1 %v2144_v1  ;;  %15623 = vmatprep.subr.mxu1 %v3626_v4 }
 0x1d3   : > { %v8060_v25 = vadd.f32 %v8059_v18, %v7990_v15  ;;  %v8061_v26 = vpop.f32.mrb[59].mxu0  ;;  %15478 = vmatmul.mubr.f32.vlgmr.msra.gmra.mrb[164].mxu0 %v44983_v46  ;;  %v8131_v27 = vpop.f32.mrb[59].mxu1  ;;  %15548 = vmatmul.mubr.f32.vlgmr.msra.gmra.mrb[164].mxu1 %v2142_v49  ;;  %v2194_v46 = vcombine.high %v45013_v31, %v45013_v31  ;;  %v3631_v49 = vcombine.high %v550_v39, %v550_v39 }
 0x1d4   : > { %15554 = vmatpush1.xpose.msra.mxu0 %v544_v54  ;;  %15624 = vmatpush1.xpose.msra.mxu1 %v545_v59  ;;  %v552_v54 = vld [vmem:[%s44474_s20 + $0x570] sm:$0xff]  ;;  %v45043_v15 = vrot.slane %v346_v57, %v44500_v19  ;;  %v2244_v18 = vrot.slane %v2230_v2, %v44500_v19  ;;  %v3641_v2 = vcombine.high %v560_v56, %v560_v56 }
 0x1d5   : > { %v8130_v32 = vadd.f32 %v8129_v20, %v8060_v25  ;;  %15617 = vmatprep.mubr.f32.mxu0 %v2160_v13  ;;  %15693 = vmatprep.subr.mxu0 %v3627_v16  ;;  %v3633_v1 = vcombine.high %v552_v54, %v552_v54  ;;  %v347_v13 = vld [vmem:[%s44467_s4 + $0x2c8] sm:$0xff] }
 0x1d6   : > { %v8199_v35 = vpop.f32.mrb[60].mxu0  ;;  %v8269_v36 = vpop.f32.mrb[60].mxu1  ;;  %15687 = vmatprep.mubr.f32.mxu1 %v2161_v21  ;;  %15763 = vmatprep.subr.mxu1 %v3628_v22  ;;  %v2229_v22 = vcombine.high %v2227_v8, %v2227_v8  ;;  %v2247_v25 = vcombine.high %v347_v13, %v347_v13 }
 0x1d7   : > { %v8200_v41 = vadd.f32 %v8199_v35, %v8130_v32  ;;  %v8201_v42 = vpop.f32.mrb[61].mxu0  ;;  %15618 = vmatmul.mubr.f32.vlgmr.msra.gmra.mrb[166].mxu0 %v44993_v62  ;;  %v8271_v43 = vpop.f32.mrb[61].mxu1  ;;  %15688 = vmatmul.mubr.f32.vlgmr.msra.gmra.mrb[166].mxu1 %v2159_v6  ;;  %v2211_v62 = vcombine.high %v45023_v47, %v45023_v47  ;;  %v3634_v6 = vcombine.high %v553_v61, %v553_v61 }
 0x1d8   : > { %15694 = vmatpush1.xpose.msra.mxu0 %v546_v5  ;;  %15764 = vmatpush1.xpose.msra.mxu1 %v547_v12  ;;  %v2212_v5 = vcombine.high %v2210_v55, %v2210_v55  ;;  %v555_v12 = vld [vmem:[%s44474_s20 + $0x588] sm:$0xff]  ;;  %v45053_v32 = vrot.slane %v347_v13, %v44500_v19  ;;  %v2246_v35 = vcombine.high %v2244_v18, %v2244_v18  ;;  %v349_v42 = vld [vmem:[%s44467_s4 + $0x2d8] sm:$0xff] }
 0x1d9   : > { %v8270_v48 = vadd.f32 %v8269_v36, %v8200_v41  ;;  %15757 = vmatprep.mubr.f32.mxu0 %v2177_v30  ;;  %15833 = vmatprep.subr.mxu0 %v3629_v33  ;;  %v348_v30 = vld [vmem:[%s44467_s4 + $0x2d0] sm:$0xff]  ;;  %v2261_v40 = vrot.slane %v2247_v25, %v44500_v19 }
 0x1da   : > { %v8339_v51 = vpop.f32.mrb[62].mxu0  ;;  %v8409_v52 = vpop.f32.mrb[62].mxu1  ;;  %15827 = vmatprep.mubr.f32.mxu1 %v2178_v37  ;;  %15903 = vmatprep.subr.mxu1 %v3630_v38  ;;  %v3638_v38 = vcombine.high %v557_v29, %v557_v29  ;;  %v2264_v41 = vcombine.high %v348_v30, %v348_v30  ;;  %v563_v13 = vld [vmem:[%s44474_s20 + $0x5c8] sm:$0xff] }
 0x1db   : > { %v8340_v58 = vadd.f32 %v8339_v51, %v8270_v48  ;;  %v8341_v59 = vpop.f32.mrb[63].mxu0  ;;  %15758 = vmatmul.mubr.f32.vlgmr.msra.gmra.mrb[168].mxu0 %v45003_v14  ;;  %v8411_v60 = vpop.f32.mrb[63].mxu1  ;;  %15828 = vmatmul.mubr.f32.vlgmr.msra.gmra.mrb[168].mxu1 %v2176_v24  ;;  %v2228_v14 = vcombine.high %v45033_v63, %v45033_v63  ;;  %v556_v24 = vld [vmem:[%s44474_s20 + $0x590] sm:$0xff]  ;;  %v45063_v48 = vrot.slane %v348_v30, %v44500_v19 }
 0x1dc   : > { %15834 = vmatpush1.xpose.msra.mxu0 %v548_v23  ;;  %15904 = vmatpush1.xpose.msra.mxu1 %v549_v28  ;;  %v3636_v23 = vcombine.high %v555_v12, %v555_v12  ;;  %v2281_v51 = vcombine.high %v349_v42, %v349_v42  ;;  %v2278_v57 = vrot.slane %v2264_v41, %v44500_v19  ;;  %v566_v41 = vld [vmem:[%s44474_s20 + $0x5e0] sm:$0xff] }
 0x1dd   : > { %v8410_v0 = vadd.f32 %v8409_v52, %v8340_v58  ;;  %15897 = vmatprep.mubr.f32.mxu0 %v2194_v46  ;;  %15973 = vmatprep.subr.mxu0 %v3631_v49  ;;  %v559_v46 = vld [vmem:[%s44474_s20 + $0x5a8] sm:$0xff] }
 0x1de   : > { %v8479_v3 = vpop.f32.mrb[64].mxu0  ;;  %v8549_v4 = vpop.f32.mrb[64].mxu1  ;;  %15967 = vmatprep.mubr.f32.mxu1 %v2195_v50  ;;  %16043 = vmatprep.subr.mxu1 %v3632_v53 }
 0x1df   : > { %v8480_v9 = vadd.f32 %v8479_v3, %v8410_v0  ;;  %v8481_v10 = vpop.f32.mrb[65].mxu0  ;;  %15898 = vmatmul.mubr.f32.vlgmr.msra.gmra.mrb[170].mxu0 %v45013_v31  ;;  %v8551_v11 = vpop.f32.mrb[65].mxu1  ;;  %15968 = vmatmul.mubr.f32.vlgmr.msra.gmra.mrb[170].mxu1 %v2193_v34  ;;  %v2245_v31 = vcombine.high %v45043_v15, %v45043_v15  ;;  %v3637_v34 = vcombine.high %v556_v24, %v556_v24 }
 0x1e0   : > { %15974 = vmatpush1.xpose.msra.mxu0 %v550_v39  ;;  %16044 = vmatpush1.xpose.msra.mxu1 %v551_v44  ;;  %v558_v39 = vld [vmem:[%s44474_s20 + $0x5a0] sm:$0xff]  ;;  %v45073_v0 = vrot.slane %v349_v42, %v44500_v19  ;;  %v2295_v3 = vrot.slane %v2281_v51, %v44500_v19  ;;  %v3647_v51 = vcombine.high %v566_v41, %v566_v41 }
 0x1e1   : > { %v8550_v16 = vadd.f32 %v8549_v4, %v8480_v9  ;;  %16037 = vmatprep.mubr.f32.mxu0 %v2211_v62  ;;  %16113 = vmatprep.subr.mxu0 %v3633_v1  ;;  %v3639_v50 = vcombine.high %v558_v39, %v558_v39  ;;  %v350_v62 = vld [vmem:[%s44467_s4 + $0x2e0] sm:$0xff] }
 0x1e2   : > { %v8619_v20 = vpop.f32.mrb[66].mxu0  ;;  %v8689_v21 = vpop.f32.mrb[66].mxu1  ;;  %16107 = vmatprep.mubr.f32.mxu1 %v2212_v5  ;;  %16183 = vmatprep.subr.mxu1 %v3634_v6  ;;  %v2280_v6 = vcombine.high %v2278_v57, %v2278_v57  ;;  %v2298_v9 = vcombine.high %v350_v62, %v350_v62 }
 0x1e3   : > { %v8620_v26 = vadd.f32 %v8619_v20, %v8550_v16  ;;  %v8621_v27 = vpop.f32.mrb[67].mxu0  ;;  %16038 = vmatmul.mubr.f32.vlgmr.msra.gmra.mrb[172].mxu0 %v45023_v47  ;;  %v8691_v28 = vpop.f32.mrb[67].mxu1  ;;  %16108 = vmatmul.mubr.f32.vlgmr.msra.gmra.mrb[172].mxu1 %v2210_v55  ;;  %v2262_v47 = vcombine.high %v45053_v32, %v45053_v32  ;;  %v3640_v55 = vcombine.high %v559_v46, %v559_v46 }
 0x1e4   : > { %16114 = vmatpush1.xpose.msra.mxu0 %v552_v54  ;;  %16184 = vmatpush1.xpose.msra.mxu1 %v553_v61  ;;  %v2263_v54 = vcombine.high %v2261_v40, %v2261_v40  ;;  %v561_v61 = vld [vmem:[%s44474_s20 + $0x5b8] sm:$0xff]  ;;  %v45083_v16 = vrot.slane %v350_v62, %v44500_v19  ;;  %v2297_v20 = vcombine.high %v2295_v3, %v2295_v3 }
 0x1e5   : > { %v8690_v33 = vadd.f32 %v8689_v21, %v8620_v26  ;;  %16177 = vmatprep.mubr.f32.mxu0 %v2228_v14  ;;  %16253 = vmatprep.subr.mxu0 %v3635_v17  ;;  %v351_v14 = vld [vmem:[%s44467_s4 + $0x2e8] sm:$0xff]  ;;  %v2312_v25 = vrot.slane %v2298_v9, %v44500_v19  ;;  %v352_v27 = vld [vmem:[%s44467_s4 + $0x2f0] sm:$0xff] }
 0x1e6   : > { %v8759_v36 = vpop.f32.mrb[68].mxu0  ;;  %v8829_v37 = vpop.f32.mrb[68].mxu1  ;;  %16247 = vmatprep.mubr.f32.mxu1 %v2229_v22  ;;  %16323 = vmatprep.subr.mxu1 %v3636_v23  ;;  %v3644_v23 = vcombine.high %v563_v13, %v563_v13  ;;  %v2315_v26 = vcombine.high %v351_v14, %v351_v14  ;;  %v569_v62 = vld [vmem:[%s44474_s20 + $0x5f8] sm:$0xff] }
 0x1e7   : > { %v8760_v43 = vadd.f32 %v8759_v36, %v8690_v33  ;;  %v8761_v44 = vpop.f32.mrb[69].mxu0  ;;  %16178 = vmatmul.mubr.f32.vlgmr.msra.gmra.mrb[174].mxu0 %v45033_v63  ;;  %v8831_v45 = vpop.f32.mrb[69].mxu1  ;;  %16248 = vmatmul.mubr.f32.vlgmr.msra.gmra.mrb[174].mxu1 %v2227_v8  ;;  %v2279_v63 = vcombine.high %v45063_v48, %v45063_v48  ;;  %v562_v8 = vld [vmem:[%s44474_s20 + $0x5c0] sm:$0xff]  ;;  %v45093_v33 = vrot.slane %v351_v14, %v44500_v19 }
 0x1e8   : > { %16254 = vmatpush1.xpose.msra.mxu0 %v554_v7  ;;  %16324 = vmatpush1.xpose.msra.mxu1 %v555_v12  ;;  %v3642_v7 = vcombine.high %v561_v61, %v561_v61  ;;  %v2332_v36 = vcombine.high %v352_v27, %v352_v27  ;;  %v2329_v42 = vrot.slane %v2315_v26, %v44500_v19  ;;  %v572_v26 = vld [vmem:[%s44474_s20 + $0x610] sm:$0xff] }
 0x1e9   : > { %v8830_v49 = vadd.f32 %v8829_v37, %v8760_v43  ;;  %16317 = vmatprep.mubr.f32.mxu0 %v2245_v31  ;;  %16393 = vmatprep.subr.mxu0 %v3637_v34  ;;  %v565_v31 = vld [vmem:[%s44474_s20 + $0x5d8] sm:$0xff] }
 0x1ea   : > { %v8899_v52 = vpop.f32.mrb[70].mxu0  ;;  %v8969_v53 = vpop.f32.mrb[70].mxu1  ;;  %16387 = vmatprep.mubr.f32.mxu1 %v2246_v35  ;;  %16463 = vmatprep.subr.mxu1 %v3638_v38 }
 0x1eb   : > { %v8900_v58 = vadd.f32 %v8899_v52, %v8830_v49  ;;  %v8901_v59 = vpop.f32.mrb[71].mxu0  ;;  %16318 = vmatmul.mubr.f32.vlgmr.msra.gmra.mrb[176].mxu0 %v45043_v15  ;;  %v8971_v60 = vpop.f32.mrb[71].mxu1  ;;  %16388 = vmatmul.mubr.f32.vlgmr.msra.gmra.mrb[176].mxu1 %v2244_v18  ;;  %v2296_v15 = vcombine.high %v45073_v0, %v45073_v0  ;;  %v3643_v18 = vcombine.high %v562_v8, %v562_v8 }
 0x1ec   : > { %16394 = vmatpush1.xpose.msra.mxu0 %v556_v24  ;;  %16464 = vmatpush1.xpose.msra.mxu1 %v557_v29  ;;  %v564_v24 = vld [vmem:[%s44474_s20 + $0x5d0] sm:$0xff]  ;;  %v45103_v49 = vrot.slane %v352_v27, %v44500_v19  ;;  %v2346_v52 = vrot.slane %v2332_v36, %v44500_v19  ;;  %v3653_v36 = vcombine.high %v572_v26, %v572_v26 }
 0x1ed   : > { %v8970_v1 = vadd.f32 %v8969_v53, %v8900_v58  ;;  %16457 = vmatprep.mubr.f32.mxu0 %v2262_v47  ;;  %16533 = vmatprep.subr.mxu0 %v3639_v50  ;;  %v3645_v35 = vcombine.high %v564_v24, %v564_v24  ;;  %v353_v47 = vld [vmem:[%s44467_s4 + $0x2f8] sm:$0xff] }
 0x1ee   : > { %v9039_v4 = vpop.f32.mrb[72].mxu0  ;;  %v9109_v5 = vpop.f32.mrb[72].mxu1  ;;  %16527 = vmatprep.mubr.f32.mxu1 %v2263_v54  ;;  %16603 = vmatprep.subr.mxu1 %v3640_v55  ;;  %v2331_v55 = vcombine.high %v2329_v42, %v2329_v42  ;;  %v2349_v58 = vcombine.high %v353_v47, %v353_v47 }
 0x1ef   : > { %v9040_v10 = vadd.f32 %v9039_v4, %v8970_v1  ;;  %v9041_v11 = vpop.f32.mrb[73].mxu0  ;;  %16458 = vmatmul.mubr.f32.vlgmr.msra.gmra.mrb[178].mxu0 %v45053_v32  ;;  %v9111_v12 = vpop.f32.mrb[73].mxu1  ;;  %16528 = vmatmul.mubr.f32.vlgmr.msra.gmra.mrb[178].mxu1 %v2261_v40  ;;  %v2313_v32 = vcombine.high %v45083_v16, %v45083_v16  ;;  %v3646_v40 = vcombine.high %v565_v31, %v565_v31 }
 0x1f0   : > { %16534 = vmatpush1.xpose.msra.mxu0 %v558_v39  ;;  %16604 = vmatpush1.xpose.msra.mxu1 %v559_v46  ;;  %v2314_v39 = vcombine.high %v2312_v25, %v2312_v25  ;;  %v567_v46 = vld [vmem:[%s44474_s20 + $0x5e8] sm:$0xff]  ;;  %v45113_v1 = vrot.slane %v353_v47, %v44500_v19  ;;  %v2348_v4 = vcombine.high %v2346_v52, %v2346_v52 }
 0x1f1   : > { %v9110_v17 = vadd.f32 %v9109_v5, %v9040_v10  ;;  %16597 = vmatprep.mubr.f32.mxu0 %v2279_v63  ;;  %16673 = vmatprep.subr.mxu0 %v3641_v2  ;;  %v354_v63 = vld [vmem:[%s44467_s4 + $0x300] sm:$0xff]  ;;  %v2363_v9 = vrot.slane %v2349_v58, %v44500_v19  ;;  %v355_v11 = vld [vmem:[%s44467_s4 + $0x308] sm:$0xff] }
 0x1f2   : > { %v9179_v21 = vpop.f32.mrb[74].mxu0  ;;  %v9249_v22 = vpop.f32.mrb[74].mxu1  ;;  %16667 = vmatprep.mubr.f32.mxu1 %v2280_v6  ;;  %16743 = vmatprep.subr.mxu1 %v3642_v7  ;;  %v3650_v7 = vcombine.high %v569_v62, %v569_v62  ;;  %v2366_v10 = vcombine.high %v354_v63, %v354_v63  ;;  %v575_v47 = vld [vmem:[%s44474_s20 + $0x628] sm:$0xff] }
 0x1f3   : > { %v9180_v28 = vadd.f32 %v9179_v21, %v9110_v17  ;;  %v9181_v29 = vpop.f32.mrb[75].mxu0  ;;  %16598 = vmatmul.mubr.f32.vlgmr.msra.gmra.mrb[180].mxu0 %v45063_v48  ;;  %v9251_v30 = vpop.f32.mrb[75].mxu1  ;;  %16668 = vmatmul.mubr.f32.vlgmr.msra.gmra.mrb[180].mxu1 %v2278_v57  ;;  %v2330_v48 = vcombine.high %v45093_v33, %v45093_v33  ;;  %v568_v57 = vld [vmem:[%s44474_s20 + $0x5f0] sm:$0xff]  ;;  %v45123_v17 = vrot.slane %v354_v63, %v44500_v19 }
 0x1f4   : > { %16674 = vmatpush1.xpose.msra.mxu0 %v560_v56  ;;  %16744 = vmatpush1.xpose.msra.mxu1 %v561_v61  ;;  %v3648_v56 = vcombine.high %v567_v46, %v567_v46  ;;  %v2383_v21 = vcombine.high %v355_v11, %v355_v11  ;;  %v2380_v27 = vrot.slane %v2366_v10, %v44500_v19  ;;  %v578_v10 = vld [vmem:[%s44474_s20 + $0x640] sm:$0xff] }
 0x1f5   : > { %v9250_v34 = vadd.f32 %v9249_v22, %v9180_v28  ;;  %16737 = vmatprep.mubr.f32.mxu0 %v2296_v15  ;;  %16813 = vmatprep.subr.mxu0 %v3643_v18  ;;  %v571_v15 = vld [vmem:[%s44474_s20 + $0x608] sm:$0xff] }
 0x1f6   : > { %v9319_v37 = vpop.f32.mrb[76].mxu0  ;;  %v9389_v38 = vpop.f32.mrb[76].mxu1  ;;  %16807 = vmatprep.mubr.f32.mxu1 %v2297_v20  ;;  %16883 = vmatprep.subr.mxu1 %v3644_v23 }
 0x1f7   : > { %v9320_v43 = vadd.f32 %v9319_v37, %v9250_v34  ;;  %v9321_v44 = vpop.f32.mrb[77].mxu0  ;;  %16738 = vmatmul.mubr.f32.vlgmr.msra.gmra.mrb[182].mxu0 %v45073_v0  ;;  %v9391_v45 = vpop.f32.mrb[77].mxu1  ;;  %16808 = vmatmul.mubr.f32.vlgmr.msra.gmra.mrb[182].mxu1 %v2295_v3  ;;  %v2347_v0 = vcombine.high %v45103_v49, %v45103_v49  ;;  %v3649_v3 = vcombine.high %v568_v57, %v568_v57 }
 0x1f8   : > { %16814 = vmatpush1.xpose.msra.mxu0 %v562_v8  ;;  %16884 = vmatpush1.xpose.msra.mxu1 %v563_v13  ;;  %v570_v8 = vld [vmem:[%s44474_s20 + $0x600] sm:$0xff]  ;;  %v45133_v34 = vrot.slane %v355_v11, %v44500_v19  ;;  %v2397_v37 = vrot.slane %v2383_v21, %v44500_v19  ;;  %v3659_v21 = vcombine.high %v578_v10, %v578_v10 }
 0x1f9   : > { %v9390_v50 = vadd.f32 %v9389_v38, %v9320_v43  ;;  %16877 = vmatprep.mubr.f32.mxu0 %v2313_v32  ;;  %16953 = vmatprep.subr.mxu0 %v3645_v35  ;;  %v3651_v20 = vcombine.high %v570_v8, %v570_v8  ;;  %v356_v32 = vld [vmem:[%s44467_s4 + $0x310] sm:$0xff] }
 0x1fa   : > { %v9459_v53 = vpop.f32.mrb[78].mxu0  ;;  %v9529_v54 = vpop.f32.mrb[78].mxu1  ;;  %16947 = vmatprep.mubr.f32.mxu1 %v2314_v39  ;;  %17023 = vmatprep.subr.mxu1 %v3646_v40  ;;  %v2382_v40 = vcombine.high %v2380_v27, %v2380_v27  ;;  %v2400_v43 = vcombine.high %v356_v32, %v356_v32 }
 0x1fb   : > { %v9460_v59 = vadd.f32 %v9459_v53, %v9390_v50  ;;  %v9461_v60 = vpop.f32.mrb[79].mxu0  ;;  %16878 = vmatmul.mubr.f32.vlgmr.msra.gmra.mrb[184].mxu0 %v45083_v16  ;;  %v9531_v61 = vpop.f32.mrb[79].mxu1  ;;  %16948 = vmatmul.mubr.f32.vlgmr.msra.gmra.mrb[184].mxu1 %v2312_v25  ;;  %v2364_v16 = vcombine.high %v45113_v1, %v45113_v1  ;;  %v3652_v25 = vcombine.high %v571_v15, %v571_v15 }
 0x1fc   : > { %16954 = vmatpush1.xpose.msra.mxu0 %v564_v24  ;;  %17024 = vmatpush1.xpose.msra.mxu1 %v565_v31  ;;  %v2365_v24 = vcombine.high %v2363_v9, %v2363_v9  ;;  %v573_v31 = vld [vmem:[%s44474_s20 + $0x618] sm:$0xff]  ;;  %v45143_v50 = vrot.slane %v356_v32, %v44500_v19  ;;  %v2399_v53 = vcombine.high %v2397_v37, %v2397_v37 }
 0x1fd   : > { %v9530_v2 = vadd.f32 %v9529_v54, %v9460_v59  ;;  %17017 = vmatprep.mubr.f32.mxu0 %v2330_v48  ;;  %17093 = vmatprep.subr.mxu0 %v3647_v51  ;;  %v357_v48 = vld [vmem:[%s44467_s4 + $0x318] sm:$0xff]  ;;  %v2414_v58 = vrot.slane %v2400_v43, %v44500_v19  ;;  %v358_v60 = vld [vmem:[%s44467_s4 + $0x320] sm:$0xff] }
 0x1fe   : > { %v9599_v5 = vpop.f32.mrb[80].mxu0  ;;  %v9669_v6 = vpop.f32.mrb[80].mxu1  ;;  %17087 = vmatprep.mubr.f32.mxu1 %v2331_v55  ;;  %17163 = vmatprep.subr.mxu1 %v3648_v56  ;;  %v3656_v56 = vcombine.high %v575_v47, %v575_v47  ;;  %v2417_v59 = vcombine.high %v357_v48, %v357_v48  ;;  %v581_v32 = vld [vmem:[%s44474_s20 + $0x658] sm:$0xff] }
 0x1ff   : > { %v9600_v12 = vadd.f32 %v9599_v5, %v9530_v2  ;;  %v9601_v13 = vpop.f32.mrb[81].mxu0  ;;  %17018 = vmatmul.mubr.f32.vlgmr.msra.gmra.mrb[186].mxu0 %v45093_v33  ;;  %v9671_v14 = vpop.f32.mrb[81].mxu1  ;;  %17088 = vmatmul.mubr.f32.vlgmr.msra.gmra.mrb[186].mxu1 %v2329_v42  ;;  %v2381_v33 = vcombine.high %v45123_v17, %v45123_v17  ;;  %v574_v42 = vld [vmem:[%s44474_s20 + $0x620] sm:$0xff]  ;;  %v45153_v2 = vrot.slane %v357_v48, %v44500_v19 }
 0x200   : > { %17094 = vmatpush1.xpose.msra.mxu0 %v566_v41  ;;  %17164 = vmatpush1.xpose.msra.mxu1 %v567_v46  ;;  %v3654_v41 = vcombine.high %v573_v31, %v573_v31  ;;  %v2434_v5 = vcombine.high %v358_v60, %v358_v60  ;;  %v2431_v11 = vrot.slane %v2417_v59, %v44500_v19  ;;  %v584_v59 = vld [vmem:[%s44474_s20 + $0x670] sm:$0xff] }
 0x201   : > { %v9670_v18 = vadd.f32 %v9669_v6, %v9600_v12  ;;  %17157 = vmatprep.mubr.f32.mxu0 %v2347_v0  ;;  %17233 = vmatprep.subr.mxu0 %v3649_v3  ;;  %v577_v0 = vld [vmem:[%s44474_s20 + $0x638] sm:$0xff] }
 0x202   : > { %v9739_v22 = vpop.f32.mrb[82].mxu0  ;;  %v9809_v23 = vpop.f32.mrb[82].mxu1  ;;  %17227 = vmatprep.mubr.f32.mxu1 %v2348_v4  ;;  %17303 = vmatprep.subr.mxu1 %v3650_v7 }
 0x203   : > { %v9740_v28 = vadd.f32 %v9739_v22, %v9670_v18  ;;  %v9741_v29 = vpop.f32.mrb[83].mxu0  ;;  %17158 = vmatmul.mubr.f32.vlgmr.msra.gmra.mrb[188].mxu0 %v45103_v49  ;;  %v9811_v30 = vpop.f32.mrb[83].mxu1  ;;  %17228 = vmatmul.mubr.f32.vlgmr.msra.gmra.mrb[188].mxu1 %v2346_v52  ;;  %v2398_v49 = vcombine.high %v45133_v34, %v45133_v34  ;;  %v3655_v52 = vcombine.high %v574_v42, %v574_v42 }
 0x204   : > { %17234 = vmatpush1.xpose.msra.mxu0 %v568_v57  ;;  %17304 = vmatpush1.xpose.msra.mxu1 %v569_v62  ;;  %v576_v57 = vld [vmem:[%s44474_s20 + $0x630] sm:$0xff]  ;;  %v45163_v18 = vrot.slane %v358_v60, %v44500_v19  ;;  %v2448_v22 = vrot.slane %v2434_v5, %v44500_v19  ;;  %v3665_v5 = vcombine.high %v584_v59, %v584_v59 }
 0x205   : > { %v9810_v35 = vadd.f32 %v9809_v23, %v9740_v28  ;;  %17297 = vmatprep.mubr.f32.mxu0 %v2364_v16  ;;  %17373 = vmatprep.subr.mxu0 %v3651_v20  ;;  %v3657_v4 = vcombine.high %v576_v57, %v576_v57  ;;  %v359_v16 = vld [vmem:[%s44467_s4 + $0x328] sm:$0xff] }
 0x206   : > { %v9879_v38 = vpop.f32.mrb[84].mxu0  ;;  %v9949_v39 = vpop.f32.mrb[84].mxu1  ;;  %17367 = vmatprep.mubr.f32.mxu1 %v2365_v24  ;;  %17443 = vmatprep.subr.mxu1 %v3652_v25  ;;  %v2433_v25 = vcombine.high %v2431_v11, %v2431_v11  ;;  %v2451_v28 = vcombine.high %v359_v16, %v359_v16 }
 0x207   : > { %v9880_v44 = vadd.f32 %v9879_v38, %v9810_v35  ;;  %v9881_v45 = vpop.f32.mrb[85].mxu0  ;;  %17298 = vmatmul.mubr.f32.vlgmr.msra.gmra.mrb[190].mxu0 %v45113_v1  ;;  %v9951_v46 = vpop.f32.mrb[85].mxu1  ;;  %17368 = vmatmul.mubr.f32.vlgmr.msra.gmra.mrb[190].mxu1 %v2363_v9  ;;  %v2415_v1 = vcombine.high %v45143_v50, %v45143_v50  ;;  %v3658_v9 = vcombine.high %v577_v0, %v577_v0 }
 0x208   : > { %17374 = vmatpush1.xpose.msra.mxu0 %v570_v8  ;;  %17444 = vmatpush1.xpose.msra.mxu1 %v571_v15  ;;  %v2416_v8 = vcombine.high %v2414_v58, %v2414_v58  ;;  %v579_v15 = vld [vmem:[%s44474_s20 + $0x648] sm:$0xff]  ;;  %v45173_v35 = vrot.slane %v359_v16, %v44500_v19  ;;  %v2450_v38 = vcombine.high %v2448_v22, %v2448_v22  ;;  %v361_v45 = vld [vmem:[%s44467_s4 + $0x338] sm:$0xff] }
 0x209   : > { %v9950_v51 = vadd.f32 %v9949_v39, %v9880_v44  ;;  %17437 = vmatprep.mubr.f32.mxu0 %v2381_v33  ;;  %17513 = vmatprep.subr.mxu0 %v3653_v36  ;;  %v360_v33 = vld [vmem:[%s44467_s4 + $0x330] sm:$0xff]  ;;  %v2465_v43 = vrot.slane %v2451_v28, %v44500_v19 }
 0x20a   : > { %v10019_v54 = vpop.f32.mrb[86].mxu0  ;;  %v10089_v55 = vpop.f32.mrb[86].mxu1  ;;  %17507 = vmatprep.mubr.f32.mxu1 %v2382_v40  ;;  %17583 = vmatprep.subr.mxu1 %v3654_v41  ;;  %v3662_v41 = vcombine.high %v581_v32, %v581_v32  ;;  %v2468_v44 = vcombine.high %v360_v33, %v360_v33  ;;  %v587_v16 = vld [vmem:[%s44474_s20 + $0x688] sm:$0xff] }
 0x20b   : > { %v10020_v61 = vadd.f32 %v10019_v54, %v9950_v51  ;;  %v10021_v62 = vpop.f32.mrb[87].mxu0  ;;  %17438 = vmatmul.mubr.f32.vlgmr.msra.gmra.mrb[192].mxu0 %v45123_v17  ;;  %v10091_v63 = vpop.f32.mrb[87].mxu1  ;;  %17508 = vmatmul.mubr.f32.vlgmr.msra.gmra.mrb[192].mxu1 %v2380_v27  ;;  %v2432_v17 = vcombine.high %v45153_v2, %v45153_v2  ;;  %v580_v27 = vld [vmem:[%s44474_s20 + $0x650] sm:$0xff]  ;;  %v45183_v51 = vrot.slane %v360_v33, %v44500_v19 }
 0x20c   : > { %17514 = vmatpush1.xpose.msra.mxu0 %v572_v26  ;;  %17584 = vmatpush1.xpose.msra.mxu1 %v573_v31  ;;  %v3660_v26 = vcombine.high %v579_v15, %v579_v15  ;;  %v2485_v54 = vcombine.high %v361_v45, %v361_v45  ;;  %v2482_v60 = vrot.slane %v2468_v44, %v44500_v19  ;;  %v590_v44 = vld [vmem:[%s44474_s20 + $0x6a0] sm:$0xff] }
 0x20d   : > { %v10090_v3 = vadd.f32 %v10089_v55, %v10020_v61  ;;  %17577 = vmatprep.mubr.f32.mxu0 %v2398_v49  ;;  %17653 = vmatprep.subr.mxu0 %v3655_v52  ;;  %v583_v49 = vld [vmem:[%s44474_s20 + $0x668] sm:$0xff] }
 0x20e   : > { %v10159_v6 = vpop.f32.mrb[88].mxu0  ;;  %v10229_v7 = vpop.f32.mrb[88].mxu1  ;;  %17647 = vmatprep.mubr.f32.mxu1 %v2399_v53  ;;  %17723 = vmatprep.subr.mxu1 %v3656_v56 }
 0x20f   : > { %v10160_v12 = vadd.f32 %v10159_v6, %v10090_v3  ;;  %v10161_v13 = vpop.f32.mrb[89].mxu0  ;;  %17578 = vmatmul.mubr.f32.vlgmr.msra.gmra.mrb[194].mxu0 %v45133_v34  ;;  %v10231_v14 = vpop.f32.mrb[89].mxu1  ;;  %17648 = vmatmul.mubr.f32.vlgmr.msra.gmra.mrb[194].mxu1 %v2397_v37  ;;  %v2449_v34 = vcombine.high %v45163_v18, %v45163_v18  ;;  %v3661_v37 = vcombine.high %v580_v27, %v580_v27 }
 0x210   : > { %17654 = vmatpush1.xpose.msra.mxu0 %v574_v42  ;;  %17724 = vmatpush1.xpose.msra.mxu1 %v575_v47  ;;  %v582_v42 = vld [vmem:[%s44474_s20 + $0x660] sm:$0xff]  ;;  %v45193_v3 = vrot.slane %v361_v45, %v44500_v19  ;;  %v2499_v6 = vrot.slane %v2485_v54, %v44500_v19  ;;  %v3671_v54 = vcombine.high %v590_v44, %v590_v44 }
 0x211   : > { %v10230_v20 = vadd.f32 %v10229_v7, %v10160_v12  ;;  %17717 = vmatprep.mubr.f32.mxu0 %v2415_v1  ;;  %17793 = vmatprep.subr.mxu0 %v3657_v4  ;;  %v3663_v53 = vcombine.high %v582_v42, %v582_v42  ;;  %v362_v1 = vld [vmem:[%s44467_s4 + $0x340] sm:$0xff] }
 0x212   : > { %v10299_v23 = vpop.f32.mrb[90].mxu0  ;;  %v10369_v24 = vpop.f32.mrb[90].mxu1  ;;  %17787 = vmatprep.mubr.f32.mxu1 %v2416_v8  ;;  %17863 = vmatprep.subr.mxu1 %v3658_v9  ;;  %v2484_v9 = vcombine.high %v2482_v60, %v2482_v60  ;;  %v2502_v12 = vcombine.high %v362_v1, %v362_v1 }
 0x213   : > { %v10300_v29 = vadd.f32 %v10299_v23, %v10230_v20  ;;  %v10301_v30 = vpop.f32.mrb[91].mxu0  ;;  %17718 = vmatmul.mubr.f32.vlgmr.msra.gmra.mrb[196].mxu0 %v45143_v50  ;;  %v10371_v31 = vpop.f32.mrb[91].mxu1  ;;  %17788 = vmatmul.mubr.f32.vlgmr.msra.gmra.mrb[196].mxu1 %v2414_v58  ;;  %v2466_v50 = vcombine.high %v45173_v35, %v45173_v35  ;;  %v3664_v58 = vcombine.high %v583_v49, %v583_v49 }
 0x214   : > { %17794 = vmatpush1.xpose.msra.mxu0 %v576_v57  ;;  %17864 = vmatpush1.xpose.msra.mxu1 %v577_v0  ;;  %v2467_v57 = vcombine.high %v2465_v43, %v2465_v43  ;;  %v585_v0 = vld [vmem:[%s44474_s20 + $0x678] sm:$0xff]  ;;  %v45203_v20 = vrot.slane %v362_v1, %v44500_v19  ;;  %v2501_v23 = vcombine.high %v2499_v6, %v2499_v6 }
 0x215   : > { %v10370_v36 = vadd.f32 %v10369_v24, %v10300_v29  ;;  %17857 = vmatprep.mubr.f32.mxu0 %v2432_v17  ;;  %17933 = vmatprep.subr.mxu0 %v3659_v21  ;;  %v363_v17 = vld [vmem:[%s44467_s4 + $0x348] sm:$0xff]  ;;  %v2516_v28 = vrot.slane %v2502_v12, %v44500_v19  ;;  %v364_v30 = vld [vmem:[%s44467_s4 + $0x350] sm:$0xff] }
 0x216   : > { %v10439_v39 = vpop.f32.mrb[92].mxu0  ;;  %v10509_v40 = vpop.f32.mrb[92].mxu1  ;;  %17927 = vmatprep.mubr.f32.mxu1 %v2433_v25  ;;  %18003 = vmatprep.subr.mxu1 %v3660_v26  ;;  %v3668_v26 = vcombine.high %v587_v16, %v587_v16  ;;  %v2519_v29 = vcombine.high %v363_v17, %v363_v17  ;;  %v593_v1 = vld [vmem:[%s44474_s20 + $0x6b8] sm:$0xff] }
 0x217   : > { %v10440_v46 = vadd.f32 %v10439_v39, %v10370_v36  ;;  %v10441_v47 = vpop.f32.mrb[93].mxu0  ;;  %17858 = vmatmul.mubr.f32.vlgmr.msra.gmra.mrb[198].mxu0 %v45153_v2  ;;  %v10511_v48 = vpop.f32.mrb[93].mxu1  ;;  %17928 = vmatmul.mubr.f32.vlgmr.msra.gmra.mrb[198].mxu1 %v2431_v11  ;;  %v2483_v2 = vcombine.high %v45183_v51, %v45183_v51  ;;  %v586_v11 = vld [vmem:[%s44474_s20 + $0x680] sm:$0xff]  ;;  %v45213_v36 = vrot.slane %v363_v17, %v44500_v19 }
 0x218   : > { %17934 = vmatpush1.xpose.msra.mxu0 %v578_v10  ;;  %18004 = vmatpush1.xpose.msra.mxu1 %v579_v15  ;;  %v3666_v10 = vcombine.high %v585_v0, %v585_v0  ;;  %v2536_v39 = vcombine.high %v364_v30, %v364_v30  ;;  %v2533_v45 = vrot.slane %v2519_v29, %v44500_v19  ;;  %v596_v29 = vld [vmem:[%s44474_s20 + $0x6d0] sm:$0xff] }
 0x219   : > { %v10510_v52 = vadd.f32 %v10509_v40, %v10440_v46  ;;  %17997 = vmatprep.mubr.f32.mxu0 %v2449_v34  ;;  %18073 = vmatprep.subr.mxu0 %v3661_v37  ;;  %v589_v34 = vld [vmem:[%s44474_s20 + $0x698] sm:$0xff] }
 0x21a   : > { %v10579_v55 = vpop.f32.mrb[94].mxu0  ;;  %v10649_v56 = vpop.f32.mrb[94].mxu1  ;;  %18067 = vmatprep.mubr.f32.mxu1 %v2450_v38  ;;  %18143 = vmatprep.subr.mxu1 %v3662_v41 }
 0x21b   : > { %v10580_v61 = vadd.f32 %v10579_v55, %v10510_v52  ;;  %v10581_v62 = vpop.f32.mrb[95].mxu0  ;;  %17998 = vmatmul.mubr.f32.vlgmr.msra.gmra.mrb[200].mxu0 %v45163_v18  ;;  %v10651_v63 = vpop.f32.mrb[95].mxu1  ;;  %18068 = vmatmul.mubr.f32.vlgmr.msra.gmra.mrb[200].mxu1 %v2448_v22  ;;  %v2500_v18 = vcombine.high %v45193_v3, %v45193_v3  ;;  %v3667_v22 = vcombine.high %v586_v11, %v586_v11 }
 0x21c   : > { %18074 = vmatpush1.xpose.msra.mxu0 %v580_v27  ;;  %18144 = vmatpush1.xpose.msra.mxu1 %v581_v32  ;;  %v588_v27 = vld [vmem:[%s44474_s20 + $0x690] sm:$0xff]  ;;  %v45223_v52 = vrot.slane %v364_v30, %v44500_v19  ;;  %v2550_v55 = vrot.slane %v2536_v39, %v44500_v19  ;;  %v3677_v39 = vcombine.high %v596_v29, %v596_v29 }
 0x21d   : > { %v10650_v4 = vadd.f32 %v10649_v56, %v10580_v61  ;;  %18137 = vmatprep.mubr.f32.mxu0 %v2466_v50  ;;  %18213 = vmatprep.subr.mxu0 %v3663_v53  ;;  %v3669_v38 = vcombine.high %v588_v27, %v588_v27  ;;  %v365_v50 = vld [vmem:[%s44467_s4 + $0x358] sm:$0xff] }
 0x21e   : > { %v10719_v7 = vpop.f32.mrb[96].mxu0  ;;  %v10789_v8 = vpop.f32.mrb[96].mxu1  ;;  %18207 = vmatprep.mubr.f32.mxu1 %v2467_v57  ;;  %18283 = vmatprep.subr.mxu1 %v3664_v58  ;;  %v2535_v58 = vcombine.high %v2533_v45, %v2533_v45  ;;  %v2553_v61 = vcombine.high %v365_v50, %v365_v50 }
 0x21f   : > { %v10720_v13 = vadd.f32 %v10719_v7, %v10650_v4  ;;  %v10721_v14 = vpop.f32.mrb[97].mxu0  ;;  %18138 = vmatmul.mubr.f32.vlgmr.msra.gmra.mrb[202].mxu0 %v45173_v35  ;;  %v10791_v15 = vpop.f32.mrb[97].mxu1  ;;  %18208 = vmatmul.mubr.f32.vlgmr.msra.gmra.mrb[202].mxu1 %v2465_v43  ;;  %v2517_v35 = vcombine.high %v45203_v20, %v45203_v20  ;;  %v3670_v43 = vcombine.high %v589_v34, %v589_v34 }
 0x220   : > { %18214 = vmatpush1.xpose.msra.mxu0 %v582_v42  ;;  %18284 = vmatpush1.xpose.msra.mxu1 %v583_v49  ;;  %v2518_v42 = vcombine.high %v2516_v28, %v2516_v28  ;;  %v591_v49 = vld [vmem:[%s44474_s20 + $0x6a8] sm:$0xff]  ;;  %v45233_v4 = vrot.slane %v365_v50, %v44500_v19  ;;  %v2552_v7 = vcombine.high %v2550_v55, %v2550_v55 }
 0x221   : > { %v10790_v21 = vadd.f32 %v10789_v8, %v10720_v13  ;;  %18277 = vmatprep.mubr.f32.mxu0 %v2483_v2  ;;  %18353 = vmatprep.subr.mxu0 %v3665_v5  ;;  %v366_v2 = vld [vmem:[%s44467_s4 + $0x360] sm:$0xff]  ;;  %v2567_v12 = vrot.slane %v2553_v61, %v44500_v19  ;;  %v367_v14 = vld [vmem:[%s44467_s4 + $0x368] sm:$0xff] }
 0x222   : > { %v10859_v24 = vpop.f32.mrb[98].mxu0  ;;  %v10929_v25 = vpop.f32.mrb[98].mxu1  ;;  %18347 = vmatprep.mubr.f32.mxu1 %v2484_v9  ;;  %18423 = vmatprep.subr.mxu1 %v3666_v10  ;;  %v3674_v10 = vcombine.high %v593_v1, %v593_v1  ;;  %v2570_v13 = vcombine.high %v366_v2, %v366_v2  ;;  %v599_v50 = vld [vmem:[%s44474_s20 + $0x6e8] sm:$0xff] }
 0x223   : > { %v10860_v31 = vadd.f32 %v10859_v24, %v10790_v21  ;;  %v10861_v32 = vpop.f32.mrb[99].mxu0  ;;  %18278 = vmatmul.mubr.f32.vlgmr.msra.gmra.mrb[204].mxu0 %v45183_v51  ;;  %v10931_v33 = vpop.f32.mrb[99].mxu1  ;;  %18348 = vmatmul.mubr.f32.vlgmr.msra.gmra.mrb[204].mxu1 %v2482_v60  ;;  %v2534_v51 = vcombine.high %v45213_v36, %v45213_v36  ;;  %v592_v60 = vld [vmem:[%s44474_s20 + $0x6b0] sm:$0xff]  ;;  %v45243_v21 = vrot.slane %v366_v2, %v44500_v19 }
 0x224   : > { %18354 = vmatpush1.xpose.msra.mxu0 %v584_v59  ;;  %18424 = vmatpush1.xpose.msra.mxu1 %v585_v0  ;;  %v3672_v59 = vcombine.high %v591_v49, %v591_v49  ;;  %v2587_v24 = vcombine.high %v367_v14, %v367_v14  ;;  %v2584_v30 = vrot.slane %v2570_v13, %v44500_v19  ;;  %v602_v13 = vld [vmem:[%s44474_s20 + $0x700] sm:$0xff] }
 0x225   : > { %v10930_v37 = vadd.f32 %v10929_v25, %v10860_v31  ;;  %18417 = vmatprep.mubr.f32.mxu0 %v2500_v18  ;;  %18493 = vmatprep.subr.mxu0 %v3667_v22  ;;  %v595_v18 = vld [vmem:[%s44474_s20 + $0x6c8] sm:$0xff] }
 0x226   : > { %v10999_v40 = vpop.f32.mrb[100].mxu0  ;;  %v11069_v41 = vpop.f32.mrb[100].mxu1  ;;  %18487 = vmatprep.mubr.f32.mxu1 %v2501_v23  ;;  %18563 = vmatprep.subr.mxu1 %v3668_v26 }
 0x227   : > { %v11000_v46 = vadd.f32 %v10999_v40, %v10930_v37  ;;  %v11001_v47 = vpop.f32.mrb[101].mxu0  ;;  %18418 = vmatmul.mubr.f32.vlgmr.msra.gmra.mrb[206].mxu0 %v45193_v3  ;;  %v11071_v48 = vpop.f32.mrb[101].mxu1  ;;  %18488 = vmatmul.mubr.f32.vlgmr.msra.gmra.mrb[206].mxu1 %v2499_v6  ;;  %v2551_v3 = vcombine.high %v45223_v52, %v45223_v52  ;;  %v3673_v6 = vcombine.high %v592_v60, %v592_v60 }
 0x228   : > { %18494 = vmatpush1.xpose.msra.mxu0 %v586_v11  ;;  %18564 = vmatpush1.xpose.msra.mxu1 %v587_v16  ;;  %v594_v11 = vld [vmem:[%s44474_s20 + $0x6c0] sm:$0xff]  ;;  %v45253_v37 = vrot.slane %v367_v14, %v44500_v19  ;;  %v2601_v40 = vrot.slane %v2587_v24, %v44500_v19  ;;  %v3683_v24 = vcombine.high %v602_v13, %v602_v13 }
 0x229   : > { %v11070_v53 = vadd.f32 %v11069_v41, %v11000_v46  ;;  %18557 = vmatprep.mubr.f32.mxu0 %v2517_v35  ;;  %18633 = vmatprep.subr.mxu0 %v3669_v38  ;;  %v3675_v23 = vcombine.high %v594_v11, %v594_v11  ;;  %v368_v35 = vld [vmem:[%s44467_s4 + $0x370] sm:$0xff] }
 0x22a   : > { %v11139_v56 = vpop.f32.mrb[102].mxu0  ;;  %v11209_v57 = vpop.f32.mrb[102].mxu1  ;;  %18627 = vmatprep.mubr.f32.mxu1 %v2518_v42  ;;  %18703 = vmatprep.subr.mxu1 %v3670_v43  ;;  %v2586_v43 = vcombine.high %v2584_v30, %v2584_v30  ;;  %v2604_v46 = vcombine.high %v368_v35, %v368_v35 }
 0x22b   : > { %v11140_v62 = vadd.f32 %v11139_v56, %v11070_v53  ;;  %v11141_v63 = vpop.f32.mrb[103].mxu0  ;;  %18558 = vmatmul.mubr.f32.vlgmr.msra.gmra.mrb[208].mxu0 %v45203_v20  ;;  %v11211_v0 = vpop.f32.mrb[103].mxu1  ;;  %18628 = vmatmul.mubr.f32.vlgmr.msra.gmra.mrb[208].mxu1 %v2516_v28  ;;  %v2568_v20 = vcombine.high %v45233_v4, %v45233_v4  ;;  %v3676_v28 = vcombine.high %v595_v18, %v595_v18 }
 0x22c   : > { %18634 = vmatpush1.xpose.msra.mxu0 %v588_v27  ;;  %18704 = vmatpush1.xpose.msra.mxu1 %v589_v34  ;;  %v2569_v27 = vcombine.high %v2567_v12, %v2567_v12  ;;  %v597_v34 = vld [vmem:[%s44474_s20 + $0x6d8] sm:$0xff]  ;;  %v45263_v53 = vrot.slane %v368_v35, %v44500_v19  ;;  %v2603_v56 = vcombine.high %v2601_v40, %v2601_v40 }
 0x22d   : > { %v11210_v5 = vadd.f32 %v11209_v57, %v11140_v62  ;;  %18697 = vmatprep.mubr.f32.mxu0 %v2534_v51  ;;  %18773 = vmatprep.subr.mxu0 %v3671_v54  ;;  %v369_v51 = vld [vmem:[%s44467_s4 + $0x378] sm:$0xff]  ;;  %v2618_v61 = vrot.slane %v2604_v46, %v44500_v19  ;;  %v370_v63 = vld [vmem:[%s44467_s4 + $0x380] sm:$0xff] }
 0x22e   : > { %v11279_v8 = vpop.f32.mrb[104].mxu0  ;;  %v11349_v9 = vpop.f32.mrb[104].mxu1  ;;  %18767 = vmatprep.mubr.f32.mxu1 %v2535_v58  ;;  %18843 = vmatprep.subr.mxu1 %v3672_v59  ;;  %v3680_v59 = vcombine.high %v599_v50, %v599_v50  ;;  %v2621_v62 = vcombine.high %v369_v51, %v369_v51  ;;  %v605_v35 = vld [vmem:[%s44474_s20 + $0x718] sm:$0xff] }
 0x22f   : > { %v11280_v15 = vadd.f32 %v11279_v8, %v11210_v5  ;;  %v11281_v16 = vpop.f32.mrb[105].mxu0  ;;  %18698 = vmatmul.mubr.f32.vlgmr.msra.gmra.mrb[210].mxu0 %v45213_v36  ;;  %v11351_v17 = vpop.f32.mrb[105].mxu1  ;;  %18768 = vmatmul.mubr.f32.vlgmr.msra.gmra.mrb[210].mxu1 %v2533_v45  ;;  %v2585_v36 = vcombine.high %v45243_v21, %v45243_v21  ;;  %v598_v45 = vld [vmem:[%s44474_s20 + $0x6e0] sm:$0xff]  ;;  %v45273_v5 = vrot.slane %v369_v51, %v44500_v19 }
 0x230   : > { %18774 = vmatpush1.xpose.msra.mxu0 %v590_v44  ;;  %18844 = vmatpush1.xpose.msra.mxu1 %v591_v49  ;;  %v3678_v44 = vcombine.high %v597_v34, %v597_v34  ;;  %v2638_v8 = vcombine.high %v370_v63, %v370_v63  ;;  %v2635_v14 = vrot.slane %v2621_v62, %v44500_v19  ;;  %v608_v62 = vld [vmem:[%s44474_s20 + $0x730] sm:$0xff] }
 0x231   : > { %v11350_v22 = vadd.f32 %v11349_v9, %v11280_v15  ;;  %18837 = vmatprep.mubr.f32.mxu0 %v2551_v3  ;;  %18913 = vmatprep.subr.mxu0 %v3673_v6  ;;  %v601_v3 = vld [vmem:[%s44474_s20 + $0x6f8] sm:$0xff] }
 0x232   : > { %v11419_v25 = vpop.f32.mrb[106].mxu0  ;;  %v11489_v26 = vpop.f32.mrb[106].mxu1  ;;  %18907 = vmatprep.mubr.f32.mxu1 %v2552_v7  ;;  %18983 = vmatprep.subr.mxu1 %v3674_v10 }
 0x233   : > { %v11420_v31 = vadd.f32 %v11419_v25, %v11350_v22  ;;  %v11421_v32 = vpop.f32.mrb[107].mxu0  ;;  %18838 = vmatmul.mubr.f32.vlgmr.msra.gmra.mrb[212].mxu0 %v45223_v52  ;;  %v11491_v33 = vpop.f32.mrb[107].mxu1  ;;  %18908 = vmatmul.mubr.f32.vlgmr.msra.gmra.mrb[212].mxu1 %v2550_v55  ;;  %v2602_v52 = vcombine.high %v45253_v37, %v45253_v37  ;;  %v3679_v55 = vcombine.high %v598_v45, %v598_v45 }
 0x234   : > { %18914 = vmatpush1.xpose.msra.mxu0 %v592_v60  ;;  %18984 = vmatpush1.xpose.msra.mxu1 %v593_v1  ;;  %v600_v60 = vld [vmem:[%s44474_s20 + $0x6f0] sm:$0xff]  ;;  %v45283_v22 = vrot.slane %v370_v63, %v44500_v19  ;;  %v2652_v25 = vrot.slane %v2638_v8, %v44500_v19  ;;  %v3689_v8 = vcombine.high %v608_v62, %v608_v62 }
 0x235   : > { %v11490_v38 = vadd.f32 %v11489_v26, %v11420_v31  ;;  %18977 = vmatprep.mubr.f32.mxu0 %v2568_v20  ;;  %19053 = vmatprep.subr.mxu0 %v3675_v23  ;;  %v3681_v7 = vcombine.high %v600_v60, %v600_v60  ;;  %v371_v20 = vld [vmem:[%s44467_s4 + $0x388] sm:$0xff] }
 0x236   : > { %v11559_v41 = vpop.f32.mrb[108].mxu0  ;;  %v11629_v42 = vpop.f32.mrb[108].mxu1  ;;  %19047 = vmatprep.mubr.f32.mxu1 %v2569_v27  ;;  %19123 = vmatprep.subr.mxu1 %v3676_v28  ;;  %v2637_v28 = vcombine.high %v2635_v14, %v2635_v14  ;;  %v2655_v31 = vcombine.high %v371_v20, %v371_v20 }
 0x237   : > { %v11560_v47 = vadd.f32 %v11559_v41, %v11490_v38  ;;  %v11561_v48 = vpop.f32.mrb[109].mxu0  ;;  %18978 = vmatmul.mubr.f32.vlgmr.msra.gmra.mrb[214].mxu0 %v45233_v4  ;;  %v11631_v49 = vpop.f32.mrb[109].mxu1  ;;  %19048 = vmatmul.mubr.f32.vlgmr.msra.gmra.mrb[214].mxu1 %v2567_v12  ;;  %v2619_v4 = vcombine.high %v45263_v53, %v45263_v53  ;;  %v3682_v12 = vcombine.high %v601_v3, %v601_v3 }
 0x238   : > { %19054 = vmatpush1.xpose.msra.mxu0 %v594_v11  ;;  %19124 = vmatpush1.xpose.msra.mxu1 %v595_v18  ;;  %v2620_v11 = vcombine.high %v2618_v61, %v2618_v61  ;;  %v603_v18 = vld [vmem:[%s44474_s20 + $0x708] sm:$0xff]  ;;  %v45293_v38 = vrot.slane %v371_v20, %v44500_v19  ;;  %v2654_v41 = vcombine.high %v2652_v25, %v2652_v25  ;;  %v373_v48 = vld [vmem:[%s44467_s4 + $0x398] sm:$0xff] }
 0x239   : > { %v11630_v54 = vadd.f32 %v11629_v42, %v11560_v47  ;;  %19117 = vmatprep.mubr.f32.mxu0 %v2585_v36  ;;  %19193 = vmatprep.subr.mxu0 %v3677_v39  ;;  %v372_v36 = vld [vmem:[%s44467_s4 + $0x390] sm:$0xff]  ;;  %v2669_v46 = vrot.slane %v2655_v31, %v44500_v19 }
 0x23a   : > { %v11699_v57 = vpop.f32.mrb[110].mxu0  ;;  %v11769_v58 = vpop.f32.mrb[110].mxu1  ;;  %19187 = vmatprep.mubr.f32.mxu1 %v2586_v43  ;;  %19263 = vmatprep.subr.mxu1 %v3678_v44  ;;  %v3686_v44 = vcombine.high %v605_v35, %v605_v35  ;;  %v2672_v47 = vcombine.high %v372_v36, %v372_v36  ;;  %v611_v20 = vld [vmem:[%s44474_s20 + $0x748] sm:$0xff] }
 0x23b   : > { %v11700_v0 = vadd.f32 %v11699_v57, %v11630_v54  ;;  %v11701_v1 = vpop.f32.mrb[111].mxu0  ;;  %19118 = vmatmul.mubr.f32.vlgmr.msra.gmra.mrb[216].mxu0 %v45243_v21  ;;  %v11771_v2 = vpop.f32.mrb[111].mxu1  ;;  %19188 = vmatmul.mubr.f32.vlgmr.msra.gmra.mrb[216].mxu1 %v2584_v30  ;;  %v2636_v21 = vcombine.high %v45273_v5, %v45273_v5  ;;  %v604_v30 = vld [vmem:[%s44474_s20 + $0x710] sm:$0xff]  ;;  %v45303_v54 = vrot.slane %v372_v36, %v44500_v19  ;;  %v613_v36 = vld [vmem:[%s44474_s20 + $0x758] sm:$0xff] }
 0x23c   : > { %19194 = vmatpush1.xpose.msra.mxu0 %v596_v29  ;;  %19264 = vmatpush1.xpose.msra.mxu1 %v597_v34  ;;  %v3684_v29 = vcombine.high %v603_v18, %v603_v18  ;;  %v2689_v57 = vcombine.high %v373_v48, %v373_v48  ;;  %v2686_v63 = vrot.slane %v2672_v47, %v44500_v19 }
 0x23d   : > { %v11770_v6 = vadd.f32 %v11769_v58, %v11700_v0  ;;  %19257 = vmatprep.mubr.f32.mxu0 %v2602_v52  ;;  %19333 = vmatprep.subr.mxu0 %v3679_v55  ;;  %v607_v52 = vld [vmem:[%s44474_s20 + $0x728] sm:$0xff] }
 0x23e   : > { %v11839_v9 = vpop.f32.mrb[112].mxu0  ;;  %v11909_v10 = vpop.f32.mrb[112].mxu1  ;;  %19327 = vmatprep.mubr.f32.mxu1 %v2603_v56  ;;  %19403 = vmatprep.subr.mxu1 %v3680_v59 }
 0x23f   : > { %v11840_v15 = vadd.f32 %v11839_v9, %v11770_v6  ;;  %v11841_v16 = vpop.f32.mrb[113].mxu0  ;;  %19258 = vmatmul.mubr.f32.vlgmr.msra.gmra.mrb[218].mxu0 %v45253_v37  ;;  %v11911_v17 = vpop.f32.mrb[113].mxu1  ;;  %19328 = vmatmul.mubr.f32.vlgmr.msra.gmra.mrb[218].mxu1 %v2601_v40  ;;  %v2653_v37 = vcombine.high %v45283_v22, %v45283_v22  ;;  %v3685_v40 = vcombine.high %v604_v30, %v604_v30 }
 0x240   : > { %19334 = vmatpush1.xpose.msra.mxu0 %v598_v45  ;;  %19404 = vmatpush1.xpose.msra.mxu1 %v599_v50  ;;  %v606_v45 = vld [vmem:[%s44474_s20 + $0x720] sm:$0xff]  ;;  %v2696_v6 = vrot.slane %v373_v48, %v44500_v19  ;;  %v2703_v9 = vrot.slane %v2689_v57, %v44500_v19 }
 0x241   : > { %v11910_v23 = vadd.f32 %v11909_v10, %v11840_v15  ;;  %19397 = vmatprep.mubr.f32.mxu0 %v2619_v4  ;;  %19473 = vmatprep.subr.mxu0 %v3681_v7  ;;  %v3687_v56 = vcombine.high %v606_v45, %v606_v45  ;;  %v374_v4 = vld [vmem:[%s44467_s4 + $0x3a0] sm:$0xff] }
 0x242   : > { %v11979_v26 = vpop.f32.mrb[114].mxu0  ;;  %v12049_v27 = vpop.f32.mrb[114].mxu1  ;;  %19467 = vmatprep.mubr.f32.mxu1 %v2620_v11  ;;  %19543 = vmatprep.subr.mxu1 %v3682_v12  ;;  %v2688_v12 = vcombine.high %v2686_v63, %v2686_v63  ;;  %v2706_v15 = vcombine.high %v374_v4, %v374_v4 }
 0x243   : > { %v11980_v32 = vadd.f32 %v11979_v26, %v11910_v23  ;;  %v11981_v33 = vpop.f32.mrb[115].mxu0  ;;  %19398 = vmatmul.mubr.f32.vlgmr.msra.gmra.mrb[220].mxu0 %v45263_v53  ;;  %v12051_v34 = vpop.f32.mrb[115].mxu1  ;;  %19468 = vmatmul.mubr.f32.vlgmr.msra.gmra.mrb[220].mxu1 %v2618_v61  ;;  %v2670_v53 = vcombine.high %v45293_v38, %v45293_v38  ;;  %v3688_v61 = vcombine.high %v607_v52, %v607_v52 }
 0x244   : > { %19474 = vmatpush1.xpose.msra.mxu0 %v600_v60  ;;  %19544 = vmatpush1.xpose.msra.mxu1 %v601_v3  ;;  %v2671_v60 = vcombine.high %v2669_v46, %v2669_v46  ;;  %v609_v3 = vld [vmem:[%s44474_s20 + $0x738] sm:$0xff]  ;;  %v2713_v23 = vrot.slane %v374_v4, %v44500_v19  ;;  %v2705_v26 = vcombine.high %v2703_v9, %v2703_v9 }
 0x245   : > { %v12050_v39 = vadd.f32 %v12049_v27, %v11980_v32  ;;  %19537 = vmatprep.mubr.f32.mxu0 %v2636_v21  ;;  %19613 = vmatprep.subr.mxu0 %v3683_v24  ;;  %v375_v21 = vld [vmem:[%s44467_s4 + $0x3a8] sm:$0xff]  ;;  %v2720_v31 = vrot.slane %v2706_v15, %v44500_v19 }
 0x246   : > { %v12119_v42 = vpop.f32.mrb[116].mxu0  ;;  %v12189_v43 = vpop.f32.mrb[116].mxu1  ;;  %19607 = vmatprep.mubr.f32.mxu1 %v2637_v28  ;;  %19683 = vmatprep.subr.mxu1 %v3684_v29  ;;  %v3692_v29 = vcombine.high %v611_v20, %v611_v20  ;;  %v2723_v32 = vcombine.high %v375_v21, %v375_v21 }
 0x247   : > { %v12120_v49 = vadd.f32 %v12119_v42, %v12050_v39  ;;  %v12121_v50 = vpop.f32.mrb[117].mxu0  ;;  %19538 = vmatmul.mubr.f32.vlgmr.msra.gmra.mrb[222].mxu0 %v45273_v5  ;;  %v12191_v51 = vpop.f32.mrb[117].mxu1  ;;  %19608 = vmatmul.mubr.f32.vlgmr.msra.gmra.mrb[222].mxu1 %v2635_v14  ;;  %v2687_v5 = vcombine.high %v45303_v54, %v45303_v54  ;;  %v610_v14 = vld [vmem:[%s44474_s20 + $0x740] sm:$0xff] }
 0x248   : > { %19614 = vmatpush1.xpose.msra.mxu0 %v602_v13  ;;  %19684 = vmatpush1.xpose.msra.mxu1 %v603_v18  ;;  %v3690_v13 = vcombine.high %v609_v3, %v609_v3 }
 0x249   : > { %v12190_v55 = vadd.f32 %v12189_v43, %v12120_v49  ;;  %19677 = vmatprep.mubr.f32.mxu0 %v2653_v37  ;;  %19753 = vmatprep.subr.mxu0 %v3685_v40  ;;  %v2721_v37 = vcombine.high %v2713_v23, %v2713_v23  ;;  %v2730_v40 = vrot.slane %v375_v21, %v44500_v19 }
 0x24a   : > { %v12259_v58 = vpop.f32.mrb[118].mxu0  ;;  %v12329_v59 = vpop.f32.mrb[118].mxu1  ;;  %19747 = vmatprep.mubr.f32.mxu1 %v2654_v41  ;;  %19823 = vmatprep.subr.mxu1 %v3686_v44  ;;  %v2722_v43 = vcombine.high %v2720_v31, %v2720_v31  ;;  %v3694_v44 = vcombine.high %v613_v36, %v613_v36 }
 0x24b   : > { %v12260_v0 = vadd.f32 %v12259_v58, %v12190_v55  ;;  %v12261_v1 = vpop.f32.mrb[119].mxu0  ;;  %19678 = vmatmul.mubr.f32.vlgmr.msra.gmra.mrb[224].mxu0 %v45283_v22  ;;  %v12331_v2 = vpop.f32.mrb[119].mxu1  ;;  %19748 = vmatmul.mubr.f32.vlgmr.msra.gmra.mrb[224].mxu1 %v2652_v25  ;;  %v2704_v22 = vcombine.high %v2696_v6, %v2696_v6  ;;  %v3691_v25 = vcombine.high %v610_v14, %v610_v14 }
 0x24c   : > { %19754 = vmatpush1.xpose.msra.mxu0 %v604_v30  ;;  %19824 = vmatpush1.xpose.msra.mxu1 %v605_v35  ;;  %v612_v30 = vld [vmem:[%s44474_s20 + $0x750] sm:$0xff]  ;;  %v2738_v51 = vcombine.high %v2730_v40, %v2730_v40 }
 0x24d   : > { %v12330_v7 = vadd.f32 %v12329_v59, %v12260_v0  ;;  %19817 = vmatprep.mubr.f32.mxu0 %v2670_v53  ;;  %19893 = vmatprep.subr.mxu0 %v3687_v56  ;;  %v3693_v39 = vcombine.high %v612_v30, %v612_v30  ;;  %v42819_v53 = vld.sshfl [vmem:[%s44467_s4 + $0x3b0] sm:$0x33 pattern:$0x76325410] }
 0x24e   : > { %v12399_v10 = vpop.f32.mrb[120].mxu0  ;;  %v12469_v11 = vpop.f32.mrb[120].mxu1  ;;  %19887 = vmatprep.mubr.f32.mxu1 %v2671_v60  ;;  %19963 = vmatprep.subr.mxu1 %v3688_v61  ;;  %v2747_v59 = vcombine.high %v42819_v53, %v42819_v53 }
 0x24f   : > { %v12400_v16 = vadd.f32 %v12399_v10, %v12330_v7  ;;  %v12401_v17 = vpop.f32.mrb[121].mxu0  ;;  %19818 = vmatmul.mubr.f32.vlgmr.msra.gmra.mrb[226].mxu0 %v45293_v38  ;;  %v12471_v18 = vpop.f32.mrb[121].mxu1  ;;  %19888 = vmatmul.mubr.f32.vlgmr.msra.gmra.mrb[226].mxu1 %v2669_v46  ;;  %v2737_v46 = vrot.slane %v2723_v32, %v44500_v19 }
 0x250   : > { %19894 = vmatpush1.xpose.msra.mxu0 %v606_v45  ;;  %19964 = vmatpush1.xpose.msra.mxu1 %v607_v52  ;;  %v614_v45 = vld [vmem:[%s44474_s20 + $0x760] sm:$0xff] }
 0x251   : > { %v12470_v24 = vadd.f32 %v12469_v11, %v12400_v16  ;;  %19957 = vmatprep.mubr.f32.mxu0 %v2687_v5  ;;  %20033 = vmatprep.subr.mxu0 %v3689_v8  ;;  %v3695_v52 = vcombine.high %v614_v45, %v614_v45  ;;  %v2739_v56 = vcombine.high %v2737_v46, %v2737_v46 }
 0x252   : > { %v12539_v27 = vpop.f32.mrb[122].mxu0  ;;  %v12609_v28 = vpop.f32.mrb[122].mxu1  ;;  %20027 = vmatprep.mubr.f32.mxu1 %v2688_v12  ;;  %20103 = vmatprep.subr.mxu1 %v3690_v13 }
 0x253   : > { %v12540_v33 = vadd.f32 %v12539_v27, %v12470_v24  ;;  %v12541_v34 = vpop.f32.mrb[123].mxu0  ;;  %19958 = vmatmul.mubr.f32.vlgmr.msra.gmra.mrb[228].mxu0 %v45303_v54  ;;  %v12611_v35 = vpop.f32.mrb[123].mxu1  ;;  %20028 = vmatmul.mubr.f32.vlgmr.msra.gmra.mrb[228].mxu1 %v2686_v63 }
 0x254   : > { %20034 = vmatpush1.xpose.msra.mxu0 %v608_v62  ;;  %20104 = vmatpush1.xpose.msra.mxu1 %v609_v3 }
 0x255   : > { %v12610_v38 = vadd.f32 %v12609_v28, %v12540_v33  ;;  %20097 = vmatprep.mubr.f32.mxu0 %v2704_v22  ;;  %20173 = vmatprep.subr.mxu0 %v3691_v25 }
 0x256   : > { %v12679_v41 = vpop.f32.mrb[124].mxu0  ;;  %v12749_v42 = vpop.f32.mrb[124].mxu1  ;;  %20167 = vmatprep.mubr.f32.mxu1 %v2705_v26  ;;  %20243 = vmatprep.subr.mxu1 %v3692_v29 }
 0x257   : > { %v12680_v47 = vadd.f32 %v12679_v41, %v12610_v38  ;;  %v12681_v48 = vpop.f32.mrb[125].mxu0  ;;  %20098 = vmatmul.mubr.f32.vlgmr.msra.gmra.mrb[230].mxu0 %v2696_v6  ;;  %v12751_v49 = vpop.f32.mrb[125].mxu1  ;;  %20168 = vmatmul.mubr.f32.vlgmr.msra.gmra.mrb[230].mxu1 %v2703_v9 }
 0x258   : > { %20174 = vmatpush1.xpose.msra.mxu0 %v610_v14  ;;  %20244 = vmatpush1.xpose.msra.mxu1 %v611_v20 }
 0x259   : > { %v12750_v50 = vadd.f32 %v12749_v42, %v12680_v47  ;;  %20237 = vmatprep.mubr.f32.mxu0 %v2721_v37  ;;  %20313 = vmatprep.subr.mxu0 %v3693_v39 }
 0x25a   : > { %v12819_v54 = vpop.f32.mrb[126].mxu0  ;;  %v12889_v55 = vpop.f32.mrb[126].mxu1  ;;  %20307 = vmatprep.mubr.f32.mxu1 %v2722_v43  ;;  %20383 = vmatprep.subr.mxu1 %v3694_v44 }
 0x25b   : > { %v12820_v57 = vadd.f32 %v12819_v54, %v12750_v50  ;;  %v12821_v19 = vpop.f32.mrb[127].mxu0  ;;  %20238 = vmatmul.mubr.f32.vlgmr.msra.gmra.mrb[232].mxu0 %v2713_v23  ;;  %v12891_v58 = vpop.f32.mrb[127].mxu1  ;;  %20308 = vmatmul.mubr.f32.vlgmr.msra.gmra.mrb[232].mxu1 %v2720_v31 }
 0x25c   : > { %20314 = vmatpush1.xpose.msra.mxu0 %v612_v30  ;;  %20384 = vmatpush1.xpose.msra.mxu1 %v613_v36 }
 0x25d   : > { %v12890_v60 = vadd.f32 %v12889_v55, %v12820_v57  ;;  %20377 = vmatprep.mubr.f32.mxu0 %v2738_v51  ;;  %20453 = vmatprep.subr.mxu0 %v3695_v52 }
 0x25e   : > { %v12959_v61 = vpop.f32.mrb[128].mxu0  ;;  %v13029_v62 = vpop.f32.mrb[128].mxu1  ;;  %20447 = vmatprep.mubr.f32.mxu1 %v2739_v56 }
 0x25f   : > { %v12960_v63 = vadd.f32 %v12959_v61, %v12890_v60  ;;  %v12961_v0 = vpop.f32.mrb[129].mxu0  ;;  %20378 = vmatmul.mubr.f32.vlgmr.msra.gmra.mrb[234].mxu0 %v2730_v40  ;;  %v13031_v1 = vpop.f32.mrb[129].mxu1  ;;  %20448 = vmatmul.mubr.f32.vlgmr.msra.gmra.mrb[234].mxu1 %v2737_v46 }
 0x260   : > { %20454 = vmatpush1.xpose.msra.mxu0 %v614_v45  ;;  %20517 = vmatprep.mubr.f32.mxu0 %v2747_v59 }
 0x261   : > { %v13030_v2 = vadd.f32 %v13029_v62, %v12960_v63 }
 0x262   : > { %v13099_v3 = vpop.f32.mrb[130].mxu0  ;;  %v13169_v4 = vpop.f32.mrb[130].mxu1 }
 0x263   : > { %v13100_v5 = vadd.f32 %v13099_v3, %v13030_v2  ;;  %v13101_v6 = vpop.f32.mrb[131].mxu0  ;;  %20518 = vmatmul.mubr.f32.vlgmr.msra.gmra.mrb[236].mxu0 %v42819_v53  ;;  %v13171_v7 = vpop.f32.mrb[131].mxu1 }
 0x265   : > { %v13170_v8 = vadd.f32 %v13169_v4, %v13100_v5 }
 0x266   : > { %v13239_v9 = vpop.f32.mrb[132].mxu0  ;;  %v13309_v10 = vpop.f32.mrb[132].mxu1 }
 0x267   : > { %v13240_v11 = vadd.f32 %v13239_v9, %v13170_v8  ;;  %v13241_v12 = vpop.f32.mrb[133].mxu0  ;;  %v13311_v13 = vpop.f32.mrb[133].mxu1 }
 0x269   : > { %v13310_v14 = vadd.f32 %v13309_v10, %v13240_v11 }
 0x26a   : > { %v13379_v15 = vpop.f32.mrb[134].mxu0  ;;  %v13449_v16 = vpop.f32.mrb[134].mxu1 }
 0x26b   : > { %v13380_v17 = vadd.f32 %v13379_v15, %v13310_v14  ;;  %v13381_v18 = vpop.f32.mrb[135].mxu0  ;;  %v13451_v20 = vpop.f32.mrb[135].mxu1 }
 0x26d   : > { %v13450_v21 = vadd.f32 %v13449_v16, %v13380_v17 }
 0x26e   : > { %v13519_v22 = vpop.f32.mrb[136].mxu0  ;;  %v13589_v23 = vpop.f32.mrb[136].mxu1 }
 0x26f   : > { %v13520_v24 = vadd.f32 %v13519_v22, %v13450_v21  ;;  %v13521_v25 = vpop.f32.mrb[137].mxu0  ;;  %v13591_v26 = vpop.f32.mrb[137].mxu1 }
 0x271   : > { %v13590_v27 = vadd.f32 %v13589_v23, %v13520_v24 }
 0x272   : > { %v13659_v28 = vpop.f32.mrb[138].mxu0  ;;  %v13729_v29 = vpop.f32.mrb[138].mxu1 }
 0x273   : > { %v13660_v30 = vadd.f32 %v13659_v28, %v13590_v27  ;;  %v13661_v31 = vpop.f32.mrb[139].mxu0  ;;  %v13731_v32 = vpop.f32.mrb[139].mxu1 }
 0x275   : > { %v13730_v33 = vadd.f32 %v13729_v29, %v13660_v30 }
 0x276   : > { %v13799_v34 = vpop.f32.mrb[140].mxu0  ;;  %v13869_v35 = vpop.f32.mrb[140].mxu1 }
 0x277   : > { %v13800_v36 = vadd.f32 %v13799_v34, %v13730_v33  ;;  %v13801_v37 = vpop.f32.mrb[141].mxu0  ;;  %v13871_v38 = vpop.f32.mrb[141].mxu1 }
 0x279   : > { %v13870_v39 = vadd.f32 %v13869_v35, %v13800_v36 }
 0x27a   : > { %v13939_v40 = vpop.f32.mrb[142].mxu0  ;;  %v14009_v41 = vpop.f32.mrb[142].mxu1 }
 0x27b   : > { %v13940_v42 = vadd.f32 %v13939_v40, %v13870_v39  ;;  %v13941_v43 = vpop.f32.mrb[143].mxu0  ;;  %v14011_v44 = vpop.f32.mrb[143].mxu1 }
 0x27d   : > { %v14010_v45 = vadd.f32 %v14009_v41, %v13940_v42 }
 0x27e   : > { %v14079_v46 = vpop.f32.mrb[144].mxu0  ;;  %v14149_v47 = vpop.f32.mrb[144].mxu1 }
 0x27f   : > { %v14080_v48 = vadd.f32 %v14079_v46, %v14010_v45  ;;  %v14081_v49 = vpop.f32.mrb[145].mxu0  ;;  %v14151_v50 = vpop.f32.mrb[145].mxu1 }
 0x281   : > { %v14150_v51 = vadd.f32 %v14149_v47, %v14080_v48 }
 0x282   : > { %v14219_v52 = vpop.f32.mrb[146].mxu0  ;;  %v14289_v53 = vpop.f32.mrb[146].mxu1 }
 0x283   : > { %v14220_v54 = vadd.f32 %v14219_v52, %v14150_v51  ;;  %v14221_v55 = vpop.f32.mrb[147].mxu0  ;;  %v14291_v56 = vpop.f32.mrb[147].mxu1 }
 0x285   : > { %v14290_v57 = vadd.f32 %v14289_v53, %v14220_v54 }
 0x286   : > { %v14359_v19 = vpop.f32.mrb[148].mxu0  ;;  %v14429_v58 = vpop.f32.mrb[148].mxu1 }
 0x287   : > { %v14360_v59 = vadd.f32 %v14359_v19, %v14290_v57  ;;  %v14361_v60 = vpop.f32.mrb[149].mxu0  ;;  %v14431_v61 = vpop.f32.mrb[149].mxu1 }
 0x289   : > { %v14430_v62 = vadd.f32 %v14429_v58, %v14360_v59 }
 0x28a   : > { %v14499_v63 = vpop.f32.mrb[150].mxu0  ;;  %v14569_v0 = vpop.f32.mrb[150].mxu1 }
 0x28b   : > { %v14500_v1 = vadd.f32 %v14499_v63, %v14430_v62  ;;  %v14501_v2 = vpop.f32.mrb[151].mxu0  ;;  %v14571_v3 = vpop.f32.mrb[151].mxu1 }
 0x28d   : > { %v14570_v4 = vadd.f32 %v14569_v0, %v14500_v1 }
 0x28e   : > { %v14639_v5 = vpop.f32.mrb[152].mxu0  ;;  %v14709_v6 = vpop.f32.mrb[152].mxu1 }
 0x28f   : > { %v14640_v7 = vadd.f32 %v14639_v5, %v14570_v4  ;;  %v14641_v8 = vpop.f32.mrb[153].mxu0  ;;  %v14711_v9 = vpop.f32.mrb[153].mxu1 }
 0x291   : > { %v14710_v10 = vadd.f32 %v14709_v6, %v14640_v7 }
 0x292   : > { %v14779_v11 = vpop.f32.mrb[154].mxu0  ;;  %v14849_v12 = vpop.f32.mrb[154].mxu1 }
 0x293   : > { %v14780_v13 = vadd.f32 %v14779_v11, %v14710_v10  ;;  %v14781_v14 = vpop.f32.mrb[155].mxu0  ;;  %v14851_v15 = vpop.f32.mrb[155].mxu1 }
 0x295   : > { %v14850_v16 = vadd.f32 %v14849_v12, %v14780_v13 }
 0x296   : > { %v14919_v17 = vpop.f32.mrb[156].mxu0  ;;  %v14989_v18 = vpop.f32.mrb[156].mxu1 }
 0x297   : > { %v14920_v20 = vadd.f32 %v14919_v17, %v14850_v16  ;;  %v14921_v21 = vpop.f32.mrb[157].mxu0  ;;  %v14991_v22 = vpop.f32.mrb[157].mxu1 }
 0x299   : > { %v14990_v23 = vadd.f32 %v14989_v18, %v14920_v20 }
 0x29a   : > { %v15059_v24 = vpop.f32.mrb[158].mxu0  ;;  %v15129_v25 = vpop.f32.mrb[158].mxu1 }
 0x29b   : > { %v15060_v26 = vadd.f32 %v15059_v24, %v14990_v23  ;;  %v15061_v27 = vpop.f32.mrb[159].mxu0  ;;  %v15131_v28 = vpop.f32.mrb[159].mxu1 }
 0x29d   : > { %v15130_v29 = vadd.f32 %v15129_v25, %v15060_v26 }
 0x29e   : > { %v15199_v30 = vpop.f32.mrb[160].mxu0  ;;  %v15269_v31 = vpop.f32.mrb[160].mxu1 }
 0x29f   : > { %v15200_v32 = vadd.f32 %v15199_v30, %v15130_v29  ;;  %v15201_v33 = vpop.f32.mrb[161].mxu0  ;;  %v15271_v34 = vpop.f32.mrb[161].mxu1 }
 0x2a1   : > { %v15270_v35 = vadd.f32 %v15269_v31, %v15200_v32 }
 0x2a2   : > { %v15339_v36 = vpop.f32.mrb[162].mxu0  ;;  %v15409_v37 = vpop.f32.mrb[162].mxu1 }
 0x2a3   : > { %v15340_v38 = vadd.f32 %v15339_v36, %v15270_v35  ;;  %v15341_v39 = vpop.f32.mrb[163].mxu0  ;;  %v15411_v40 = vpop.f32.mrb[163].mxu1 }
 0x2a5   : > { %v15410_v41 = vadd.f32 %v15409_v37, %v15340_v38 }
 0x2a6   : > { %v15479_v42 = vpop.f32.mrb[164].mxu0  ;;  %v15549_v43 = vpop.f32.mrb[164].mxu1 }
 0x2a7   : > { %v15480_v44 = vadd.f32 %v15479_v42, %v15410_v41  ;;  %v15481_v45 = vpop.f32.mrb[165].mxu0  ;;  %v15551_v46 = vpop.f32.mrb[165].mxu1 }
 0x2a9   : > { %v15550_v47 = vadd.f32 %v15549_v43, %v15480_v44 }
 0x2aa   : > { %v15619_v48 = vpop.f32.mrb[166].mxu0  ;;  %v15689_v49 = vpop.f32.mrb[166].mxu1 }
 0x2ab   : > { %v15620_v50 = vadd.f32 %v15619_v48, %v15550_v47  ;;  %v15621_v51 = vpop.f32.mrb[167].mxu0  ;;  %v15691_v52 = vpop.f32.mrb[167].mxu1 }
 0x2ad   : > { %v15690_v53 = vadd.f32 %v15689_v49, %v15620_v50 }
 0x2ae   : > { %v15759_v54 = vpop.f32.mrb[168].mxu0  ;;  %v15829_v55 = vpop.f32.mrb[168].mxu1 }
 0x2af   : > { %v15760_v56 = vadd.f32 %v15759_v54, %v15690_v53  ;;  %v15761_v57 = vpop.f32.mrb[169].mxu0  ;;  %v15831_v19 = vpop.f32.mrb[169].mxu1 }
 0x2b1   : > { %v15830_v58 = vadd.f32 %v15829_v55, %v15760_v56 }
 0x2b2   : > { %v15899_v59 = vpop.f32.mrb[170].mxu0  ;;  %v15969_v60 = vpop.f32.mrb[170].mxu1 }
 0x2b3   : > { %v15900_v61 = vadd.f32 %v15899_v59, %v15830_v58  ;;  %v15901_v62 = vpop.f32.mrb[171].mxu0  ;;  %v15971_v63 = vpop.f32.mrb[171].mxu1 }
 0x2b5   : > { %v15970_v0 = vadd.f32 %v15969_v60, %v15900_v61 }
 0x2b6   : > { %v16039_v1 = vpop.f32.mrb[172].mxu0  ;;  %v16109_v2 = vpop.f32.mrb[172].mxu1 }
 0x2b7   : > { %v16040_v3 = vadd.f32 %v16039_v1, %v15970_v0  ;;  %v16041_v4 = vpop.f32.mrb[173].mxu0  ;;  %v16111_v5 = vpop.f32.mrb[173].mxu1 }
 0x2b9   : > { %v16110_v6 = vadd.f32 %v16109_v2, %v16040_v3 }
 0x2ba   : > { %v16179_v7 = vpop.f32.mrb[174].mxu0  ;;  %v16249_v8 = vpop.f32.mrb[174].mxu1 }
 0x2bb   : > { %v16180_v9 = vadd.f32 %v16179_v7, %v16110_v6  ;;  %v16181_v10 = vpop.f32.mrb[175].mxu0  ;;  %v16251_v11 = vpop.f32.mrb[175].mxu1 }
 0x2bd   : > { %v16250_v12 = vadd.f32 %v16249_v8, %v16180_v9 }
 0x2be   : > { %v16319_v13 = vpop.f32.mrb[176].mxu0  ;;  %v16389_v14 = vpop.f32.mrb[176].mxu1 }
 0x2bf   : > { %v16320_v15 = vadd.f32 %v16319_v13, %v16250_v12  ;;  %v16321_v16 = vpop.f32.mrb[177].mxu0  ;;  %v16391_v17 = vpop.f32.mrb[177].mxu1 }
 0x2c1   : > { %v16390_v18 = vadd.f32 %v16389_v14, %v16320_v15 }
 0x2c2   : > { %v16459_v20 = vpop.f32.mrb[178].mxu0  ;;  %v16529_v21 = vpop.f32.mrb[178].mxu1 }
 0x2c3   : > { %v16460_v22 = vadd.f32 %v16459_v20, %v16390_v18  ;;  %v16461_v23 = vpop.f32.mrb[179].mxu0  ;;  %v16531_v24 = vpop.f32.mrb[179].mxu1 }
 0x2c5   : > { %v16530_v25 = vadd.f32 %v16529_v21, %v16460_v22 }
 0x2c6   : > { %v16599_v26 = vpop.f32.mrb[180].mxu0  ;;  %v16669_v27 = vpop.f32.mrb[180].mxu1 }
 0x2c7   : > { %v16600_v28 = vadd.f32 %v16599_v26, %v16530_v25  ;;  %v16601_v29 = vpop.f32.mrb[181].mxu0  ;;  %v16671_v30 = vpop.f32.mrb[181].mxu1 }
 0x2c9   : > { %v16670_v31 = vadd.f32 %v16669_v27, %v16600_v28 }
 0x2ca   : > { %v16739_v32 = vpop.f32.mrb[182].mxu0  ;;  %v16809_v33 = vpop.f32.mrb[182].mxu1 }
 0x2cb   : > { %v16740_v34 = vadd.f32 %v16739_v32, %v16670_v31  ;;  %v16741_v35 = vpop.f32.mrb[183].mxu0  ;;  %v16811_v36 = vpop.f32.mrb[183].mxu1 }
 0x2cd   : > { %v16810_v37 = vadd.f32 %v16809_v33, %v16740_v34 }
 0x2ce   : > { %v16879_v38 = vpop.f32.mrb[184].mxu0  ;;  %v16949_v39 = vpop.f32.mrb[184].mxu1 }
 0x2cf   : > { %v16880_v40 = vadd.f32 %v16879_v38, %v16810_v37  ;;  %v16881_v41 = vpop.f32.mrb[185].mxu0  ;;  %v16951_v42 = vpop.f32.mrb[185].mxu1 }
 0x2d1   : > { %v16950_v43 = vadd.f32 %v16949_v39, %v16880_v40 }
 0x2d2   : > { %v17019_v44 = vpop.f32.mrb[186].mxu0  ;;  %v17089_v45 = vpop.f32.mrb[186].mxu1 }
 0x2d3   : > { %v17020_v46 = vadd.f32 %v17019_v44, %v16950_v43  ;;  %v17021_v47 = vpop.f32.mrb[187].mxu0  ;;  %v17091_v48 = vpop.f32.mrb[187].mxu1 }
 0x2d5   : > { %v17090_v49 = vadd.f32 %v17089_v45, %v17020_v46 }
 0x2d6   : > { %v17159_v50 = vpop.f32.mrb[188].mxu0  ;;  %v17229_v51 = vpop.f32.mrb[188].mxu1 }
 0x2d7   : > { %v17160_v52 = vadd.f32 %v17159_v50, %v17090_v49  ;;  %v17161_v53 = vpop.f32.mrb[189].mxu0  ;;  %v17231_v54 = vpop.f32.mrb[189].mxu1 }
 0x2d9   : > { %v17230_v55 = vadd.f32 %v17229_v51, %v17160_v52 }
 0x2da   : > { %v17299_v56 = vpop.f32.mrb[190].mxu0  ;;  %v17369_v57 = vpop.f32.mrb[190].mxu1 }
 0x2db   : > { %v17300_v19 = vadd.f32 %v17299_v56, %v17230_v55  ;;  %v17301_v58 = vpop.f32.mrb[191].mxu0  ;;  %v17371_v59 = vpop.f32.mrb[191].mxu1 }
 0x2dd   : > { %v17370_v60 = vadd.f32 %v17369_v57, %v17300_v19 }
 0x2de   : > { %v17439_v61 = vpop.f32.mrb[192].mxu0  ;;  %v17509_v62 = vpop.f32.mrb[192].mxu1 }
 0x2df   : > { %v17440_v63 = vadd.f32 %v17439_v61, %v17370_v60  ;;  %v17441_v0 = vpop.f32.mrb[193].mxu0  ;;  %v17511_v1 = vpop.f32.mrb[193].mxu1 }
 0x2e1   : > { %v17510_v2 = vadd.f32 %v17509_v62, %v17440_v63 }
 0x2e2   : > { %v17579_v3 = vpop.f32.mrb[194].mxu0  ;;  %v17649_v4 = vpop.f32.mrb[194].mxu1 }
 0x2e3   : > { %v17580_v5 = vadd.f32 %v17579_v3, %v17510_v2  ;;  %v17581_v6 = vpop.f32.mrb[195].mxu0  ;;  %v17651_v7 = vpop.f32.mrb[195].mxu1 }
 0x2e5   : > { %v17650_v8 = vadd.f32 %v17649_v4, %v17580_v5 }
 0x2e6   : > { %v17719_v9 = vpop.f32.mrb[196].mxu0  ;;  %v17789_v10 = vpop.f32.mrb[196].mxu1 }
 0x2e7   : > { %v17720_v11 = vadd.f32 %v17719_v9, %v17650_v8  ;;  %v17721_v12 = vpop.f32.mrb[197].mxu0  ;;  %v17791_v13 = vpop.f32.mrb[197].mxu1 }
 0x2e9   : > { %v17790_v14 = vadd.f32 %v17789_v10, %v17720_v11 }
 0x2ea   : > { %v17859_v15 = vpop.f32.mrb[198].mxu0  ;;  %v17929_v16 = vpop.f32.mrb[198].mxu1 }
 0x2eb   : > { %v17860_v17 = vadd.f32 %v17859_v15, %v17790_v14  ;;  %v17861_v18 = vpop.f32.mrb[199].mxu0  ;;  %v17931_v20 = vpop.f32.mrb[199].mxu1 }
 0x2ed   : > { %v17930_v21 = vadd.f32 %v17929_v16, %v17860_v17 }
 0x2ee   : > { %v17999_v22 = vpop.f32.mrb[200].mxu0  ;;  %v18069_v23 = vpop.f32.mrb[200].mxu1 }
 0x2ef   : > { %v18000_v24 = vadd.f32 %v17999_v22, %v17930_v21  ;;  %v18001_v25 = vpop.f32.mrb[201].mxu0  ;;  %v18071_v26 = vpop.f32.mrb[201].mxu1 }
 0x2f1   : > { %v18070_v27 = vadd.f32 %v18069_v23, %v18000_v24 }
 0x2f2   : > { %v18139_v28 = vpop.f32.mrb[202].mxu0  ;;  %v18209_v29 = vpop.f32.mrb[202].mxu1 }
 0x2f3   : > { %v18140_v30 = vadd.f32 %v18139_v28, %v18070_v27  ;;  %v18141_v31 = vpop.f32.mrb[203].mxu0  ;;  %v18211_v32 = vpop.f32.mrb[203].mxu1 }
 0x2f5   : > { %v18210_v33 = vadd.f32 %v18209_v29, %v18140_v30 }
 0x2f6   : > { %v18279_v34 = vpop.f32.mrb[204].mxu0  ;;  %v18349_v35 = vpop.f32.mrb[204].mxu1 }
 0x2f7   : > { %v18280_v36 = vadd.f32 %v18279_v34, %v18210_v33  ;;  %v18281_v37 = vpop.f32.mrb[205].mxu0  ;;  %v18351_v38 = vpop.f32.mrb[205].mxu1 }
 0x2f9   : > { %v18350_v39 = vadd.f32 %v18349_v35, %v18280_v36 }
 0x2fa   : > { %v18419_v40 = vpop.f32.mrb[206].mxu0  ;;  %v18489_v41 = vpop.f32.mrb[206].mxu1 }
 0x2fb   : > { %v18420_v42 = vadd.f32 %v18419_v40, %v18350_v39  ;;  %v18421_v43 = vpop.f32.mrb[207].mxu0  ;;  %v18491_v44 = vpop.f32.mrb[207].mxu1 }
 0x2fd   : > { %v18490_v45 = vadd.f32 %v18489_v41, %v18420_v42 }
 0x2fe   : > { %v18559_v46 = vpop.f32.mrb[208].mxu0  ;;  %v18629_v47 = vpop.f32.mrb[208].mxu1 }
 0x2ff   : > { %v18560_v48 = vadd.f32 %v18559_v46, %v18490_v45  ;;  %v18561_v49 = vpop.f32.mrb[209].mxu0  ;;  %v18631_v50 = vpop.f32.mrb[209].mxu1 }
 0x301   : > { %v18630_v51 = vadd.f32 %v18629_v47, %v18560_v48 }
 0x302   : > { %v18699_v52 = vpop.f32.mrb[210].mxu0  ;;  %v18769_v53 = vpop.f32.mrb[210].mxu1 }
 0x303   : > { %v18700_v54 = vadd.f32 %v18699_v52, %v18630_v51  ;;  %v18701_v55 = vpop.f32.mrb[211].mxu0  ;;  %v18771_v56 = vpop.f32.mrb[211].mxu1 }
 0x305   : > { %v18770_v57 = vadd.f32 %v18769_v53, %v18700_v54 }
 0x306   : > { %v18839_v19 = vpop.f32.mrb[212].mxu0  ;;  %v18909_v58 = vpop.f32.mrb[212].mxu1 }
 0x307   : > { %v18840_v59 = vadd.f32 %v18839_v19, %v18770_v57  ;;  %v18841_v60 = vpop.f32.mrb[213].mxu0  ;;  %v18911_v61 = vpop.f32.mrb[213].mxu1 }
 0x309   : > { %v18910_v62 = vadd.f32 %v18909_v58, %v18840_v59 }
 0x30a   : > { %v18979_v63 = vpop.f32.mrb[214].mxu0  ;;  %v19049_v0 = vpop.f32.mrb[214].mxu1 }
 0x30b   : > { %v18980_v1 = vadd.f32 %v18979_v63, %v18910_v62  ;;  %v18981_v2 = vpop.f32.mrb[215].mxu0  ;;  %v19051_v3 = vpop.f32.mrb[215].mxu1 }
 0x30d   : > { %v19050_v4 = vadd.f32 %v19049_v0, %v18980_v1  ;;  %v377_v1 = vld [vmem:[#allocation2] sm:$0x3] }
 0x30e   : > { %v19119_v5 = vpop.f32.mrb[216].mxu0  ;;  %v19189_v6 = vpop.f32.mrb[216].mxu1 }
 0x30f   : > { %v19120_v7 = vadd.f32 %v19119_v5, %v19050_v4  ;;  %v19121_v8 = vpop.f32.mrb[217].mxu0  ;;  %v19191_v9 = vpop.f32.mrb[217].mxu1 }
 0x311   : > { %v19190_v10 = vadd.f32 %v19189_v6, %v19120_v7 }
 0x312   : > { %v19259_v11 = vpop.f32.mrb[218].mxu0  ;;  %v19329_v12 = vpop.f32.mrb[218].mxu1 }
 0x313   : > { %v19260_v13 = vadd.f32 %v19259_v11, %v19190_v10  ;;  %v19261_v14 = vpop.f32.mrb[219].mxu0  ;;  %v19331_v15 = vpop.f32.mrb[219].mxu1 }
 0x315   : > { %v19330_v16 = vadd.f32 %v19329_v12, %v19260_v13 }
 0x316   : > { %v19399_v17 = vpop.f32.mrb[220].mxu0  ;;  %v19469_v18 = vpop.f32.mrb[220].mxu1 }
 0x317   : > { %v19400_v20 = vadd.f32 %v19399_v17, %v19330_v16  ;;  %v19401_v21 = vpop.f32.mrb[221].mxu0  ;;  %v19471_v22 = vpop.f32.mrb[221].mxu1 }
 0x319   : > { %v19470_v23 = vadd.f32 %v19469_v18, %v19400_v20 }
 0x31a   : > { %v19539_v24 = vpop.f32.mrb[222].mxu0  ;;  %v19609_v25 = vpop.f32.mrb[222].mxu1 }
 0x31b   : > { %v19540_v26 = vadd.f32 %v19539_v24, %v19470_v23  ;;  %v19541_v27 = vpop.f32.mrb[223].mxu0  ;;  %v19611_v28 = vpop.f32.mrb[223].mxu1 }
 0x31d   : > { %v19610_v29 = vadd.f32 %v19609_v25, %v19540_v26 }
 0x31e   : > { %v19679_v30 = vpop.f32.mrb[224].mxu0  ;;  %v19749_v31 = vpop.f32.mrb[224].mxu1 }
 0x31f   : > { %v19680_v32 = vadd.f32 %v19679_v30, %v19610_v29  ;;  %v19681_v33 = vpop.f32.mrb[225].mxu0  ;;  %v19751_v34 = vpop.f32.mrb[225].mxu1 }
 0x321   : > { %v19750_v35 = vadd.f32 %v19749_v31, %v19680_v32 }
 0x322   : > { %v19819_v36 = vpop.f32.mrb[226].mxu0  ;;  %v19889_v37 = vpop.f32.mrb[226].mxu1 }
 0x323   : > { %v19820_v38 = vadd.f32 %v19819_v36, %v19750_v35  ;;  %v19821_v39 = vpop.f32.mrb[227].mxu0  ;;  %v19891_v40 = vpop.f32.mrb[227].mxu1 }
 0x325   : > { %v19890_v41 = vadd.f32 %v19889_v37, %v19820_v38 }
 0x326   : > { %v19959_v42 = vpop.f32.mrb[228].mxu0  ;;  %v20029_v43 = vpop.f32.mrb[228].mxu1 }
 0x327   : > { %v19960_v44 = vadd.f32 %v19959_v42, %v19890_v41  ;;  %v19961_v45 = vpop.f32.mrb[229].mxu0  ;;  %v20031_v46 = vpop.f32.mrb[229].mxu1 }
 0x329   : > { %v20030_v47 = vadd.f32 %v20029_v43, %v19960_v44 }
 0x32a   : > { %v20099_v48 = vpop.f32.mrb[230].mxu0  ;;  %v20169_v49 = vpop.f32.mrb[230].mxu1 }
 0x32b   : > { %v20100_v50 = vadd.f32 %v20099_v48, %v20030_v47  ;;  %v20101_v51 = vpop.f32.mrb[231].mxu0  ;;  %v20171_v52 = vpop.f32.mrb[231].mxu1 }
 0x32d   : > { %v20170_v53 = vadd.f32 %v20169_v49, %v20100_v50 }
 0x32e   : > { %v20239_v54 = vpop.f32.mrb[232].mxu0  ;;  %v20309_v55 = vpop.f32.mrb[232].mxu1 }
 0x32f   : > { %v20240_v56 = vadd.f32 %v20239_v54, %v20170_v53  ;;  %v20241_v57 = vpop.f32.mrb[233].mxu0  ;;  %v20311_v19 = vpop.f32.mrb[233].mxu1 }
 0x331   : > { %v20310_v58 = vadd.f32 %v20309_v55, %v20240_v56 }
 0x332   : > { %v20379_v59 = vpop.f32.mrb[234].mxu0  ;;  %v20449_v60 = vpop.f32.mrb[234].mxu1 }
 0x333   : > { %v20380_v61 = vadd.f32 %v20379_v59, %v20310_v58  ;;  %v20381_v62 = vpop.f32.mrb[235].mxu0  ;;  %v20451_v63 = vpop.f32.mrb[235].mxu1 }
 0x335   : > { %v20450_v0 = vadd.f32 %v20449_v60, %v20380_v61 }
 0x336   : > { %v20519_v2 = vpop.f32.mrb[236].mxu0 }
 0x337   : > { %v20520_v3 = vadd.f32 %v20519_v2, %v20450_v0  ;;  %v20521_v4 = vpop.f32.mrb[237].mxu0 }
 0x339   : > { %v20523_v5 = vadd.f32 %v20520_v3, %v377_v1 }
 0x33b   : > { %20525 = vst.msk [vmem:[#allocation2] sm:$0x3] %vm20524_vm1, %v20523_v5 }
 0x33c PF: > { %p42820_p5 = scmp.lt.s32.totalorder %s44484_s3, 5 }
 0x33d   : > { %v25156_v6 = vld [vmem:[%s44474_s20] sm:$0xff] (!%p42820_p5)  ;;  %v25157_v7 = vld [vmem:[%s44474_s20 + $0x8] sm:$0xff] (!%p42820_p5)  ;;  %v20530_v8 = vlaneseq (!%p42820_p5)  ;;  %s21005_s16 = smul.u32 (!%p42820_p5), 60672, %s44484_s3  ;;  %v44265_v12 = vmov (!%p42820_p5), 1983009808   ;;  %v25158_v15 = vld [vmem:[%s44474_s20 + $0x10] sm:$0xff] (!%p42820_p5) }
 0x33e   : > { %20529 = sbr.rel (%p42820_p5) target bundleno = 1647 (0x66f), region = 48  ;;  %v21955_v9 = vld [vmem:[%s44467_s4] sm:$0xff] (!%p42820_p5)  ;;  %v25630_v10 = vcombine.high (!%p42820_p5), %v25156_v6, %v25156_v6  ;;  %v25631_v11 = vcombine.high (!%p42820_p5), %v25157_v7, %v25157_v7  ;;  %v22195_v13 = vunpack.c.l.s4 (!%p42820_p5), %v44265_v12  ;;  %v21956_v17 = vld [vmem:[%s44467_s4 + $0x8] sm:$0xff] (!%p42820_p5)  ;;  %v25632_v22 = vcombine.high (!%p42820_p5), %v25158_v15, %v25158_v15  ;;  %v21957_v45 = vld [vmem:[%s44467_s4 + $0x10] sm:$0xff] (!%p42820_p5) }
 0x33f   : > { %v22193_v14 = vcombine.high (!%p42820_p5), %v21955_v9, %v21955_v9  ;;  %v25159_v16 = vld [vmem:[%s44474_s20 + $0x18] sm:$0xff] (!%p42820_p5)  ;;  %v45335_v18 = vand.u32 (!%p42820_p5), 127, %v20530_v8  ;;  %v45337_v20 = vstv (!%p42820_p5), %s21005_s16  ;;  %v22198_v21 = vshrl.u32 (!%p42820_p5), %v20530_v8, 7  ;;  %v45340_v23 = vld [vmem:[%s44474_s20 + $0x20] sm:$0xff] (!%p42820_p5)  ;;  %v25161_v44 = vld [vmem:[%s44474_s20 + $0x28] sm:$0xff] (!%p42820_p5) }
 0x340   : > { %26104 = vmatprep.subr.mxu0 (!%p42820_p5), %v25630_v10  ;;  %26174 = vmatprep.subr.mxu1 (!%p42820_p5), %v25631_v11  ;;  %v22196_v24 = vunpack.c.0.s8 (!%p42820_p5), %v22195_v13  ;;  %v25633_v25 = vcombine.high (!%p42820_p5), %v25159_v16, %v25159_v16  ;;  %v25634_v26 = vcombine.high (!%p42820_p5), %v45340_v23, %v45340_v23  ;;  %v22210_v27 = vcombine.high (!%p42820_p5), %v21956_v17, %v21956_v17  ;;  %v45365_v46 = vld [vmem:[%s44474_s20 + $0x30] sm:$0xff] (!%p42820_p5)  ;;  %v25163_v57 = vld [vmem:[%s44474_s20 + $0x38] sm:$0xff] (!%p42820_p5)  ;;  %v45383_v1 = vld [vmem:[%s44474_s20 + $0x40] sm:$0xff] (!%p42820_p5) }
 0x341   : > { %26105 = vmatpush1.xpose.msra.mxu0 (!%p42820_p5), %v25156_v6  ;;  %26175 = vmatpush1.xpose.msra.mxu1 (!%p42820_p5), %v25157_v7  ;;  %v20532_v28 = vadd.s32 (!%p42820_p5), 128, %v45335_v18  ;;  %v20534_v29 = vadd.s32 (!%p42820_p5), 384, %v45335_v18  ;;  %v21007_v30 = vadd.s32 (!%p42820_p5), %v45337_v20, %v45335_v18  ;;  %v20533_v31 = vadd.s32 (!%p42820_p5), 256, %v45335_v18  ;;  %v21958_v0 = vld [vmem:[%s44467_s4 + $0x18] sm:$0xff] (!%p42820_p5)  ;;  %v25165_v11 = vld [vmem:[%s44474_s20 + $0x48] sm:$0xff] (!%p42820_p5) }
 0x342   : > { %v45349_v32 = vsub.s32 (!%p42820_p5), %v22196_v24, %v22198_v21  ;;  %26244 = vmatprep.subr.mxu0 (!%p42820_p5), %v25632_v22  ;;  %26314 = vmatprep.subr.mxu1 (!%p42820_p5), %v25633_v25  ;;  %v20536_v33 = vadd.s32 (!%p42820_p5), 640, %v45335_v18  ;;  %v20535_v34 = vadd.s32 (!%p42820_p5), 512, %v45335_v18  ;;  %v20538_v35 = vadd.s32 (!%p42820_p5), 896, %v45335_v18  ;;  %v45405_v22 = vld [vmem:[%s44474_s20 + $0x50] sm:$0xff] (!%p42820_p5) }
 0x343   : > { %v21008_v36 = vadd.s32 (!%p42820_p5), %v45337_v20, %v20532_v28  ;;  %v21010_v37 = vadd.s32 (!%p42820_p5), %v45337_v20, %v20534_v29  ;;  %vm21481_vm2 = vcmp.lt.s32.totalorder (!%p42820_p5), %v21007_v30, 363791  ;;  %v21009_v38 = vadd.s32 (!%p42820_p5), %v45337_v20, %v20533_v31 }
 0x344   : > { %v22200_v39 = vrot.slane (!%p42820_p5), %v21955_v9, %v45349_v32  ;;  %v22207_v40 = vrot.slane (!%p42820_p5), %v22193_v14, %v45349_v32  ;;  %v21012_v41 = vadd.s32 (!%p42820_p5), %v45337_v20, %v20536_v33  ;;  %v22217_v42 = vrot.slane (!%p42820_p5), %v21956_v17, %v45349_v32 }
 0x345   : > { %vm21482_vm3 = vcmp.lt.s32.totalorder %v21008_v36, 363791  ;;  %vm21484_vm4 = vcmp.lt.s32.totalorder %v21010_v37, 363791  ;;  %vm21483_vm5 = vcmp.lt.s32.totalorder %v21009_v38, 363791  ;;  %v21011_v43 = vadd.s32 %v45337_v20, %v20535_v34  ;;  %v25167_v34 = vld [vmem:[%s44474_s20 + $0x58] sm:$0xff]  ;;  %v21960_v38 = vld [vmem:[%s44467_s4 + $0x28] sm:$0xff] }
 0x346   : > { %v22208_v47 = vcombine.high %v22200_v39, %v22200_v39  ;;  %v22209_v48 = vcombine.high %v22207_v40, %v22207_v40  ;;  %vm21486_vm6 = vcmp.lt.s32.totalorder %v21012_v41, 363791  ;;  %v22225_v49 = vcombine.high %v22217_v42, %v22217_v42 }
 0x347   : > { %vm21485_vm7 = vcmp.lt.s32.totalorder %v21011_v43, 363791  ;;  %v21014_v50 = vadd.s32 %v45337_v20, %v20538_v35  ;;  %v22224_v51 = vrot.slane %v22210_v27, %v45349_v32  ;;  %v20537_v52 = vadd.s32 768, %v45335_v18 }
 0x348   : > { %42822 = vmatprep.mubr.msk.f32.mxu0 %vm21482_vm3, %v22208_v47  ;;  %42824 = vmatprep.mubr.msk.f32.mxu1 %vm21484_vm4, %v22209_v48  ;;  %v25635_v53 = vcombine.high %v25161_v44, %v25161_v44  ;;  %v20540_v54 = vadd.s32 1152, %v45335_v18  ;;  %v22234_v55 = vrot.slane %v21957_v45, %v45349_v32  ;;  %v25636_v56 = vcombine.high %v45365_v46, %v45365_v46 }
 0x349   : > { %42823 = vmatmul.mubr.msk.f32.vlgmr.msra.gmra.mrb[0].mxu0 %vm21481_vm2, %v22200_v39  ;;  %42825 = vmatmul.mubr.msk.f32.vlgmr.msra.gmra.mrb[0].mxu1 %vm21483_vm5, %v22207_v40  ;;  %vm21488_vm8 = vcmp.lt.s32.totalorder %v21014_v50, 363791  ;;  %v22226_v19 = vcombine.high %v22224_v51, %v22224_v51  ;;  %v21013_v58 = vadd.s32 %v45337_v20, %v20537_v52  ;;  %v20539_v59 = vadd.s32 1024, %v45335_v18 }
 0x34a   : > { %26245 = vmatpush1.xpose.msra.mxu0 %v25158_v15  ;;  %26315 = vmatpush1.xpose.msra.mxu1 %v25159_v16  ;;  %v21016_v60 = vadd.s32 %v45337_v20, %v20540_v54  ;;  %v22242_v61 = vcombine.high %v22234_v55, %v22234_v55  ;;  %v20542_v62 = vadd.s32 1408, %v45335_v18  ;;  %v22227_v63 = vcombine.high %v21957_v45, %v21957_v45  ;;  %v21959_v15 = vld [vmem:[%s44467_s4 + $0x20] sm:$0xff] }
 0x34b   : > { %42826 = vmatprep.mubr.msk.f32.mxu0 %vm21486_vm6, %v22225_v49  ;;  %26384 = vmatprep.subr.mxu0 %v25634_v26  ;;  %vm21487_vm9 = vcmp.lt.s32.totalorder %v21013_v58, 363791  ;;  %v21015_v2 = vadd.s32 %v45337_v20, %v20539_v59  ;;  %v20541_v3 = vadd.s32 1280, %v45335_v18  ;;  %v25637_v4 = vcombine.high %v25163_v57, %v25163_v57 }
 0x34c   : > { %42828 = vmatprep.mubr.msk.f32.mxu1 %vm21488_vm8, %v22226_v19  ;;  %26454 = vmatprep.subr.mxu1 %v25635_v53  ;;  %vm21490_vm10 = vcmp.lt.s32.totalorder %v21016_v60, 363791  ;;  %v21018_v5 = vadd.s32 %v45337_v20, %v20542_v62  ;;  %v22241_v6 = vrot.slane %v22227_v63, %v45349_v32  ;;  %v20544_v7 = vadd.s32 1664, %v45335_v18  ;;  %v25169_v53 = vld [vmem:[%s44474_s20 + $0x68] sm:$0xff]  ;;  %v25170_v19 = vld [vmem:[%s44474_s20 + $0x70] sm:$0xff] }
 0x34d   : > { %42827 = vmatmul.mubr.msk.f32.vlgmr.msra.gmra.mrb[2].mxu0 %vm21485_vm7, %v22217_v42  ;;  %42829 = vmatmul.mubr.msk.f32.vlgmr.msra.gmra.mrb[2].mxu1 %vm21487_vm9, %v22224_v51  ;;  %vm21489_vm11 = vcmp.lt.s32.totalorder %v21015_v2, 363791  ;;  %v21017_v8 = vadd.s32 %v45337_v20, %v20541_v3  ;;  %v22251_v9 = vrot.slane %v21958_v0, %v45349_v32  ;;  %v25638_v10 = vcombine.high %v45383_v1, %v45383_v1  ;;  %v25168_v42 = vld [vmem:[%s44474_s20 + $0x60] sm:$0xff] }
 0x34e   : > { %26385 = vmatpush1.xpose.msra.mxu0 %v45340_v23  ;;  %26455 = vmatpush1.xpose.msra.mxu1 %v25161_v44  ;;  %vm21492_vm12 = vcmp.lt.s32.totalorder %v21018_v5, 363791  ;;  %v22243_v12 = vcombine.high %v22241_v6, %v22241_v6  ;;  %v21020_v13 = vadd.s32 %v45337_v20, %v20544_v7  ;;  %v20543_v14 = vadd.s32 1536, %v45335_v18 }
 0x34f   : > { %42830 = vmatprep.mubr.msk.f32.mxu0 %vm21490_vm10, %v22242_v61  ;;  %26524 = vmatprep.subr.mxu0 %v25636_v56  ;;  %vm21491_vm13 = vcmp.lt.s32.totalorder %v21017_v8, 363791  ;;  %v22259_v16 = vcombine.high %v22251_v9, %v22251_v9  ;;  %v20546_v17 = vadd.s32 1920, %v45335_v18  ;;  %v22244_v21 = vcombine.high %v21958_v0, %v21958_v0 }
 0x350   : > { %42832 = vmatprep.mubr.msk.f32.mxu1 %vm21492_vm12, %v22243_v12  ;;  %26594 = vmatprep.subr.mxu1 %v25637_v4  ;;  %vm21494_vm14 = vcmp.lt.s32.totalorder %v21020_v13, 363791  ;;  %v21019_v23 = vadd.s32 %v45337_v20, %v20543_v14  ;;  %v20545_v24 = vadd.s32 1792, %v45335_v18  ;;  %v25639_v25 = vcombine.high %v25165_v11, %v25165_v11  ;;  %v25172_v12 = vld [vmem:[%s44474_s20 + $0x80] sm:$0xff] }
 0x351   : > { %42831 = vmatmul.mubr.msk.f32.vlgmr.msra.gmra.mrb[4].mxu0 %vm21489_vm11, %v22234_v55  ;;  %42833 = vmatmul.mubr.msk.f32.vlgmr.msra.gmra.mrb[4].mxu1 %vm21491_vm13, %v22241_v6  ;;  %v21022_v26 = vadd.s32 %v45337_v20, %v20546_v17  ;;  %v22258_v27 = vrot.slane %v22244_v21, %v45349_v32  ;;  %v20548_v28 = vadd.s32 2176, %v45335_v18  ;;  %v22268_v29 = vrot.slane %v21959_v15, %v45349_v32  ;;  %v25171_v6 = vld [vmem:[%s44474_s20 + $0x78] sm:$0xff] }
 0x352   : > { %26525 = vmatpush1.xpose.msra.mxu0 %v45365_v46  ;;  %26595 = vmatpush1.xpose.msra.mxu1 %v25163_v57  ;;  %vm21493_vm15 = vcmp.lt.s32.totalorder %v21019_v23, 363791  ;;  %v21021_v30 = vadd.s32 %v45337_v20, %v20545_v24  ;;  %v25640_v31 = vcombine.high %v45405_v22, %v45405_v22  ;;  %v20547_v33 = vadd.s32 2048, %v45335_v18  ;;  %v21961_v57 = vld [vmem:[%s44467_s4 + $0x30] sm:$0xff] }
 0x353   : > { %42834 = vmatprep.mubr.msk.f32.mxu0 %vm21494_vm14, %v22259_v16  ;;  %26664 = vmatprep.subr.mxu0 %v25638_v10  ;;  %vm21496_vm0 = vcmp.lt.s32.totalorder %v21022_v26, 363791  ;;  %v22260_v35 = vcombine.high %v22258_v27, %v22258_v27  ;;  %v21024_v36 = vadd.s32 %v45337_v20, %v20548_v28  ;;  %v22276_v37 = vcombine.high %v22268_v29, %v22268_v29 }
 0x354   : > { %vm21495_vm1 = vcmp.lt.s32.totalorder %v21021_v30, 363791  ;;  %26734 = vmatprep.subr.mxu1 %v25639_v25  ;;  %v21023_v39 = vadd.s32 %v45337_v20, %v20547_v33  ;;  %v20550_v40 = vadd.s32 2432, %v45335_v18  ;;  %v22261_v41 = vcombine.high %v21959_v15, %v21959_v15  ;;  %v25173_v25 = vld [vmem:[%s44474_s20 + $0x88] sm:$0xff] }
 0x355   : > { %42835 = vmatmul.mubr.msk.f32.vlgmr.msra.gmra.mrb[6].mxu0 %vm21493_vm15, %v22251_v9  ;;  %42836 = vmatprep.mubr.msk.f32.mxu1 %vm21496_vm0, %v22260_v35  ;;  %vm21498_vm2 = vcmp.lt.s32.totalorder %v21024_v36, 363791  ;;  %v20549_v43 = vadd.s32 2304, %v45335_v18  ;;  %v25641_v44 = vcombine.high %v25167_v34, %v25167_v34  ;;  %v20552_v45 = vadd.s32 2688, %v45335_v18 }
 0x356   : > { %26665 = vmatpush1.xpose.msra.mxu0 %v45383_v1  ;;  %42837 = vmatmul.mubr.msk.f32.vlgmr.msra.gmra.mrb[6].mxu1 %vm21495_vm1, %v22258_v27  ;;  %vm21497_vm3 = vcmp.lt.s32.totalorder %v21023_v39, 363791  ;;  %v21026_v46 = vadd.s32 %v45337_v20, %v20550_v40  ;;  %v22275_v47 = vrot.slane %v22261_v41, %v45349_v32  ;;  %v22285_v48 = vrot.slane %v21960_v38, %v45349_v32 }
 0x357   : > { %26735 = vmatpush1.xpose.msra.mxu1 %v25165_v11  ;;  %42838 = vmatprep.mubr.msk.f32.mxu0 %vm21498_vm2, %v22276_v37  ;;  %v21025_v49 = vadd.s32 %v45337_v20, %v20549_v43  ;;  %v21028_v50 = vadd.s32 %v45337_v20, %v20552_v45  ;;  %v25642_v51 = vcombine.high %v25168_v42, %v25168_v42  ;;  %v20551_v52 = vadd.s32 2560, %v45335_v18  ;;  %v21962_v11 = vld [vmem:[%s44467_s4 + $0x38] sm:$0xff] }
 0x358   : > { %26804 = vmatprep.subr.mxu0 %v25640_v31  ;;  %vm21500_vm4 = vcmp.lt.s32.totalorder %v21026_v46, 363791  ;;  %v22277_v54 = vcombine.high %v22275_v47, %v22275_v47  ;;  %26874 = vmatprep.subr.mxu1 %v25641_v44  ;;  %v22293_v55 = vcombine.high %v22285_v48, %v22285_v48  ;;  %v20554_v56 = vadd.s32 2944, %v45335_v18  ;;  %v25175_v45 = vld [vmem:[%s44474_s20 + $0x98] sm:$0xff] }
 0x359   : > { %42839 = vmatmul.mubr.msk.f32.vlgmr.msra.gmra.mrb[8].mxu0 %vm21497_vm3, %v22268_v29  ;;  %vm21499_vm5 = vcmp.lt.s32.totalorder %v21025_v49, 363791  ;;  %vm21502_vm6 = vcmp.lt.s32.totalorder %v21028_v50, 363791  ;;  %v21027_v58 = vadd.s32 %v45337_v20, %v20551_v52  ;;  %v22278_v59 = vcombine.high %v21960_v38, %v21960_v38  ;;  %v21963_v29 = vld [vmem:[%s44467_s4 + $0x40] sm:$0xff]  ;;  %v21964_v49 = vld [vmem:[%s44467_s4 + $0x48] sm:$0xff] }
 0x35a   : > { %42840 = vmatprep.mubr.msk.f32.mxu1 %vm21500_vm4, %v22277_v54  ;;  %26805 = vmatpush1.xpose.msra.mxu0 %v45405_v22  ;;  %v21030_v60 = vadd.s32 %v45337_v20, %v20554_v56  ;;  %v20553_v61 = vadd.s32 2816, %v45335_v18  ;;  %v25643_v62 = vcombine.high %v25169_v53, %v25169_v53  ;;  %v20556_v63 = vadd.s32 3200, %v45335_v18 }
 0x35b   : > { %42841 = vmatmul.mubr.msk.f32.vlgmr.msra.gmra.mrb[8].mxu1 %vm21499_vm5, %v22275_v47  ;;  %42842 = vmatprep.mubr.msk.f32.mxu0 %vm21502_vm6, %v22293_v55  ;;  %vm21501_vm7 = vcmp.lt.s32.totalorder %v21027_v58, 363791  ;;  %v22292_v0 = vrot.slane %v22278_v59, %v45349_v32  ;;  %v22302_v1 = vrot.slane %v21961_v57, %v45349_v32  ;;  %v25644_v2 = vcombine.high %v25170_v19, %v25170_v19 }
 0x35c   : > { %26875 = vmatpush1.xpose.msra.mxu1 %v25167_v34  ;;  %26944 = vmatprep.subr.mxu0 %v25642_v51  ;;  %vm21504_vm8 = vcmp.lt.s32.totalorder %v21030_v60, 363791  ;;  %v21029_v3 = vadd.s32 %v45337_v20, %v20553_v61  ;;  %v21032_v4 = vadd.s32 %v45337_v20, %v20556_v63  ;;  %v20555_v5 = vadd.s32 3072, %v45335_v18  ;;  %v25174_v34 = vld [vmem:[%s44474_s20 + $0x90] sm:$0xff]  ;;  %v25177_v63 = vld [vmem:[%s44474_s20 + $0xa8] sm:$0xff] }
 0x35d   : > { %42843 = vmatmul.mubr.msk.f32.vlgmr.msra.gmra.mrb[10].mxu0 %vm21501_vm7, %v22285_v48  ;;  %v22294_v7 = vcombine.high %v22292_v0, %v22292_v0  ;;  %27014 = vmatprep.subr.mxu1 %v25643_v62  ;;  %v22310_v8 = vcombine.high %v22302_v1, %v22302_v1  ;;  %v20558_v9 = vadd.s32 3456, %v45335_v18  ;;  %v22295_v10 = vcombine.high %v21961_v57, %v21961_v57 }
 0x35e   : > { %26945 = vmatpush1.xpose.msra.mxu0 %v25168_v42  ;;  %vm21503_vm9 = vcmp.lt.s32.totalorder %v21029_v3, 363791  ;;  %vm21506_vm10 = vcmp.lt.s32.totalorder %v21032_v4, 363791  ;;  %v21031_v13 = vadd.s32 %v45337_v20, %v20555_v5  ;;  %v20557_v14 = vadd.s32 3328, %v45335_v18  ;;  %v21965_v3 = vld [vmem:[%s44467_s4 + $0x50] sm:$0xff] }
 0x35f   : > { %42844 = vmatprep.mubr.msk.f32.mxu1 %vm21504_vm8, %v22294_v7  ;;  %42846 = vmatprep.mubr.msk.f32.mxu0 %vm21506_vm10, %v22310_v8  ;;  %v21034_v15 = vadd.s32 %v45337_v20, %v20558_v9  ;;  %v22309_v16 = vrot.slane %v22295_v10, %v45349_v32  ;;  %v25645_v17 = vcombine.high %v25171_v6, %v25171_v6  ;;  %v20560_v21 = vadd.s32 3712, %v45335_v18  ;;  %v25178_v4 = vld [vmem:[%s44474_s20 + $0xb0] sm:$0xff] }
 0x360   : > { %42845 = vmatmul.mubr.msk.f32.vlgmr.msra.gmra.mrb[10].mxu1 %vm21503_vm9, %v22292_v0  ;;  %27084 = vmatprep.subr.mxu0 %v25644_v2  ;;  %vm21505_vm11 = vcmp.lt.s32.totalorder %v21031_v13, 363791  ;;  %v21033_v22 = vadd.s32 %v45337_v20, %v20557_v14  ;;  %v22319_v23 = vrot.slane %v21962_v11, %v45349_v32  ;;  %v25646_v24 = vcombine.high %v25172_v12, %v25172_v12 }
 0x361   : > { %27015 = vmatpush1.xpose.msra.mxu1 %v25169_v53  ;;  %42847 = vmatmul.mubr.msk.f32.vlgmr.msra.gmra.mrb[12].mxu0 %vm21505_vm11, %v22302_v1  ;;  %vm21508_vm12 = vcmp.lt.s32.totalorder %v21034_v15, 363791  ;;  %v22311_v26 = vcombine.high %v22309_v16, %v22309_v16  ;;  %v21036_v27 = vadd.s32 %v45337_v20, %v20560_v21  ;;  %v20559_v28 = vadd.s32 3584, %v45335_v18  ;;  %v25176_v53 = vld [vmem:[%s44474_s20 + $0xa0] sm:$0xff] }
 0x362   : > { %27085 = vmatpush1.xpose.msra.mxu0 %v25170_v19  ;;  %vm21507_vm13 = vcmp.lt.s32.totalorder %v21033_v22, 363791  ;;  %27154 = vmatprep.subr.mxu1 %v25645_v17  ;;  %v22327_v30 = vcombine.high %v22319_v23, %v22319_v23  ;;  %v20562_v31 = vadd.s32 3968, %v45335_v18  ;;  %v22312_v33 = vcombine.high %v21962_v11, %v21962_v11  ;;  %v25179_v17 = vld [vmem:[%s44474_s20 + $0xb8] sm:$0xff] }
 0x363   : > { %42848 = vmatprep.mubr.msk.f32.mxu1 %vm21508_vm12, %v22311_v26  ;;  %vm21510_vm14 = vcmp.lt.s32.totalorder %v21036_v27, 363791  ;;  %27224 = vmatprep.subr.mxu0 %v25646_v24  ;;  %v21035_v35 = vadd.s32 %v45337_v20, %v20559_v28  ;;  %v20561_v36 = vadd.s32 3840, %v45335_v18  ;;  %v25647_v37 = vcombine.high %v25173_v25, %v25173_v25  ;;  %v25180_v26 = vld [vmem:[%s44474_s20 + $0xc0] sm:$0xff] }
 0x364   : > { %42849 = vmatmul.mubr.msk.f32.vlgmr.msra.gmra.mrb[12].mxu1 %vm21507_vm13, %v22309_v16  ;;  %42850 = vmatprep.mubr.msk.f32.mxu0 %vm21510_vm14, %v22327_v30  ;;  %v21038_v38 = vadd.s32 %v45337_v20, %v20562_v31  ;;  %v22326_v39 = vrot.slane %v22312_v33, %v45349_v32  ;;  %v20564_v40 = vadd.s32 4224, %v45335_v18  ;;  %v22336_v41 = vrot.slane %v21963_v29, %v45349_v32 }
 0x365   : > { %27155 = vmatpush1.xpose.msra.mxu1 %v25171_v6  ;;  %vm21509_vm15 = vcmp.lt.s32.totalorder %v21035_v35, 363791  ;;  %v21037_v42 = vadd.s32 %v45337_v20, %v20561_v36  ;;  %v25648_v43 = vcombine.high %v25174_v34, %v25174_v34  ;;  %v20563_v44 = vadd.s32 4096, %v45335_v18 }
 0x366   : > { %42851 = vmatmul.mubr.msk.f32.vlgmr.msra.gmra.mrb[14].mxu0 %vm21509_vm15, %v22319_v23  ;;  %vm21512_vm0 = vcmp.lt.s32.totalorder %v21038_v38, 363791  ;;  %v22328_v46 = vcombine.high %v22326_v39, %v22326_v39  ;;  %27294 = vmatprep.subr.mxu1 %v25647_v37  ;;  %v21040_v47 = vadd.s32 %v45337_v20, %v20564_v40  ;;  %v22344_v48 = vcombine.high %v22336_v41, %v22336_v41  ;;  %v25181_v37 = vld [vmem:[%s44474_s20 + $0xc8] sm:$0xff] }
 0x367   : > { %27225 = vmatpush1.xpose.msra.mxu0 %v25172_v12  ;;  %vm21511_vm1 = vcmp.lt.s32.totalorder %v21037_v42, 363791  ;;  %v21039_v50 = vadd.s32 %v45337_v20, %v20563_v44  ;;  %v20566_v51 = vadd.s32 4480, %v45335_v18  ;;  %v22329_v52 = vcombine.high %v21963_v29, %v21963_v29 }
 0x368   : > { %42852 = vmatprep.mubr.msk.f32.mxu1 %vm21512_vm0, %v22328_v46  ;;  %vm21514_vm2 = vcmp.lt.s32.totalorder %v21040_v47, 363791  ;;  %27364 = vmatprep.subr.mxu0 %v25648_v43  ;;  %v20565_v54 = vadd.s32 4352, %v45335_v18  ;;  %v25649_v55 = vcombine.high %v25175_v45, %v25175_v45  ;;  %v20568_v56 = vadd.s32 4736, %v45335_v18 }
 0x369   : > { %42853 = vmatmul.mubr.msk.f32.vlgmr.msra.gmra.mrb[14].mxu1 %vm21511_vm1, %v22326_v39  ;;  %42854 = vmatprep.mubr.msk.f32.mxu0 %vm21514_vm2, %v22344_v48  ;;  %vm21513_vm3 = vcmp.lt.s32.totalorder %v21039_v50, 363791  ;;  %v21042_v57 = vadd.s32 %v45337_v20, %v20566_v51  ;;  %v22343_v19 = vrot.slane %v22329_v52, %v45349_v32  ;;  %v22353_v58 = vrot.slane %v21964_v49, %v45349_v32 }
 0x36a   : > { %27295 = vmatpush1.xpose.msra.mxu1 %v25173_v25  ;;  %42855 = vmatmul.mubr.msk.f32.vlgmr.msra.gmra.mrb[16].mxu0 %vm21513_vm3, %v22336_v41  ;;  %v21041_v59 = vadd.s32 %v45337_v20, %v20565_v54  ;;  %v21044_v60 = vadd.s32 %v45337_v20, %v20568_v56  ;;  %v25650_v61 = vcombine.high %v25176_v53, %v25176_v53  ;;  %v20567_v62 = vadd.s32 4608, %v45335_v18  ;;  %v21966_v25 = vld [vmem:[%s44467_s4 + $0x58] sm:$0xff]  ;;  %v21967_v41 = vld [vmem:[%s44467_s4 + $0x60] sm:$0xff] }
 0x36b   : > { %vm21516_vm4 = vcmp.lt.s32.totalorder %v21042_v57, 363791  ;;  %v22345_v0 = vcombine.high %v22343_v19, %v22343_v19  ;;  %27365 = vmatpush1.xpose.msra.mxu0 %v25174_v34  ;;  %27434 = vmatprep.subr.mxu1 %v25649_v55  ;;  %v22361_v1 = vcombine.high %v22353_v58, %v22353_v58  ;;  %v20570_v2 = vadd.s32 4992, %v45335_v18  ;;  %v25183_v56 = vld [vmem:[%s44474_s20 + $0xd8] sm:$0xff] }
 0x36c   : > { %vm21515_vm5 = vcmp.lt.s32.totalorder %v21041_v59, 363791  ;;  %vm21518_vm6 = vcmp.lt.s32.totalorder %v21044_v60, 363791  ;;  %27504 = vmatprep.subr.mxu0 %v25650_v61  ;;  %v21043_v5 = vadd.s32 %v45337_v20, %v20567_v62  ;;  %v22346_v6 = vcombine.high %v21964_v49, %v21964_v49  ;;  %v21968_v59 = vld [vmem:[%s44467_s4 + $0x68] sm:$0xff] }
 0x36d   : > { %42856 = vmatprep.mubr.msk.f32.mxu1 %vm21516_vm4, %v22345_v0  ;;  %42858 = vmatprep.mubr.msk.f32.mxu0 %vm21518_vm6, %v22361_v1  ;;  %v21046_v7 = vadd.s32 %v45337_v20, %v20570_v2  ;;  %v20569_v8 = vadd.s32 4864, %v45335_v18  ;;  %v25651_v9 = vcombine.high %v25177_v63, %v25177_v63  ;;  %v20572_v10 = vadd.s32 5248, %v45335_v18 }
 0x36e   : > { %42857 = vmatmul.mubr.msk.f32.vlgmr.msra.gmra.mrb[16].mxu1 %vm21515_vm5, %v22343_v19  ;;  %vm21517_vm7 = vcmp.lt.s32.totalorder %v21043_v5, 363791  ;;  %v22360_v11 = vrot.slane %v22346_v6, %v45349_v32  ;;  %v22370_v12 = vrot.slane %v21965_v3, %v45349_v32  ;;  %v25652_v13 = vcombine.high %v25178_v4, %v25178_v4 }
 0x36f   : > { %27435 = vmatpush1.xpose.msra.mxu1 %v25175_v45  ;;  %42859 = vmatmul.mubr.msk.f32.vlgmr.msra.gmra.mrb[18].mxu0 %vm21517_vm7, %v22353_v58  ;;  %vm21520_vm8 = vcmp.lt.s32.totalorder %v21046_v7, 363791  ;;  %v21045_v14 = vadd.s32 %v45337_v20, %v20569_v8  ;;  %v21048_v15 = vadd.s32 %v45337_v20, %v20572_v10  ;;  %v20571_v16 = vadd.s32 5120, %v45335_v18  ;;  %v25182_v45 = vld [vmem:[%s44474_s20 + $0xd0] sm:$0xff]  ;;  %v25185_v10 = vld [vmem:[%s44474_s20 + $0xe8] sm:$0xff] }
 0x370   : > { %v22362_v21 = vcombine.high %v22360_v11, %v22360_v11  ;;  %27505 = vmatpush1.xpose.msra.mxu0 %v25176_v53  ;;  %27574 = vmatprep.subr.mxu1 %v25651_v9  ;;  %v22378_v22 = vcombine.high %v22370_v12, %v22370_v12  ;;  %v20574_v23 = vadd.s32 5504, %v45335_v18  ;;  %v22363_v24 = vcombine.high %v21965_v3, %v21965_v3 }
 0x371   : > { %vm21519_vm9 = vcmp.lt.s32.totalorder %v21045_v14, 363791  ;;  %vm21522_vm10 = vcmp.lt.s32.totalorder %v21048_v15, 363791  ;;  %27644 = vmatprep.subr.mxu0 %v25652_v13  ;;  %v21047_v27 = vadd.s32 %v45337_v20, %v20571_v16  ;;  %v20573_v28 = vadd.s32 5376, %v45335_v18  ;;  %v21969_v14 = vld [vmem:[%s44467_s4 + $0x70] sm:$0xff] }
 0x372   : > { %42860 = vmatprep.mubr.msk.f32.mxu1 %vm21520_vm8, %v22362_v21  ;;  %42862 = vmatprep.mubr.msk.f32.mxu0 %vm21522_vm10, %v22378_v22  ;;  %v21050_v29 = vadd.s32 %v45337_v20, %v20574_v23  ;;  %v22377_v30 = vrot.slane %v22363_v24, %v45349_v32  ;;  %v25653_v31 = vcombine.high %v25179_v17, %v25179_v17  ;;  %v20576_v33 = vadd.s32 5760, %v45335_v18  ;;  %v25186_v15 = vld [vmem:[%s44474_s20 + $0xf0] sm:$0xff] }
 0x373   : > { %42861 = vmatmul.mubr.msk.f32.vlgmr.msra.gmra.mrb[18].mxu1 %vm21519_vm9, %v22360_v11  ;;  %vm21521_vm11 = vcmp.lt.s32.totalorder %v21047_v27, 363791  ;;  %v21049_v34 = vadd.s32 %v45337_v20, %v20573_v28  ;;  %v22387_v35 = vrot.slane %v21966_v25, %v45349_v32  ;;  %v25654_v36 = vcombine.high %v25180_v26, %v25180_v26 }
 0x374   : > { %27575 = vmatpush1.xpose.msra.mxu1 %v25177_v63  ;;  %42863 = vmatmul.mubr.msk.f32.vlgmr.msra.gmra.mrb[20].mxu0 %vm21521_vm11, %v22370_v12  ;;  %vm21524_vm12 = vcmp.lt.s32.totalorder %v21050_v29, 363791  ;;  %v22379_v38 = vcombine.high %v22377_v30, %v22377_v30  ;;  %v21052_v39 = vadd.s32 %v45337_v20, %v20576_v33  ;;  %v20575_v40 = vadd.s32 5632, %v45335_v18  ;;  %v25184_v63 = vld [vmem:[%s44474_s20 + $0xe0] sm:$0xff] }
 0x375   : > { %27645 = vmatpush1.xpose.msra.mxu0 %v25178_v4  ;;  %vm21523_vm13 = vcmp.lt.s32.totalorder %v21049_v34, 363791  ;;  %27714 = vmatprep.subr.mxu1 %v25653_v31  ;;  %v22395_v42 = vcombine.high %v22387_v35, %v22387_v35  ;;  %v20578_v43 = vadd.s32 6016, %v45335_v18  ;;  %v22380_v44 = vcombine.high %v21966_v25, %v21966_v25  ;;  %v25187_v31 = vld [vmem:[%s44474_s20 + $0xf8] sm:$0xff] }
 0x376   : > { %42864 = vmatprep.mubr.msk.f32.mxu1 %vm21524_vm12, %v22379_v38  ;;  %vm21526_vm14 = vcmp.lt.s32.totalorder %v21052_v39, 363791  ;;  %27784 = vmatprep.subr.mxu0 %v25654_v36  ;;  %v21051_v46 = vadd.s32 %v45337_v20, %v20575_v40  ;;  %v20577_v47 = vadd.s32 5888, %v45335_v18  ;;  %v25655_v48 = vcombine.high %v25181_v37, %v25181_v37  ;;  %v25188_v38 = vld [vmem:[%s44474_s20 + $0x100] sm:$0xff] }
 0x377   : > { %42865 = vmatmul.mubr.msk.f32.vlgmr.msra.gmra.mrb[20].mxu1 %vm21523_vm13, %v22377_v30  ;;  %42866 = vmatprep.mubr.msk.f32.mxu0 %vm21526_vm14, %v22395_v42  ;;  %v21054_v49 = vadd.s32 %v45337_v20, %v20578_v43  ;;  %v22394_v50 = vrot.slane %v22380_v44, %v45349_v32  ;;  %v20580_v51 = vadd.s32 6272, %v45335_v18  ;;  %v22404_v52 = vrot.slane %v21967_v41, %v45349_v32 }
 0x378   : > { %27715 = vmatpush1.xpose.msra.mxu1 %v25179_v17  ;;  %vm21525_vm15 = vcmp.lt.s32.totalorder %v21051_v46, 363791  ;;  %v21053_v53 = vadd.s32 %v45337_v20, %v20577_v47  ;;  %v25656_v54 = vcombine.high %v25182_v45, %v25182_v45  ;;  %v20579_v55 = vadd.s32 6144, %v45335_v18 }
 0x379   : > { %42867 = vmatmul.mubr.msk.f32.vlgmr.msra.gmra.mrb[22].mxu0 %vm21525_vm15, %v22387_v35  ;;  %vm21528_vm0 = vcmp.lt.s32.totalorder %v21054_v49, 363791  ;;  %v22396_v57 = vcombine.high %v22394_v50, %v22394_v50  ;;  %27854 = vmatprep.subr.mxu1 %v25655_v48  ;;  %v21056_v19 = vadd.s32 %v45337_v20, %v20580_v51  ;;  %v22412_v58 = vcombine.high %v22404_v52, %v22404_v52  ;;  %v25189_v48 = vld [vmem:[%s44474_s20 + $0x108] sm:$0xff] }
 0x37a   : > { %27785 = vmatpush1.xpose.msra.mxu0 %v25180_v26  ;;  %vm21527_vm1 = vcmp.lt.s32.totalorder %v21053_v53, 363791  ;;  %v21055_v60 = vadd.s32 %v45337_v20, %v20579_v55  ;;  %v20582_v61 = vadd.s32 6528, %v45335_v18  ;;  %v22397_v62 = vcombine.high %v21967_v41, %v21967_v41 }
 0x37b   : > { %42868 = vmatprep.mubr.msk.f32.mxu1 %vm21528_vm0, %v22396_v57  ;;  %vm21530_vm2 = vcmp.lt.s32.totalorder %v21056_v19, 363791  ;;  %27924 = vmatprep.subr.mxu0 %v25656_v54  ;;  %v20581_v0 = vadd.s32 6400, %v45335_v18  ;;  %v25657_v1 = vcombine.high %v25183_v56, %v25183_v56  ;;  %v20584_v2 = vadd.s32 6784, %v45335_v18 }
 0x37c   : > { %42869 = vmatmul.mubr.msk.f32.vlgmr.msra.gmra.mrb[22].mxu1 %vm21527_vm1, %v22394_v50  ;;  %42870 = vmatprep.mubr.msk.f32.mxu0 %vm21530_vm2, %v22412_v58  ;;  %vm21529_vm3 = vcmp.lt.s32.totalorder %v21055_v60, 363791  ;;  %v21058_v3 = vadd.s32 %v45337_v20, %v20582_v61  ;;  %v22411_v4 = vrot.slane %v22397_v62, %v45349_v32  ;;  %v22421_v5 = vrot.slane %v21968_v59, %v45349_v32 }
 0x37d   : > { %27855 = vmatpush1.xpose.msra.mxu1 %v25181_v37  ;;  %42871 = vmatmul.mubr.msk.f32.vlgmr.msra.gmra.mrb[24].mxu0 %vm21529_vm3, %v22404_v52  ;;  %v21057_v6 = vadd.s32 %v45337_v20, %v20581_v0  ;;  %v21060_v7 = vadd.s32 %v45337_v20, %v20584_v2  ;;  %v25658_v8 = vcombine.high %v25184_v63, %v25184_v63  ;;  %v20583_v9 = vadd.s32 6656, %v45335_v18  ;;  %v21970_v37 = vld [vmem:[%s44467_s4 + $0x78] sm:$0xff]  ;;  %v21971_v52 = vld [vmem:[%s44467_s4 + $0x80] sm:$0xff] }
 0x37e   : > { %vm21532_vm4 = vcmp.lt.s32.totalorder %v21058_v3, 363791  ;;  %v22413_v11 = vcombine.high %v22411_v4, %v22411_v4  ;;  %27925 = vmatpush1.xpose.msra.mxu0 %v25182_v45  ;;  %27994 = vmatprep.subr.mxu1 %v25657_v1  ;;  %v22429_v12 = vcombine.high %v22421_v5, %v22421_v5  ;;  %v20586_v13 = vadd.s32 7040, %v45335_v18  ;;  %v25191_v2 = vld [vmem:[%s44474_s20 + $0x118] sm:$0xff] }
 0x37f   : > { %vm21531_vm5 = vcmp.lt.s32.totalorder %v21057_v6, 363791  ;;  %vm21534_vm6 = vcmp.lt.s32.totalorder %v21060_v7, 363791  ;;  %28064 = vmatprep.subr.mxu0 %v25658_v8  ;;  %v21059_v16 = vadd.s32 %v45337_v20, %v20583_v9  ;;  %v22414_v17 = vcombine.high %v21968_v59, %v21968_v59  ;;  %v21972_v6 = vld [vmem:[%s44467_s4 + $0x88] sm:$0xff] }
 0x380   : > { %42872 = vmatprep.mubr.msk.f32.mxu1 %vm21532_vm4, %v22413_v11  ;;  %42874 = vmatprep.mubr.msk.f32.mxu0 %vm21534_vm6, %v22429_v12  ;;  %v21062_v21 = vadd.s32 %v45337_v20, %v20586_v13  ;;  %v20585_v22 = vadd.s32 6912, %v45335_v18  ;;  %v25659_v23 = vcombine.high %v25185_v10, %v25185_v10  ;;  %v20588_v24 = vadd.s32 7296, %v45335_v18 }
 0x381   : > { %42873 = vmatmul.mubr.msk.f32.vlgmr.msra.gmra.mrb[24].mxu1 %vm21531_vm5, %v22411_v4  ;;  %vm21533_vm7 = vcmp.lt.s32.totalorder %v21059_v16, 363791  ;;  %v22428_v25 = vrot.slane %v22414_v17, %v45349_v32  ;;  %v22438_v26 = vrot.slane %v21969_v14, %v45349_v32  ;;  %v25660_v27 = vcombine.high %v25186_v15, %v25186_v15 }
 0x382   : > { %27995 = vmatpush1.xpose.msra.mxu1 %v25183_v56  ;;  %42875 = vmatmul.mubr.msk.f32.vlgmr.msra.gmra.mrb[26].mxu0 %vm21533_vm7, %v22421_v5  ;;  %vm21536_vm8 = vcmp.lt.s32.totalorder %v21062_v21, 363791  ;;  %v21061_v28 = vadd.s32 %v45337_v20, %v20585_v22  ;;  %v21064_v29 = vadd.s32 %v45337_v20, %v20588_v24  ;;  %v20587_v30 = vadd.s32 7168, %v45335_v18  ;;  %v25190_v56 = vld [vmem:[%s44474_s20 + $0x110] sm:$0xff]  ;;  %v25193_v24 = vld [vmem:[%s44474_s20 + $0x128] sm:$0xff] }
 0x383   : > { %v22430_v33 = vcombine.high %v22428_v25, %v22428_v25  ;;  %28065 = vmatpush1.xpose.msra.mxu0 %v25184_v63  ;;  %28134 = vmatprep.subr.mxu1 %v25659_v23  ;;  %v22446_v34 = vcombine.high %v22438_v26, %v22438_v26  ;;  %v20590_v35 = vadd.s32 7552, %v45335_v18  ;;  %v22431_v36 = vcombine.high %v21969_v14, %v21969_v14 }
 0x384   : > { %vm21535_vm9 = vcmp.lt.s32.totalorder %v21061_v28, 363791  ;;  %vm21538_vm10 = vcmp.lt.s32.totalorder %v21064_v29, 363791  ;;  %28204 = vmatprep.subr.mxu0 %v25660_v27  ;;  %v21063_v39 = vadd.s32 %v45337_v20, %v20587_v30  ;;  %v20589_v40 = vadd.s32 7424, %v45335_v18  ;;  %v21973_v28 = vld [vmem:[%s44467_s4 + $0x90] sm:$0xff] }
 0x385   : > { %42876 = vmatprep.mubr.msk.f32.mxu1 %vm21536_vm8, %v22430_v33  ;;  %42878 = vmatprep.mubr.msk.f32.mxu0 %vm21538_vm10, %v22446_v34  ;;  %v21066_v41 = vadd.s32 %v45337_v20, %v20590_v35  ;;  %v22445_v42 = vrot.slane %v22431_v36, %v45349_v32  ;;  %v25661_v43 = vcombine.high %v25187_v31, %v25187_v31  ;;  %v20592_v44 = vadd.s32 7808, %v45335_v18  ;;  %v25194_v29 = vld [vmem:[%s44474_s20 + $0x130] sm:$0xff] }
 0x386   : > { %42877 = vmatmul.mubr.msk.f32.vlgmr.msra.gmra.mrb[26].mxu1 %vm21535_vm9, %v22428_v25  ;;  %vm21537_vm11 = vcmp.lt.s32.totalorder %v21063_v39, 363791  ;;  %v21065_v45 = vadd.s32 %v45337_v20, %v20589_v40  ;;  %v22455_v46 = vrot.slane %v21970_v37, %v45349_v32  ;;  %v25662_v47 = vcombine.high %v25188_v38, %v25188_v38 }
 0x387   : > { %28135 = vmatpush1.xpose.msra.mxu1 %v25185_v10  ;;  %42879 = vmatmul.mubr.msk.f32.vlgmr.msra.gmra.mrb[28].mxu0 %vm21537_vm11, %v22438_v26  ;;  %vm21540_vm12 = vcmp.lt.s32.totalorder %v21066_v41, 363791  ;;  %v22447_v49 = vcombine.high %v22445_v42, %v22445_v42  ;;  %v21068_v50 = vadd.s32 %v45337_v20, %v20592_v44  ;;  %v20591_v51 = vadd.s32 7680, %v45335_v18  ;;  %v25192_v10 = vld [vmem:[%s44474_s20 + $0x120] sm:$0xff] }
 0x388   : > { %28205 = vmatpush1.xpose.msra.mxu0 %v25186_v15  ;;  %vm21539_vm13 = vcmp.lt.s32.totalorder %v21065_v45, 363791  ;;  %28274 = vmatprep.subr.mxu1 %v25661_v43  ;;  %v22463_v53 = vcombine.high %v22455_v46, %v22455_v46  ;;  %v20594_v54 = vadd.s32 8064, %v45335_v18  ;;  %v22448_v55 = vcombine.high %v21970_v37, %v21970_v37  ;;  %v25195_v43 = vld [vmem:[%s44474_s20 + $0x138] sm:$0xff] }
 0x389   : > { %42880 = vmatprep.mubr.msk.f32.mxu1 %vm21540_vm12, %v22447_v49  ;;  %vm21542_vm14 = vcmp.lt.s32.totalorder %v21068_v50, 363791  ;;  %28344 = vmatprep.subr.mxu0 %v25662_v47  ;;  %v21067_v57 = vadd.s32 %v45337_v20, %v20591_v51  ;;  %v20593_v19 = vadd.s32 7936, %v45335_v18  ;;  %v25663_v58 = vcombine.high %v25189_v48, %v25189_v48  ;;  %v25196_v49 = vld [vmem:[%s44474_s20 + $0x140] sm:$0xff] }
 0x38a   : > { %42881 = vmatmul.mubr.msk.f32.vlgmr.msra.gmra.mrb[28].mxu1 %vm21539_vm13, %v22445_v42  ;;  %42882 = vmatprep.mubr.msk.f32.mxu0 %vm21542_vm14, %v22463_v53  ;;  %v21070_v59 = vadd.s32 %v45337_v20, %v20594_v54  ;;  %v22462_v60 = vrot.slane %v22448_v55, %v45349_v32  ;;  %v20596_v61 = vadd.s32 8320, %v45335_v18  ;;  %v22472_v62 = vrot.slane %v21971_v52, %v45349_v32 }
 0x38b   : > { %28275 = vmatpush1.xpose.msra.mxu1 %v25187_v31  ;;  %vm21541_vm15 = vcmp.lt.s32.totalorder %v21067_v57, 363791  ;;  %v21069_v63 = vadd.s32 %v45337_v20, %v20593_v19  ;;  %v25664_v0 = vcombine.high %v25190_v56, %v25190_v56  ;;  %v20595_v1 = vadd.s32 8192, %v45335_v18 }
 0x38c   : > { %42883 = vmatmul.mubr.msk.f32.vlgmr.msra.gmra.mrb[30].mxu0 %vm21541_vm15, %v22455_v46  ;;  %vm21544_vm0 = vcmp.lt.s32.totalorder %v21070_v59, 363791  ;;  %v22464_v3 = vcombine.high %v22462_v60, %v22462_v60  ;;  %28414 = vmatprep.subr.mxu1 %v25663_v58  ;;  %v21072_v4 = vadd.s32 %v45337_v20, %v20596_v61  ;;  %v22480_v5 = vcombine.high %v22472_v62, %v22472_v62  ;;  %v25197_v58 = vld [vmem:[%s44474_s20 + $0x148] sm:$0xff] }
 0x38d   : > { %28345 = vmatpush1.xpose.msra.mxu0 %v25188_v38  ;;  %vm21543_vm1 = vcmp.lt.s32.totalorder %v21069_v63, 363791  ;;  %v21071_v7 = vadd.s32 %v45337_v20, %v20595_v1  ;;  %v20598_v8 = vadd.s32 8576, %v45335_v18  ;;  %v22465_v9 = vcombine.high %v21971_v52, %v21971_v52 }
 0x38e   : > { %42884 = vmatprep.mubr.msk.f32.mxu1 %vm21544_vm0, %v22464_v3  ;;  %vm21546_vm2 = vcmp.lt.s32.totalorder %v21072_v4, 363791  ;;  %28484 = vmatprep.subr.mxu0 %v25664_v0  ;;  %v20597_v11 = vadd.s32 8448, %v45335_v18  ;;  %v25665_v12 = vcombine.high %v25191_v2, %v25191_v2  ;;  %v20600_v13 = vadd.s32 8832, %v45335_v18 }
 0x38f   : > { %42885 = vmatmul.mubr.msk.f32.vlgmr.msra.gmra.mrb[30].mxu1 %vm21543_vm1, %v22462_v60  ;;  %42886 = vmatprep.mubr.msk.f32.mxu0 %vm21546_vm2, %v22480_v5  ;;  %vm21545_vm3 = vcmp.lt.s32.totalorder %v21071_v7, 363791  ;;  %v21074_v14 = vadd.s32 %v45337_v20, %v20598_v8  ;;  %v22479_v15 = vrot.slane %v22465_v9, %v45349_v32  ;;  %v22489_v16 = vrot.slane %v21972_v6, %v45349_v32 }
 0x390   : > { %28415 = vmatpush1.xpose.msra.mxu1 %v25189_v48  ;;  %42887 = vmatmul.mubr.msk.f32.vlgmr.msra.gmra.mrb[32].mxu0 %vm21545_vm3, %v22472_v62  ;;  %v21073_v17 = vadd.s32 %v45337_v20, %v20597_v11  ;;  %v21076_v21 = vadd.s32 %v45337_v20, %v20600_v13  ;;  %v25666_v22 = vcombine.high %v25192_v10, %v25192_v10  ;;  %v20599_v23 = vadd.s32 8704, %v45335_v18  ;;  %v21974_v48 = vld [vmem:[%s44467_s4 + $0x98] sm:$0xff]  ;;  %v21975_v62 = vld [vmem:[%s44467_s4 + $0xa0] sm:$0xff] }
 0x391   : > { %vm21548_vm4 = vcmp.lt.s32.totalorder %v21074_v14, 363791  ;;  %v22481_v25 = vcombine.high %v22479_v15, %v22479_v15  ;;  %28485 = vmatpush1.xpose.msra.mxu0 %v25190_v56  ;;  %28554 = vmatprep.subr.mxu1 %v25665_v12  ;;  %v22497_v26 = vcombine.high %v22489_v16, %v22489_v16  ;;  %v20602_v27 = vadd.s32 9088, %v45335_v18  ;;  %v25199_v13 = vld [vmem:[%s44474_s20 + $0x158] sm:$0xff] }
 0x392   : > { %vm21547_vm5 = vcmp.lt.s32.totalorder %v21073_v17, 363791  ;;  %vm21550_vm6 = vcmp.lt.s32.totalorder %v21076_v21, 363791  ;;  %28624 = vmatprep.subr.mxu0 %v25666_v22  ;;  %v21075_v30 = vadd.s32 %v45337_v20, %v20599_v23  ;;  %v22482_v31 = vcombine.high %v21972_v6, %v21972_v6  ;;  %v21976_v17 = vld [vmem:[%s44467_s4 + $0xa8] sm:$0xff] }
 0x393   : > { %42888 = vmatprep.mubr.msk.f32.mxu1 %vm21548_vm4, %v22481_v25  ;;  %42890 = vmatprep.mubr.msk.f32.mxu0 %vm21550_vm6, %v22497_v26  ;;  %v21078_v33 = vadd.s32 %v45337_v20, %v20602_v27  ;;  %v20601_v34 = vadd.s32 8960, %v45335_v18  ;;  %v25667_v35 = vcombine.high %v25193_v24, %v25193_v24  ;;  %v20604_v36 = vadd.s32 9344, %v45335_v18 }
 0x394   : > { %42889 = vmatmul.mubr.msk.f32.vlgmr.msra.gmra.mrb[32].mxu1 %vm21547_vm5, %v22479_v15  ;;  %vm21549_vm7 = vcmp.lt.s32.totalorder %v21075_v30, 363791  ;;  %v22496_v37 = vrot.slane %v22482_v31, %v45349_v32  ;;  %v22506_v38 = vrot.slane %v21973_v28, %v45349_v32  ;;  %v25668_v39 = vcombine.high %v25194_v29, %v25194_v29 }
 0x395   : > { %28555 = vmatpush1.xpose.msra.mxu1 %v25191_v2  ;;  %42891 = vmatmul.mubr.msk.f32.vlgmr.msra.gmra.mrb[34].mxu0 %vm21549_vm7, %v22489_v16  ;;  %vm21552_vm8 = vcmp.lt.s32.totalorder %v21078_v33, 363791  ;;  %v21077_v40 = vadd.s32 %v45337_v20, %v20601_v34  ;;  %v21080_v41 = vadd.s32 %v45337_v20, %v20604_v36  ;;  %v20603_v42 = vadd.s32 9216, %v45335_v18  ;;  %v25198_v2 = vld [vmem:[%s44474_s20 + $0x150] sm:$0xff]  ;;  %v25201_v36 = vld [vmem:[%s44474_s20 + $0x168] sm:$0xff] }
 0x396   : > { %v22498_v44 = vcombine.high %v22496_v37, %v22496_v37  ;;  %28625 = vmatpush1.xpose.msra.mxu0 %v25192_v10  ;;  %28694 = vmatprep.subr.mxu1 %v25667_v35  ;;  %v22514_v45 = vcombine.high %v22506_v38, %v22506_v38  ;;  %v20606_v46 = vadd.s32 9600, %v45335_v18  ;;  %v22499_v47 = vcombine.high %v21973_v28, %v21973_v28 }
 0x397   : > { %vm21551_vm9 = vcmp.lt.s32.totalorder %v21077_v40, 363791  ;;  %vm21554_vm10 = vcmp.lt.s32.totalorder %v21080_v41, 363791  ;;  %28764 = vmatprep.subr.mxu0 %v25668_v39  ;;  %v21079_v50 = vadd.s32 %v45337_v20, %v20603_v42  ;;  %v20605_v51 = vadd.s32 9472, %v45335_v18  ;;  %v21977_v40 = vld [vmem:[%s44467_s4 + $0xb0] sm:$0xff] }
 0x398   : > { %42892 = vmatprep.mubr.msk.f32.mxu1 %vm21552_vm8, %v22498_v44  ;;  %42894 = vmatprep.mubr.msk.f32.mxu0 %vm21554_vm10, %v22514_v45  ;;  %v21082_v52 = vadd.s32 %v45337_v20, %v20606_v46  ;;  %v22513_v53 = vrot.slane %v22499_v47, %v45349_v32  ;;  %v25669_v54 = vcombine.high %v25195_v43, %v25195_v43  ;;  %v20608_v55 = vadd.s32 9856, %v45335_v18  ;;  %v25202_v41 = vld [vmem:[%s44474_s20 + $0x170] sm:$0xff] }
 0x399   : > { %42893 = vmatmul.mubr.msk.f32.vlgmr.msra.gmra.mrb[34].mxu1 %vm21551_vm9, %v22496_v37  ;;  %vm21553_vm11 = vcmp.lt.s32.totalorder %v21079_v50, 363791  ;;  %v21081_v56 = vadd.s32 %v45337_v20, %v20605_v51  ;;  %v22523_v57 = vrot.slane %v21974_v48, %v45349_v32  ;;  %v25670_v19 = vcombine.high %v25196_v49, %v25196_v49 }
 0x39a   : > { %28695 = vmatpush1.xpose.msra.mxu1 %v25193_v24  ;;  %42895 = vmatmul.mubr.msk.f32.vlgmr.msra.gmra.mrb[36].mxu0 %vm21553_vm11, %v22506_v38  ;;  %vm21556_vm12 = vcmp.lt.s32.totalorder %v21082_v52, 363791  ;;  %v22515_v59 = vcombine.high %v22513_v53, %v22513_v53  ;;  %v21084_v60 = vadd.s32 %v45337_v20, %v20608_v55  ;;  %v20607_v61 = vadd.s32 9728, %v45335_v18  ;;  %v25200_v24 = vld [vmem:[%s44474_s20 + $0x160] sm:$0xff] }
 0x39b   : > { %28765 = vmatpush1.xpose.msra.mxu0 %v25194_v29  ;;  %vm21555_vm13 = vcmp.lt.s32.totalorder %v21081_v56, 363791  ;;  %28834 = vmatprep.subr.mxu1 %v25669_v54  ;;  %v22531_v63 = vcombine.high %v22523_v57, %v22523_v57  ;;  %v20610_v0 = vadd.s32 10112, %v45335_v18  ;;  %v22516_v1 = vcombine.high %v21974_v48, %v21974_v48  ;;  %v25203_v54 = vld [vmem:[%s44474_s20 + $0x178] sm:$0xff] }
 0x39c   : > { %42896 = vmatprep.mubr.msk.f32.mxu1 %vm21556_vm12, %v22515_v59  ;;  %vm21558_vm14 = vcmp.lt.s32.totalorder %v21084_v60, 363791  ;;  %28904 = vmatprep.subr.mxu0 %v25670_v19  ;;  %v21083_v3 = vadd.s32 %v45337_v20, %v20607_v61  ;;  %v20609_v4 = vadd.s32 9984, %v45335_v18  ;;  %v25671_v5 = vcombine.high %v25197_v58, %v25197_v58  ;;  %v25204_v59 = vld [vmem:[%s44474_s20 + $0x180] sm:$0xff] }
 0x39d   : > { %42897 = vmatmul.mubr.msk.f32.vlgmr.msra.gmra.mrb[36].mxu1 %vm21555_vm13, %v22513_v53  ;;  %42898 = vmatprep.mubr.msk.f32.mxu0 %vm21558_vm14, %v22531_v63  ;;  %v21086_v6 = vadd.s32 %v45337_v20, %v20610_v0  ;;  %v22530_v7 = vrot.slane %v22516_v1, %v45349_v32  ;;  %v20612_v8 = vadd.s32 10368, %v45335_v18  ;;  %v22540_v9 = vrot.slane %v21975_v62, %v45349_v32 }
 0x39e   : > { %28835 = vmatpush1.xpose.msra.mxu1 %v25195_v43  ;;  %vm21557_vm15 = vcmp.lt.s32.totalorder %v21083_v3, 363791  ;;  %v21085_v10 = vadd.s32 %v45337_v20, %v20609_v4  ;;  %v25672_v11 = vcombine.high %v25198_v2, %v25198_v2  ;;  %v20611_v12 = vadd.s32 10240, %v45335_v18 }
 0x39f   : > { %42899 = vmatmul.mubr.msk.f32.vlgmr.msra.gmra.mrb[38].mxu0 %vm21557_vm15, %v22523_v57  ;;  %vm21560_vm0 = vcmp.lt.s32.totalorder %v21086_v6, 363791  ;;  %v22532_v14 = vcombine.high %v22530_v7, %v22530_v7  ;;  %28974 = vmatprep.subr.mxu1 %v25671_v5  ;;  %v21088_v15 = vadd.s32 %v45337_v20, %v20612_v8  ;;  %v22548_v16 = vcombine.high %v22540_v9, %v22540_v9  ;;  %v25205_v5 = vld [vmem:[%s44474_s20 + $0x188] sm:$0xff] }
 0x3a0   : > { %28905 = vmatpush1.xpose.msra.mxu0 %v25196_v49  ;;  %vm21559_vm1 = vcmp.lt.s32.totalorder %v21085_v10, 363791  ;;  %v21087_v21 = vadd.s32 %v45337_v20, %v20611_v12  ;;  %v20614_v22 = vadd.s32 10624, %v45335_v18  ;;  %v22533_v23 = vcombine.high %v21975_v62, %v21975_v62 }
 0x3a1   : > { %42900 = vmatprep.mubr.msk.f32.mxu1 %vm21560_vm0, %v22532_v14  ;;  %vm21562_vm2 = vcmp.lt.s32.totalorder %v21088_v15, 363791  ;;  %29044 = vmatprep.subr.mxu0 %v25672_v11  ;;  %v20613_v25 = vadd.s32 10496, %v45335_v18  ;;  %v25673_v26 = vcombine.high %v25199_v13, %v25199_v13  ;;  %v20616_v27 = vadd.s32 10880, %v45335_v18 }
 0x3a2   : > { %42901 = vmatmul.mubr.msk.f32.vlgmr.msra.gmra.mrb[38].mxu1 %vm21559_vm1, %v22530_v7  ;;  %42902 = vmatprep.mubr.msk.f32.mxu0 %vm21562_vm2, %v22548_v16  ;;  %vm21561_vm3 = vcmp.lt.s32.totalorder %v21087_v21, 363791  ;;  %v21090_v28 = vadd.s32 %v45337_v20, %v20614_v22  ;;  %v22547_v29 = vrot.slane %v22533_v23, %v45349_v32  ;;  %v22557_v30 = vrot.slane %v21976_v17, %v45349_v32 }
 0x3a3   : > { %28975 = vmatpush1.xpose.msra.mxu1 %v25197_v58  ;;  %42903 = vmatmul.mubr.msk.f32.vlgmr.msra.gmra.mrb[40].mxu0 %vm21561_vm3, %v22540_v9  ;;  %v21089_v31 = vadd.s32 %v45337_v20, %v20613_v25  ;;  %v21092_v33 = vadd.s32 %v45337_v20, %v20616_v27  ;;  %v25674_v34 = vcombine.high %v25200_v24, %v25200_v24  ;;  %v20615_v35 = vadd.s32 10752, %v45335_v18  ;;  %v21978_v58 = vld [vmem:[%s44467_s4 + $0xb8] sm:$0xff]  ;;  %v21979_v9 = vld [vmem:[%s44467_s4 + $0xc0] sm:$0xff] }
 0x3a4   : > { %vm21564_vm4 = vcmp.lt.s32.totalorder %v21090_v28, 363791  ;;  %v22549_v37 = vcombine.high %v22547_v29, %v22547_v29  ;;  %29045 = vmatpush1.xpose.msra.mxu0 %v25198_v2  ;;  %29114 = vmatprep.subr.mxu1 %v25673_v26  ;;  %v22565_v38 = vcombine.high %v22557_v30, %v22557_v30  ;;  %v20618_v39 = vadd.s32 11136, %v45335_v18  ;;  %v25207_v27 = vld [vmem:[%s44474_s20 + $0x198] sm:$0xff] }
 0x3a5   : > { %vm21563_vm5 = vcmp.lt.s32.totalorder %v21089_v31, 363791  ;;  %vm21566_vm6 = vcmp.lt.s32.totalorder %v21092_v33, 363791  ;;  %29184 = vmatprep.subr.mxu0 %v25674_v34  ;;  %v21091_v42 = vadd.s32 %v45337_v20, %v20615_v35  ;;  %v22550_v43 = vcombine.high %v21976_v17, %v21976_v17  ;;  %v21980_v31 = vld [vmem:[%s44467_s4 + $0xc8] sm:$0xff] }
 0x3a6   : > { %42904 = vmatprep.mubr.msk.f32.mxu1 %vm21564_vm4, %v22549_v37  ;;  %42906 = vmatprep.mubr.msk.f32.mxu0 %vm21566_vm6, %v22565_v38  ;;  %v21094_v44 = vadd.s32 %v45337_v20, %v20618_v39  ;;  %v20617_v45 = vadd.s32 11008, %v45335_v18  ;;  %v25675_v46 = vcombine.high %v25201_v36, %v25201_v36  ;;  %v20620_v47 = vadd.s32 11392, %v45335_v18 }
 0x3a7   : > { %42905 = vmatmul.mubr.msk.f32.vlgmr.msra.gmra.mrb[40].mxu1 %vm21563_vm5, %v22547_v29  ;;  %vm21565_vm7 = vcmp.lt.s32.totalorder %v21091_v42, 363791  ;;  %v22564_v48 = vrot.slane %v22550_v43, %v45349_v32  ;;  %v22574_v49 = vrot.slane %v21977_v40, %v45349_v32  ;;  %v25676_v50 = vcombine.high %v25202_v41, %v25202_v41 }
 0x3a8   : > { %29115 = vmatpush1.xpose.msra.mxu1 %v25199_v13  ;;  %42907 = vmatmul.mubr.msk.f32.vlgmr.msra.gmra.mrb[42].mxu0 %vm21565_vm7, %v22557_v30  ;;  %vm21568_vm8 = vcmp.lt.s32.totalorder %v21094_v44, 363791  ;;  %v21093_v51 = vadd.s32 %v45337_v20, %v20617_v45  ;;  %v21096_v52 = vadd.s32 %v45337_v20, %v20620_v47  ;;  %v20619_v53 = vadd.s32 11264, %v45335_v18  ;;  %v25206_v13 = vld [vmem:[%s44474_s20 + $0x190] sm:$0xff]  ;;  %v25209_v47 = vld [vmem:[%s44474_s20 + $0x1a8] sm:$0xff] }
 0x3a9   : > { %v22566_v55 = vcombine.high %v22564_v48, %v22564_v48  ;;  %29185 = vmatpush1.xpose.msra.mxu0 %v25200_v24  ;;  %29254 = vmatprep.subr.mxu1 %v25675_v46  ;;  %v22582_v56 = vcombine.high %v22574_v49, %v22574_v49  ;;  %v20622_v57 = vadd.s32 11648, %v45335_v18  ;;  %v22567_v19 = vcombine.high %v21977_v40, %v21977_v40 }
 0x3aa   : > { %vm21567_vm9 = vcmp.lt.s32.totalorder %v21093_v51, 363791  ;;  %vm21570_vm10 = vcmp.lt.s32.totalorder %v21096_v52, 363791  ;;  %29324 = vmatprep.subr.mxu0 %v25676_v50  ;;  %v21095_v60 = vadd.s32 %v45337_v20, %v20619_v53  ;;  %v20621_v61 = vadd.s32 11520, %v45335_v18  ;;  %v21981_v51 = vld [vmem:[%s44467_s4 + $0xd0] sm:$0xff] }
 0x3ab   : > { %42908 = vmatprep.mubr.msk.f32.mxu1 %vm21568_vm8, %v22566_v55  ;;  %42910 = vmatprep.mubr.msk.f32.mxu0 %vm21570_vm10, %v22582_v56  ;;  %v21098_v62 = vadd.s32 %v45337_v20, %v20622_v57  ;;  %v22581_v63 = vrot.slane %v22567_v19, %v45349_v32  ;;  %v25677_v0 = vcombine.high %v25203_v54, %v25203_v54  ;;  %v20624_v1 = vadd.s32 11904, %v45335_v18  ;;  %v25210_v52 = vld [vmem:[%s44474_s20 + $0x1b0] sm:$0xff] }
 0x3ac   : > { %42909 = vmatmul.mubr.msk.f32.vlgmr.msra.gmra.mrb[42].mxu1 %vm21567_vm9, %v22564_v48  ;;  %vm21569_vm11 = vcmp.lt.s32.totalorder %v21095_v60, 363791  ;;  %v21097_v2 = vadd.s32 %v45337_v20, %v20621_v61  ;;  %v22591_v3 = vrot.slane %v21978_v58, %v45349_v32  ;;  %v25678_v4 = vcombine.high %v25204_v59, %v25204_v59 }
 0x3ad   : > { %29255 = vmatpush1.xpose.msra.mxu1 %v25201_v36  ;;  %42911 = vmatmul.mubr.msk.f32.vlgmr.msra.gmra.mrb[44].mxu0 %vm21569_vm11, %v22574_v49  ;;  %vm21572_vm12 = vcmp.lt.s32.totalorder %v21098_v62, 363791  ;;  %v22583_v6 = vcombine.high %v22581_v63, %v22581_v63  ;;  %v21100_v7 = vadd.s32 %v45337_v20, %v20624_v1  ;;  %v20623_v8 = vadd.s32 11776, %v45335_v18  ;;  %v25208_v36 = vld [vmem:[%s44474_s20 + $0x1a0] sm:$0xff] }
 0x3ae   : > { %29325 = vmatpush1.xpose.msra.mxu0 %v25202_v41  ;;  %vm21571_vm13 = vcmp.lt.s32.totalorder %v21097_v2, 363791  ;;  %29394 = vmatprep.subr.mxu1 %v25677_v0  ;;  %v22599_v10 = vcombine.high %v22591_v3, %v22591_v3  ;;  %v20626_v11 = vadd.s32 12160, %v45335_v18  ;;  %v22584_v12 = vcombine.high %v21978_v58, %v21978_v58  ;;  %v25211_v0 = vld [vmem:[%s44474_s20 + $0x1b8] sm:$0xff] }
 0x3af   : > { %42912 = vmatprep.mubr.msk.f32.mxu1 %vm21572_vm12, %v22583_v6  ;;  %vm21574_vm14 = vcmp.lt.s32.totalorder %v21100_v7, 363791  ;;  %29464 = vmatprep.subr.mxu0 %v25678_v4  ;;  %v21099_v14 = vadd.s32 %v45337_v20, %v20623_v8  ;;  %v20625_v15 = vadd.s32 12032, %v45335_v18  ;;  %v25679_v16 = vcombine.high %v25205_v5, %v25205_v5  ;;  %v25212_v6 = vld [vmem:[%s44474_s20 + $0x1c0] sm:$0xff] }
 0x3b0   : > { %42913 = vmatmul.mubr.msk.f32.vlgmr.msra.gmra.mrb[44].mxu1 %vm21571_vm13, %v22581_v63  ;;  %42914 = vmatprep.mubr.msk.f32.mxu0 %vm21574_vm14, %v22599_v10  ;;  %v21102_v17 = vadd.s32 %v45337_v20, %v20626_v11  ;;  %v22598_v21 = vrot.slane %v22584_v12, %v45349_v32  ;;  %v20628_v22 = vadd.s32 12416, %v45335_v18  ;;  %v22608_v23 = vrot.slane %v21979_v9, %v45349_v32 }
 0x3b1   : > { %29395 = vmatpush1.xpose.msra.mxu1 %v25203_v54  ;;  %vm21573_vm15 = vcmp.lt.s32.totalorder %v21099_v14, 363791  ;;  %v21101_v24 = vadd.s32 %v45337_v20, %v20625_v15  ;;  %v25680_v25 = vcombine.high %v25206_v13, %v25206_v13  ;;  %v20627_v26 = vadd.s32 12288, %v45335_v18 }
 0x3b2   : > { %42915 = vmatmul.mubr.msk.f32.vlgmr.msra.gmra.mrb[46].mxu0 %vm21573_vm15, %v22591_v3  ;;  %vm21576_vm0 = vcmp.lt.s32.totalorder %v21102_v17, 363791  ;;  %v22600_v28 = vcombine.high %v22598_v21, %v22598_v21  ;;  %29534 = vmatprep.subr.mxu1 %v25679_v16  ;;  %v21104_v29 = vadd.s32 %v45337_v20, %v20628_v22  ;;  %v22616_v30 = vcombine.high %v22608_v23, %v22608_v23  ;;  %v25213_v16 = vld [vmem:[%s44474_s20 + $0x1c8] sm:$0xff] }
 0x3b3   : > { %29465 = vmatpush1.xpose.msra.mxu0 %v25204_v59  ;;  %vm21575_vm1 = vcmp.lt.s32.totalorder %v21101_v24, 363791  ;;  %v21103_v33 = vadd.s32 %v45337_v20, %v20627_v26  ;;  %v20630_v34 = vadd.s32 12672, %v45335_v18  ;;  %v22601_v35 = vcombine.high %v21979_v9, %v21979_v9 }
 0x3b4   : > { %42916 = vmatprep.mubr.msk.f32.mxu1 %vm21576_vm0, %v22600_v28  ;;  %vm21578_vm2 = vcmp.lt.s32.totalorder %v21104_v29, 363791  ;;  %29604 = vmatprep.subr.mxu0 %v25680_v25  ;;  %v20629_v37 = vadd.s32 12544, %v45335_v18  ;;  %v25681_v38 = vcombine.high %v25207_v27, %v25207_v27  ;;  %v20632_v39 = vadd.s32 12928, %v45335_v18 }
 0x3b5   : > { %42917 = vmatmul.mubr.msk.f32.vlgmr.msra.gmra.mrb[46].mxu1 %vm21575_vm1, %v22598_v21  ;;  %42918 = vmatprep.mubr.msk.f32.mxu0 %vm21578_vm2, %v22616_v30  ;;  %vm21577_vm3 = vcmp.lt.s32.totalorder %v21103_v33, 363791  ;;  %v21106_v40 = vadd.s32 %v45337_v20, %v20630_v34  ;;  %v22615_v41 = vrot.slane %v22601_v35, %v45349_v32  ;;  %v22625_v42 = vrot.slane %v21980_v31, %v45349_v32 }
 0x3b6   : > { %29535 = vmatpush1.xpose.msra.mxu1 %v25205_v5  ;;  %42919 = vmatmul.mubr.msk.f32.vlgmr.msra.gmra.mrb[48].mxu0 %vm21577_vm3, %v22608_v23  ;;  %v21105_v43 = vadd.s32 %v45337_v20, %v20629_v37  ;;  %v21108_v44 = vadd.s32 %v45337_v20, %v20632_v39  ;;  %v25682_v45 = vcombine.high %v25208_v36, %v25208_v36  ;;  %v20631_v46 = vadd.s32 12800, %v45335_v18  ;;  %v21982_v5 = vld [vmem:[%s44467_s4 + $0xd8] sm:$0xff]  ;;  %v21983_v23 = vld [vmem:[%s44467_s4 + $0xe0] sm:$0xff] }
 0x3b7   : > { %vm21580_vm4 = vcmp.lt.s32.totalorder %v21106_v40, 363791  ;;  %v22617_v48 = vcombine.high %v22615_v41, %v22615_v41  ;;  %29605 = vmatpush1.xpose.msra.mxu0 %v25206_v13  ;;  %29674 = vmatprep.subr.mxu1 %v25681_v38  ;;  %v22633_v49 = vcombine.high %v22625_v42, %v22625_v42  ;;  %v20634_v50 = vadd.s32 13184, %v45335_v18  ;;  %v25215_v39 = vld [vmem:[%s44474_s20 + $0x1d8] sm:$0xff] }
 0x3b8   : > { %vm21579_vm5 = vcmp.lt.s32.totalorder %v21105_v43, 363791  ;;  %vm21582_vm6 = vcmp.lt.s32.totalorder %v21108_v44, 363791  ;;  %29744 = vmatprep.subr.mxu0 %v25682_v45  ;;  %v21107_v53 = vadd.s32 %v45337_v20, %v20631_v46  ;;  %v22618_v54 = vcombine.high %v21980_v31, %v21980_v31  ;;  %v21984_v43 = vld [vmem:[%s44467_s4 + $0xe8] sm:$0xff] }
 0x3b9   : > { %42920 = vmatprep.mubr.msk.f32.mxu1 %vm21580_vm4, %v22617_v48  ;;  %42922 = vmatprep.mubr.msk.f32.mxu0 %vm21582_vm6, %v22633_v49  ;;  %v21110_v55 = vadd.s32 %v45337_v20, %v20634_v50  ;;  %v20633_v56 = vadd.s32 13056, %v45335_v18  ;;  %v25683_v57 = vcombine.high %v25209_v47, %v25209_v47  ;;  %v20636_v19 = vadd.s32 13440, %v45335_v18 }
 0x3ba   : > { %42921 = vmatmul.mubr.msk.f32.vlgmr.msra.gmra.mrb[48].mxu1 %vm21579_vm5, %v22615_v41  ;;  %vm21581_vm7 = vcmp.lt.s32.totalorder %v21107_v53, 363791  ;;  %v22632_v58 = vrot.slane %v22618_v54, %v45349_v32  ;;  %v22642_v59 = vrot.slane %v21981_v51, %v45349_v32  ;;  %v25684_v60 = vcombine.high %v25210_v52, %v25210_v52 }
 0x3bb   : > { %29675 = vmatpush1.xpose.msra.mxu1 %v25207_v27  ;;  %42923 = vmatmul.mubr.msk.f32.vlgmr.msra.gmra.mrb[50].mxu0 %vm21581_vm7, %v22625_v42  ;;  %vm21584_vm8 = vcmp.lt.s32.totalorder %v21110_v55, 363791  ;;  %v21109_v61 = vadd.s32 %v45337_v20, %v20633_v56  ;;  %v21112_v62 = vadd.s32 %v45337_v20, %v20636_v19  ;;  %v20635_v63 = vadd.s32 13312, %v45335_v18  ;;  %v25214_v27 = vld [vmem:[%s44474_s20 + $0x1d0] sm:$0xff]  ;;  %v25217_v19 = vld [vmem:[%s44474_s20 + $0x1e8] sm:$0xff] }
 0x3bc   : > { %v22634_v1 = vcombine.high %v22632_v58, %v22632_v58  ;;  %29745 = vmatpush1.xpose.msra.mxu0 %v25208_v36  ;;  %29814 = vmatprep.subr.mxu1 %v25683_v57  ;;  %v22650_v2 = vcombine.high %v22642_v59, %v22642_v59  ;;  %v20638_v3 = vadd.s32 13696, %v45335_v18  ;;  %v22635_v4 = vcombine.high %v21981_v51, %v21981_v51 }
 0x3bd   : > { %vm21583_vm9 = vcmp.lt.s32.totalorder %v21109_v61, 363791  ;;  %vm21586_vm10 = vcmp.lt.s32.totalorder %v21112_v62, 363791  ;;  %29884 = vmatprep.subr.mxu0 %v25684_v60  ;;  %v21111_v7 = vadd.s32 %v45337_v20, %v20635_v63  ;;  %v20637_v8 = vadd.s32 13568, %v45335_v18  ;;  %v21985_v61 = vld [vmem:[%s44467_s4 + $0xf0] sm:$0xff] }
 0x3be   : > { %42924 = vmatprep.mubr.msk.f32.mxu1 %vm21584_vm8, %v22634_v1  ;;  %42926 = vmatprep.mubr.msk.f32.mxu0 %vm21586_vm10, %v22650_v2  ;;  %v21114_v9 = vadd.s32 %v45337_v20, %v20638_v3  ;;  %v22649_v10 = vrot.slane %v22635_v4, %v45349_v32  ;;  %v25685_v11 = vcombine.high %v25211_v0, %v25211_v0  ;;  %v20640_v12 = vadd.s32 13952, %v45335_v18  ;;  %v25218_v62 = vld [vmem:[%s44474_s20 + $0x1f0] sm:$0xff] }
 0x3bf   : > { %42925 = vmatmul.mubr.msk.f32.vlgmr.msra.gmra.mrb[50].mxu1 %vm21583_vm9, %v22632_v58  ;;  %vm21585_vm11 = vcmp.lt.s32.totalorder %v21111_v7, 363791  ;;  %v21113_v13 = vadd.s32 %v45337_v20, %v20637_v8  ;;  %v22659_v14 = vrot.slane %v21982_v5, %v45349_v32  ;;  %v25686_v15 = vcombine.high %v25212_v6, %v25212_v6 }
 0x3c0   : > { %29815 = vmatpush1.xpose.msra.mxu1 %v25209_v47  ;;  %42927 = vmatmul.mubr.msk.f32.vlgmr.msra.gmra.mrb[52].mxu0 %vm21585_vm11, %v22642_v59  ;;  %vm21588_vm12 = vcmp.lt.s32.totalorder %v21114_v9, 363791  ;;  %v22651_v17 = vcombine.high %v22649_v10, %v22649_v10  ;;  %v21116_v21 = vadd.s32 %v45337_v20, %v20640_v12  ;;  %v20639_v22 = vadd.s32 13824, %v45335_v18  ;;  %v25216_v47 = vld [vmem:[%s44474_s20 + $0x1e0] sm:$0xff] }
 0x3c1   : > { %29885 = vmatpush1.xpose.msra.mxu0 %v25210_v52  ;;  %vm21587_vm13 = vcmp.lt.s32.totalorder %v21113_v13, 363791  ;;  %29954 = vmatprep.subr.mxu1 %v25685_v11  ;;  %v22667_v24 = vcombine.high %v22659_v14, %v22659_v14  ;;  %v20642_v25 = vadd.s32 14208, %v45335_v18  ;;  %v22652_v26 = vcombine.high %v21982_v5, %v21982_v5  ;;  %v25219_v11 = vld [vmem:[%s44474_s20 + $0x1f8] sm:$0xff] }
 0x3c2   : > { %42928 = vmatprep.mubr.msk.f32.mxu1 %vm21588_vm12, %v22651_v17  ;;  %vm21590_vm14 = vcmp.lt.s32.totalorder %v21116_v21, 363791  ;;  %30024 = vmatprep.subr.mxu0 %v25686_v15  ;;  %v21115_v28 = vadd.s32 %v45337_v20, %v20639_v22  ;;  %v20641_v29 = vadd.s32 14080, %v45335_v18  ;;  %v25687_v30 = vcombine.high %v25213_v16, %v25213_v16  ;;  %v25220_v17 = vld [vmem:[%s44474_s20 + $0x200] sm:$0xff] }
 0x3c3   : > { %42929 = vmatmul.mubr.msk.f32.vlgmr.msra.gmra.mrb[52].mxu1 %vm21587_vm13, %v22649_v10  ;;  %42930 = vmatprep.mubr.msk.f32.mxu0 %vm21590_vm14, %v22667_v24  ;;  %v21118_v31 = vadd.s32 %v45337_v20, %v20642_v25  ;;  %v22666_v33 = vrot.slane %v22652_v26, %v45349_v32  ;;  %v20644_v34 = vadd.s32 14464, %v45335_v18  ;;  %v22676_v35 = vrot.slane %v21983_v23, %v45349_v32 }
 0x3c4   : > { %29955 = vmatpush1.xpose.msra.mxu1 %v25211_v0  ;;  %vm21589_vm15 = vcmp.lt.s32.totalorder %v21115_v28, 363791  ;;  %v21117_v36 = vadd.s32 %v45337_v20, %v20641_v29  ;;  %v25688_v37 = vcombine.high %v25214_v27, %v25214_v27  ;;  %v20643_v38 = vadd.s32 14336, %v45335_v18 }
 0x3c5   : > { %42931 = vmatmul.mubr.msk.f32.vlgmr.msra.gmra.mrb[54].mxu0 %vm21589_vm15, %v22659_v14  ;;  %vm21592_vm0 = vcmp.lt.s32.totalorder %v21118_v31, 363791  ;;  %v22668_v40 = vcombine.high %v22666_v33, %v22666_v33  ;;  %30094 = vmatprep.subr.mxu1 %v25687_v30  ;;  %v21120_v41 = vadd.s32 %v45337_v20, %v20644_v34  ;;  %v22684_v42 = vcombine.high %v22676_v35, %v22676_v35  ;;  %v25221_v30 = vld [vmem:[%s44474_s20 + $0x208] sm:$0xff] }
 0x3c6   : > { %30025 = vmatpush1.xpose.msra.mxu0 %v25212_v6  ;;  %vm21591_vm1 = vcmp.lt.s32.totalorder %v21117_v36, 363791  ;;  %v21119_v44 = vadd.s32 %v45337_v20, %v20643_v38  ;;  %v20646_v45 = vadd.s32 14720, %v45335_v18  ;;  %v22669_v46 = vcombine.high %v21983_v23, %v21983_v23 }
 0x3c7   : > { %42932 = vmatprep.mubr.msk.f32.mxu1 %vm21592_vm0, %v22668_v40  ;;  %vm21594_vm2 = vcmp.lt.s32.totalorder %v21120_v41, 363791  ;;  %30164 = vmatprep.subr.mxu0 %v25688_v37  ;;  %v20645_v48 = vadd.s32 14592, %v45335_v18  ;;  %v25689_v49 = vcombine.high %v25215_v39, %v25215_v39  ;;  %v20648_v50 = vadd.s32 14976, %v45335_v18 }
 0x3c8   : > { %42933 = vmatmul.mubr.msk.f32.vlgmr.msra.gmra.mrb[54].mxu1 %vm21591_vm1, %v22666_v33  ;;  %42934 = vmatprep.mubr.msk.f32.mxu0 %vm21594_vm2, %v22684_v42  ;;  %vm21593_vm3 = vcmp.lt.s32.totalorder %v21119_v44, 363791  ;;  %v21122_v51 = vadd.s32 %v45337_v20, %v20646_v45  ;;  %v22683_v52 = vrot.slane %v22669_v46, %v45349_v32  ;;  %v22693_v53 = vrot.slane %v21984_v43, %v45349_v32 }
 0x3c9   : > { %30095 = vmatpush1.xpose.msra.mxu1 %v25213_v16  ;;  %42935 = vmatmul.mubr.msk.f32.vlgmr.msra.gmra.mrb[56].mxu0 %vm21593_vm3, %v22676_v35  ;;  %v21121_v54 = vadd.s32 %v45337_v20, %v20645_v48  ;;  %v21124_v55 = vadd.s32 %v45337_v20, %v20648_v50  ;;  %v25690_v56 = vcombine.high %v25216_v47, %v25216_v47  ;;  %v20647_v57 = vadd.s32 14848, %v45335_v18  ;;  %v21986_v16 = vld [vmem:[%s44467_s4 + $0xf8] sm:$0xff]  ;;  %v21987_v35 = vld [vmem:[%s44467_s4 + $0x100] sm:$0xff] }
 0x3ca   : > { %vm21596_vm4 = vcmp.lt.s32.totalorder %v21122_v51, 363791  ;;  %v22685_v58 = vcombine.high %v22683_v52, %v22683_v52  ;;  %30165 = vmatpush1.xpose.msra.mxu0 %v25214_v27  ;;  %30234 = vmatprep.subr.mxu1 %v25689_v49  ;;  %v22701_v59 = vcombine.high %v22693_v53, %v22693_v53  ;;  %v20650_v60 = vadd.s32 15232, %v45335_v18  ;;  %v25223_v50 = vld [vmem:[%s44474_s20 + $0x218] sm:$0xff] }
 0x3cb   : > { %vm21595_vm5 = vcmp.lt.s32.totalorder %v21121_v54, 363791  ;;  %vm21598_vm6 = vcmp.lt.s32.totalorder %v21124_v55, 363791  ;;  %30304 = vmatprep.subr.mxu0 %v25690_v56  ;;  %v21123_v63 = vadd.s32 %v45337_v20, %v20647_v57  ;;  %v22686_v0 = vcombine.high %v21984_v43, %v21984_v43  ;;  %v21988_v54 = vld [vmem:[%s44467_s4 + $0x108] sm:$0xff] }
 0x3cc   : > { %42936 = vmatprep.mubr.msk.f32.mxu1 %vm21596_vm4, %v22685_v58  ;;  %42938 = vmatprep.mubr.msk.f32.mxu0 %vm21598_vm6, %v22701_v59  ;;  %v21126_v1 = vadd.s32 %v45337_v20, %v20650_v60  ;;  %v20649_v2 = vadd.s32 15104, %v45335_v18  ;;  %v25691_v3 = vcombine.high %v25217_v19, %v25217_v19  ;;  %v20652_v4 = vadd.s32 15488, %v45335_v18 }
 0x3cd   : > { %42937 = vmatmul.mubr.msk.f32.vlgmr.msra.gmra.mrb[56].mxu1 %vm21595_vm5, %v22683_v52  ;;  %vm21597_vm7 = vcmp.lt.s32.totalorder %v21123_v63, 363791  ;;  %v22700_v5 = vrot.slane %v22686_v0, %v45349_v32  ;;  %v22710_v6 = vrot.slane %v21985_v61, %v45349_v32  ;;  %v25692_v7 = vcombine.high %v25218_v62, %v25218_v62 }
 0x3ce   : > { %30235 = vmatpush1.xpose.msra.mxu1 %v25215_v39  ;;  %42939 = vmatmul.mubr.msk.f32.vlgmr.msra.gmra.mrb[58].mxu0 %vm21597_vm7, %v22693_v53  ;;  %vm21600_vm8 = vcmp.lt.s32.totalorder %v21126_v1, 363791  ;;  %v21125_v8 = vadd.s32 %v45337_v20, %v20649_v2  ;;  %v21128_v9 = vadd.s32 %v45337_v20, %v20652_v4  ;;  %v20651_v10 = vadd.s32 15360, %v45335_v18  ;;  %v25222_v39 = vld [vmem:[%s44474_s20 + $0x210] sm:$0xff]  ;;  %v25225_v4 = vld [vmem:[%s44474_s20 + $0x228] sm:$0xff] }
 0x3cf   : > { %v22702_v12 = vcombine.high %v22700_v5, %v22700_v5  ;;  %30305 = vmatpush1.xpose.msra.mxu0 %v25216_v47  ;;  %30374 = vmatprep.subr.mxu1 %v25691_v3  ;;  %v22718_v13 = vcombine.high %v22710_v6, %v22710_v6  ;;  %v20654_v14 = vadd.s32 15744, %v45335_v18  ;;  %v22703_v15 = vcombine.high %v21985_v61, %v21985_v61 }
 0x3d0   : > { %vm21599_vm9 = vcmp.lt.s32.totalorder %v21125_v8, 363791  ;;  %vm21602_vm10 = vcmp.lt.s32.totalorder %v21128_v9, 363791  ;;  %30444 = vmatprep.subr.mxu0 %v25692_v7  ;;  %v21127_v21 = vadd.s32 %v45337_v20, %v20651_v10  ;;  %v20653_v22 = vadd.s32 15616, %v45335_v18  ;;  %v21989_v8 = vld [vmem:[%s44467_s4 + $0x110] sm:$0xff] }
 0x3d1   : > { %42940 = vmatprep.mubr.msk.f32.mxu1 %vm21600_vm8, %v22702_v12  ;;  %42942 = vmatprep.mubr.msk.f32.mxu0 %vm21602_vm10, %v22718_v13  ;;  %v21130_v23 = vadd.s32 %v45337_v20, %v20654_v14  ;;  %v22717_v24 = vrot.slane %v22703_v15, %v45349_v32  ;;  %v25693_v25 = vcombine.high %v25219_v11, %v25219_v11  ;;  %v20656_v26 = vadd.s32 16000, %v45335_v18  ;;  %v25226_v9 = vld [vmem:[%s44474_s20 + $0x230] sm:$0xff] }
 0x3d2   : > { %42941 = vmatmul.mubr.msk.f32.vlgmr.msra.gmra.mrb[58].mxu1 %vm21599_vm9, %v22700_v5  ;;  %vm21601_vm11 = vcmp.lt.s32.totalorder %v21127_v21, 363791  ;;  %v21129_v27 = vadd.s32 %v45337_v20, %v20653_v22  ;;  %v22727_v28 = vrot.slane %v21986_v16, %v45349_v32  ;;  %v25694_v29 = vcombine.high %v25220_v17, %v25220_v17 }
 0x3d3   : > { %30375 = vmatpush1.xpose.msra.mxu1 %v25217_v19  ;;  %42943 = vmatmul.mubr.msk.f32.vlgmr.msra.gmra.mrb[60].mxu0 %vm21601_vm11, %v22710_v6  ;;  %vm21604_vm12 = vcmp.lt.s32.totalorder %v21130_v23, 363791  ;;  %v22719_v31 = vcombine.high %v22717_v24, %v22717_v24  ;;  %v21132_v33 = vadd.s32 %v45337_v20, %v20656_v26  ;;  %v20655_v34 = vadd.s32 15872, %v45335_v18  ;;  %v25224_v19 = vld [vmem:[%s44474_s20 + $0x220] sm:$0xff] }
 0x3d4   : > { %30445 = vmatpush1.xpose.msra.mxu0 %v25218_v62  ;;  %vm21603_vm13 = vcmp.lt.s32.totalorder %v21129_v27, 363791  ;;  %30514 = vmatprep.subr.mxu1 %v25693_v25  ;;  %v22735_v36 = vcombine.high %v22727_v28, %v22727_v28  ;;  %v20658_v37 = vadd.s32 16256, %v45335_v18  ;;  %v22720_v38 = vcombine.high %v21986_v16, %v21986_v16  ;;  %v25227_v25 = vld [vmem:[%s44474_s20 + $0x238] sm:$0xff] }
 0x3d5   : > { %42944 = vmatprep.mubr.msk.f32.mxu1 %vm21604_vm12, %v22719_v31  ;;  %vm21606_vm14 = vcmp.lt.s32.totalorder %v21132_v33, 363791  ;;  %30584 = vmatprep.subr.mxu0 %v25694_v29  ;;  %v21131_v40 = vadd.s32 %v45337_v20, %v20655_v34  ;;  %v20657_v41 = vadd.s32 16128, %v45335_v18  ;;  %v25695_v42 = vcombine.high %v25221_v30, %v25221_v30  ;;  %v25228_v31 = vld [vmem:[%s44474_s20 + $0x240] sm:$0xff] }
 0x3d6   : > { %42945 = vmatmul.mubr.msk.f32.vlgmr.msra.gmra.mrb[60].mxu1 %vm21603_vm13, %v22717_v24  ;;  %42946 = vmatprep.mubr.msk.f32.mxu0 %vm21606_vm14, %v22735_v36  ;;  %v21134_v43 = vadd.s32 %v45337_v20, %v20658_v37  ;;  %v22734_v44 = vrot.slane %v22720_v38, %v45349_v32  ;;  %v20660_v45 = vadd.s32 16512, %v45335_v18  ;;  %v22744_v46 = vrot.slane %v21987_v35, %v45349_v32 }
 0x3d7   : > { %30515 = vmatpush1.xpose.msra.mxu1 %v25219_v11  ;;  %vm21605_vm15 = vcmp.lt.s32.totalorder %v21131_v40, 363791  ;;  %v21133_v47 = vadd.s32 %v45337_v20, %v20657_v41  ;;  %v25696_v48 = vcombine.high %v25222_v39, %v25222_v39  ;;  %v20659_v49 = vadd.s32 16384, %v45335_v18 }
 0x3d8   : > { %42947 = vmatmul.mubr.msk.f32.vlgmr.msra.gmra.mrb[62].mxu0 %vm21605_vm15, %v22727_v28  ;;  %vm21608_vm0 = vcmp.lt.s32.totalorder %v21134_v43, 363791  ;;  %v22736_v51 = vcombine.high %v22734_v44, %v22734_v44  ;;  %30654 = vmatprep.subr.mxu1 %v25695_v42  ;;  %v21136_v52 = vadd.s32 %v45337_v20, %v20660_v45  ;;  %v22752_v53 = vcombine.high %v22744_v46, %v22744_v46  ;;  %v25229_v42 = vld [vmem:[%s44474_s20 + $0x248] sm:$0xff] }
 0x3d9   : > { %30585 = vmatpush1.xpose.msra.mxu0 %v25220_v17  ;;  %vm21607_vm1 = vcmp.lt.s32.totalorder %v21133_v47, 363791  ;;  %v21135_v55 = vadd.s32 %v45337_v20, %v20659_v49  ;;  %v20662_v56 = vadd.s32 16768, %v45335_v18  ;;  %v22737_v57 = vcombine.high %v21987_v35, %v21987_v35 }
 0x3da   : > { %42948 = vmatprep.mubr.msk.f32.mxu1 %vm21608_vm0, %v22736_v51  ;;  %vm21610_vm2 = vcmp.lt.s32.totalorder %v21136_v52, 363791  ;;  %30724 = vmatprep.subr.mxu0 %v25696_v48  ;;  %v20661_v58 = vadd.s32 16640, %v45335_v18  ;;  %v25697_v59 = vcombine.high %v25223_v50, %v25223_v50  ;;  %v20664_v60 = vadd.s32 17024, %v45335_v18 }
 0x3db   : > { %42949 = vmatmul.mubr.msk.f32.vlgmr.msra.gmra.mrb[62].mxu1 %vm21607_vm1, %v22734_v44  ;;  %42950 = vmatprep.mubr.msk.f32.mxu0 %vm21610_vm2, %v22752_v53  ;;  %vm21609_vm3 = vcmp.lt.s32.totalorder %v21135_v55, 363791  ;;  %v21138_v61 = vadd.s32 %v45337_v20, %v20662_v56  ;;  %v22751_v62 = vrot.slane %v22737_v57, %v45349_v32  ;;  %v22761_v63 = vrot.slane %v21988_v54, %v45349_v32 }
 0x3dc   : > { %30655 = vmatpush1.xpose.msra.mxu1 %v25221_v30  ;;  %42951 = vmatmul.mubr.msk.f32.vlgmr.msra.gmra.mrb[64].mxu0 %vm21609_vm3, %v22744_v46  ;;  %v21137_v0 = vadd.s32 %v45337_v20, %v20661_v58  ;;  %v21140_v1 = vadd.s32 %v45337_v20, %v20664_v60  ;;  %v25698_v2 = vcombine.high %v25224_v19, %v25224_v19  ;;  %v20663_v3 = vadd.s32 16896, %v45335_v18  ;;  %v21990_v30 = vld [vmem:[%s44467_s4 + $0x118] sm:$0xff]  ;;  %v21991_v46 = vld [vmem:[%s44467_s4 + $0x120] sm:$0xff] }
 0x3dd   : > { %vm21612_vm4 = vcmp.lt.s32.totalorder %v21138_v61, 363791  ;;  %v22753_v5 = vcombine.high %v22751_v62, %v22751_v62  ;;  %30725 = vmatpush1.xpose.msra.mxu0 %v25222_v39  ;;  %30794 = vmatprep.subr.mxu1 %v25697_v59  ;;  %v22769_v6 = vcombine.high %v22761_v63, %v22761_v63  ;;  %v20666_v7 = vadd.s32 17280, %v45335_v18  ;;  %v25231_v60 = vld [vmem:[%s44474_s20 + $0x258] sm:$0xff] }
 0x3de   : > { %vm21611_vm5 = vcmp.lt.s32.totalorder %v21137_v0, 363791  ;;  %vm21614_vm6 = vcmp.lt.s32.totalorder %v21140_v1, 363791  ;;  %30864 = vmatprep.subr.mxu0 %v25698_v2  ;;  %v21139_v10 = vadd.s32 %v45337_v20, %v20663_v3  ;;  %v22754_v11 = vcombine.high %v21988_v54, %v21988_v54  ;;  %v21992_v0 = vld [vmem:[%s44467_s4 + $0x128] sm:$0xff] }
 0x3df   : > { %42952 = vmatprep.mubr.msk.f32.mxu1 %vm21612_vm4, %v22753_v5  ;;  %42954 = vmatprep.mubr.msk.f32.mxu0 %vm21614_vm6, %v22769_v6  ;;  %v21142_v12 = vadd.s32 %v45337_v20, %v20666_v7  ;;  %v20665_v13 = vadd.s32 17152, %v45335_v18  ;;  %v25699_v14 = vcombine.high %v25225_v4, %v25225_v4  ;;  %v20668_v15 = vadd.s32 17536, %v45335_v18 }
 0x3e0   : > { %42953 = vmatmul.mubr.msk.f32.vlgmr.msra.gmra.mrb[64].mxu1 %vm21611_vm5, %v22751_v62  ;;  %vm21613_vm7 = vcmp.lt.s32.totalorder %v21139_v10, 363791  ;;  %v22768_v16 = vrot.slane %v22754_v11, %v45349_v32  ;;  %v22778_v17 = vrot.slane %v21989_v8, %v45349_v32  ;;  %v25700_v21 = vcombine.high %v25226_v9, %v25226_v9 }
 0x3e1   : > { %30795 = vmatpush1.xpose.msra.mxu1 %v25223_v50  ;;  %42955 = vmatmul.mubr.msk.f32.vlgmr.msra.gmra.mrb[66].mxu0 %vm21613_vm7, %v22761_v63  ;;  %vm21616_vm8 = vcmp.lt.s32.totalorder %v21142_v12, 363791  ;;  %v21141_v22 = vadd.s32 %v45337_v20, %v20665_v13  ;;  %v21144_v23 = vadd.s32 %v45337_v20, %v20668_v15  ;;  %v20667_v24 = vadd.s32 17408, %v45335_v18  ;;  %v25230_v50 = vld [vmem:[%s44474_s20 + $0x250] sm:$0xff]  ;;  %v25233_v15 = vld [vmem:[%s44474_s20 + $0x268] sm:$0xff] }
 0x3e2   : > { %v22770_v26 = vcombine.high %v22768_v16, %v22768_v16  ;;  %30865 = vmatpush1.xpose.msra.mxu0 %v25224_v19  ;;  %30934 = vmatprep.subr.mxu1 %v25699_v14  ;;  %v22786_v27 = vcombine.high %v22778_v17, %v22778_v17  ;;  %v20670_v28 = vadd.s32 17792, %v45335_v18  ;;  %v22771_v29 = vcombine.high %v21989_v8, %v21989_v8 }
 0x3e3   : > { %vm21615_vm9 = vcmp.lt.s32.totalorder %v21141_v22, 363791  ;;  %vm21618_vm10 = vcmp.lt.s32.totalorder %v21144_v23, 363791  ;;  %31004 = vmatprep.subr.mxu0 %v25700_v21  ;;  %v21143_v33 = vadd.s32 %v45337_v20, %v20667_v24  ;;  %v20669_v34 = vadd.s32 17664, %v45335_v18  ;;  %v21993_v22 = vld [vmem:[%s44467_s4 + $0x130] sm:$0xff] }
 0x3e4   : > { %42956 = vmatprep.mubr.msk.f32.mxu1 %vm21616_vm8, %v22770_v26  ;;  %42958 = vmatprep.mubr.msk.f32.mxu0 %vm21618_vm10, %v22786_v27  ;;  %v21146_v35 = vadd.s32 %v45337_v20, %v20670_v28  ;;  %v22785_v36 = vrot.slane %v22771_v29, %v45349_v32  ;;  %v25701_v37 = vcombine.high %v25227_v25, %v25227_v25  ;;  %v20672_v38 = vadd.s32 18048, %v45335_v18  ;;  %v25234_v23 = vld [vmem:[%s44474_s20 + $0x270] sm:$0xff] }
 0x3e5   : > { %42957 = vmatmul.mubr.msk.f32.vlgmr.msra.gmra.mrb[66].mxu1 %vm21615_vm9, %v22768_v16  ;;  %vm21617_vm11 = vcmp.lt.s32.totalorder %v21143_v33, 363791  ;;  %v21145_v39 = vadd.s32 %v45337_v20, %v20669_v34  ;;  %v22795_v40 = vrot.slane %v21990_v30, %v45349_v32  ;;  %v25702_v41 = vcombine.high %v25228_v31, %v25228_v31 }
 0x3e6   : > { %30935 = vmatpush1.xpose.msra.mxu1 %v25225_v4  ;;  %42959 = vmatmul.mubr.msk.f32.vlgmr.msra.gmra.mrb[68].mxu0 %vm21617_vm11, %v22778_v17  ;;  %vm21620_vm12 = vcmp.lt.s32.totalorder %v21146_v35, 363791  ;;  %v22787_v43 = vcombine.high %v22785_v36, %v22785_v36  ;;  %v21148_v44 = vadd.s32 %v45337_v20, %v20672_v38  ;;  %v20671_v45 = vadd.s32 17920, %v45335_v18  ;;  %v25232_v4 = vld [vmem:[%s44474_s20 + $0x260] sm:$0xff] }
 0x3e7   : > { %31005 = vmatpush1.xpose.msra.mxu0 %v25226_v9  ;;  %vm21619_vm13 = vcmp.lt.s32.totalorder %v21145_v39, 363791  ;;  %31074 = vmatprep.subr.mxu1 %v25701_v37  ;;  %v22803_v47 = vcombine.high %v22795_v40, %v22795_v40  ;;  %v20674_v48 = vadd.s32 18304, %v45335_v18  ;;  %v22788_v49 = vcombine.high %v21990_v30, %v21990_v30  ;;  %v25235_v37 = vld [vmem:[%s44474_s20 + $0x278] sm:$0xff] }
 0x3e8   : > { %42960 = vmatprep.mubr.msk.f32.mxu1 %vm21620_vm12, %v22787_v43  ;;  %vm21622_vm14 = vcmp.lt.s32.totalorder %v21148_v44, 363791  ;;  %31144 = vmatprep.subr.mxu0 %v25702_v41  ;;  %v21147_v51 = vadd.s32 %v45337_v20, %v20671_v45  ;;  %v20673_v52 = vadd.s32 18176, %v45335_v18  ;;  %v25703_v53 = vcombine.high %v25229_v42, %v25229_v42  ;;  %v25236_v43 = vld [vmem:[%s44474_s20 + $0x280] sm:$0xff] }
 0x3e9   : > { %42961 = vmatmul.mubr.msk.f32.vlgmr.msra.gmra.mrb[68].mxu1 %vm21619_vm13, %v22785_v36  ;;  %42962 = vmatprep.mubr.msk.f32.mxu0 %vm21622_vm14, %v22803_v47  ;;  %v21150_v54 = vadd.s32 %v45337_v20, %v20674_v48  ;;  %v22802_v55 = vrot.slane %v22788_v49, %v45349_v32  ;;  %v20676_v56 = vadd.s32 18560, %v45335_v18  ;;  %v22812_v57 = vrot.slane %v21991_v46, %v45349_v32 }
 0x3ea   : > { %31075 = vmatpush1.xpose.msra.mxu1 %v25227_v25  ;;  %vm21621_vm15 = vcmp.lt.s32.totalorder %v21147_v51, 363791  ;;  %v21149_v19 = vadd.s32 %v45337_v20, %v20673_v52  ;;  %v25704_v58 = vcombine.high %v25230_v50, %v25230_v50  ;;  %v20675_v59 = vadd.s32 18432, %v45335_v18 }
 0x3eb   : > { %42963 = vmatmul.mubr.msk.f32.vlgmr.msra.gmra.mrb[70].mxu0 %vm21621_vm15, %v22795_v40  ;;  %vm21624_vm0 = vcmp.lt.s32.totalorder %v21150_v54, 363791  ;;  %v22804_v61 = vcombine.high %v22802_v55, %v22802_v55  ;;  %31214 = vmatprep.subr.mxu1 %v25703_v53  ;;  %v21152_v62 = vadd.s32 %v45337_v20, %v20676_v56  ;;  %v22820_v63 = vcombine.high %v22812_v57, %v22812_v57  ;;  %v25237_v53 = vld [vmem:[%s44474_s20 + $0x288] sm:$0xff] }
 0x3ec   : > { %31145 = vmatpush1.xpose.msra.mxu0 %v25228_v31  ;;  %vm21623_vm1 = vcmp.lt.s32.totalorder %v21149_v19, 363791  ;;  %v21151_v1 = vadd.s32 %v45337_v20, %v20675_v59  ;;  %v20678_v2 = vadd.s32 18816, %v45335_v18  ;;  %v22805_v3 = vcombine.high %v21991_v46, %v21991_v46 }
 0x3ed   : > { %42964 = vmatprep.mubr.msk.f32.mxu1 %vm21624_vm0, %v22804_v61  ;;  %vm21626_vm2 = vcmp.lt.s32.totalorder %v21152_v62, 363791  ;;  %31284 = vmatprep.subr.mxu0 %v25704_v58  ;;  %v20677_v5 = vadd.s32 18688, %v45335_v18  ;;  %v25705_v6 = vcombine.high %v25231_v60, %v25231_v60  ;;  %v20680_v7 = vadd.s32 19072, %v45335_v18 }
 0x3ee   : > { %42965 = vmatmul.mubr.msk.f32.vlgmr.msra.gmra.mrb[70].mxu1 %vm21623_vm1, %v22802_v55  ;;  %42966 = vmatprep.mubr.msk.f32.mxu0 %vm21626_vm2, %v22820_v63  ;;  %vm21625_vm3 = vcmp.lt.s32.totalorder %v21151_v1, 363791  ;;  %v21154_v8 = vadd.s32 %v45337_v20, %v20678_v2  ;;  %v22819_v9 = vrot.slane %v22805_v3, %v45349_v32  ;;  %v22829_v10 = vrot.slane %v21992_v0, %v45349_v32 }
 0x3ef   : > { %31215 = vmatpush1.xpose.msra.mxu1 %v25229_v42  ;;  %42967 = vmatmul.mubr.msk.f32.vlgmr.msra.gmra.mrb[72].mxu0 %vm21625_vm3, %v22812_v57  ;;  %v21153_v11 = vadd.s32 %v45337_v20, %v20677_v5  ;;  %v21156_v12 = vadd.s32 %v45337_v20, %v20680_v7  ;;  %v25706_v13 = vcombine.high %v25232_v4, %v25232_v4  ;;  %v20679_v14 = vadd.s32 18944, %v45335_v18  ;;  %v21994_v42 = vld [vmem:[%s44467_s4 + $0x138] sm:$0xff]  ;;  %v21995_v57 = vld [vmem:[%s44467_s4 + $0x140] sm:$0xff] }
 0x3f0   : > { %vm21628_vm4 = vcmp.lt.s32.totalorder %v21154_v8, 363791  ;;  %v22821_v16 = vcombine.high %v22819_v9, %v22819_v9  ;;  %31285 = vmatpush1.xpose.msra.mxu0 %v25230_v50  ;;  %31354 = vmatprep.subr.mxu1 %v25705_v6  ;;  %v22837_v17 = vcombine.high %v22829_v10, %v22829_v10  ;;  %v20682_v21 = vadd.s32 19328, %v45335_v18  ;;  %v25239_v7 = vld [vmem:[%s44474_s20 + $0x298] sm:$0xff] }
 0x3f1   : > { %vm21627_vm5 = vcmp.lt.s32.totalorder %v21153_v11, 363791  ;;  %vm21630_vm6 = vcmp.lt.s32.totalorder %v21156_v12, 363791  ;;  %31424 = vmatprep.subr.mxu0 %v25706_v13  ;;  %v21155_v24 = vadd.s32 %v45337_v20, %v20679_v14  ;;  %v22822_v25 = vcombine.high %v21992_v0, %v21992_v0  ;;  %v21996_v11 = vld [vmem:[%s44467_s4 + $0x148] sm:$0xff] }
 0x3f2   : > { %42968 = vmatprep.mubr.msk.f32.mxu1 %vm21628_vm4, %v22821_v16  ;;  %42970 = vmatprep.mubr.msk.f32.mxu0 %vm21630_vm6, %v22837_v17  ;;  %v21158_v26 = vadd.s32 %v45337_v20, %v20682_v21  ;;  %v20681_v27 = vadd.s32 19200, %v45335_v18  ;;  %v25707_v28 = vcombine.high %v25233_v15, %v25233_v15  ;;  %v20684_v29 = vadd.s32 19584, %v45335_v18 }
 0x3f3   : > { %42969 = vmatmul.mubr.msk.f32.vlgmr.msra.gmra.mrb[72].mxu1 %vm21627_vm5, %v22819_v9  ;;  %vm21629_vm7 = vcmp.lt.s32.totalorder %v21155_v24, 363791  ;;  %v22836_v30 = vrot.slane %v22822_v25, %v45349_v32  ;;  %v22846_v31 = vrot.slane %v21993_v22, %v45349_v32  ;;  %v25708_v33 = vcombine.high %v25234_v23, %v25234_v23 }
 0x3f4   : > { %31355 = vmatpush1.xpose.msra.mxu1 %v25231_v60  ;;  %42971 = vmatmul.mubr.msk.f32.vlgmr.msra.gmra.mrb[74].mxu0 %vm21629_vm7, %v22829_v10  ;;  %vm21632_vm8 = vcmp.lt.s32.totalorder %v21158_v26, 363791  ;;  %v21157_v34 = vadd.s32 %v45337_v20, %v20681_v27  ;;  %v21160_v35 = vadd.s32 %v45337_v20, %v20684_v29  ;;  %v20683_v36 = vadd.s32 19456, %v45335_v18  ;;  %v25238_v60 = vld [vmem:[%s44474_s20 + $0x290] sm:$0xff]  ;;  %v25241_v29 = vld [vmem:[%s44474_s20 + $0x2a8] sm:$0xff] }
 0x3f5   : > { %v22838_v38 = vcombine.high %v22836_v30, %v22836_v30  ;;  %31425 = vmatpush1.xpose.msra.mxu0 %v25232_v4  ;;  %31494 = vmatprep.subr.mxu1 %v25707_v28  ;;  %v22854_v39 = vcombine.high %v22846_v31, %v22846_v31  ;;  %v20686_v40 = vadd.s32 19840, %v45335_v18  ;;  %v22839_v41 = vcombine.high %v21993_v22, %v21993_v22 }
 0x3f6   : > { %vm21631_vm9 = vcmp.lt.s32.totalorder %v21157_v34, 363791  ;;  %vm21634_vm10 = vcmp.lt.s32.totalorder %v21160_v35, 363791  ;;  %31564 = vmatprep.subr.mxu0 %v25708_v33  ;;  %v21159_v44 = vadd.s32 %v45337_v20, %v20683_v36  ;;  %v20685_v45 = vadd.s32 19712, %v45335_v18  ;;  %v21997_v34 = vld [vmem:[%s44467_s4 + $0x150] sm:$0xff] }
 0x3f7   : > { %42972 = vmatprep.mubr.msk.f32.mxu1 %vm21632_vm8, %v22838_v38  ;;  %42974 = vmatprep.mubr.msk.f32.mxu0 %vm21634_vm10, %v22854_v39  ;;  %v21162_v46 = vadd.s32 %v45337_v20, %v20686_v40  ;;  %v22853_v47 = vrot.slane %v22839_v41, %v45349_v32  ;;  %v25709_v48 = vcombine.high %v25235_v37, %v25235_v37  ;;  %v20688_v49 = vadd.s32 20096, %v45335_v18  ;;  %v25242_v35 = vld [vmem:[%s44474_s20 + $0x2b0] sm:$0xff] }
 0x3f8   : > { %42973 = vmatmul.mubr.msk.f32.vlgmr.msra.gmra.mrb[74].mxu1 %vm21631_vm9, %v22836_v30  ;;  %vm21633_vm11 = vcmp.lt.s32.totalorder %v21159_v44, 363791  ;;  %v21161_v50 = vadd.s32 %v45337_v20, %v20685_v45  ;;  %v22863_v51 = vrot.slane %v21994_v42, %v45349_v32  ;;  %v25710_v52 = vcombine.high %v25236_v43, %v25236_v43 }
 0x3f9   : > { %31495 = vmatpush1.xpose.msra.mxu1 %v25233_v15  ;;  %42975 = vmatmul.mubr.msk.f32.vlgmr.msra.gmra.mrb[76].mxu0 %vm21633_vm11, %v22846_v31  ;;  %vm21636_vm12 = vcmp.lt.s32.totalorder %v21162_v46, 363791  ;;  %v22855_v54 = vcombine.high %v22853_v47, %v22853_v47  ;;  %v21164_v55 = vadd.s32 %v45337_v20, %v20688_v49  ;;  %v20687_v56 = vadd.s32 19968, %v45335_v18  ;;  %v25240_v15 = vld [vmem:[%s44474_s20 + $0x2a0] sm:$0xff] }
 0x3fa   : > { %31565 = vmatpush1.xpose.msra.mxu0 %v25234_v23  ;;  %vm21635_vm13 = vcmp.lt.s32.totalorder %v21161_v50, 363791  ;;  %31634 = vmatprep.subr.mxu1 %v25709_v48  ;;  %v22871_v19 = vcombine.high %v22863_v51, %v22863_v51  ;;  %v20690_v58 = vadd.s32 20352, %v45335_v18  ;;  %v22856_v59 = vcombine.high %v21994_v42, %v21994_v42  ;;  %v25243_v48 = vld [vmem:[%s44474_s20 + $0x2b8] sm:$0xff] }
 0x3fb   : > { %42976 = vmatprep.mubr.msk.f32.mxu1 %vm21636_vm12, %v22855_v54  ;;  %vm21638_vm14 = vcmp.lt.s32.totalorder %v21164_v55, 363791  ;;  %31704 = vmatprep.subr.mxu0 %v25710_v52  ;;  %v21163_v61 = vadd.s32 %v45337_v20, %v20687_v56  ;;  %v20689_v62 = vadd.s32 20224, %v45335_v18  ;;  %v25711_v63 = vcombine.high %v25237_v53, %v25237_v53  ;;  %v25244_v54 = vld [vmem:[%s44474_s20 + $0x2c0] sm:$0xff] }
 0x3fc   : > { %42977 = vmatmul.mubr.msk.f32.vlgmr.msra.gmra.mrb[76].mxu1 %vm21635_vm13, %v22853_v47  ;;  %42978 = vmatprep.mubr.msk.f32.mxu0 %vm21638_vm14, %v22871_v19  ;;  %v21166_v0 = vadd.s32 %v45337_v20, %v20690_v58  ;;  %v22870_v1 = vrot.slane %v22856_v59, %v45349_v32  ;;  %v20692_v2 = vadd.s32 20608, %v45335_v18  ;;  %v22880_v3 = vrot.slane %v21995_v57, %v45349_v32 }
 0x3fd   : > { %31635 = vmatpush1.xpose.msra.mxu1 %v25235_v37  ;;  %vm21637_vm15 = vcmp.lt.s32.totalorder %v21163_v61, 363791  ;;  %v21165_v4 = vadd.s32 %v45337_v20, %v20689_v62  ;;  %v25712_v5 = vcombine.high %v25238_v60, %v25238_v60  ;;  %v20691_v6 = vadd.s32 20480, %v45335_v18 }
 0x3fe   : > { %42979 = vmatmul.mubr.msk.f32.vlgmr.msra.gmra.mrb[78].mxu0 %vm21637_vm15, %v22863_v51  ;;  %vm21640_vm0 = vcmp.lt.s32.totalorder %v21166_v0, 363791  ;;  %v22872_v8 = vcombine.high %v22870_v1, %v22870_v1  ;;  %31774 = vmatprep.subr.mxu1 %v25711_v63  ;;  %v21168_v9 = vadd.s32 %v45337_v20, %v20692_v2  ;;  %v22888_v10 = vcombine.high %v22880_v3, %v22880_v3  ;;  %v25245_v63 = vld [vmem:[%s44474_s20 + $0x2c8] sm:$0xff] }
 0x3ff   : > { %31705 = vmatpush1.xpose.msra.mxu0 %v25236_v43  ;;  %vm21639_vm1 = vcmp.lt.s32.totalorder %v21165_v4, 363791  ;;  %v21167_v12 = vadd.s32 %v45337_v20, %v20691_v6  ;;  %v20694_v13 = vadd.s32 20864, %v45335_v18  ;;  %v22873_v14 = vcombine.high %v21995_v57, %v21995_v57 }
 0x400   : > { %42980 = vmatprep.mubr.msk.f32.mxu1 %vm21640_vm0, %v22872_v8  ;;  %vm21642_vm2 = vcmp.lt.s32.totalorder %v21168_v9, 363791  ;;  %31844 = vmatprep.subr.mxu0 %v25712_v5  ;;  %v20693_v16 = vadd.s32 20736, %v45335_v18  ;;  %v25713_v17 = vcombine.high %v25239_v7, %v25239_v7  ;;  %v20696_v21 = vadd.s32 21120, %v45335_v18 }
 0x401   : > { %42981 = vmatmul.mubr.msk.f32.vlgmr.msra.gmra.mrb[78].mxu1 %vm21639_vm1, %v22870_v1  ;;  %42982 = vmatprep.mubr.msk.f32.mxu0 %vm21642_vm2, %v22888_v10  ;;  %vm21641_vm3 = vcmp.lt.s32.totalorder %v21167_v12, 363791  ;;  %v21170_v22 = vadd.s32 %v45337_v20, %v20694_v13  ;;  %v22887_v23 = vrot.slane %v22873_v14, %v45349_v32  ;;  %v22897_v24 = vrot.slane %v21996_v11, %v45349_v32 }
 0x402   : > { %31775 = vmatpush1.xpose.msra.mxu1 %v25237_v53  ;;  %42983 = vmatmul.mubr.msk.f32.vlgmr.msra.gmra.mrb[80].mxu0 %vm21641_vm3, %v22880_v3  ;;  %v21169_v25 = vadd.s32 %v45337_v20, %v20693_v16  ;;  %v21172_v26 = vadd.s32 %v45337_v20, %v20696_v21  ;;  %v25714_v27 = vcombine.high %v25240_v15, %v25240_v15  ;;  %v20695_v28 = vadd.s32 20992, %v45335_v18  ;;  %v21998_v53 = vld [vmem:[%s44467_s4 + $0x158] sm:$0xff]  ;;  %v21999_v3 = vld [vmem:[%s44467_s4 + $0x160] sm:$0xff] }
 0x403   : > { %vm21644_vm4 = vcmp.lt.s32.totalorder %v21170_v22, 363791  ;;  %v22889_v30 = vcombine.high %v22887_v23, %v22887_v23  ;;  %31845 = vmatpush1.xpose.msra.mxu0 %v25238_v60  ;;  %31914 = vmatprep.subr.mxu1 %v25713_v17  ;;  %v22905_v31 = vcombine.high %v22897_v24, %v22897_v24  ;;  %v20698_v33 = vadd.s32 21376, %v45335_v18  ;;  %v25247_v21 = vld [vmem:[%s44474_s20 + $0x2d8] sm:$0xff] }
 0x404   : > { %vm21643_vm5 = vcmp.lt.s32.totalorder %v21169_v25, 363791  ;;  %vm21646_vm6 = vcmp.lt.s32.totalorder %v21172_v26, 363791  ;;  %31984 = vmatprep.subr.mxu0 %v25714_v27  ;;  %v21171_v36 = vadd.s32 %v45337_v20, %v20695_v28  ;;  %v22890_v37 = vcombine.high %v21996_v11, %v21996_v11  ;;  %v22000_v25 = vld [vmem:[%s44467_s4 + $0x168] sm:$0xff] }
 0x405   : > { %42984 = vmatprep.mubr.msk.f32.mxu1 %vm21644_vm4, %v22889_v30  ;;  %42986 = vmatprep.mubr.msk.f32.mxu0 %vm21646_vm6, %v22905_v31  ;;  %v21174_v38 = vadd.s32 %v45337_v20, %v20698_v33  ;;  %v20697_v39 = vadd.s32 21248, %v45335_v18  ;;  %v25715_v40 = vcombine.high %v25241_v29, %v25241_v29  ;;  %v20700_v41 = vadd.s32 21632, %v45335_v18 }
 0x406   : > { %42985 = vmatmul.mubr.msk.f32.vlgmr.msra.gmra.mrb[80].mxu1 %vm21643_vm5, %v22887_v23  ;;  %vm21645_vm7 = vcmp.lt.s32.totalorder %v21171_v36, 363791  ;;  %v22904_v42 = vrot.slane %v22890_v37, %v45349_v32  ;;  %v22914_v43 = vrot.slane %v21997_v34, %v45349_v32  ;;  %v25716_v44 = vcombine.high %v25242_v35, %v25242_v35 }
 0x407   : > { %31915 = vmatpush1.xpose.msra.mxu1 %v25239_v7  ;;  %42987 = vmatmul.mubr.msk.f32.vlgmr.msra.gmra.mrb[82].mxu0 %vm21645_vm7, %v22897_v24  ;;  %vm21648_vm8 = vcmp.lt.s32.totalorder %v21174_v38, 363791  ;;  %v21173_v45 = vadd.s32 %v45337_v20, %v20697_v39  ;;  %v21176_v46 = vadd.s32 %v45337_v20, %v20700_v41  ;;  %v20699_v47 = vadd.s32 21504, %v45335_v18  ;;  %v25246_v7 = vld [vmem:[%s44474_s20 + $0x2d0] sm:$0xff]  ;;  %v25249_v41 = vld [vmem:[%s44474_s20 + $0x2e8] sm:$0xff] }
 0x408   : > { %v22906_v49 = vcombine.high %v22904_v42, %v22904_v42  ;;  %31985 = vmatpush1.xpose.msra.mxu0 %v25240_v15  ;;  %32054 = vmatprep.subr.mxu1 %v25715_v40  ;;  %v22922_v50 = vcombine.high %v22914_v43, %v22914_v43  ;;  %v20702_v51 = vadd.s32 21888, %v45335_v18  ;;  %v22907_v52 = vcombine.high %v21997_v34, %v21997_v34 }
 0x409   : > { %vm21647_vm9 = vcmp.lt.s32.totalorder %v21173_v45, 363791  ;;  %vm21650_vm10 = vcmp.lt.s32.totalorder %v21176_v46, 363791  ;;  %32124 = vmatprep.subr.mxu0 %v25716_v44  ;;  %v21175_v55 = vadd.s32 %v45337_v20, %v20699_v47  ;;  %v20701_v56 = vadd.s32 21760, %v45335_v18  ;;  %v22001_v45 = vld [vmem:[%s44467_s4 + $0x170] sm:$0xff] }
 0x40a   : > { %42988 = vmatprep.mubr.msk.f32.mxu1 %vm21648_vm8, %v22906_v49  ;;  %42990 = vmatprep.mubr.msk.f32.mxu0 %vm21650_vm10, %v22922_v50  ;;  %v21178_v57 = vadd.s32 %v45337_v20, %v20702_v51  ;;  %v22921_v19 = vrot.slane %v22907_v52, %v45349_v32  ;;  %v25717_v58 = vcombine.high %v25243_v48, %v25243_v48  ;;  %v20704_v59 = vadd.s32 22144, %v45335_v18  ;;  %v25250_v46 = vld [vmem:[%s44474_s20 + $0x2f0] sm:$0xff] }
 0x40b   : > { %42989 = vmatmul.mubr.msk.f32.vlgmr.msra.gmra.mrb[82].mxu1 %vm21647_vm9, %v22904_v42  ;;  %vm21649_vm11 = vcmp.lt.s32.totalorder %v21175_v55, 363791  ;;  %v21177_v60 = vadd.s32 %v45337_v20, %v20701_v56  ;;  %v22931_v61 = vrot.slane %v21998_v53, %v45349_v32  ;;  %v25718_v62 = vcombine.high %v25244_v54, %v25244_v54 }
 0x40c   : > { %32055 = vmatpush1.xpose.msra.mxu1 %v25241_v29  ;;  %42991 = vmatmul.mubr.msk.f32.vlgmr.msra.gmra.mrb[84].mxu0 %vm21649_vm11, %v22914_v43  ;;  %vm21652_vm12 = vcmp.lt.s32.totalorder %v21178_v57, 363791  ;;  %v22923_v0 = vcombine.high %v22921_v19, %v22921_v19  ;;  %v21180_v1 = vadd.s32 %v45337_v20, %v20704_v59  ;;  %v20703_v2 = vadd.s32 22016, %v45335_v18  ;;  %v25248_v29 = vld [vmem:[%s44474_s20 + $0x2e0] sm:$0xff] }
 0x40d   : > { %32125 = vmatpush1.xpose.msra.mxu0 %v25242_v35  ;;  %vm21651_vm13 = vcmp.lt.s32.totalorder %v21177_v60, 363791  ;;  %32194 = vmatprep.subr.mxu1 %v25717_v58  ;;  %v22939_v4 = vcombine.high %v22931_v61, %v22931_v61  ;;  %v20706_v5 = vadd.s32 22400, %v45335_v18  ;;  %v22924_v6 = vcombine.high %v21998_v53, %v21998_v53  ;;  %v25251_v58 = vld [vmem:[%s44474_s20 + $0x2f8] sm:$0xff] }
 0x40e   : > { %42992 = vmatprep.mubr.msk.f32.mxu1 %vm21652_vm12, %v22923_v0  ;;  %vm21654_vm14 = vcmp.lt.s32.totalorder %v21180_v1, 363791  ;;  %32264 = vmatprep.subr.mxu0 %v25718_v62  ;;  %v21179_v8 = vadd.s32 %v45337_v20, %v20703_v2  ;;  %v20705_v9 = vadd.s32 22272, %v45335_v18  ;;  %v25719_v10 = vcombine.high %v25245_v63, %v25245_v63  ;;  %v45985_v0 = vld [vmem:[%s44474_s20 + $0x300] sm:$0xff] }
 0x40f   : > { %42993 = vmatmul.mubr.msk.f32.vlgmr.msra.gmra.mrb[84].mxu1 %vm21651_vm13, %v22921_v19  ;;  %42994 = vmatprep.mubr.msk.f32.mxu0 %vm21654_vm14, %v22939_v4  ;;  %v21182_v11 = vadd.s32 %v45337_v20, %v20706_v5  ;;  %v22938_v12 = vrot.slane %v22924_v6, %v45349_v32  ;;  %v20708_v13 = vadd.s32 22656, %v45335_v18  ;;  %v22948_v14 = vrot.slane %v21999_v3, %v45349_v32 }
 0x410   : > { %32195 = vmatpush1.xpose.msra.mxu1 %v25243_v48  ;;  %vm21653_vm15 = vcmp.lt.s32.totalorder %v21179_v8, 363791  ;;  %v21181_v15 = vadd.s32 %v45337_v20, %v20705_v9  ;;  %v25720_v16 = vcombine.high %v25246_v7, %v25246_v7  ;;  %v20707_v17 = vadd.s32 22528, %v45335_v18 }
 0x411   : > { %42995 = vmatmul.mubr.msk.f32.vlgmr.msra.gmra.mrb[86].mxu0 %vm21653_vm15, %v22931_v61  ;;  %vm21656_vm0 = vcmp.lt.s32.totalorder %v21182_v11, 363791  ;;  %v22940_v22 = vcombine.high %v22938_v12, %v22938_v12  ;;  %32334 = vmatprep.subr.mxu1 %v25719_v10  ;;  %v21184_v23 = vadd.s32 %v45337_v20, %v20708_v13  ;;  %v22956_v24 = vcombine.high %v22948_v14, %v22948_v14 }
 0x412   : > { %32265 = vmatpush1.xpose.msra.mxu0 %v25244_v54  ;;  %vm21655_vm1 = vcmp.lt.s32.totalorder %v21181_v15, 363791  ;;  %v21183_v26 = vadd.s32 %v45337_v20, %v20707_v17  ;;  %v20710_v27 = vadd.s32 22912, %v45335_v18  ;;  %v22941_v28 = vcombine.high %v21999_v3, %v21999_v3 }
 0x413   : > { %42996 = vmatprep.mubr.msk.f32.mxu1 %vm21656_vm0, %v22940_v22  ;;  %vm21658_vm2 = vcmp.lt.s32.totalorder %v21184_v23, 363791  ;;  %32404 = vmatprep.subr.mxu0 %v25720_v16  ;;  %v20709_v30 = vadd.s32 22784, %v45335_v18  ;;  %v25721_v31 = vcombine.high %v25247_v21, %v25247_v21  ;;  %v20712_v33 = vadd.s32 23168, %v45335_v18 }
 0x414   : > { %42997 = vmatmul.mubr.msk.f32.vlgmr.msra.gmra.mrb[86].mxu1 %vm21655_vm1, %v22938_v12  ;;  %42998 = vmatprep.mubr.msk.f32.mxu0 %vm21658_vm2, %v22956_v24  ;;  %vm21657_vm3 = vcmp.lt.s32.totalorder %v21183_v26, 363791  ;;  %v21186_v34 = vadd.s32 %v45337_v20, %v20710_v27  ;;  %v22955_v35 = vrot.slane %v22941_v28, %v45349_v32  ;;  %v22965_v36 = vrot.slane %v22000_v25, %v45349_v32 }
 0x415   : > { %32335 = vmatpush1.xpose.msra.mxu1 %v25245_v63  ;;  %42999 = vmatmul.mubr.msk.f32.vlgmr.msra.gmra.mrb[88].mxu0 %vm21657_vm3, %v22948_v14  ;;  %v21185_v37 = vadd.s32 %v45337_v20, %v20709_v30  ;;  %v21188_v38 = vadd.s32 %v45337_v20, %v20712_v33  ;;  %v25722_v39 = vcombine.high %v25248_v29, %v25248_v29  ;;  %v20711_v40 = vadd.s32 23040, %v45335_v18  ;;  %v22002_v63 = vld [vmem:[%s44467_s4 + $0x178] sm:$0xff]  ;;  %v46002_v14 = vld [vmem:[%s44474_s20 + $0x308] sm:$0xff] }
 0x416   : > { %vm21660_vm4 = vcmp.lt.s32.totalorder %v21186_v34, 363791  ;;  %v22957_v42 = vcombine.high %v22955_v35, %v22955_v35  ;;  %32405 = vmatpush1.xpose.msra.mxu0 %v25246_v7  ;;  %32474 = vmatprep.subr.mxu1 %v25721_v31  ;;  %v22973_v43 = vcombine.high %v22965_v36, %v22965_v36  ;;  %v20714_v44 = vadd.s32 23424, %v45335_v18 }
 0x417   : > { %vm21659_vm5 = vcmp.lt.s32.totalorder %v21185_v37, 363791  ;;  %vm21662_vm6 = vcmp.lt.s32.totalorder %v21188_v38, 363791  ;;  %32544 = vmatprep.subr.mxu0 %v25722_v39  ;;  %v21187_v47 = vadd.s32 %v45337_v20, %v20711_v40  ;;  %v22958_v48 = vcombine.high %v22000_v25, %v22000_v25  ;;  %v25254_v25 = vld [vmem:[%s44474_s20 + $0x310] sm:$0xff] }
 0x418   : > { %43000 = vmatprep.mubr.msk.f32.mxu1 %vm21660_vm4, %v22957_v42  ;;  %43002 = vmatprep.mubr.msk.f32.mxu0 %vm21662_vm6, %v22973_v43  ;;  %v21190_v49 = vadd.s32 %v45337_v20, %v20714_v44  ;;  %v20713_v50 = vadd.s32 23296, %v45335_v18  ;;  %v25723_v51 = vcombine.high %v25249_v41, %v25249_v41  ;;  %v20716_v52 = vadd.s32 23680, %v45335_v18 }
 0x419   : > { %43001 = vmatmul.mubr.msk.f32.vlgmr.msra.gmra.mrb[88].mxu1 %vm21659_vm5, %v22955_v35  ;;  %vm21661_vm7 = vcmp.lt.s32.totalorder %v21187_v47, 363791  ;;  %v22972_v53 = vrot.slane %v22958_v48, %v45349_v32  ;;  %v22982_v54 = vrot.slane %v22001_v45, %v45349_v32  ;;  %v25724_v55 = vcombine.high %v25250_v46, %v25250_v46 }
 0x41a   : > { %32475 = vmatpush1.xpose.msra.mxu1 %v25247_v21  ;;  %43003 = vmatmul.mubr.msk.f32.vlgmr.msra.gmra.mrb[90].mxu0 %vm21661_vm7, %v22965_v36  ;;  %vm21664_vm8 = vcmp.lt.s32.totalorder %v21190_v49, 363791  ;;  %v21189_v56 = vadd.s32 %v45337_v20, %v20713_v50  ;;  %v21192_v57 = vadd.s32 %v45337_v20, %v20716_v52  ;;  %v20715_v19 = vadd.s32 23552, %v45335_v18  ;;  %v22003_v21 = vld [vmem:[%s44467_s4 + $0x180] sm:$0xff] }
 0x41b   : > { %v22974_v59 = vcombine.high %v22972_v53, %v22972_v53  ;;  %32545 = vmatpush1.xpose.msra.mxu0 %v25248_v29  ;;  %32614 = vmatprep.subr.mxu1 %v25723_v51  ;;  %v22990_v60 = vcombine.high %v22982_v54, %v22982_v54  ;;  %v20718_v61 = vadd.s32 23936, %v45335_v18  ;;  %v22975_v62 = vcombine.high %v22001_v45, %v22001_v45  ;;  %v22004_v45 = vld [vmem:[%s44467_s4 + $0x188] sm:$0xff] }
 0x41c   : > { %vm21663_vm9 = vcmp.lt.s32.totalorder %v21189_v56, 363791  ;;  %vm21666_vm10 = vcmp.lt.s32.totalorder %v21192_v57, 363791  ;;  %32684 = vmatprep.subr.mxu0 %v25724_v55  ;;  %v21191_v1 = vadd.s32 %v45337_v20, %v20715_v19  ;;  %v20717_v2 = vadd.s32 23808, %v45335_v18  ;;  %v45989_v3 = vpop.f32.mrb[0].mxu0  ;;  %v45991_v4 = vpop.f32.mrb[0].mxu1  ;;  %v25256_v51 = vld [vmem:[%s44474_s20 + $0x320] sm:$0xff] }
 0x41d   : > { %43004 = vmatprep.mubr.msk.f32.mxu1 %vm21664_vm8, %v22974_v59  ;;  %43006 = vmatprep.mubr.msk.f32.mxu0 %vm21666_vm10, %v22990_v60  ;;  %v21194_v5 = vadd.s32 %v45337_v20, %v20718_v61  ;;  %v22989_v6 = vrot.slane %v22975_v62, %v45349_v32  ;;  %v25725_v7 = vcombine.high %v25251_v58, %v25251_v58  ;;  %v20720_v8 = vadd.s32 24192, %v45335_v18  ;;  %v26172_v9 = vpop.f32.mrb[1].mxu0  ;;  %v26242_v10 = vpop.f32.mrb[1].mxu1 }
 0x41e   : > { %43005 = vmatmul.mubr.msk.f32.vlgmr.msra.gmra.mrb[90].mxu1 %vm21663_vm9, %v22972_v53  ;;  %vm21665_vm11 = vcmp.lt.s32.totalorder %v21191_v1, 363791  ;;  %v21193_v11 = vadd.s32 %v45337_v20, %v20717_v2  ;;  %v22999_v12 = vrot.slane %v22002_v63, %v45349_v32  ;;  %v25726_v13 = vcombine.high %v45985_v0, %v45985_v0 }
 0x41f   : > { %32615 = vmatpush1.xpose.msra.mxu1 %v25249_v41  ;;  %43007 = vmatmul.mubr.msk.f32.vlgmr.msra.gmra.mrb[92].mxu0 %vm21665_vm11, %v22982_v54  ;;  %vm21668_vm12 = vcmp.lt.s32.totalorder %v21194_v5, 363791  ;;  %v22991_v15 = vcombine.high %v22989_v6, %v22989_v6  ;;  %v21196_v16 = vadd.s32 %v45337_v20, %v20720_v8  ;;  %v20719_v17 = vadd.s32 24064, %v45335_v18  ;;  %v46025_v41 = vld [vmem:[%s44474_s20 + $0x318] sm:$0xff] }
 0x420   : > { %32685 = vmatpush1.xpose.msra.mxu0 %v25250_v46  ;;  %vm21667_vm13 = vcmp.lt.s32.totalorder %v21193_v11, 363791  ;;  %32754 = vmatprep.subr.mxu1 %v25725_v7  ;;  %v23007_v22 = vcombine.high %v22999_v12, %v22999_v12  ;;  %v20722_v23 = vadd.s32 24448, %v45335_v18  ;;  %v22992_v24 = vcombine.high %v22002_v63, %v22002_v63  ;;  %v46009_v26 = vpop.f32.mrb[2].mxu0  ;;  %v46011_v27 = vpop.f32.mrb[2].mxu1  ;;  %v46050_v63 = vld [vmem:[%s44474_s20 + $0x328] sm:$0xff]  ;;  %v46057_v7 = vld [vmem:[%s44474_s20 + $0x330] sm:$0xff] }
 0x421   : > { %43008 = vmatprep.mubr.msk.f32.mxu1 %vm21668_vm12, %v22991_v15  ;;  %vm21670_vm14 = vcmp.lt.s32.totalorder %v21196_v16, 363791  ;;  %32824 = vmatprep.subr.mxu0 %v25726_v13  ;;  %v21195_v28 = vadd.s32 %v45337_v20, %v20719_v17  ;;  %v20721_v29 = vadd.s32 24320, %v45335_v18  ;;  %v25727_v30 = vcombine.high %v46002_v14, %v46002_v14  ;;  %v26312_v31 = vpop.f32.mrb[3].mxu0  ;;  %v26382_v33 = vpop.f32.mrb[3].mxu1 }
 0x422   : > { %43009 = vmatmul.mubr.msk.f32.vlgmr.msra.gmra.mrb[92].mxu1 %vm21667_vm13, %v22989_v6  ;;  %43010 = vmatprep.mubr.msk.f32.mxu0 %vm21670_vm14, %v23007_v22  ;;  %v21198_v34 = vadd.s32 %v45337_v20, %v20722_v23  ;;  %v23006_v35 = vrot.slane %v22992_v24, %v45349_v32  ;;  %v20724_v36 = vadd.s32 24704, %v45335_v18  ;;  %v23016_v37 = vrot.slane %v22003_v21, %v45349_v32  ;;  %v22005_v6 = vld [vmem:[%s44467_s4 + $0x190] sm:$0xff] }
 0x423   : > { %32755 = vmatpush1.xpose.msra.mxu1 %v25251_v58  ;;  %vm21669_vm15 = vcmp.lt.s32.totalorder %v21195_v28, 363791  ;;  %v21197_v38 = vadd.s32 %v45337_v20, %v20721_v29  ;;  %v25728_v39 = vcombine.high %v25254_v25, %v25254_v25  ;;  %v20723_v40 = vadd.s32 24576, %v45335_v18  ;;  %v25259_v29 = vld [vmem:[%s44474_s20 + $0x338] sm:$0xff] }
 0x424   : > { %43011 = vmatmul.mubr.msk.f32.vlgmr.msra.gmra.mrb[94].mxu0 %vm21669_vm15, %v22999_v12  ;;  %vm21672_vm0 = vcmp.lt.s32.totalorder %v21198_v34, 363791  ;;  %v23008_v42 = vcombine.high %v23006_v35, %v23006_v35  ;;  %32894 = vmatprep.subr.mxu1 %v25727_v30  ;;  %v21200_v43 = vadd.s32 %v45337_v20, %v20724_v36  ;;  %v23024_v44 = vcombine.high %v23016_v37, %v23016_v37  ;;  %v46029_v46 = vpop.f32.mrb[4].mxu0  ;;  %v46031_v47 = vpop.f32.mrb[4].mxu1  ;;  %v22006_v36 = vld [vmem:[%s44467_s4 + $0x198] sm:$0xff] }
 0x425   : > { %32825 = vmatpush1.xpose.msra.mxu0 %v45985_v0  ;;  %vm21671_vm1 = vcmp.lt.s32.totalorder %v21197_v38, 363791  ;;  %v21199_v48 = vadd.s32 %v45337_v20, %v20723_v40  ;;  %v20726_v49 = vadd.s32 24960, %v45335_v18  ;;  %v23009_v50 = vcombine.high %v22003_v21, %v22003_v21  ;;  %v26452_v52 = vpop.f32.mrb[5].mxu0  ;;  %v26522_v53 = vpop.f32.mrb[5].mxu1 }
 0x426   : > { %43012 = vmatprep.mubr.msk.f32.mxu1 %vm21672_vm0, %v23008_v42  ;;  %vm21674_vm2 = vcmp.lt.s32.totalorder %v21200_v43, 363791  ;;  %32964 = vmatprep.subr.mxu0 %v25728_v39  ;;  %v20725_v54 = vadd.s32 24832, %v45335_v18  ;;  %v25729_v55 = vcombine.high %v46025_v41, %v46025_v41  ;;  %v20728_v56 = vadd.s32 25216, %v45335_v18  ;;  %v46099_v52 = vld [vmem:[%s44474_s20 + $0x348] sm:$0xff] }
 0x427   : > { %43013 = vmatmul.mubr.msk.f32.vlgmr.msra.gmra.mrb[94].mxu1 %vm21671_vm1, %v23006_v35  ;;  %43014 = vmatprep.mubr.msk.f32.mxu0 %vm21674_vm2, %v23024_v44  ;;  %vm21673_vm3 = vcmp.lt.s32.totalorder %v21199_v48, 363791  ;;  %v21202_v57 = vadd.s32 %v45337_v20, %v20726_v49  ;;  %v23023_v19 = vrot.slane %v23009_v50, %v45349_v32  ;;  %v23033_v58 = vrot.slane %v22004_v45, %v45349_v32 }
 0x428   : > { %32895 = vmatpush1.xpose.msra.mxu1 %v46002_v14  ;;  %43015 = vmatmul.mubr.msk.f32.vlgmr.msra.gmra.mrb[96].mxu0 %vm21673_vm3, %v23016_v37  ;;  %v21201_v59 = vadd.s32 %v45337_v20, %v20725_v54  ;;  %v21204_v60 = vadd.s32 %v45337_v20, %v20728_v56  ;;  %v25730_v61 = vcombine.high %v25256_v51, %v25256_v51  ;;  %v20727_v62 = vadd.s32 25088, %v45335_v18  ;;  %v46052_v0 = vpop.f32.mrb[6].mxu0  ;;  %v46082_v37 = vld [vmem:[%s44474_s20 + $0x340] sm:$0xff] }
 0x429   : > { %vm21676_vm4 = vcmp.lt.s32.totalorder %v21202_v57, 363791  ;;  %v23025_v1 = vcombine.high %v23023_v19, %v23023_v19  ;;  %32965 = vmatpush1.xpose.msra.mxu0 %v25254_v25  ;;  %33034 = vmatprep.subr.mxu1 %v25729_v55  ;;  %v23041_v2 = vcombine.high %v23033_v58, %v23033_v58  ;;  %v20730_v5 = vadd.s32 25472, %v45335_v18  ;;  %v26592_v8 = vpop.f32.mrb[7].mxu0  ;;  %v46059_v9 = vpop.f32.mrb[6].mxu1  ;;  %v22007_v57 = vld [vmem:[%s44467_s4 + $0x1a0] sm:$0xff] }
 0x42a   : > { %vm21675_vm5 = vcmp.lt.s32.totalorder %v21201_v59, 363791  ;;  %vm21678_vm6 = vcmp.lt.s32.totalorder %v21204_v60, 363791  ;;  %33104 = vmatprep.subr.mxu0 %v25730_v61  ;;  %v21203_v10 = vadd.s32 %v45337_v20, %v20727_v62  ;;  %v23026_v11 = vcombine.high %v22004_v45, %v22004_v45  ;;  %v26662_v12 = vpop.f32.mrb[7].mxu1  ;;  %v25262_v60 = vld [vmem:[%s44474_s20 + $0x350] sm:$0xff] }
 0x42b   : > { %43016 = vmatprep.mubr.msk.f32.mxu1 %vm21676_vm4, %v23025_v1  ;;  %43018 = vmatprep.mubr.msk.f32.mxu0 %vm21678_vm6, %v23041_v2  ;;  %v21206_v13 = vadd.s32 %v45337_v20, %v20730_v5  ;;  %v20729_v14 = vadd.s32 25344, %v45335_v18  ;;  %v25731_v15 = vcombine.high %v46050_v63, %v46050_v63  ;;  %v20732_v16 = vadd.s32 25728, %v45335_v18 }
 0x42c   : > { %43017 = vmatmul.mubr.msk.f32.vlgmr.msra.gmra.mrb[96].mxu1 %vm21675_vm5, %v23023_v19  ;;  %vm21677_vm7 = vcmp.lt.s32.totalorder %v21203_v10, 363791  ;;  %v23040_v17 = vrot.slane %v23026_v11, %v45349_v32  ;;  %v23050_v21 = vrot.slane %v22005_v6, %v45349_v32  ;;  %v25732_v22 = vcombine.high %v46057_v7, %v46057_v7  ;;  %v46072_v23 = vpop.f32.mrb[8].mxu0 }
 0x42d   : > { %33035 = vmatpush1.xpose.msra.mxu1 %v46025_v41  ;;  %43019 = vmatmul.mubr.msk.f32.vlgmr.msra.gmra.mrb[98].mxu0 %vm21677_vm7, %v23033_v58  ;;  %vm21680_vm8 = vcmp.lt.s32.totalorder %v21206_v13, 363791  ;;  %v21205_v24 = vadd.s32 %v45337_v20, %v20729_v14  ;;  %v21208_v25 = vadd.s32 %v45337_v20, %v20732_v16  ;;  %v20731_v28 = vadd.s32 25600, %v45335_v18  ;;  %v26732_v30 = vpop.f32.mrb[9].mxu0 }
 0x42e   : > { %v23042_v31 = vcombine.high %v23040_v17, %v23040_v17  ;;  %33105 = vmatpush1.xpose.msra.mxu0 %v25256_v51  ;;  %33174 = vmatprep.subr.mxu1 %v25731_v15  ;;  %v23058_v33 = vcombine.high %v23050_v21, %v23050_v21  ;;  %v20734_v34 = vadd.s32 25984, %v45335_v18  ;;  %v23043_v35 = vcombine.high %v22005_v6, %v22005_v6  ;;  %v46084_v38 = vpop.f32.mrb[8].mxu1  ;;  %v46123_v15 = vld [vmem:[%s44474_s20 + $0x358] sm:$0xff]  ;;  %v25264_v30 = vld [vmem:[%s44474_s20 + $0x360] sm:$0xff] }
 0x42f   : > { %vm21679_vm9 = vcmp.lt.s32.totalorder %v21205_v24, 363791  ;;  %vm21682_vm10 = vcmp.lt.s32.totalorder %v21208_v25, 363791  ;;  %33244 = vmatprep.subr.mxu0 %v25732_v22  ;;  %v21207_v39 = vadd.s32 %v45337_v20, %v20731_v28  ;;  %v20733_v40 = vadd.s32 25856, %v45335_v18  ;;  %v26802_v41 = vpop.f32.mrb[9].mxu1 }
 0x430   : > { %43020 = vmatprep.mubr.msk.f32.mxu1 %vm21680_vm8, %v23042_v31  ;;  %43022 = vmatprep.mubr.msk.f32.mxu0 %vm21682_vm10, %v23058_v33  ;;  %v21210_v42 = vadd.s32 %v45337_v20, %v20734_v34  ;;  %v23057_v43 = vrot.slane %v23043_v35, %v45349_v32  ;;  %v25733_v44 = vcombine.high %v25259_v29, %v25259_v29  ;;  %v20736_v45 = vadd.s32 26240, %v45335_v18  ;;  %v46092_v48 = vpop.f32.mrb[10].mxu0 }
 0x431   : > { %43021 = vmatmul.mubr.msk.f32.vlgmr.msra.gmra.mrb[98].mxu1 %vm21679_vm9, %v23040_v17  ;;  %vm21681_vm11 = vcmp.lt.s32.totalorder %v21207_v39, 363791  ;;  %v21209_v49 = vadd.s32 %v45337_v20, %v20733_v40  ;;  %v23067_v50 = vrot.slane %v22006_v36, %v45349_v32  ;;  %v25734_v51 = vcombine.high %v46082_v37, %v46082_v37  ;;  %v26872_v53 = vpop.f32.mrb[11].mxu0 }
 0x432   : > { %33175 = vmatpush1.xpose.msra.mxu1 %v46050_v63  ;;  %43023 = vmatmul.mubr.msk.f32.vlgmr.msra.gmra.mrb[100].mxu0 %vm21681_vm11, %v23050_v21  ;;  %vm21684_vm12 = vcmp.lt.s32.totalorder %v21210_v42, 363791  ;;  %v23059_v54 = vcombine.high %v23057_v43, %v23057_v43  ;;  %v21212_v55 = vadd.s32 %v45337_v20, %v20736_v45  ;;  %v20735_v56 = vadd.s32 26112, %v45335_v18 }
 0x433   : > { %33245 = vmatpush1.xpose.msra.mxu0 %v46057_v7  ;;  %vm21683_vm13 = vcmp.lt.s32.totalorder %v21209_v49, 363791  ;;  %33314 = vmatprep.subr.mxu1 %v25733_v44  ;;  %v23075_v19 = vcombine.high %v23067_v50, %v23067_v50  ;;  %v20738_v58 = vadd.s32 26496, %v45335_v18  ;;  %v23060_v59 = vcombine.high %v22006_v36, %v22006_v36  ;;  %v46108_v61 = vpop.f32.mrb[10].mxu1  ;;  %v46148_v44 = vld [vmem:[%s44474_s20 + $0x368] sm:$0xff] }
 0x434   : > { %43024 = vmatprep.mubr.msk.f32.mxu1 %vm21684_vm12, %v23059_v54  ;;  %vm21686_vm14 = vcmp.lt.s32.totalorder %v21212_v55, 363791  ;;  %33384 = vmatprep.subr.mxu0 %v25734_v51  ;;  %v21211_v62 = vadd.s32 %v45337_v20, %v20735_v56  ;;  %v20737_v63 = vadd.s32 26368, %v45335_v18  ;;  %v25735_v1 = vcombine.high %v46099_v52, %v46099_v52  ;;  %v26942_v2 = vpop.f32.mrb[11].mxu1  ;;  %v46114_v5 = vpop.f32.mrb[12].mxu0  ;;  %v22009_v55 = vld [vmem:[%s44467_s4 + $0x1b0] sm:$0xff] }
 0x435   : > { %43025 = vmatmul.mubr.msk.f32.vlgmr.msra.gmra.mrb[100].mxu1 %vm21683_vm13, %v23057_v43  ;;  %43026 = vmatprep.mubr.msk.f32.mxu0 %vm21686_vm14, %v23075_v19  ;;  %v21214_v6 = vadd.s32 %v45337_v20, %v20738_v58  ;;  %v23074_v7 = vrot.slane %v23060_v59, %v45349_v32  ;;  %v20740_v8 = vadd.s32 26752, %v45335_v18  ;;  %v23084_v10 = vrot.slane %v22007_v57, %v45349_v32  ;;  %v27012_v11 = vpop.f32.mrb[13].mxu0  ;;  %v46157_v56 = vld [vmem:[%s44474_s20 + $0x370] sm:$0xff] }
 0x436   : > { %33315 = vmatpush1.xpose.msra.mxu1 %v25259_v29  ;;  %vm21685_vm15 = vcmp.lt.s32.totalorder %v21211_v62, 363791  ;;  %v21213_v12 = vadd.s32 %v45337_v20, %v20737_v63  ;;  %v25736_v13 = vcombine.high %v25262_v60, %v25262_v60  ;;  %v20739_v14 = vadd.s32 26624, %v45335_v18  ;;  %v22008_v29 = vld [vmem:[%s44467_s4 + $0x1a8] sm:$0xff] }
 0x437   : > { %43027 = vmatmul.mubr.msk.f32.vlgmr.msra.gmra.mrb[102].mxu0 %vm21685_vm15, %v23067_v50  ;;  %vm21688_vm0 = vcmp.lt.s32.totalorder %v21214_v6, 363791  ;;  %v23076_v16 = vcombine.high %v23074_v7, %v23074_v7  ;;  %33454 = vmatprep.subr.mxu1 %v25735_v1  ;;  %v21216_v17 = vadd.s32 %v45337_v20, %v20740_v8  ;;  %v23092_v21 = vcombine.high %v23084_v10, %v23084_v10  ;;  %v46126_v22 = vpop.f32.mrb[12].mxu1 }
 0x438   : > { %33385 = vmatpush1.xpose.msra.mxu0 %v46082_v37  ;;  %vm21687_vm1 = vcmp.lt.s32.totalorder %v21213_v12, 363791  ;;  %v21215_v24 = vadd.s32 %v45337_v20, %v20739_v14  ;;  %v20742_v25 = vadd.s32 27008, %v45335_v18  ;;  %v23077_v28 = vcombine.high %v22007_v57, %v22007_v57  ;;  %v27082_v31 = vpop.f32.mrb[13].mxu1 }
 0x439   : > { %43028 = vmatprep.mubr.msk.f32.mxu1 %vm21688_vm0, %v23076_v16  ;;  %vm21690_vm2 = vcmp.lt.s32.totalorder %v21216_v17, 363791  ;;  %33524 = vmatprep.subr.mxu0 %v25736_v13  ;;  %v20741_v33 = vadd.s32 26880, %v45335_v18  ;;  %v25737_v34 = vcombine.high %v46123_v15, %v46123_v15  ;;  %v26241_v35 = vadd.f32 %v45991_v4, %v45989_v3  ;;  %v46138_v36 = vpop.f32.mrb[14].mxu0 }
 0x43a   : > { %43029 = vmatmul.mubr.msk.f32.vlgmr.msra.gmra.mrb[102].mxu1 %vm21687_vm1, %v23074_v7  ;;  %43030 = vmatprep.mubr.msk.f32.mxu0 %vm21690_vm2, %v23092_v21  ;;  %vm21689_vm3 = vcmp.lt.s32.totalorder %v21215_v24, 363791  ;;  %v21218_v37 = vadd.s32 %v45337_v20, %v20742_v25  ;;  %v23091_v39 = vrot.slane %v23077_v28, %v45349_v32  ;;  %v20744_v40 = vadd.s32 27264, %v45335_v18  ;;  %v27152_v41 = vpop.f32.mrb[15].mxu0  ;;  %v22010_v21 = vld [vmem:[%s44467_s4 + $0x1b8] sm:$0xff] }
 0x43b   : > { %33455 = vmatpush1.xpose.msra.mxu1 %v46099_v52  ;;  %43031 = vmatmul.mubr.msk.f32.vlgmr.msra.gmra.mrb[104].mxu0 %vm21689_vm3, %v23084_v10  ;;  %v21217_v42 = vadd.s32 %v45337_v20, %v20741_v33  ;;  %v23101_v43 = vrot.slane %v22008_v29, %v45349_v32  ;;  %v25738_v3 = vcombine.high %v25264_v30, %v25264_v30  ;;  %v20743_v4 = vadd.s32 27136, %v45335_v18  ;;  %v46175_v10 = vld [vmem:[%s44474_s20 + $0x378] sm:$0xff]  ;;  %v46185_v24 = vld [vmem:[%s44474_s20 + $0x380] sm:$0xff] }
 0x43c   : > { %vm21692_vm4 = vcmp.lt.s32.totalorder %v21218_v37, 363791  ;;  %v23093_v45 = vcombine.high %v23091_v39, %v23091_v39  ;;  %33525 = vmatpush1.xpose.msra.mxu0 %v25262_v60  ;;  %33594 = vmatprep.subr.mxu1 %v25737_v34  ;;  %v21220_v49 = vadd.s32 %v45337_v20, %v20744_v40  ;;  %v20746_v50 = vadd.s32 27520, %v45335_v18  ;;  %v46152_v51 = vpop.f32.mrb[14].mxu1 }
 0x43d   : > { %vm21691_vm5 = vcmp.lt.s32.totalorder %v21217_v42, 363791  ;;  %v23109_v52 = vcombine.high %v23101_v43, %v23101_v43  ;;  %33664 = vmatprep.subr.mxu0 %v25738_v3  ;;  %v21219_v53 = vadd.s32 %v45337_v20, %v20743_v4  ;;  %v23094_v54 = vcombine.high %v22008_v29, %v22008_v29  ;;  %v27222_v57 = vpop.f32.mrb[15].mxu1  ;;  %v46159_v19 = vpop.f32.mrb[16].mxu0  ;;  %v46204_v42 = vld [vmem:[%s44474_s20 + $0x388] sm:$0xff] }
 0x43e   : > { %43032 = vmatprep.mubr.msk.f32.mxu1 %vm21692_vm4, %v23093_v45  ;;  %vm21694_vm6 = vcmp.lt.s32.totalorder %v21220_v49, 363791  ;;  %v21222_v58 = vadd.s32 %v45337_v20, %v20746_v50  ;;  %v20745_v59 = vadd.s32 27392, %v45335_v18  ;;  %v25739_v60 = vcombine.high %v46148_v44, %v46148_v44  ;;  %v27292_v62 = vpop.f32.mrb[17].mxu0  ;;  %v22011_v4 = vld [vmem:[%s44467_s4 + $0x1c0] sm:$0xff] }
 0x43f   : > { %43033 = vmatmul.mubr.msk.f32.vlgmr.msra.gmra.mrb[104].mxu1 %vm21691_vm5, %v23091_v39  ;;  %43034 = vmatprep.mubr.msk.f32.mxu0 %vm21694_vm6, %v23109_v52  ;;  %vm21693_vm7 = vcmp.lt.s32.totalorder %v21219_v53, 363791  ;;  %v23108_v63 = vrot.slane %v23094_v54, %v45349_v32  ;;  %v26311_v1 = vadd.f32 %v46009_v26, %v26241_v35  ;;  %v20748_v2 = vadd.s32 27776, %v45335_v18  ;;  %v46215_v52 = vld [vmem:[%s44474_s20 + $0x390] sm:$0xff] }
 0x440   : > { %33595 = vmatpush1.xpose.msra.mxu1 %v46123_v15  ;;  %43035 = vmatmul.mubr.msk.f32.vlgmr.msra.gmra.mrb[106].mxu0 %vm21693_vm7, %v23101_v43  ;;  %vm21696_vm8 = vcmp.lt.s32.totalorder %v21222_v58, 363791  ;;  %v21221_v6 = vadd.s32 %v45337_v20, %v20745_v59  ;;  %v23118_v7 = vrot.slane %v22009_v55, %v45349_v32  ;;  %v25740_v8 = vcombine.high %v46157_v56, %v46157_v56 }
 0x441   : > { %v23110_v11 = vcombine.high %v23108_v63, %v23108_v63  ;;  %33665 = vmatpush1.xpose.msra.mxu0 %v25264_v30  ;;  %33734 = vmatprep.subr.mxu1 %v25739_v60  ;;  %v21224_v26 = vadd.s32 %v45337_v20, %v20748_v2  ;;  %v26381_v12 = vadd.f32 %v46011_v27, %v26311_v1  ;;  %v20747_v13 = vadd.s32 27648, %v45335_v18  ;;  %v46180_v14 = vpop.f32.mrb[16].mxu1 }
 0x442   : > { %vm21695_vm9 = vcmp.lt.s32.totalorder %v21221_v6, 363791  ;;  %v23126_v15 = vcombine.high %v23118_v7, %v23118_v7  ;;  %33804 = vmatprep.subr.mxu0 %v25740_v8  ;;  %v20750_v16 = vadd.s32 28032, %v45335_v18  ;;  %v23111_v17 = vcombine.high %v22009_v55, %v22009_v55  ;;  %v27362_v25 = vpop.f32.mrb[17].mxu1  ;;  %v46187_v28 = vpop.f32.mrb[18].mxu0 }
 0x443   : > { %43036 = vmatprep.mubr.msk.f32.mxu1 %vm21696_vm8, %v23110_v11  ;;  %vm21698_vm10 = vcmp.lt.s32.totalorder %v21224_v26, 363791  ;;  %v21223_v27 = vadd.s32 %v45337_v20, %v20747_v13  ;;  %v20749_v29 = vadd.s32 27904, %v45335_v18  ;;  %v25741_v30 = vcombine.high %v46175_v10, %v46175_v10  ;;  %v27432_v31 = vpop.f32.mrb[19].mxu0  ;;  %v25272_v25 = vld [vmem:[%s44474_s20 + $0x3a0] sm:$0xff] }
 0x444   : > { %43037 = vmatmul.mubr.msk.f32.vlgmr.msra.gmra.mrb[106].mxu1 %vm21695_vm9, %v23108_v63  ;;  %43038 = vmatprep.mubr.msk.f32.mxu0 %vm21698_vm10, %v23126_v15  ;;  %v21226_v33 = vadd.s32 %v45337_v20, %v20750_v16  ;;  %v23125_v34 = vrot.slane %v23111_v17, %v45349_v32  ;;  %v26451_v35 = vadd.f32 %v46029_v46, %v26381_v12  ;;  %v20752_v37 = vadd.s32 28288, %v45335_v18 }
 0x445   : > { %33735 = vmatpush1.xpose.msra.mxu1 %v46148_v44  ;;  %vm21697_vm11 = vcmp.lt.s32.totalorder %v21223_v27, 363791  ;;  %v21225_v39 = vadd.s32 %v45337_v20, %v20749_v29  ;;  %v23135_v40 = vrot.slane %v22010_v21, %v45349_v32  ;;  %v25742_v41 = vcombine.high %v46185_v24, %v46185_v24 }
 0x446   : > { %43039 = vmatmul.mubr.msk.f32.vlgmr.msra.gmra.mrb[108].mxu0 %vm21697_vm11, %v23118_v7  ;;  %vm21700_vm12 = vcmp.lt.s32.totalorder %v21226_v33, 363791  ;;  %v23127_v43 = vcombine.high %v23125_v34, %v23125_v34  ;;  %33874 = vmatprep.subr.mxu1 %v25741_v30  ;;  %v21228_v46 = vadd.s32 %v45337_v20, %v20752_v37  ;;  %v26521_v3 = vadd.f32 %v46031_v47, %v26451_v35  ;;  %v46209_v44 = vpop.f32.mrb[18].mxu1 }
 0x447   : > { %33805 = vmatpush1.xpose.msra.mxu0 %v46157_v56  ;;  %vm21699_vm13 = vcmp.lt.s32.totalorder %v21225_v39, 363791  ;;  %v23143_v45 = vcombine.high %v23135_v40, %v23135_v40  ;;  %v20751_v49 = vadd.s32 28160, %v45335_v18  ;;  %v20754_v50 = vadd.s32 28544, %v45335_v18  ;;  %v27502_v53 = vpop.f32.mrb[19].mxu1  ;;  %v46217_v54 = vpop.f32.mrb[20].mxu0 }
 0x448   : > { %43040 = vmatprep.mubr.msk.f32.mxu1 %vm21700_vm12, %v23127_v43  ;;  %vm21702_vm14 = vcmp.lt.s32.totalorder %v21228_v46, 363791  ;;  %33944 = vmatprep.subr.mxu0 %v25742_v41  ;;  %v23128_v47 = vcombine.high %v22010_v21, %v22010_v21  ;;  %v20753_v55 = vadd.s32 28416, %v45335_v18  ;;  %v25743_v56 = vcombine.high %v46204_v42, %v46204_v42  ;;  %v27572_v57 = vpop.f32.mrb[21].mxu0  ;;  %v46264_v43 = vld [vmem:[%s44474_s20 + $0x3a8] sm:$0xff] }
 0x449   : > { %43041 = vmatmul.mubr.msk.f32.vlgmr.msra.gmra.mrb[108].mxu1 %vm21699_vm13, %v23125_v34  ;;  %43042 = vmatprep.mubr.msk.f32.mxu0 %vm21702_vm14, %v23143_v45  ;;  %v21227_v58 = vadd.s32 %v45337_v20, %v20751_v49  ;;  %v21230_v59 = vadd.s32 %v45337_v20, %v20754_v50  ;;  %v26591_v60 = vadd.f32 %v46052_v0, %v26521_v3  ;;  %v20756_v62 = vadd.s32 28800, %v45335_v18 }
 0x44a   : > { %33875 = vmatpush1.xpose.msra.mxu1 %v46175_v10  ;;  %v23142_v63 = vrot.slane %v23128_v47, %v45349_v32  ;;  %v21229_v1 = vadd.s32 %v45337_v20, %v20753_v55  ;;  %v23152_v2 = vrot.slane %v22011_v4, %v45349_v32  ;;  %v25744_v6 = vcombine.high %v46215_v52, %v46215_v52  ;;  %v46232_v7 = vpop.f32.mrb[20].mxu1  ;;  %v46237_v10 = vld [vmem:[%s44474_s20 + $0x398] sm:$0xff]  ;;  %v25274_v55 = vld [vmem:[%s44474_s20 + $0x3b0] sm:$0xff] }
 0x44b   : > { %vm21701_vm15 = vcmp.lt.s32.totalorder %v21227_v58, 363791  ;;  %vm21704_vm0 = vcmp.lt.s32.totalorder %v21230_v59, 363791  ;;  %34014 = vmatprep.subr.mxu1 %v25743_v56  ;;  %v21232_v0 = vadd.s32 %v45337_v20, %v20756_v62  ;;  %v26661_v8 = vadd.f32 %v46059_v9, %v26591_v60  ;;  %v27642_v11 = vpop.f32.mrb[21].mxu1  ;;  %v22012_v9 = vld [vmem:[%s44467_s4 + $0x1c8] sm:$0xff] }
 0x44c   : > { %43043 = vmatmul.mubr.msk.f32.vlgmr.msra.gmra.mrb[110].mxu0 %vm21701_vm15, %v23135_v40  ;;  %v23144_v26 = vcombine.high %v23142_v63, %v23142_v63  ;;  %vm21703_vm1 = vcmp.lt.s32.totalorder %v21229_v1, 363791  ;;  %v23160_v12 = vcombine.high %v23152_v2, %v23152_v2  ;;  %v20755_v13 = vadd.s32 28672, %v45335_v18  ;;  %v46240_v15 = vpop.f32.mrb[22].mxu0 }
 0x44d   : > { %33945 = vmatpush1.xpose.msra.mxu0 %v46185_v24  ;;  %vm21706_vm2 = vcmp.lt.s32.totalorder %v21232_v0, 363791  ;;  %v20758_v16 = vadd.s32 29056, %v45335_v18  ;;  %v23145_v17 = vcombine.high %v22011_v4, %v22011_v4  ;;  %v20757_v21 = vadd.s32 28928, %v45335_v18  ;;  %v27712_v27 = vpop.f32.mrb[23].mxu0 }
 0x44e   : > { %43044 = vmatprep.mubr.msk.f32.mxu1 %vm21704_vm0, %v23144_v26  ;;  %43046 = vmatprep.mubr.msk.f32.mxu0 %vm21706_vm2, %v23160_v12  ;;  %v21231_v29 = vadd.s32 %v45337_v20, %v20755_v13  ;;  %v25745_v30 = vcombine.high %v46237_v10, %v46237_v10  ;;  %v26731_v24 = vadd.f32 %v46072_v23, %v26661_v8  ;;  %v20760_v31 = vadd.s32 29312, %v45335_v18 }
 0x44f   : > { %43045 = vmatmul.mubr.msk.f32.vlgmr.msra.gmra.mrb[110].mxu1 %vm21703_vm1, %v23142_v63  ;;  %34084 = vmatprep.subr.mxu0 %v25744_v6  ;;  %v21234_v33 = vadd.s32 %v45337_v20, %v20758_v16  ;;  %v23159_v34 = vrot.slane %v23145_v17, %v45349_v32  ;;  %v21233_v35 = vadd.s32 %v45337_v20, %v20757_v21  ;;  %v20759_v37 = vadd.s32 29184, %v45335_v18  ;;  %v46258_v39 = vpop.f32.mrb[22].mxu1  ;;  %v46289_v6 = vld [vmem:[%s44474_s20 + $0x3b8] sm:$0xff] }
 0x450   : > { %34015 = vmatpush1.xpose.msra.mxu1 %v46204_v42  ;;  %vm21705_vm3 = vcmp.lt.s32.totalorder %v21231_v29, 363791  ;;  %v21236_v23 = vadd.s32 %v45337_v20, %v20760_v31  ;;  %v23169_v40 = vrot.slane %v22012_v9, %v45349_v32  ;;  %v25746_v41 = vcombine.high %v25272_v25, %v25272_v25  ;;  %v27782_v46 = vpop.f32.mrb[23].mxu1  ;;  %v46266_v3 = vpop.f32.mrb[24].mxu0  ;;  %v22013_v42 = vld [vmem:[%s44467_s4 + $0x1d0] sm:$0xff]  ;;  %v22014_v21 = vld [vmem:[%s44467_s4 + $0x1d8] sm:$0xff] }
 0x451   : > { %43047 = vmatmul.mubr.msk.f32.vlgmr.msra.gmra.mrb[112].mxu0 %vm21705_vm3, %v23152_v2  ;;  %vm21708_vm4 = vcmp.lt.s32.totalorder %v21234_v33, 363791  ;;  %v23161_v4 = vcombine.high %v23159_v34, %v23159_v34  ;;  %vm21707_vm5 = vcmp.lt.s32.totalorder %v21233_v35, 363791  ;;  %34154 = vmatprep.subr.mxu1 %v25745_v30  ;;  %v26801_v45 = vadd.f32 %v46084_v38, %v26731_v24  ;;  %v27852_v49 = vpop.f32.mrb[25].mxu0  ;;  %v25276_v29 = vld [vmem:[%s44474_s20 + $0x3c0] sm:$0xff] }
 0x452   : > { %34085 = vmatpush1.xpose.msra.mxu0 %v46215_v52  ;;  %vm21710_vm6 = vcmp.lt.s32.totalorder %v21236_v23, 363791  ;;  %v23177_v50 = vcombine.high %v23169_v40, %v23169_v40  ;;  %v21235_v53 = vadd.s32 %v45337_v20, %v20759_v37  ;;  %v20762_v47 = vadd.s32 29568, %v45335_v18 }
 0x453   : > { %43048 = vmatprep.mubr.msk.f32.mxu1 %vm21708_vm4, %v23161_v4  ;;  %34224 = vmatprep.subr.mxu0 %v25746_v41  ;;  %v23162_v56 = vcombine.high %v22012_v9, %v22012_v9  ;;  %v20761_v57 = vadd.s32 29440, %v45335_v18  ;;  %v25747_v38 = vcombine.high %v46264_v43, %v46264_v43  ;;  %v26871_v58 = vadd.f32 %v46092_v48, %v26801_v45  ;;  %v46319_v4 = vld [vmem:[%s44474_s20 + $0x3c8] sm:$0xff] }
 0x454   : > { %43049 = vmatmul.mubr.msk.f32.vlgmr.msra.gmra.mrb[112].mxu1 %vm21707_vm5, %v23159_v34  ;;  %43050 = vmatprep.mubr.msk.f32.mxu0 %vm21710_vm6, %v23177_v50  ;;  %vm21709_vm7 = vcmp.lt.s32.totalorder %v21235_v53, 363791  ;;  %v21238_v52 = vadd.s32 %v45337_v20, %v20762_v47  ;;  %v20764_v59 = vadd.s32 29824, %v45335_v18  ;;  %v23186_v60 = vrot.slane %v22013_v42, %v45349_v32  ;;  %v46282_v62 = vpop.f32.mrb[24].mxu1 }
 0x455   : > { %34155 = vmatpush1.xpose.msra.mxu1 %v46237_v10  ;;  %43051 = vmatmul.mubr.msk.f32.vlgmr.msra.gmra.mrb[114].mxu0 %vm21709_vm7, %v23169_v40  ;;  %v23176_v63 = vrot.slane %v23162_v56, %v45349_v32  ;;  %v21237_v1 = vadd.s32 %v45337_v20, %v20761_v57  ;;  %v25748_v48 = vcombine.high %v25274_v55, %v25274_v55  ;;  %v20763_v2 = vadd.s32 29696, %v45335_v18  ;;  %v27922_v0 = vpop.f32.mrb[25].mxu1  ;;  %v46291_v8 = vpop.f32.mrb[26].mxu0  ;;  %v25278_v56 = vld [vmem:[%s44474_s20 + $0x3d0] sm:$0xff] }
 0x456   : > { %vm21712_vm8 = vcmp.lt.s32.totalorder %v21238_v52, 363791  ;;  %34225 = vmatpush1.xpose.msra.mxu0 %v25272_v25  ;;  %34294 = vmatprep.subr.mxu1 %v25747_v38  ;;  %v21240_v10 = vadd.s32 %v45337_v20, %v20764_v59  ;;  %v23194_v11 = vcombine.high %v23186_v60, %v23186_v60  ;;  %v26941_v26 = vadd.f32 %v46108_v61, %v26871_v58  ;;  %v27992_v12 = vpop.f32.mrb[27].mxu0 }
 0x457   : > { %v23178_v13 = vcombine.high %v23176_v63, %v23176_v63  ;;  %vm21711_vm9 = vcmp.lt.s32.totalorder %v21237_v1, 363791  ;;  %34364 = vmatprep.subr.mxu0 %v25748_v48  ;;  %v21239_v16 = vadd.s32 %v45337_v20, %v20763_v2  ;;  %v20766_v17 = vadd.s32 30080, %v45335_v18 }
 0x458   : > { %vm21714_vm10 = vcmp.lt.s32.totalorder %v21240_v10, 363791  ;;  %v23179_v9 = vcombine.high %v22013_v42, %v22013_v42  ;;  %v20765_v25 = vadd.s32 29952, %v45335_v18  ;;  %v25749_v27 = vcombine.high %v46289_v6, %v46289_v6 }
 0x459   : > { %43052 = vmatprep.mubr.msk.f32.mxu1 %vm21712_vm8, %v23178_v13  ;;  %43054 = vmatprep.mubr.msk.f32.mxu0 %vm21714_vm10, %v23194_v11  ;;  %vm21713_vm11 = vcmp.lt.s32.totalorder %v21239_v16, 363791  ;;  %v21242_v61 = vadd.s32 %v45337_v20, %v20766_v17  ;;  %v27011_v30 = vadd.f32 %v46114_v5, %v26941_v26  ;;  %v20768_v24 = vadd.s32 30336, %v45335_v18  ;;  %v46306_v31 = vpop.f32.mrb[26].mxu1  ;;  %v46345_v11 = vld [vmem:[%s44474_s20 + $0x3d8] sm:$0xff]  ;;  %v22016_v16 = vld [vmem:[%s44467_s4 + $0x1e8] sm:$0xff] }
 0x45a   : > { %43053 = vmatmul.mubr.msk.f32.vlgmr.msra.gmra.mrb[114].mxu1 %vm21711_vm9, %v23176_v63  ;;  %43055 = vmatmul.mubr.msk.f32.vlgmr.msra.gmra.mrb[116].mxu0 %vm21713_vm11, %v23186_v60  ;;  %v23193_v33 = vrot.slane %v23179_v9, %v45349_v32  ;;  %v21241_v34 = vadd.s32 %v45337_v20, %v20765_v25  ;;  %v23203_v35 = vrot.slane %v22014_v21, %v45349_v32  ;;  %v20767_v37 = vadd.s32 30208, %v45335_v18  ;;  %v28062_v23 = vpop.f32.mrb[27].mxu1  ;;  %v46313_v40 = vpop.f32.mrb[28].mxu0  ;;  %v25280_v9 = vld [vmem:[%s44474_s20 + $0x3e0] sm:$0xff] }
 0x45b   : > { %34295 = vmatpush1.xpose.msra.mxu1 %v46264_v43  ;;  %vm21716_vm12 = vcmp.lt.s32.totalorder %v21242_v61, 363791  ;;  %34365 = vmatpush1.xpose.msra.mxu0 %v25274_v55  ;;  %v21244_v5 = vadd.s32 %v45337_v20, %v20768_v24  ;;  %v25750_v41 = vcombine.high %v25276_v29, %v25276_v29  ;;  %v27081_v46 = vadd.f32 %v46126_v22, %v27011_v30  ;;  %v28132_v45 = vpop.f32.mrb[29].mxu0  ;;  %v22015_v55 = vld [vmem:[%s44467_s4 + $0x1e0] sm:$0xff] }
 0x45c   : > { %v23195_v42 = vcombine.high %v23193_v33, %v23193_v33  ;;  %vm21715_vm13 = vcmp.lt.s32.totalorder %v21241_v34, 363791  ;;  %34434 = vmatprep.subr.mxu1 %v25749_v27  ;;  %v23211_v49 = vcombine.high %v23203_v35, %v23203_v35  ;;  %v21243_v50 = vadd.s32 %v45337_v20, %v20767_v37 }
 0x45d   : > { %vm21718_vm14 = vcmp.lt.s32.totalorder %v21244_v5, 363791  ;;  %34504 = vmatprep.subr.mxu0 %v25750_v41  ;;  %v20770_v43 = vadd.s32 30592, %v45335_v18  ;;  %v23196_v53 = vcombine.high %v22014_v21, %v22014_v21  ;;  %v20769_v47 = vadd.s32 30464, %v45335_v18  ;;  %v46326_v57 = vpop.f32.mrb[28].mxu1  ;;  %v46368_v41 = vld [vmem:[%s44474_s20 + $0x3e8] sm:$0xff] }
 0x45e   : > { %43056 = vmatprep.mubr.msk.f32.mxu1 %vm21716_vm12, %v23195_v42  ;;  %43058 = vmatprep.mubr.msk.f32.mxu0 %vm21718_vm14, %v23211_v49  ;;  %vm21717_vm15 = vcmp.lt.s32.totalorder %v21243_v50, 363791  ;;  %v25751_v22 = vcombine.high %v46319_v4, %v46319_v4  ;;  %v27151_v38 = vadd.f32 %v46138_v36, %v27081_v46  ;;  %v20772_v58 = vadd.s32 30848, %v45335_v18  ;;  %v28202_v52 = vpop.f32.mrb[29].mxu1 }
 0x45f   : > { %43057 = vmatmul.mubr.msk.f32.vlgmr.msra.gmra.mrb[116].mxu1 %vm21715_vm13, %v23193_v33  ;;  %43059 = vmatmul.mubr.msk.f32.vlgmr.msra.gmra.mrb[118].mxu0 %vm21717_vm15, %v23203_v35  ;;  %v21246_v59 = vadd.s32 %v45337_v20, %v20770_v43  ;;  %v23210_v60 = vrot.slane %v23196_v53, %v45349_v32  ;;  %v21245_v63 = vadd.s32 %v45337_v20, %v20769_v47  ;;  %v20771_v1 = vadd.s32 30720, %v45335_v18  ;;  %v46338_v48 = vpop.f32.mrb[30].mxu0  ;;  %v22017_v53 = vld [vmem:[%s44467_s4 + $0x1f0] sm:$0xff] }
 0x460   : > { %34435 = vmatpush1.xpose.msra.mxu1 %v46289_v6  ;;  %34505 = vmatpush1.xpose.msra.mxu0 %v25276_v29  ;;  %v21248_v36 = vadd.s32 %v45337_v20, %v20772_v58  ;;  %v23220_v2 = vrot.slane %v22015_v55, %v45349_v32  ;;  %v25752_v0 = vcombine.high %v25278_v56, %v25278_v56  ;;  %v20774_v10 = vadd.s32 31104, %v45335_v18  ;;  %v28272_v26 = vpop.f32.mrb[31].mxu0  ;;  %v46376_v47 = vld [vmem:[%s44474_s20 + $0x3f0] sm:$0xff] }
 0x461   : > { %vm21720_vm0 = vcmp.lt.s32.totalorder %v21246_v59, 363791  ;;  %v23212_v12 = vcombine.high %v23210_v60, %v23210_v60  ;;  %vm21719_vm1 = vcmp.lt.s32.totalorder %v21245_v63, 363791  ;;  %34574 = vmatprep.subr.mxu1 %v25751_v22  ;;  %v27221_v13 = vadd.f32 %v46152_v51, %v27151_v38 }
 0x462   : > { %vm21722_vm2 = vcmp.lt.s32.totalorder %v21248_v36, 363791  ;;  %v23228_v6 = vcombine.high %v23220_v2, %v23220_v2  ;;  %34644 = vmatprep.subr.mxu0 %v25752_v0  ;;  %v21247_v17 = vadd.s32 %v45337_v20, %v20771_v1  ;;  %v21250_v21 = vadd.s32 %v45337_v20, %v20774_v10  ;;  %v46352_v25 = vpop.f32.mrb[30].mxu1  ;;  %v46396_v0 = vld [vmem:[%s44474_s20 + $0x3f8] sm:$0xff] }
 0x463   : > { %43060 = vmatprep.mubr.msk.f32.mxu1 %vm21720_vm0, %v23212_v12  ;;  %v23213_v27 = vcombine.high %v22015_v55, %v22015_v55  ;;  %v20773_v29 = vadd.s32 30976, %v45335_v18  ;;  %v25753_v61 = vcombine.high %v46345_v11, %v46345_v11  ;;  %v27291_v51 = vadd.f32 %v46159_v19, %v27221_v13  ;;  %v28342_v30 = vpop.f32.mrb[31].mxu1  ;;  %v46358_v24 = vpop.f32.mrb[32].mxu0 }
 0x464   : > { %43061 = vmatmul.mubr.msk.f32.vlgmr.msra.gmra.mrb[118].mxu1 %vm21719_vm1, %v23210_v60  ;;  %43062 = vmatprep.mubr.msk.f32.mxu0 %vm21722_vm2, %v23228_v6  ;;  %vm21721_vm3 = vcmp.lt.s32.totalorder %v21247_v17, 363791  ;;  %vm21724_vm4 = vcmp.lt.s32.totalorder %v21250_v21, 363791  ;;  %v20776_v33 = vadd.s32 31360, %v45335_v18  ;;  %v23237_v34 = vrot.slane %v22016_v16, %v45349_v32  ;;  %v28412_v35 = vpop.f32.mrb[33].mxu0  ;;  %v22018_v17 = vld [vmem:[%s44467_s4 + $0x1f8] sm:$0xff] }
 0x465   : > { %34575 = vmatpush1.xpose.msra.mxu1 %v46319_v4  ;;  %43063 = vmatmul.mubr.msk.f32.vlgmr.msra.gmra.mrb[120].mxu0 %vm21721_vm3, %v23220_v2  ;;  %v23227_v37 = vrot.slane %v23213_v27, %v45349_v32  ;;  %v21249_v19 = vadd.s32 %v45337_v20, %v20773_v29  ;;  %v25754_v23 = vcombine.high %v25280_v9, %v25280_v9  ;;  %v20775_v5 = vadd.s32 31232, %v45335_v18  ;;  %v46405_v21 = vld [vmem:[%s44474_s20 + $0x400] sm:$0xff] }
 0x466   : > { %34645 = vmatpush1.xpose.msra.mxu0 %v25278_v56  ;;  %34714 = vmatprep.subr.mxu1 %v25753_v61  ;;  %v21252_v46 = vadd.s32 %v45337_v20, %v20776_v33  ;;  %v23245_v45 = vcombine.high %v23237_v34, %v23237_v34  ;;  %v27361_v42 = vadd.f32 %v46180_v14, %v27291_v51  ;;  %v20778_v4 = vadd.s32 31616, %v45335_v18 }
 0x467   : > { %v23229_v49 = vcombine.high %v23227_v37, %v23227_v37  ;;  %vm21723_vm5 = vcmp.lt.s32.totalorder %v21249_v19, 363791  ;;  %34784 = vmatprep.subr.mxu0 %v25754_v23  ;;  %v21251_v50 = vadd.s32 %v45337_v20, %v20775_v5  ;;  %v23230_v43 = vcombine.high %v22016_v16, %v22016_v16  ;;  %v46378_v55 = vpop.f32.mrb[32].mxu1  ;;  %v46427_v5 = vld [vmem:[%s44474_s20 + $0x408] sm:$0xff] }
 0x468   : > { %vm21726_vm6 = vcmp.lt.s32.totalorder %v21252_v46, 363791  ;;  %v21254_v56 = vadd.s32 %v45337_v20, %v20778_v4  ;;  %v20777_v22 = vadd.s32 31488, %v45335_v18  ;;  %v25755_v14 = vcombine.high %v46368_v41, %v46368_v41  ;;  %v28482_v38 = vpop.f32.mrb[33].mxu1  ;;  %v46384_v58 = vpop.f32.mrb[34].mxu0 }
 0x469   : > { %43064 = vmatprep.mubr.msk.f32.mxu1 %vm21724_vm4, %v23229_v49  ;;  %43066 = vmatprep.mubr.msk.f32.mxu0 %vm21726_vm6, %v23245_v45  ;;  %vm21725_vm7 = vcmp.lt.s32.totalorder %v21251_v50, 363791  ;;  %v23244_v52 = vrot.slane %v23230_v43, %v45349_v32  ;;  %v27431_v59 = vadd.f32 %v46187_v28, %v27361_v42  ;;  %v20780_v60 = vadd.s32 31872, %v45335_v18  ;;  %v28552_v63 = vpop.f32.mrb[35].mxu0  ;;  %v22019_v50 = vld [vmem:[%s44467_s4 + $0x200] sm:$0xff]  ;;  %v46438_v43 = vld [vmem:[%s44474_s20 + $0x410] sm:$0xff] }
 0x46a   : > { %43065 = vmatmul.mubr.msk.f32.vlgmr.msra.gmra.mrb[120].mxu1 %vm21723_vm5, %v23227_v37  ;;  %43067 = vmatmul.mubr.msk.f32.vlgmr.msra.gmra.mrb[122].mxu0 %vm21725_vm7, %v23237_v34  ;;  %vm21728_vm8 = vcmp.lt.s32.totalorder %v21254_v56, 363791  ;;  %v21253_v1 = vadd.s32 %v45337_v20, %v20777_v22  ;;  %v23254_v36 = vrot.slane %v22017_v53, %v45349_v32  ;;  %v25756_v2 = vcombine.high %v46376_v47, %v46376_v47 }
 0x46b   : > { %34715 = vmatpush1.xpose.msra.mxu1 %v46345_v11  ;;  %v23246_v28 = vcombine.high %v23244_v52, %v23244_v52  ;;  %34785 = vmatpush1.xpose.msra.mxu0 %v25280_v9  ;;  %v21256_v10 = vadd.s32 %v45337_v20, %v20780_v60  ;;  %v27501_v26 = vadd.f32 %v46209_v44, %v27431_v59  ;;  %v20779_v12 = vadd.s32 31744, %v45335_v18 }
 0x46c   : > { %vm21727_vm9 = vcmp.lt.s32.totalorder %v21253_v1, 363791  ;;  %34854 = vmatprep.subr.mxu1 %v25755_v14  ;;  %v23262_v13 = vcombine.high %v23254_v36, %v23254_v36  ;;  %34924 = vmatprep.subr.mxu0 %v25756_v2  ;;  %v20782_v16 = vadd.s32 32128, %v45335_v18  ;;  %v23247_v6 = vcombine.high %v22017_v53, %v22017_v53  ;;  %v46407_v27 = vpop.f32.mrb[34].mxu1 }
 0x46d   : > { %43068 = vmatprep.mubr.msk.f32.mxu1 %vm21728_vm8, %v23246_v28  ;;  %vm21730_vm10 = vcmp.lt.s32.totalorder %v21256_v10, 363791  ;;  %v21255_v11 = vadd.s32 %v45337_v20, %v20779_v12  ;;  %v20781_v44 = vadd.s32 32000, %v45335_v18  ;;  %v25757_v9 = vcombine.high %v46396_v0, %v46396_v0  ;;  %v28622_v29 = vpop.f32.mrb[35].mxu1  ;;  %v46414_v61 = vpop.f32.mrb[36].mxu0  ;;  %v46458_v10 = vld [vmem:[%s44474_s20 + $0x418] sm:$0xff] }
 0x46e   : > { %43069 = vmatmul.mubr.msk.f32.vlgmr.msra.gmra.mrb[122].mxu1 %vm21727_vm9, %v23244_v52  ;;  %43070 = vmatprep.mubr.msk.f32.mxu0 %vm21730_vm10, %v23262_v13  ;;  %v21258_v51 = vadd.s32 %v45337_v20, %v20782_v16  ;;  %v23261_v30 = vrot.slane %v23247_v6, %v45349_v32  ;;  %v27571_v33 = vadd.f32 %v46217_v54, %v27501_v26  ;;  %v20784_v34 = vadd.s32 32384, %v45335_v18  ;;  %v28692_v35 = vpop.f32.mrb[37].mxu0 }
 0x46f   : > { %34855 = vmatpush1.xpose.msra.mxu1 %v46368_v41  ;;  %vm21729_vm11 = vcmp.lt.s32.totalorder %v21255_v11, 363791  ;;  %v21257_v37 = vadd.s32 %v45337_v20, %v20781_v44  ;;  %v23271_v19 = vrot.slane %v22018_v17, %v45349_v32  ;;  %v25758_v23 = vcombine.high %v46405_v21, %v46405_v21  ;;  %v22020_v44 = vld [vmem:[%s44467_s4 + $0x208] sm:$0xff] }
 0x470   : > { %43071 = vmatmul.mubr.msk.f32.vlgmr.msra.gmra.mrb[124].mxu0 %vm21729_vm11, %v23254_v36  ;;  %vm21732_vm12 = vcmp.lt.s32.totalorder %v21258_v51, 363791  ;;  %v23263_v54 = vcombine.high %v23261_v30, %v23261_v30  ;;  %34994 = vmatprep.subr.mxu1 %v25757_v9  ;;  %v21260_v46 = vadd.s32 %v45337_v20, %v20784_v34  ;;  %v27641_v41 = vadd.f32 %v46232_v7, %v27571_v33  ;;  %v46431_v45 = vpop.f32.mrb[36].mxu1  ;;  %v25288_v9 = vld [vmem:[%s44474_s20 + $0x420] sm:$0xff] }
 0x471   : > { %34925 = vmatpush1.xpose.msra.mxu0 %v46376_v47  ;;  %vm21731_vm13 = vcmp.lt.s32.totalorder %v21257_v37, 363791  ;;  %v23279_v42 = vcombine.high %v23271_v19, %v23271_v19  ;;  %v20783_v4 = vadd.s32 32256, %v45335_v18  ;;  %v20786_v49 = vadd.s32 32640, %v45335_v18  ;;  %v28762_v53 = vpop.f32.mrb[37].mxu1 }
 0x472   : > { %43072 = vmatprep.mubr.msk.f32.mxu1 %vm21732_vm12, %v23263_v54  ;;  %vm21734_vm14 = vcmp.lt.s32.totalorder %v21260_v46, 363791  ;;  %35064 = vmatprep.subr.mxu0 %v25758_v23  ;;  %v23264_v56 = vcombine.high %v22018_v17, %v22018_v17  ;;  %v20785_v7 = vadd.s32 32512, %v45335_v18  ;;  %v25759_v22 = vcombine.high %v46427_v5, %v46427_v5  ;;  %v46443_v47 = vpop.f32.mrb[38].mxu0  ;;  %v46485_v46 = vld [vmem:[%s44474_s20 + $0x428] sm:$0xff] }
 0x473   : > { %43073 = vmatmul.mubr.msk.f32.vlgmr.msra.gmra.mrb[124].mxu1 %vm21731_vm13, %v23261_v30  ;;  %43074 = vmatprep.mubr.msk.f32.mxu0 %vm21734_vm14, %v23279_v42  ;;  %v21259_v14 = vadd.s32 %v45337_v20, %v20783_v4  ;;  %v21262_v38 = vadd.s32 %v45337_v20, %v20786_v49  ;;  %v27711_v52 = vadd.f32 %v46240_v15, %v27641_v41  ;;  %v20788_v59 = vadd.s32 32896, %v45335_v18  ;;  %v28832_v60 = vpop.f32.mrb[39].mxu0  ;;  %v22021_v49 = vld [vmem:[%s44467_s4 + $0x210] sm:$0xff] }
 0x474   : > { %34995 = vmatpush1.xpose.msra.mxu1 %v46396_v0  ;;  %v23278_v63 = vrot.slane %v23264_v56, %v45349_v32  ;;  %v21261_v1 = vadd.s32 %v45337_v20, %v20785_v7  ;;  %v23288_v36 = vrot.slane %v22019_v50, %v45349_v32  ;;  %v25760_v2 = vcombine.high %v46438_v43, %v46438_v43 }
 0x475   : > { %vm21733_vm15 = vcmp.lt.s32.totalorder %v21259_v14, 363791  ;;  %vm21736_vm0 = vcmp.lt.s32.totalorder %v21262_v38, 363791  ;;  %35134 = vmatprep.subr.mxu1 %v25759_v22  ;;  %v21264_v28 = vadd.s32 %v45337_v20, %v20788_v59  ;;  %v27781_v15 = vadd.f32 %v46258_v39, %v27711_v52  ;;  %v46460_v0 = vpop.f32.mrb[38].mxu1  ;;  %v25290_v22 = vld [vmem:[%s44474_s20 + $0x430] sm:$0xff] }
 0x476   : > { %43075 = vmatmul.mubr.msk.f32.vlgmr.msra.gmra.mrb[126].mxu0 %vm21733_vm15, %v23271_v19  ;;  %v23280_v26 = vcombine.high %v23278_v63, %v23278_v63  ;;  %vm21735_vm1 = vcmp.lt.s32.totalorder %v21261_v1, 363791  ;;  %v23296_v12 = vcombine.high %v23288_v36, %v23288_v36  ;;  %v20787_v13 = vadd.s32 32768, %v45335_v18  ;;  %v28902_v16 = vpop.f32.mrb[39].mxu1  ;;  %v46463_v6 = vpop.f32.mrb[40].mxu0 }
 0x477   : > { %35065 = vmatpush1.xpose.msra.mxu0 %v46405_v21  ;;  %vm21738_vm2 = vcmp.lt.s32.totalorder %v21264_v28, 363791  ;;  %v20790_v17 = vadd.s32 33152, %v45335_v18  ;;  %v23281_v39 = vcombine.high %v22019_v50, %v22019_v50  ;;  %v20789_v11 = vadd.s32 33024, %v45335_v18  ;;  %v28972_v29 = vpop.f32.mrb[41].mxu0  ;;  %v46510_v28 = vld [vmem:[%s44474_s20 + $0x438] sm:$0xff] }
 0x478   : > { %43076 = vmatprep.mubr.msk.f32.mxu1 %vm21736_vm0, %v23280_v26  ;;  %43078 = vmatprep.mubr.msk.f32.mxu0 %vm21738_vm2, %v23296_v12  ;;  %v21263_v51 = vadd.s32 %v45337_v20, %v20787_v13  ;;  %v25761_v30 = vcombine.high %v46458_v10, %v46458_v10  ;;  %v27851_v21 = vadd.f32 %v46266_v3, %v27781_v15  ;;  %v20792_v33 = vadd.s32 33408, %v45335_v18 }
 0x479   : > { %43077 = vmatmul.mubr.msk.f32.vlgmr.msra.gmra.mrb[126].mxu1 %vm21735_vm1, %v23278_v63  ;;  %35204 = vmatprep.subr.mxu0 %v25760_v2  ;;  %v21266_v34 = vadd.s32 %v45337_v20, %v20790_v17  ;;  %v23295_v35 = vrot.slane %v23281_v39, %v45349_v32  ;;  %v21265_v37 = vadd.s32 %v45337_v20, %v20789_v11  ;;  %v20791_v19 = vadd.s32 33280, %v45335_v18 }
 0x47a   : > { %35135 = vmatpush1.xpose.msra.mxu1 %v46427_v5  ;;  %vm21737_vm3 = vcmp.lt.s32.totalorder %v21263_v51, 363791  ;;  %v21268_v23 = vadd.s32 %v45337_v20, %v20792_v33  ;;  %v23305_v3 = vrot.slane %v22020_v44, %v45349_v32  ;;  %v25762_v54 = vcombine.high %v25288_v9, %v25288_v9  ;;  %v46487_v41 = vpop.f32.mrb[40].mxu1 }
 0x47b   : > { %43079 = vmatmul.mubr.msk.f32.vlgmr.msra.gmra.mrb[128].mxu0 %vm21737_vm3, %v23288_v36  ;;  %vm21740_vm4 = vcmp.lt.s32.totalorder %v21266_v34, 363791  ;;  %v23297_v42 = vcombine.high %v23295_v35, %v23295_v35  ;;  %vm21739_vm5 = vcmp.lt.s32.totalorder %v21265_v37, 363791  ;;  %35274 = vmatprep.subr.mxu1 %v25761_v30  ;;  %v27921_v4 = vadd.f32 %v46282_v62, %v27851_v21  ;;  %v29042_v5 = vpop.f32.mrb[41].mxu1  ;;  %v46491_v50 = vpop.f32.mrb[42].mxu0 }
 0x47c   : > { %35205 = vmatpush1.xpose.msra.mxu0 %v46438_v43  ;;  %vm21742_vm6 = vcmp.lt.s32.totalorder %v21268_v23, 363791  ;;  %v23313_v53 = vcombine.high %v23305_v3, %v23305_v3  ;;  %v21267_v56 = vadd.s32 %v45337_v20, %v20791_v19  ;;  %v20794_v7 = vadd.s32 33664, %v45335_v18  ;;  %v29112_v14 = vpop.f32.mrb[43].mxu0 }
 0x47d   : > { %43080 = vmatprep.mubr.msk.f32.mxu1 %vm21740_vm4, %v23297_v42  ;;  %35344 = vmatprep.subr.mxu0 %v25762_v54  ;;  %v23298_v38 = vcombine.high %v22020_v44, %v22020_v44  ;;  %v20793_v62 = vadd.s32 33536, %v45335_v18  ;;  %v25763_v52 = vcombine.high %v46485_v46, %v46485_v46  ;;  %v27991_v59 = vadd.f32 %v46291_v8, %v27921_v4  ;;  %v22022_v44 = vld [vmem:[%s44467_s4 + $0x218] sm:$0xff] }
 0x47e   : > { %43081 = vmatmul.mubr.msk.f32.vlgmr.msra.gmra.mrb[128].mxu1 %vm21739_vm5, %v23295_v35  ;;  %43082 = vmatprep.mubr.msk.f32.mxu0 %vm21742_vm6, %v23313_v53  ;;  %vm21741_vm7 = vcmp.lt.s32.totalorder %v21267_v56, 363791  ;;  %v21270_v43 = vadd.s32 %v45337_v20, %v20794_v7  ;;  %v20796_v60 = vadd.s32 33920, %v45335_v18  ;;  %v23322_v63 = vrot.slane %v22021_v49, %v45349_v32 }
 0x47f   : > { %35275 = vmatpush1.xpose.msra.mxu1 %v46458_v10  ;;  %43083 = vmatmul.mubr.msk.f32.vlgmr.msra.gmra.mrb[130].mxu0 %vm21741_vm7, %v23305_v3  ;;  %v23312_v1 = vrot.slane %v23298_v38, %v45349_v32  ;;  %v21269_v36 = vadd.s32 %v45337_v20, %v20793_v62  ;;  %v25764_v2 = vcombine.high %v25290_v22, %v25290_v22  ;;  %v20795_v8 = vadd.s32 33792, %v45335_v18  ;;  %v46512_v15 = vpop.f32.mrb[42].mxu1  ;;  %v22023_v62 = vld [vmem:[%s44467_s4 + $0x220] sm:$0xff] }
 0x480   : > { %vm21744_vm8 = vcmp.lt.s32.totalorder %v21270_v43, 363791  ;;  %35345 = vmatpush1.xpose.msra.mxu0 %v25288_v9  ;;  %35414 = vmatprep.subr.mxu1 %v25763_v52  ;;  %v21272_v26 = vadd.s32 %v45337_v20, %v20796_v60  ;;  %v23330_v10 = vcombine.high %v23322_v63, %v23322_v63  ;;  %v28061_v12 = vadd.f32 %v46306_v31, %v27991_v59  ;;  %v29182_v13 = vpop.f32.mrb[43].mxu1  ;;  %v46516_v16 = vpop.f32.mrb[44].mxu0  ;;  %v25292_v31 = vld [vmem:[%s44474_s20 + $0x440] sm:$0xff] }
 0x481   : > { %v23314_v17 = vcombine.high %v23312_v1, %v23312_v1  ;;  %vm21743_vm9 = vcmp.lt.s32.totalorder %v21269_v36, 363791  ;;  %35484 = vmatprep.subr.mxu0 %v25764_v2  ;;  %v21271_v39 = vadd.s32 %v45337_v20, %v20795_v8  ;;  %v20798_v11 = vadd.s32 34176, %v45335_v18  ;;  %v29252_v29 = vpop.f32.mrb[45].mxu0 }
 0x482   : > { %vm21746_vm10 = vcmp.lt.s32.totalorder %v21272_v26, 363791  ;;  %v23315_v9 = vcombine.high %v22021_v49, %v22021_v49  ;;  %v20797_v51 = vadd.s32 34048, %v45335_v18  ;;  %v25765_v30 = vcombine.high %v46510_v28, %v46510_v28  ;;  %v46540_v49 = vld [vmem:[%s44474_s20 + $0x448] sm:$0xff] }
 0x483   : > { %43084 = vmatprep.mubr.msk.f32.mxu1 %vm21744_vm8, %v23314_v17  ;;  %43086 = vmatprep.mubr.msk.f32.mxu0 %vm21746_vm10, %v23330_v10  ;;  %vm21745_vm11 = vcmp.lt.s32.totalorder %v21271_v39, 363791  ;;  %v21274_v21 = vadd.s32 %v45337_v20, %v20798_v11  ;;  %v28131_v33 = vadd.f32 %v46313_v40, %v28061_v12  ;;  %v20800_v34 = vadd.s32 34432, %v45335_v18  ;;  %v46529_v35 = vpop.f32.mrb[44].mxu1  ;;  %v46568_v17 = vld [vmem:[%s44474_s20 + $0x458] sm:$0xff]  ;;  %v22024_v29 = vld [vmem:[%s44467_s4 + $0x228] sm:$0xff] }
 0x484   : > { %43085 = vmatmul.mubr.msk.f32.vlgmr.msra.gmra.mrb[130].mxu1 %vm21743_vm9, %v23312_v1  ;;  %43087 = vmatmul.mubr.msk.f32.vlgmr.msra.gmra.mrb[132].mxu0 %vm21745_vm11, %v23322_v63  ;;  %v23329_v37 = vrot.slane %v23315_v9, %v45349_v32  ;;  %v21273_v19 = vadd.s32 %v45337_v20, %v20797_v51  ;;  %v23339_v23 = vrot.slane %v22022_v44, %v45349_v32  ;;  %v20799_v3 = vadd.s32 34304, %v45335_v18  ;;  %v29322_v54 = vpop.f32.mrb[45].mxu1 }
 0x485   : > { %35415 = vmatpush1.xpose.msra.mxu1 %v46485_v46  ;;  %vm21748_vm12 = vcmp.lt.s32.totalorder %v21274_v21, 363791  ;;  %35485 = vmatpush1.xpose.msra.mxu0 %v25290_v22  ;;  %v21276_v40 = vadd.s32 %v45337_v20, %v20800_v34  ;;  %v25766_v42 = vcombine.high %v25292_v31, %v25292_v31  ;;  %v28201_v4 = vadd.f32 %v46326_v57, %v28131_v33  ;;  %v46542_v5 = vpop.f32.mrb[46].mxu0  ;;  %v25294_v57 = vld [vmem:[%s44474_s20 + $0x450] sm:$0xff] }
 0x486   : > { %v23331_v53 = vcombine.high %v23329_v37, %v23329_v37  ;;  %vm21747_vm13 = vcmp.lt.s32.totalorder %v21273_v19, 363791  ;;  %35554 = vmatprep.subr.mxu1 %v25765_v30  ;;  %v23347_v56 = vcombine.high %v23339_v23, %v23339_v23  ;;  %v21275_v7 = vadd.s32 %v45337_v20, %v20799_v3  ;;  %v29392_v46 = vpop.f32.mrb[47].mxu0  ;;  %v25296_v30 = vld [vmem:[%s44474_s20 + $0x460] sm:$0xff] }
 0x487   : > { %vm21750_vm14 = vcmp.lt.s32.totalorder %v21276_v40, 363791  ;;  %35624 = vmatprep.subr.mxu0 %v25766_v42  ;;  %v20802_v22 = vadd.s32 34688, %v45335_v18  ;;  %v23332_v14 = vcombine.high %v22022_v44, %v22022_v44  ;;  %v20801_v38 = vadd.s32 34560, %v45335_v18 }
 0x488   : > { %43088 = vmatprep.mubr.msk.f32.mxu1 %vm21748_vm12, %v23331_v53  ;;  %43090 = vmatprep.mubr.msk.f32.mxu0 %vm21750_vm14, %v23347_v56  ;;  %vm21749_vm15 = vcmp.lt.s32.totalorder %v21275_v7, 363791  ;;  %v25767_v52 = vcombine.high %v46540_v49, %v46540_v49  ;;  %v28271_v59 = vadd.f32 %v46338_v48, %v28201_v4  ;;  %v20804_v43 = vadd.s32 34944, %v45335_v18  ;;  %v46554_v60 = vpop.f32.mrb[46].mxu1  ;;  %v46591_v4 = vld [vmem:[%s44474_s20 + $0x468] sm:$0xff] }
 0x489   : > { %43089 = vmatmul.mubr.msk.f32.vlgmr.msra.gmra.mrb[132].mxu1 %vm21747_vm13, %v23329_v37  ;;  %43091 = vmatmul.mubr.msk.f32.vlgmr.msra.gmra.mrb[134].mxu0 %vm21749_vm15, %v23339_v23  ;;  %v21278_v63 = vadd.s32 %v45337_v20, %v20802_v22  ;;  %v23346_v1 = vrot.slane %v23332_v14, %v45349_v32  ;;  %v21277_v36 = vadd.s32 %v45337_v20, %v20801_v38  ;;  %v20803_v2 = vadd.s32 34816, %v45335_v18  ;;  %v29462_v8 = vpop.f32.mrb[47].mxu1  ;;  %v46561_v26 = vpop.f32.mrb[48].mxu0 }
 0x48a   : > { %35555 = vmatpush1.xpose.msra.mxu1 %v46510_v28  ;;  %35625 = vmatpush1.xpose.msra.mxu0 %v25292_v31  ;;  %v21280_v48 = vadd.s32 %v45337_v20, %v20804_v43  ;;  %v23356_v10 = vrot.slane %v22023_v62, %v45349_v32  ;;  %v25768_v12 = vcombine.high %v25294_v57, %v25294_v57  ;;  %v20806_v13 = vadd.s32 35200, %v45335_v18  ;;  %v29532_v39 = vpop.f32.mrb[49].mxu0 }
 0x48b   : > { %vm21752_vm0 = vcmp.lt.s32.totalorder %v21278_v63, 363791  ;;  %v23348_v11 = vcombine.high %v23346_v1, %v23346_v1  ;;  %vm21751_vm1 = vcmp.lt.s32.totalorder %v21277_v36, 363791  ;;  %35694 = vmatprep.subr.mxu1 %v25767_v52  ;;  %v28341_v44 = vadd.f32 %v46352_v25, %v28271_v59  ;;  %v46599_v52 = vld [vmem:[%s44474_s20 + $0x470] sm:$0xff] }
 0x48c   : > { %vm21754_vm2 = vcmp.lt.s32.totalorder %v21280_v48, 363791  ;;  %v23364_v28 = vcombine.high %v23356_v10, %v23356_v10  ;;  %35764 = vmatprep.subr.mxu0 %v25768_v12  ;;  %v21279_v9 = vadd.s32 %v45337_v20, %v20803_v2  ;;  %v21282_v51 = vadd.s32 %v45337_v20, %v20806_v13  ;;  %v46619_v13 = vld [vmem:[%s44474_s20 + $0x478] sm:$0xff] }
 0x48d   : > { %43092 = vmatprep.mubr.msk.f32.mxu1 %vm21752_vm0, %v23348_v11  ;;  %v23349_v31 = vcombine.high %v22023_v62, %v22023_v62  ;;  %v20805_v21 = vadd.s32 35072, %v45335_v18  ;;  %v25769_v33 = vcombine.high %v46568_v17, %v46568_v17  ;;  %v28411_v34 = vadd.f32 %v46358_v24, %v28341_v44  ;;  %v46579_v25 = vpop.f32.mrb[48].mxu1  ;;  %v22025_v62 = vld [vmem:[%s44467_s4 + $0x230] sm:$0xff] }
 0x48e   : > { %43093 = vmatmul.mubr.msk.f32.vlgmr.msra.gmra.mrb[134].mxu1 %vm21751_vm1, %v23346_v1  ;;  %43094 = vmatprep.mubr.msk.f32.mxu0 %vm21754_vm2, %v23364_v28  ;;  %vm21753_vm3 = vcmp.lt.s32.totalorder %v21279_v9, 363791  ;;  %vm21756_vm4 = vcmp.lt.s32.totalorder %v21282_v51, 363791  ;;  %v20808_v37 = vadd.s32 35456, %v45335_v18  ;;  %v23373_v19 = vrot.slane %v22024_v29, %v45349_v32  ;;  %v29602_v23 = vpop.f32.mrb[49].mxu1  ;;  %v46584_v3 = vpop.f32.mrb[50].mxu0 }
 0x48f   : > { %35695 = vmatpush1.xpose.msra.mxu1 %v46540_v49  ;;  %43095 = vmatmul.mubr.msk.f32.vlgmr.msra.gmra.mrb[136].mxu0 %vm21753_vm3, %v23356_v10  ;;  %v23363_v24 = vrot.slane %v23349_v31, %v45349_v32  ;;  %v21281_v54 = vadd.s32 %v45337_v20, %v20805_v21  ;;  %v25770_v40 = vcombine.high %v25296_v30, %v25296_v30  ;;  %v20807_v42 = vadd.s32 35328, %v45335_v18  ;;  %v29672_v53 = vpop.f32.mrb[51].mxu0  ;;  %v22026_v31 = vld [vmem:[%s44467_s4 + $0x238] sm:$0xff] }
 0x490   : > { %35765 = vmatpush1.xpose.msra.mxu0 %v25294_v57  ;;  %35834 = vmatprep.subr.mxu1 %v25769_v33  ;;  %v21284_v56 = vadd.s32 %v45337_v20, %v20808_v37  ;;  %v23381_v7 = vcombine.high %v23373_v19, %v23373_v19  ;;  %v28481_v49 = vadd.f32 %v46378_v55, %v28411_v34  ;;  %v20810_v46 = vadd.s32 35712, %v45335_v18  ;;  %v46628_v21 = vld [vmem:[%s44474_s20 + $0x480] sm:$0xff] }
 0x491   : > { %v23365_v22 = vcombine.high %v23363_v24, %v23363_v24  ;;  %vm21755_vm5 = vcmp.lt.s32.totalorder %v21281_v54, 363791  ;;  %35904 = vmatprep.subr.mxu0 %v25770_v40  ;;  %v21283_v14 = vadd.s32 %v45337_v20, %v20807_v42  ;;  %v23366_v38 = vcombine.high %v22024_v29, %v22024_v29 }
 0x492   : > { %vm21758_vm6 = vcmp.lt.s32.totalorder %v21284_v56, 363791  ;;  %v21286_v57 = vadd.s32 %v45337_v20, %v20810_v46  ;;  %v20809_v59 = vadd.s32 35584, %v45335_v18  ;;  %v25771_v43 = vcombine.high %v46591_v4, %v46591_v4  ;;  %v46605_v55 = vpop.f32.mrb[50].mxu1  ;;  %v46649_v56 = vld [vmem:[%s44474_s20 + $0x488] sm:$0xff] }
 0x493   : > { %43096 = vmatprep.mubr.msk.f32.mxu1 %vm21756_vm4, %v23365_v22  ;;  %43098 = vmatprep.mubr.msk.f32.mxu0 %vm21758_vm6, %v23381_v7  ;;  %vm21757_vm7 = vcmp.lt.s32.totalorder %v21283_v14, 363791  ;;  %v23380_v63 = vrot.slane %v23366_v38, %v45349_v32  ;;  %v28551_v1 = vadd.f32 %v46384_v58, %v28481_v49  ;;  %v20812_v36 = vadd.s32 35968, %v45335_v18  ;;  %v29742_v2 = vpop.f32.mrb[51].mxu1  ;;  %v46611_v8 = vpop.f32.mrb[52].mxu0  ;;  %v22027_v38 = vld [vmem:[%s44467_s4 + $0x240] sm:$0xff] }
 0x494   : > { %43097 = vmatmul.mubr.msk.f32.vlgmr.msra.gmra.mrb[136].mxu1 %vm21755_vm5, %v23363_v24  ;;  %43099 = vmatmul.mubr.msk.f32.vlgmr.msra.gmra.mrb[138].mxu0 %vm21757_vm7, %v23373_v19  ;;  %vm21760_vm8 = vcmp.lt.s32.totalorder %v21286_v57, 363791  ;;  %v21285_v48 = vadd.s32 %v45337_v20, %v20809_v59  ;;  %v23390_v10 = vrot.slane %v22025_v62, %v45349_v32  ;;  %v25772_v12 = vcombine.high %v46599_v52, %v46599_v52  ;;  %v29812_v58 = vpop.f32.mrb[53].mxu0 }
 0x495   : > { %35835 = vmatpush1.xpose.msra.mxu1 %v46568_v17  ;;  %v23382_v39 = vcombine.high %v23380_v63, %v23380_v63  ;;  %35905 = vmatpush1.xpose.msra.mxu0 %v25296_v30  ;;  %v21288_v11 = vadd.s32 %v45337_v20, %v20812_v36  ;;  %v28621_v44 = vadd.f32 %v46407_v27, %v28551_v1  ;;  %v20811_v29 = vadd.s32 35840, %v45335_v18 }
 0x496   : > { %vm21759_vm9 = vcmp.lt.s32.totalorder %v21285_v48, 363791  ;;  %35974 = vmatprep.subr.mxu1 %v25771_v43  ;;  %v23398_v28 = vcombine.high %v23390_v10, %v23390_v10  ;;  %36044 = vmatprep.subr.mxu0 %v25772_v12  ;;  %v20814_v9 = vadd.s32 36224, %v45335_v18  ;;  %v23383_v51 = vcombine.high %v22025_v62, %v22025_v62  ;;  %v46630_v33 = vpop.f32.mrb[52].mxu1  ;;  %v46658_v62 = vld [vmem:[%s44474_s20 + $0x490] sm:$0xff] }
 0x497   : > { %43100 = vmatprep.mubr.msk.f32.mxu1 %vm21760_vm8, %v23382_v39  ;;  %vm21762_vm10 = vcmp.lt.s32.totalorder %v21288_v11, 363791  ;;  %v21287_v17 = vadd.s32 %v45337_v20, %v20811_v29  ;;  %v20813_v27 = vadd.s32 36096, %v45335_v18  ;;  %v25773_v30 = vcombine.high %v46619_v13, %v46619_v13  ;;  %v29882_v34 = vpop.f32.mrb[53].mxu1  ;;  %v46680_v29 = vld [vmem:[%s44474_s20 + $0x498] sm:$0xff] }
 0x498   : > { %43101 = vmatmul.mubr.msk.f32.vlgmr.msra.gmra.mrb[138].mxu1 %vm21759_vm9, %v23380_v63  ;;  %43102 = vmatprep.mubr.msk.f32.mxu0 %vm21762_vm10, %v23398_v28  ;;  %v21290_v37 = vadd.s32 %v45337_v20, %v20814_v9  ;;  %v23397_v19 = vrot.slane %v23383_v51, %v45349_v32  ;;  %v28691_v23 = vadd.f32 %v46414_v61, %v28621_v44  ;;  %v20816_v24 = vadd.s32 36480, %v45335_v18  ;;  %v46641_v54 = vpop.f32.mrb[54].mxu0  ;;  %v22028_v51 = vld [vmem:[%s44467_s4 + $0x248] sm:$0xff] }
 0x499   : > { %35975 = vmatpush1.xpose.msra.mxu1 %v46591_v4  ;;  %vm21761_vm11 = vcmp.lt.s32.totalorder %v21287_v17, 363791  ;;  %v21289_v40 = vadd.s32 %v45337_v20, %v20813_v27  ;;  %v23407_v42 = vrot.slane %v22026_v31, %v45349_v32  ;;  %v25774_v53 = vcombine.high %v46628_v21, %v46628_v21  ;;  %v29952_v7 = vpop.f32.mrb[55].mxu0 }
 0x49a   : > { %43103 = vmatmul.mubr.msk.f32.vlgmr.msra.gmra.mrb[140].mxu0 %vm21761_vm11, %v23390_v10  ;;  %vm21764_vm12 = vcmp.lt.s32.totalorder %v21290_v37, 363791  ;;  %v23399_v61 = vcombine.high %v23397_v19, %v23397_v19  ;;  %36114 = vmatprep.subr.mxu1 %v25773_v30  ;;  %v21292_v49 = vadd.s32 %v45337_v20, %v20816_v24  ;;  %v28761_v4 = vadd.f32 %v46431_v45, %v28691_v23 }
 0x49b   : > { %36045 = vmatpush1.xpose.msra.mxu0 %v46599_v52  ;;  %vm21763_vm13 = vcmp.lt.s32.totalorder %v21289_v40, 363791  ;;  %v23415_v46 = vcombine.high %v23407_v42, %v23407_v42  ;;  %v20815_v22 = vadd.s32 36352, %v45335_v18  ;;  %v20818_v14 = vadd.s32 36736, %v45335_v18  ;;  %v46660_v57 = vpop.f32.mrb[54].mxu1 }
 0x49c   : > { %43104 = vmatprep.mubr.msk.f32.mxu1 %vm21764_vm12, %v23399_v61  ;;  %vm21766_vm14 = vcmp.lt.s32.totalorder %v21292_v49, 363791  ;;  %36184 = vmatprep.subr.mxu0 %v25774_v53  ;;  %v23400_v59 = vcombine.high %v22026_v31, %v22026_v31  ;;  %v20817_v43 = vadd.s32 36608, %v45335_v18  ;;  %v25775_v45 = vcombine.high %v46649_v56, %v46649_v56  ;;  %v30022_v52 = vpop.f32.mrb[55].mxu1  ;;  %v46665_v63 = vpop.f32.mrb[56].mxu0 }
 0x49d   : > { %43105 = vmatmul.mubr.msk.f32.vlgmr.msra.gmra.mrb[140].mxu1 %vm21763_vm13, %v23397_v19  ;;  %43106 = vmatprep.mubr.msk.f32.mxu0 %vm21766_vm14, %v23415_v46  ;;  %v21291_v1 = vadd.s32 %v45337_v20, %v20815_v22  ;;  %v21294_v36 = vadd.s32 %v45337_v20, %v20818_v14  ;;  %v28831_v2 = vadd.f32 %v46443_v47, %v28761_v4  ;;  %v20820_v48 = vadd.s32 36992, %v45335_v18  ;;  %v30092_v10 = vpop.f32.mrb[57].mxu0  ;;  %v46707_v46 = vld [vmem:[%s44474_s20 + $0x4a8] sm:$0xff]  ;;  %v25306_v52 = vld [vmem:[%s44474_s20 + $0x4b0] sm:$0xff] }
 0x49e   : > { %36115 = vmatpush1.xpose.msra.mxu1 %v46619_v13  ;;  %v23414_v12 = vrot.slane %v23400_v59, %v45349_v32  ;;  %v21293_v58 = vadd.s32 %v45337_v20, %v20817_v43  ;;  %v23424_v39 = vrot.slane %v22027_v38, %v45349_v32  ;;  %v25776_v11 = vcombine.high %v46658_v62, %v46658_v62 }
 0x49f   : > { %vm21765_vm15 = vcmp.lt.s32.totalorder %v21291_v1, 363791  ;;  %vm21768_vm0 = vcmp.lt.s32.totalorder %v21294_v36, 363791  ;;  %36254 = vmatprep.subr.mxu1 %v25775_v45  ;;  %v21296_v47 = vadd.s32 %v45337_v20, %v20820_v48  ;;  %v28901_v44 = vadd.f32 %v46460_v0, %v28831_v2  ;;  %v25304_v0 = vld [vmem:[%s44474_s20 + $0x4a0] sm:$0xff] }
 0x4a0   : > { %43107 = vmatmul.mubr.msk.f32.vlgmr.msra.gmra.mrb[142].mxu0 %vm21765_vm15, %v23407_v42  ;;  %v23416_v13 = vcombine.high %v23414_v12, %v23414_v12  ;;  %vm21767_vm1 = vcmp.lt.s32.totalorder %v21293_v58, 363791  ;;  %v23432_v28 = vcombine.high %v23424_v39, %v23424_v39  ;;  %v20819_v9 = vadd.s32 36864, %v45335_v18  ;;  %v46684_v31 = vpop.f32.mrb[56].mxu1 }
 0x4a1   : > { %36185 = vmatpush1.xpose.msra.mxu0 %v46628_v21  ;;  %vm21770_vm2 = vcmp.lt.s32.totalorder %v21296_v47, 363791  ;;  %v20822_v17 = vadd.s32 37248, %v45335_v18  ;;  %v23417_v27 = vcombine.high %v22027_v38, %v22027_v38  ;;  %v20821_v30 = vadd.s32 37120, %v45335_v18  ;;  %v30162_v34 = vpop.f32.mrb[57].mxu1  ;;  %v46690_v37 = vpop.f32.mrb[58].mxu0  ;;  %v22029_v38 = vld [vmem:[%s44467_s4 + $0x250] sm:$0xff] }
 0x4a2   : > { %43108 = vmatprep.mubr.msk.f32.mxu1 %vm21768_vm0, %v23416_v13  ;;  %43110 = vmatprep.mubr.msk.f32.mxu0 %vm21770_vm2, %v23432_v28  ;;  %v21295_v19 = vadd.s32 %v45337_v20, %v20819_v9  ;;  %v25777_v23 = vcombine.high %v46680_v29, %v46680_v29  ;;  %v28971_v21 = vadd.f32 %v46463_v6, %v28901_v44  ;;  %v20824_v24 = vadd.s32 37504, %v45335_v18  ;;  %v30232_v40 = vpop.f32.mrb[59].mxu0  ;;  %v46732_v13 = vld [vmem:[%s44474_s20 + $0x4b8] sm:$0xff] }
 0x4a3   : > { %43109 = vmatmul.mubr.msk.f32.vlgmr.msra.gmra.mrb[142].mxu1 %vm21767_vm1, %v23414_v12  ;;  %36324 = vmatprep.subr.mxu0 %v25776_v11  ;;  %v21298_v42 = vadd.s32 %v45337_v20, %v20822_v17  ;;  %v23431_v53 = vrot.slane %v23417_v27, %v45349_v32  ;;  %v21297_v7 = vadd.s32 %v45337_v20, %v20821_v30  ;;  %v20823_v61 = vadd.s32 37376, %v45335_v18  ;;  %v25308_v40 = vld [vmem:[%s44474_s20 + $0x4c0] sm:$0xff] }
 0x4a4   : > { %36255 = vmatpush1.xpose.msra.mxu1 %v46649_v56  ;;  %vm21769_vm3 = vcmp.lt.s32.totalorder %v21295_v19, 363791  ;;  %v21300_v6 = vadd.s32 %v45337_v20, %v20824_v24  ;;  %v23441_v49 = vrot.slane %v22028_v51, %v45349_v32  ;;  %v25778_v4 = vcombine.high %v25304_v0, %v25304_v0  ;;  %v22030_v19 = vld [vmem:[%s44467_s4 + $0x258] sm:$0xff] }
 0x4a5   : > { %43111 = vmatmul.mubr.msk.f32.vlgmr.msra.gmra.mrb[144].mxu0 %vm21769_vm3, %v23424_v39  ;;  %vm21772_vm4 = vcmp.lt.s32.totalorder %v21298_v42, 363791  ;;  %v23433_v22 = vcombine.high %v23431_v53, %v23431_v53  ;;  %vm21771_vm5 = vcmp.lt.s32.totalorder %v21297_v7, 363791  ;;  %36394 = vmatprep.subr.mxu1 %v25777_v23  ;;  %v29041_v14 = vadd.f32 %v46487_v41, %v28971_v21  ;;  %v46711_v59 = vpop.f32.mrb[58].mxu1 }
 0x4a6   : > { %36325 = vmatpush1.xpose.msra.mxu0 %v46658_v62  ;;  %vm21774_vm6 = vcmp.lt.s32.totalorder %v21300_v6, 363791  ;;  %v23449_v56 = vcombine.high %v23441_v49, %v23441_v49  ;;  %v21299_v43 = vadd.s32 %v45337_v20, %v20823_v61  ;;  %v20826_v45 = vadd.s32 37760, %v45335_v18  ;;  %v30302_v1 = vpop.f32.mrb[59].mxu1  ;;  %v46717_v36 = vpop.f32.mrb[60].mxu0 }
 0x4a7   : > { %43112 = vmatprep.mubr.msk.f32.mxu1 %vm21772_vm4, %v23433_v22  ;;  %36464 = vmatprep.subr.mxu0 %v25778_v4  ;;  %v23434_v2 = vcombine.high %v22028_v51, %v22028_v51  ;;  %v20825_v41 = vadd.s32 37632, %v45335_v18  ;;  %v25779_v48 = vcombine.high %v46707_v46, %v46707_v46  ;;  %v29111_v62 = vadd.f32 %v46491_v50, %v29041_v14  ;;  %v30372_v10 = vpop.f32.mrb[61].mxu0 }
 0x4a8   : > { %43113 = vmatmul.mubr.msk.f32.vlgmr.msra.gmra.mrb[144].mxu1 %vm21771_vm5, %v23431_v53  ;;  %43114 = vmatprep.mubr.msk.f32.mxu0 %vm21774_vm6, %v23449_v56  ;;  %vm21773_vm7 = vcmp.lt.s32.totalorder %v21299_v43, 363791  ;;  %v21302_v12 = vadd.s32 %v45337_v20, %v20826_v45  ;;  %v20828_v58 = vadd.s32 38016, %v45335_v18  ;;  %v23458_v39 = vrot.slane %v22029_v38, %v45349_v32  ;;  %v25309_v56 = vld [vmem:[%s44474_s20 + $0x4c8] sm:$0xff]  ;;  %v25310_v10 = vld [vmem:[%s44474_s20 + $0x4d0] sm:$0xff] }
 0x4a9   : > { %36395 = vmatpush1.xpose.msra.mxu1 %v46680_v29  ;;  %43115 = vmatmul.mubr.msk.f32.vlgmr.msra.gmra.mrb[146].mxu0 %vm21773_vm7, %v23441_v49  ;;  %v23448_v11 = vrot.slane %v23434_v2, %v45349_v32  ;;  %v21301_v47 = vadd.s32 %v45337_v20, %v20825_v41  ;;  %v25780_v44 = vcombine.high %v25306_v52, %v25306_v52  ;;  %v20827_v50 = vadd.s32 37888, %v45335_v18  ;;  %v46734_v28 = vpop.f32.mrb[60].mxu1 }
 0x4aa   : > { %vm21776_vm8 = vcmp.lt.s32.totalorder %v21302_v12, 363791  ;;  %36465 = vmatpush1.xpose.msra.mxu0 %v25304_v0  ;;  %36534 = vmatprep.subr.mxu1 %v25779_v48  ;;  %v21304_v9 = vadd.s32 %v45337_v20, %v20828_v58  ;;  %v23466_v29 = vcombine.high %v23458_v39, %v23458_v39  ;;  %v29181_v51 = vadd.f32 %v46512_v15, %v29111_v62  ;;  %v30442_v17 = vpop.f32.mrb[61].mxu1 }
 0x4ab   : > { %v23450_v27 = vcombine.high %v23448_v11, %v23448_v11  ;;  %vm21775_vm9 = vcmp.lt.s32.totalorder %v21301_v47, 363791  ;;  %36604 = vmatprep.subr.mxu0 %v25780_v44  ;;  %v21303_v30 = vadd.s32 %v45337_v20, %v20827_v50  ;;  %v20830_v34 = vadd.s32 38272, %v45335_v18  ;;  %v46741_v23 = vpop.f32.mrb[62].mxu0 }
 0x4ac   : > { %vm21778_vm10 = vcmp.lt.s32.totalorder %v21304_v9, 363791  ;;  %v23451_v0 = vcombine.high %v22029_v38, %v22029_v38  ;;  %v20829_v21 = vadd.s32 38144, %v45335_v18  ;;  %v25781_v24 = vcombine.high %v46732_v13, %v46732_v13  ;;  %v30512_v15 = vpop.f32.mrb[63].mxu0 }
 0x4ad   : > { %43116 = vmatprep.mubr.msk.f32.mxu1 %vm21776_vm8, %v23450_v27  ;;  %43118 = vmatprep.mubr.msk.f32.mxu0 %vm21778_vm10, %v23466_v29  ;;  %vm21777_vm11 = vcmp.lt.s32.totalorder %v21303_v30, 363791  ;;  %v21306_v42 = vadd.s32 %v45337_v20, %v20830_v34  ;;  %v29251_v53 = vadd.f32 %v46516_v16, %v29181_v51  ;;  %v20832_v7 = vadd.s32 38528, %v45335_v18  ;;  %v46784_v27 = vld [vmem:[%s44474_s20 + $0x4d8] sm:$0xff] }
 0x4ae   : > { %43117 = vmatmul.mubr.msk.f32.vlgmr.msra.gmra.mrb[146].mxu1 %vm21775_vm9, %v23448_v11  ;;  %43119 = vmatmul.mubr.msk.f32.vlgmr.msra.gmra.mrb[148].mxu0 %vm21777_vm11, %v23458_v39  ;;  %v23465_v61 = vrot.slane %v23451_v0, %v45349_v32  ;;  %v21305_v6 = vadd.s32 %v45337_v20, %v20829_v21  ;;  %v23475_v49 = vrot.slane %v22030_v19, %v45349_v32  ;;  %v20831_v4 = vadd.s32 38400, %v45335_v18  ;;  %v46756_v22 = vpop.f32.mrb[62].mxu1  ;;  %v22032_v0 = vld [vmem:[%s44467_s4 + $0x268] sm:$0xff] }
 0x4af   : > { %36535 = vmatpush1.xpose.msra.mxu1 %v46707_v46  ;;  %vm21780_vm12 = vcmp.lt.s32.totalorder %v21306_v42, 363791  ;;  %36605 = vmatpush1.xpose.msra.mxu0 %v25306_v52  ;;  %v21308_v16 = vadd.s32 %v45337_v20, %v20832_v7  ;;  %v25782_v14 = vcombine.high %v25308_v40, %v25308_v40  ;;  %v29321_v38 = vadd.f32 %v46529_v35, %v29251_v53  ;;  %v30582_v43 = vpop.f32.mrb[63].mxu1  ;;  %v46762_v45 = vpop.f32.mrb[64].mxu0  ;;  %v22031_v35 = vld [vmem:[%s44467_s4 + $0x260] sm:$0xff] }
 0x4b0   : > { %v23467_v1 = vcombine.high %v23465_v61, %v23465_v61  ;;  %vm21779_vm13 = vcmp.lt.s32.totalorder %v21305_v6, 363791  ;;  %36674 = vmatprep.subr.mxu1 %v25781_v24  ;;  %v23483_v2 = vcombine.high %v23475_v49, %v23475_v49  ;;  %v21307_v41 = vadd.s32 %v45337_v20, %v20831_v4  ;;  %v30652_v46 = vpop.f32.mrb[65].mxu0  ;;  %v25312_v42 = vld [vmem:[%s44474_s20 + $0x4e0] sm:$0xff]  ;;  %v46806_v43 = vld [vmem:[%s44474_s20 + $0x4e8] sm:$0xff] }
 0x4b1   : > { %vm21782_vm14 = vcmp.lt.s32.totalorder %v21308_v16, 363791  ;;  %36744 = vmatprep.subr.mxu0 %v25782_v14  ;;  %v20834_v52 = vadd.s32 38784, %v45335_v18  ;;  %v23468_v48 = vcombine.high %v22030_v19, %v22030_v19  ;;  %v20833_v62 = vadd.s32 38656, %v45335_v18 }
 0x4b2   : > { %43120 = vmatprep.mubr.msk.f32.mxu1 %vm21780_vm12, %v23467_v1  ;;  %43122 = vmatprep.mubr.msk.f32.mxu0 %vm21782_vm14, %v23483_v2  ;;  %vm21781_vm15 = vcmp.lt.s32.totalorder %v21307_v41, 363791  ;;  %v25783_v12 = vcombine.high %v25309_v56, %v25309_v56  ;;  %v29391_v58 = vadd.f32 %v46542_v5, %v29321_v38  ;;  %v20836_v39 = vadd.s32 39040, %v45335_v18 }
 0x4b3   : > { %43121 = vmatmul.mubr.msk.f32.vlgmr.msra.gmra.mrb[148].mxu1 %vm21779_vm13, %v23465_v61  ;;  %43123 = vmatmul.mubr.msk.f32.vlgmr.msra.gmra.mrb[150].mxu0 %vm21781_vm15, %v23475_v49  ;;  %v21310_v11 = vadd.s32 %v45337_v20, %v20834_v52  ;;  %v23482_v47 = vrot.slane %v23468_v48, %v45349_v32  ;;  %v21309_v44 = vadd.s32 %v45337_v20, %v20833_v62  ;;  %v20835_v50 = vadd.s32 38912, %v45335_v18  ;;  %v46777_v9 = vpop.f32.mrb[64].mxu1 }
 0x4b4   : > { %36675 = vmatpush1.xpose.msra.mxu1 %v46732_v13  ;;  %36745 = vmatpush1.xpose.msra.mxu0 %v25308_v40  ;;  %v21312_v5 = vadd.s32 %v45337_v20, %v20836_v39  ;;  %v23492_v29 = vrot.slane %v22031_v35, %v45349_v32  ;;  %v25784_v51 = vcombine.high %v25310_v10, %v25310_v10  ;;  %v20838_v17 = vadd.s32 39296, %v45335_v18  ;;  %v30722_v30 = vpop.f32.mrb[65].mxu1  ;;  %v46786_v34 = vpop.f32.mrb[66].mxu0  ;;  %v46816_v39 = vld [vmem:[%s44474_s20 + $0x4f0] sm:$0xff] }
 0x4b5   : > { %vm21784_vm0 = vcmp.lt.s32.totalorder %v21310_v11, 363791  ;;  %v23484_v19 = vcombine.high %v23482_v47, %v23482_v47  ;;  %vm21783_vm1 = vcmp.lt.s32.totalorder %v21309_v44, 363791  ;;  %36814 = vmatprep.subr.mxu1 %v25783_v12  ;;  %v29461_v13 = vadd.f32 %v46554_v60, %v29391_v58  ;;  %v30792_v21 = vpop.f32.mrb[67].mxu0  ;;  %v22033_v58 = vld [vmem:[%s44467_s4 + $0x270] sm:$0xff] }
 0x4b6   : > { %vm21786_vm2 = vcmp.lt.s32.totalorder %v21312_v5, 363791  ;;  %v23500_v24 = vcombine.high %v23492_v29, %v23492_v29  ;;  %36884 = vmatprep.subr.mxu0 %v25784_v51  ;;  %v21311_v40 = vadd.s32 %v45337_v20, %v20835_v50  ;;  %v21314_v15 = vadd.s32 %v45337_v20, %v20838_v17 }
 0x4b7   : > { %43124 = vmatprep.mubr.msk.f32.mxu1 %vm21784_vm0, %v23484_v19  ;;  %v23485_v53 = vcombine.high %v22031_v35, %v22031_v35  ;;  %v20837_v7 = vadd.s32 39168, %v45335_v18  ;;  %v25785_v61 = vcombine.high %v46784_v27, %v46784_v27  ;;  %v29531_v60 = vadd.f32 %v46561_v26, %v29461_v13  ;;  %v46834_v19 = vld [vmem:[%s44474_s20 + $0x4f8] sm:$0xff] }
 0x4b8   : > { %43125 = vmatmul.mubr.msk.f32.vlgmr.msra.gmra.mrb[150].mxu1 %vm21783_vm1, %v23482_v47  ;;  %43126 = vmatprep.mubr.msk.f32.mxu0 %vm21786_vm2, %v23500_v24  ;;  %vm21785_vm3 = vcmp.lt.s32.totalorder %v21311_v40, 363791  ;;  %vm21788_vm4 = vcmp.lt.s32.totalorder %v21314_v15, 363791  ;;  %v20840_v6 = vadd.s32 39552, %v45335_v18  ;;  %v23509_v49 = vrot.slane %v22032_v0, %v45349_v32  ;;  %v46800_v4 = vpop.f32.mrb[66].mxu1 }
 0x4b9   : > { %36815 = vmatpush1.xpose.msra.mxu1 %v25309_v56  ;;  %43127 = vmatmul.mubr.msk.f32.vlgmr.msra.gmra.mrb[152].mxu0 %vm21785_vm3, %v23492_v29  ;;  %v23499_v16 = vrot.slane %v23485_v53, %v45349_v32  ;;  %v21313_v14 = vadd.s32 %v45337_v20, %v20837_v7  ;;  %v25786_v38 = vcombine.high %v25312_v42, %v25312_v42  ;;  %v20839_v26 = vadd.s32 39424, %v45335_v18  ;;  %v30862_v1 = vpop.f32.mrb[67].mxu1  ;;  %v46808_v2 = vpop.f32.mrb[68].mxu0 }
 0x4ba   : > { %36885 = vmatpush1.xpose.msra.mxu0 %v25310_v10  ;;  %36954 = vmatprep.subr.mxu1 %v25785_v61  ;;  %v21316_v41 = vadd.s32 %v45337_v20, %v20840_v6  ;;  %v23517_v56 = vcombine.high %v23509_v49, %v23509_v49  ;;  %v29601_v46 = vadd.f32 %v46579_v25, %v29531_v60  ;;  %v20842_v52 = vadd.s32 39808, %v45335_v18  ;;  %v30932_v48 = vpop.f32.mrb[69].mxu0  ;;  %v22034_v61 = vld [vmem:[%s44467_s4 + $0x278] sm:$0xff] }
 0x4bb   : > { %v23501_v62 = vcombine.high %v23499_v16, %v23499_v16  ;;  %vm21787_vm5 = vcmp.lt.s32.totalorder %v21313_v14, 363791  ;;  %37024 = vmatprep.subr.mxu0 %v25786_v38  ;;  %v21315_v35 = vadd.s32 %v45337_v20, %v20839_v26  ;;  %v23502_v12 = vcombine.high %v22032_v0, %v22032_v0  ;;  %v46845_v60 = vld [vmem:[%s44474_s20 + $0x500] sm:$0xff] }
 0x4bc   : > { %vm21790_vm6 = vcmp.lt.s32.totalorder %v21316_v41, 363791  ;;  %v21318_v10 = vadd.s32 %v45337_v20, %v20842_v52  ;;  %v20841_v11 = vadd.s32 39680, %v45335_v18  ;;  %v25787_v25 = vcombine.high %v46806_v43, %v46806_v43  ;;  %v46822_v47 = vpop.f32.mrb[68].mxu1  ;;  %v46866_v52 = vld [vmem:[%s44474_s20 + $0x508] sm:$0xff] }
 0x4bd   : > { %43128 = vmatprep.mubr.msk.f32.mxu1 %vm21788_vm4, %v23501_v62  ;;  %43130 = vmatprep.mubr.msk.f32.mxu0 %vm21790_vm6, %v23517_v56  ;;  %vm21789_vm7 = vcmp.lt.s32.totalorder %v21315_v35, 363791  ;;  %v23516_v44 = vrot.slane %v23502_v12, %v45349_v32  ;;  %v29671_v50 = vadd.f32 %v46584_v3, %v29601_v46  ;;  %v20844_v5 = vadd.s32 40064, %v45335_v18  ;;  %v31002_v29 = vpop.f32.mrb[69].mxu1 }
 0x4be   : > { %43129 = vmatmul.mubr.msk.f32.vlgmr.msra.gmra.mrb[152].mxu1 %vm21787_vm5, %v23499_v16  ;;  %43131 = vmatmul.mubr.msk.f32.vlgmr.msra.gmra.mrb[154].mxu0 %vm21789_vm7, %v23509_v49  ;;  %vm21792_vm8 = vcmp.lt.s32.totalorder %v21318_v10, 363791  ;;  %v21317_v51 = vadd.s32 %v45337_v20, %v20841_v11  ;;  %v23526_v17 = vrot.slane %v22033_v58, %v45349_v32  ;;  %v25788_v30 = vcombine.high %v46816_v39, %v46816_v39  ;;  %v46836_v13 = vpop.f32.mrb[70].mxu0  ;;  %v22035_v10 = vld [vmem:[%s44467_s4 + $0x280] sm:$0xff]  ;;  %v46875_v11 = vld [vmem:[%s44474_s20 + $0x510] sm:$0xff] }
 0x4bf   : > { %36955 = vmatpush1.xpose.msra.mxu1 %v46784_v27  ;;  %v23518_v3 = vcombine.high %v23516_v44, %v23516_v44  ;;  %37025 = vmatpush1.xpose.msra.mxu0 %v25312_v42  ;;  %v21320_v0 = vadd.s32 %v45337_v20, %v20844_v5  ;;  %v29741_v21 = vadd.f32 %v46605_v55, %v29671_v50  ;;  %v20843_v24 = vadd.s32 39936, %v45335_v18  ;;  %v31072_v40 = vpop.f32.mrb[71].mxu0 }
 0x4c0   : > { %vm21791_vm9 = vcmp.lt.s32.totalorder %v21317_v51, 363791  ;;  %37094 = vmatprep.subr.mxu1 %v25787_v25  ;;  %v23534_v15 = vcombine.high %v23526_v17, %v23526_v17  ;;  %37164 = vmatprep.subr.mxu0 %v25788_v30  ;;  %v20846_v53 = vadd.s32 40320, %v45335_v18  ;;  %v23519_v7 = vcombine.high %v22033_v58, %v22033_v58 }
 0x4c1   : > { %43132 = vmatprep.mubr.msk.f32.mxu1 %vm21792_vm8, %v23518_v3  ;;  %vm21794_vm10 = vcmp.lt.s32.totalorder %v21320_v0, 363791  ;;  %v21319_v27 = vadd.s32 %v45337_v20, %v20843_v24  ;;  %v20845_v55 = vadd.s32 40192, %v45335_v18  ;;  %v25789_v42 = vcombine.high %v46834_v19, %v46834_v19  ;;  %v46852_v6 = vpop.f32.mrb[70].mxu1 }
 0x4c2   : > { %43133 = vmatmul.mubr.msk.f32.vlgmr.msra.gmra.mrb[154].mxu1 %vm21791_vm9, %v23516_v44  ;;  %43134 = vmatprep.mubr.msk.f32.mxu0 %vm21794_vm10, %v23534_v15  ;;  %v21322_v49 = vadd.s32 %v45337_v20, %v20846_v53  ;;  %v23533_v16 = vrot.slane %v23519_v7, %v45349_v32  ;;  %v29811_v14 = vadd.f32 %v46611_v8, %v29741_v21  ;;  %v20848_v38 = vadd.s32 40576, %v45335_v18  ;;  %v31142_v26 = vpop.f32.mrb[71].mxu1  ;;  %v46858_v1 = vpop.f32.mrb[72].mxu0 }
 0x4c3   : > { %37095 = vmatpush1.xpose.msra.mxu1 %v46806_v43  ;;  %vm21793_vm11 = vcmp.lt.s32.totalorder %v21319_v27, 363791  ;;  %v21321_v41 = vadd.s32 %v45337_v20, %v20845_v55  ;;  %v23543_v56 = vrot.slane %v22034_v61, %v45349_v32  ;;  %v25790_v46 = vcombine.high %v46845_v60, %v46845_v60  ;;  %v31212_v8 = vpop.f32.mrb[73].mxu0 }
 0x4c4   : > { %43135 = vmatmul.mubr.msk.f32.vlgmr.msra.gmra.mrb[156].mxu0 %vm21793_vm11, %v23526_v17  ;;  %vm21796_vm12 = vcmp.lt.s32.totalorder %v21322_v49, 363791  ;;  %v23535_v48 = vcombine.high %v23533_v16, %v23533_v16  ;;  %37234 = vmatprep.subr.mxu1 %v25789_v42  ;;  %v21324_v62 = vadd.s32 %v45337_v20, %v20848_v38  ;;  %v29881_v43 = vadd.f32 %v46630_v33, %v29811_v14  ;;  %v22036_v49 = vld [vmem:[%s44467_s4 + $0x288] sm:$0xff] }
 0x4c5   : > { %37165 = vmatpush1.xpose.msra.mxu0 %v46816_v39  ;;  %vm21795_vm13 = vcmp.lt.s32.totalorder %v21321_v41, 363791  ;;  %v23551_v35 = vcombine.high %v23543_v56, %v23543_v56  ;;  %v20847_v12 = vadd.s32 40448, %v45335_v18  ;;  %v20850_v58 = vadd.s32 40832, %v45335_v18 }
 0x4c6   : > { %43136 = vmatprep.mubr.msk.f32.mxu1 %vm21796_vm12, %v23535_v48  ;;  %vm21798_vm14 = vcmp.lt.s32.totalorder %v21324_v62, 363791  ;;  %37304 = vmatprep.subr.mxu0 %v25790_v46  ;;  %v23536_v25 = vcombine.high %v22034_v61, %v22034_v61  ;;  %v20849_v44 = vadd.s32 40704, %v45335_v18  ;;  %v25791_v33 = vcombine.high %v46866_v52, %v46866_v52  ;;  %v46880_v50 = vpop.f32.mrb[72].mxu1 }
 0x4c7   : > { %43137 = vmatmul.mubr.msk.f32.vlgmr.msra.gmra.mrb[156].mxu1 %vm21795_vm13, %v23533_v16  ;;  %43138 = vmatprep.mubr.msk.f32.mxu0 %vm21798_vm14, %v23551_v35  ;;  %v21323_v39 = vadd.s32 %v45337_v20, %v20847_v12  ;;  %v21326_v5 = vadd.s32 %v45337_v20, %v20850_v58  ;;  %v29951_v29 = vadd.f32 %v46641_v54, %v29881_v43  ;;  %v20852_v51 = vadd.s32 41088, %v45335_v18  ;;  %v31282_v17 = vpop.f32.mrb[73].mxu1  ;;  %v46886_v30 = vpop.f32.mrb[74].mxu0  ;;  %v25320_v16 = vld [vmem:[%s44474_s20 + $0x520] sm:$0xff]  ;;  %v46924_v58 = vld [vmem:[%s44474_s20 + $0x528] sm:$0xff] }
 0x4c8   : > { %37235 = vmatpush1.xpose.msra.mxu1 %v46834_v19  ;;  %v23550_v3 = vrot.slane %v23536_v25, %v45349_v32  ;;  %v21325_v0 = vadd.s32 %v45337_v20, %v20849_v44  ;;  %v23560_v21 = vrot.slane %v22035_v10, %v45349_v32  ;;  %v25792_v24 = vcombine.high %v46875_v11, %v46875_v11  ;;  %v31352_v40 = vpop.f32.mrb[75].mxu0  ;;  %v46897_v19 = vld [vmem:[%s44474_s20 + $0x518] sm:$0xff] }
 0x4c9   : > { %vm21797_vm15 = vcmp.lt.s32.totalorder %v21323_v39, 363791  ;;  %vm21800_vm0 = vcmp.lt.s32.totalorder %v21326_v5, 363791  ;;  %37374 = vmatprep.subr.mxu1 %v25791_v33  ;;  %v21328_v54 = vadd.s32 %v45337_v20, %v20852_v51  ;;  %v30021_v15 = vadd.f32 %v46660_v57, %v29951_v29  ;;  %v22037_v44 = vld [vmem:[%s44467_s4 + $0x290] sm:$0xff] }
 0x4ca   : > { %43139 = vmatmul.mubr.msk.f32.vlgmr.msra.gmra.mrb[158].mxu0 %vm21797_vm15, %v23543_v56  ;;  %v23552_v53 = vcombine.high %v23550_v3, %v23550_v3  ;;  %vm21799_vm1 = vcmp.lt.s32.totalorder %v21325_v0, 363791  ;;  %v23568_v7 = vcombine.high %v23560_v21, %v23560_v21  ;;  %v20851_v61 = vadd.s32 40960, %v45335_v18  ;;  %v25322_v29 = vld [vmem:[%s44474_s20 + $0x530] sm:$0xff] }
 0x4cb   : > { %37305 = vmatpush1.xpose.msra.mxu0 %v46845_v60  ;;  %vm21802_vm2 = vcmp.lt.s32.totalorder %v21328_v54, 363791  ;;  %v20854_v27 = vadd.s32 41344, %v45335_v18  ;;  %v23553_v55 = vcombine.high %v22035_v10, %v22035_v10  ;;  %v20853_v42 = vadd.s32 41216, %v45335_v18  ;;  %v46905_v14 = vpop.f32.mrb[74].mxu1 }
 0x4cc   : > { %43140 = vmatprep.mubr.msk.f32.mxu1 %vm21800_vm0, %v23552_v53  ;;  %43142 = vmatprep.mubr.msk.f32.mxu0 %vm21802_vm2, %v23568_v7  ;;  %v21327_v57 = vadd.s32 %v45337_v20, %v20851_v61  ;;  %v25793_v38 = vcombine.high %v46897_v19, %v46897_v19  ;;  %v30091_v60 = vadd.f32 %v46665_v63, %v30021_v15  ;;  %v20856_v26 = vadd.s32 41600, %v45335_v18  ;;  %v31422_v41 = vpop.f32.mrb[75].mxu1  ;;  %v46913_v56 = vpop.f32.mrb[76].mxu0  ;;  %v46949_v61 = vld [vmem:[%s44474_s20 + $0x538] sm:$0xff] }
 0x4cd   : > { %43141 = vmatmul.mubr.msk.f32.vlgmr.msra.gmra.mrb[158].mxu1 %vm21799_vm1, %v23550_v3  ;;  %37444 = vmatprep.subr.mxu0 %v25792_v24  ;;  %v21330_v46 = vadd.s32 %v45337_v20, %v20854_v27  ;;  %v23567_v8 = vrot.slane %v23553_v55, %v45349_v32  ;;  %v21329_v48 = vadd.s32 %v45337_v20, %v20853_v42  ;;  %v20855_v62 = vadd.s32 41472, %v45335_v18  ;;  %v31492_v43 = vpop.f32.mrb[77].mxu0 }
 0x4ce   : > { %37375 = vmatpush1.xpose.msra.mxu1 %v46866_v52  ;;  %vm21801_vm3 = vcmp.lt.s32.totalorder %v21327_v57, 363791  ;;  %v21332_v63 = vadd.s32 %v45337_v20, %v20856_v26  ;;  %v23577_v35 = vrot.slane %v22036_v49, %v45349_v32  ;;  %v25794_v12 = vcombine.high %v25320_v16, %v25320_v16 }
 0x4cf   : > { %43143 = vmatmul.mubr.msk.f32.vlgmr.msra.gmra.mrb[160].mxu0 %vm21801_vm3, %v23560_v21  ;;  %vm21804_vm4 = vcmp.lt.s32.totalorder %v21330_v46, 363791  ;;  %v23569_v10 = vcombine.high %v23567_v8, %v23567_v8  ;;  %vm21803_vm5 = vcmp.lt.s32.totalorder %v21329_v48, 363791  ;;  %37514 = vmatprep.subr.mxu1 %v25793_v38  ;;  %v30161_v25 = vadd.f32 %v46684_v31, %v30091_v60  ;;  %v46928_v33 = vpop.f32.mrb[76].mxu1  ;;  %v22038_v60 = vld [vmem:[%s44467_s4 + $0x298] sm:$0xff] }
 0x4d0   : > { %37445 = vmatpush1.xpose.msra.mxu0 %v46875_v11  ;;  %vm21806_vm6 = vcmp.lt.s32.totalorder %v21332_v63, 363791  ;;  %v23585_v52 = vcombine.high %v23577_v35, %v23577_v35  ;;  %v21331_v39 = vadd.s32 %v45337_v20, %v20855_v62  ;;  %v20858_v5 = vadd.s32 41856, %v45335_v18  ;;  %v31562_v51 = vpop.f32.mrb[77].mxu1 }
 0x4d1   : > { %43144 = vmatprep.mubr.msk.f32.mxu1 %vm21804_vm4, %v23569_v10  ;;  %37584 = vmatprep.subr.mxu0 %v25794_v12  ;;  %v23570_v17 = vcombine.high %v22036_v49, %v22036_v49  ;;  %v20857_v3 = vadd.s32 41728, %v45335_v18  ;;  %v25795_v31 = vcombine.high %v46924_v58, %v46924_v58  ;;  %v30231_v0 = vadd.f32 %v46690_v37, %v30161_v25  ;;  %v46938_v11 = vpop.f32.mrb[78].mxu0 }
 0x4d2   : > { %43145 = vmatmul.mubr.msk.f32.vlgmr.msra.gmra.mrb[160].mxu1 %vm21803_vm5, %v23567_v8  ;;  %43146 = vmatprep.mubr.msk.f32.mxu0 %vm21806_vm6, %v23585_v52  ;;  %vm21805_vm7 = vcmp.lt.s32.totalorder %v21331_v39, 363791  ;;  %v21334_v21 = vadd.s32 %v45337_v20, %v20858_v5  ;;  %v20860_v24 = vadd.s32 42112, %v45335_v18  ;;  %v23594_v40 = vrot.slane %v22037_v44, %v45349_v32  ;;  %v31632_v54 = vpop.f32.mrb[79].mxu0  ;;  %v25324_v8 = vld [vmem:[%s44474_s20 + $0x540] sm:$0xff]  ;;  %v46977_v39 = vld [vmem:[%s44474_s20 + $0x548] sm:$0xff] }
 0x4d3   : > { %37515 = vmatpush1.xpose.msra.mxu1 %v46897_v19  ;;  %43147 = vmatmul.mubr.msk.f32.vlgmr.msra.gmra.mrb[162].mxu0 %vm21805_vm7, %v23577_v35  ;;  %v23584_v15 = vrot.slane %v23570_v17, %v45349_v32  ;;  %v21333_v37 = vadd.s32 %v45337_v20, %v20857_v3  ;;  %v25796_v53 = vcombine.high %v25322_v29, %v25322_v29  ;;  %v20859_v7 = vadd.s32 41984, %v45335_v18 }
 0x4d4   : > { %vm21808_vm8 = vcmp.lt.s32.totalorder %v21334_v21, 363791  ;;  %37585 = vmatpush1.xpose.msra.mxu0 %v25320_v16  ;;  %37654 = vmatprep.subr.mxu1 %v25795_v31  ;;  %v21336_v27 = vadd.s32 %v45337_v20, %v20860_v24  ;;  %v23602_v55 = vcombine.high %v23594_v40, %v23594_v40  ;;  %v30301_v19 = vadd.f32 %v46711_v59, %v30231_v0  ;;  %v46953_v42 = vpop.f32.mrb[78].mxu1  ;;  %v22039_v21 = vld [vmem:[%s44467_s4 + $0x2a0] sm:$0xff]  ;;  %v25326_v24 = vld [vmem:[%s44474_s20 + $0x550] sm:$0xff] }
 0x4d5   : > { %v23586_v49 = vcombine.high %v23584_v15, %v23584_v15  ;;  %vm21807_vm9 = vcmp.lt.s32.totalorder %v21333_v37, 363791  ;;  %37724 = vmatprep.subr.mxu0 %v25796_v53  ;;  %v21335_v57 = vadd.s32 %v45337_v20, %v20859_v7  ;;  %v20862_v38 = vadd.s32 42368, %v45335_v18  ;;  %v31702_v26 = vpop.f32.mrb[79].mxu1  ;;  %v46958_v41 = vpop.f32.mrb[80].mxu0 }
 0x4d6   : > { %vm21810_vm10 = vcmp.lt.s32.totalorder %v21336_v27, 363791  ;;  %v23587_v16 = vcombine.high %v22037_v44, %v22037_v44  ;;  %v20861_v46 = vadd.s32 42240, %v45335_v18  ;;  %v25797_v59 = vcombine.high %v46949_v61, %v46949_v61  ;;  %v31772_v48 = vpop.f32.mrb[81].mxu0 }
 0x4d7   : > { %43148 = vmatprep.mubr.msk.f32.mxu1 %vm21808_vm8, %v23586_v49  ;;  %43150 = vmatprep.mubr.msk.f32.mxu0 %vm21810_vm10, %v23602_v55  ;;  %vm21809_vm11 = vcmp.lt.s32.totalorder %v21335_v57, 363791  ;;  %v21338_v62 = vadd.s32 %v45337_v20, %v20862_v38  ;;  %v30371_v43 = vadd.f32 %v46717_v36, %v30301_v19  ;;  %v20864_v63 = vadd.s32 42624, %v45335_v18  ;;  %v47003_v38 = vld [vmem:[%s44474_s20 + $0x558] sm:$0xff] }
 0x4d8   : > { %43149 = vmatmul.mubr.msk.f32.vlgmr.msra.gmra.mrb[162].mxu1 %vm21807_vm9, %v23584_v15  ;;  %43151 = vmatmul.mubr.msk.f32.vlgmr.msra.gmra.mrb[164].mxu0 %vm21809_vm11, %v23594_v40  ;;  %v23601_v35 = vrot.slane %v23587_v16, %v45349_v32  ;;  %v21337_v12 = vadd.s32 %v45337_v20, %v20861_v46  ;;  %v23611_v10 = vrot.slane %v22038_v60, %v45349_v32  ;;  %v20863_v25 = vadd.s32 42496, %v45335_v18 }
 0x4d9   : > { %37655 = vmatpush1.xpose.msra.mxu1 %v46924_v58  ;;  %vm21812_vm12 = vcmp.lt.s32.totalorder %v21338_v62, 363791  ;;  %37725 = vmatpush1.xpose.msra.mxu0 %v25322_v29  ;;  %v21340_v44 = vadd.s32 %v45337_v20, %v20864_v63  ;;  %v25798_v36 = vcombine.high %v25324_v8, %v25324_v8  ;;  %v30441_v52 = vadd.f32 %v46734_v28, %v30371_v43  ;;  %v46979_v5 = vpop.f32.mrb[80].mxu1  ;;  %v25328_v43 = vld [vmem:[%s44474_s20 + $0x560] sm:$0xff] }
 0x4da   : > { %v23603_v51 = vcombine.high %v23601_v35, %v23601_v35  ;;  %vm21811_vm13 = vcmp.lt.s32.totalorder %v21337_v12, 363791  ;;  %37794 = vmatprep.subr.mxu1 %v25797_v59  ;;  %v23619_v17 = vcombine.high %v23611_v10, %v23611_v10  ;;  %v21339_v3 = vadd.s32 %v45337_v20, %v20863_v25  ;;  %v31842_v58 = vpop.f32.mrb[81].mxu1  ;;  %v46982_v31 = vpop.f32.mrb[82].mxu0 }
 0x4db   : > { %vm21814_vm14 = vcmp.lt.s32.totalorder %v21340_v44, 363791  ;;  %37864 = vmatprep.subr.mxu0 %v25798_v36  ;;  %v20866_v29 = vadd.s32 42880, %v45335_v18  ;;  %v23604_v0 = vcombine.high %v22038_v60, %v22038_v60  ;;  %v20865_v28 = vadd.s32 42752, %v45335_v18  ;;  %v31912_v40 = vpop.f32.mrb[83].mxu0 }
 0x4dc   : > { %43152 = vmatprep.mubr.msk.f32.mxu1 %vm21812_vm12, %v23603_v51  ;;  %43154 = vmatprep.mubr.msk.f32.mxu0 %vm21814_vm14, %v23619_v17  ;;  %vm21813_vm15 = vcmp.lt.s32.totalorder %v21339_v3, 363791  ;;  %v25799_v54 = vcombine.high %v46977_v39, %v46977_v39  ;;  %v30511_v15 = vadd.f32 %v46741_v23, %v30441_v52  ;;  %v20868_v37 = vadd.s32 43136, %v45335_v18  ;;  %v47028_v3 = vld [vmem:[%s44474_s20 + $0x568] sm:$0xff] }
 0x4dd   : > { %43153 = vmatmul.mubr.msk.f32.vlgmr.msra.gmra.mrb[164].mxu1 %vm21811_vm13, %v23601_v35  ;;  %43155 = vmatmul.mubr.msk.f32.vlgmr.msra.gmra.mrb[166].mxu0 %vm21813_vm15, %v23611_v10  ;;  %v21342_v53 = vadd.s32 %v45337_v20, %v20866_v29  ;;  %v23618_v7 = vrot.slane %v23604_v0, %v45349_v32  ;;  %v21341_v27 = vadd.s32 %v45337_v20, %v20865_v28  ;;  %v20867_v55 = vadd.s32 43008, %v45335_v18 }
 0x4de   : > { %37795 = vmatpush1.xpose.msra.mxu1 %v46949_v61  ;;  %37865 = vmatpush1.xpose.msra.mxu0 %v25324_v8  ;;  %v21344_v19 = vadd.s32 %v45337_v20, %v20868_v37  ;;  %v23628_v23 = vrot.slane %v22039_v21, %v45349_v32  ;;  %v25800_v49 = vcombine.high %v25326_v24, %v25326_v24  ;;  %v20870_v57 = vadd.s32 43392, %v45335_v18  ;;  %v47005_v60 = vpop.f32.mrb[82].mxu1  ;;  %v22040_v61 = vld [vmem:[%s44467_s4 + $0x2a8] sm:$0xff]  ;;  %v22041_v37 = vld [vmem:[%s44467_s4 + $0x2b0] sm:$0xff] }
 0x4df   : > { %vm21816_vm0 = vcmp.lt.s32.totalorder %v21342_v53, 363791  ;;  %v23620_v26 = vcombine.high %v23618_v7, %v23618_v7  ;;  %vm21815_vm1 = vcmp.lt.s32.totalorder %v21341_v27, 363791  ;;  %37934 = vmatprep.subr.mxu1 %v25799_v54  ;;  %v30581_v16 = vadd.f32 %v46756_v22, %v30511_v15  ;;  %v31982_v46 = vpop.f32.mrb[83].mxu1  ;;  %v47009_v59 = vpop.f32.mrb[84].mxu0  ;;  %v47038_v53 = vld [vmem:[%s44474_s20 + $0x570] sm:$0xff] }
 0x4e0   : > { %vm21818_vm2 = vcmp.lt.s32.totalorder %v21344_v19, 363791  ;;  %v23636_v8 = vcombine.high %v23628_v23, %v23628_v23  ;;  %38004 = vmatprep.subr.mxu0 %v25800_v49  ;;  %v21343_v48 = vadd.s32 %v45337_v20, %v20867_v55  ;;  %v21346_v62 = vadd.s32 %v45337_v20, %v20870_v57  ;;  %v32052_v63 = vpop.f32.mrb[85].mxu0 }
 0x4e1   : > { %43156 = vmatprep.mubr.msk.f32.mxu1 %vm21816_vm0, %v23620_v26  ;;  %v23621_v35 = vcombine.high %v22039_v21, %v22039_v21  ;;  %v20869_v12 = vadd.s32 43264, %v45335_v18  ;;  %v25801_v22 = vcombine.high %v47003_v38, %v47003_v38  ;;  %v30651_v10 = vadd.f32 %v46762_v45, %v30581_v16 }
 0x4e2   : > { %43157 = vmatmul.mubr.msk.f32.vlgmr.msra.gmra.mrb[166].mxu1 %vm21815_vm1, %v23618_v7  ;;  %43158 = vmatprep.mubr.msk.f32.mxu0 %vm21818_vm2, %v23636_v8  ;;  %vm21817_vm3 = vcmp.lt.s32.totalorder %v21343_v48, 363791  ;;  %vm21820_vm4 = vcmp.lt.s32.totalorder %v21346_v62, 363791  ;;  %v20872_v25 = vadd.s32 43648, %v45335_v18  ;;  %v23645_v44 = vrot.slane %v22040_v61, %v45349_v32  ;;  %v47021_v36 = vpop.f32.mrb[84].mxu1 }
 0x4e3   : > { %37935 = vmatpush1.xpose.msra.mxu1 %v46977_v39  ;;  %43159 = vmatmul.mubr.msk.f32.vlgmr.msra.gmra.mrb[168].mxu0 %vm21817_vm3, %v23628_v23  ;;  %v23635_v52 = vrot.slane %v23621_v35, %v45349_v32  ;;  %v21345_v51 = vadd.s32 %v45337_v20, %v20869_v12  ;;  %v25802_v17 = vcombine.high %v25328_v43, %v25328_v43  ;;  %v20871_v45 = vadd.s32 43520, %v45335_v18  ;;  %v32122_v58 = vpop.f32.mrb[85].mxu1 }
 0x4e4   : > { %38005 = vmatpush1.xpose.msra.mxu0 %v25326_v24  ;;  %38074 = vmatprep.subr.mxu1 %v25801_v22  ;;  %v21348_v29 = vadd.s32 %v45337_v20, %v20872_v25  ;;  %v23653_v0 = vcombine.high %v23645_v44, %v23645_v44  ;;  %v30721_v39 = vadd.f32 %v46777_v9, %v30651_v10  ;;  %v20874_v28 = vadd.s32 43904, %v45335_v18  ;;  %v47033_v21 = vpop.f32.mrb[86].mxu0  ;;  %v22042_v25 = vld [vmem:[%s44467_s4 + $0x2b8] sm:$0xff] }
 0x4e5   : > { %v23637_v40 = vcombine.high %v23635_v52, %v23635_v52  ;;  %vm21819_vm5 = vcmp.lt.s32.totalorder %v21345_v51, 363791  ;;  %38144 = vmatprep.subr.mxu0 %v25802_v17  ;;  %v21347_v54 = vadd.s32 %v45337_v20, %v20871_v45  ;;  %v23638_v15 = vcombine.high %v22040_v61, %v22040_v61  ;;  %v32192_v24 = vpop.f32.mrb[87].mxu0  ;;  %v47056_v61 = vld [vmem:[%s44474_s20 + $0x578] sm:$0xff] }
 0x4e6   : > { %vm21822_vm6 = vcmp.lt.s32.totalorder %v21348_v29, 363791  ;;  %v21350_v7 = vadd.s32 %v45337_v20, %v20874_v28  ;;  %v20873_v9 = vadd.s32 43776, %v45335_v18  ;;  %v25803_v27 = vcombine.high %v47028_v3, %v47028_v3  ;;  %v47086_v28 = vld [vmem:[%s44474_s20 + $0x588] sm:$0xff] }
 0x4e7   : > { %43160 = vmatprep.mubr.msk.f32.mxu1 %vm21820_vm4, %v23637_v40  ;;  %43162 = vmatprep.mubr.msk.f32.mxu0 %vm21822_vm6, %v23653_v0  ;;  %vm21821_vm7 = vcmp.lt.s32.totalorder %v21347_v54, 363791  ;;  %v23652_v55 = vrot.slane %v23638_v15, %v45349_v32  ;;  %v30791_v19 = vadd.f32 %v46786_v34, %v30721_v39  ;;  %v20876_v23 = vadd.s32 44160, %v45335_v18  ;;  %v47048_v49 = vpop.f32.mrb[86].mxu1 }
 0x4e8   : > { %43161 = vmatmul.mubr.msk.f32.vlgmr.msra.gmra.mrb[168].mxu1 %vm21819_vm5, %v23635_v52  ;;  %43163 = vmatmul.mubr.msk.f32.vlgmr.msra.gmra.mrb[170].mxu0 %vm21821_vm7, %v23645_v44  ;;  %vm21824_vm8 = vcmp.lt.s32.totalorder %v21350_v7, 363791  ;;  %v21349_v57 = vadd.s32 %v45337_v20, %v20873_v9  ;;  %v23662_v26 = vrot.slane %v22041_v37, %v45349_v32  ;;  %v25804_v16 = vcombine.high %v47038_v53, %v47038_v53  ;;  %v32262_v46 = vpop.f32.mrb[87].mxu1  ;;  %v47058_v34 = vpop.f32.mrb[88].mxu0  ;;  %v47067_v44 = vld [vmem:[%s44474_s20 + $0x580] sm:$0xff] }
 0x4e9   : > { %38075 = vmatpush1.xpose.msra.mxu1 %v47003_v38  ;;  %v23654_v8 = vcombine.high %v23652_v55, %v23652_v55  ;;  %38145 = vmatpush1.xpose.msra.mxu0 %v25328_v43  ;;  %v21352_v48 = vadd.s32 %v45337_v20, %v20876_v23  ;;  %v30861_v62 = vadd.f32 %v46800_v4, %v30791_v19  ;;  %v20875_v63 = vadd.s32 44032, %v45335_v18  ;;  %v32332_v35 = vpop.f32.mrb[89].mxu0 }
 0x4ea   : > { %vm21823_vm9 = vcmp.lt.s32.totalorder %v21349_v57, 363791  ;;  %38214 = vmatprep.subr.mxu1 %v25803_v27  ;;  %v23670_v12 = vcombine.high %v23662_v26, %v23662_v26  ;;  %38284 = vmatprep.subr.mxu0 %v25804_v16  ;;  %v20878_v22 = vadd.s32 44416, %v45335_v18  ;;  %v23655_v10 = vcombine.high %v22041_v37, %v22041_v37  ;;  %v22043_v27 = vld [vmem:[%s44467_s4 + $0x2c0] sm:$0xff] }
 0x4eb   : > { %43164 = vmatprep.mubr.msk.f32.mxu1 %vm21824_vm8, %v23654_v8  ;;  %vm21826_vm10 = vcmp.lt.s32.totalorder %v21352_v48, 363791  ;;  %v21351_v38 = vadd.s32 %v45337_v20, %v20875_v63  ;;  %v20877_v4 = vadd.s32 44288, %v45335_v18  ;;  %v25805_v43 = vcombine.high %v47056_v61, %v47056_v61 }
 0x4ec   : > { %43165 = vmatmul.mubr.msk.f32.vlgmr.msra.gmra.mrb[170].mxu1 %vm21823_vm9, %v23652_v55  ;;  %43166 = vmatprep.mubr.msk.f32.mxu0 %vm21826_vm10, %v23670_v12  ;;  %v21354_v52 = vadd.s32 %v45337_v20, %v20878_v22  ;;  %v23669_v51 = vrot.slane %v23655_v10, %v45349_v32  ;;  %v30931_v17 = vadd.f32 %v46808_v2, %v30861_v62  ;;  %v20880_v45 = vadd.s32 44672, %v45335_v18  ;;  %v47078_v58 = vpop.f32.mrb[88].mxu1  ;;  %v47097_v55 = vld [vmem:[%s44474_s20 + $0x590] sm:$0xff]  ;;  %v47119_v22 = vld [vmem:[%s44474_s20 + $0x598] sm:$0xff] }
 0x4ed   : > { %38215 = vmatpush1.xpose.msra.mxu1 %v47028_v3  ;;  %vm21825_vm11 = vcmp.lt.s32.totalorder %v21351_v38, 363791  ;;  %v21353_v29 = vadd.s32 %v45337_v20, %v20877_v4  ;;  %v23679_v0 = vrot.slane %v22042_v25, %v45349_v32  ;;  %v25806_v39 = vcombine.high %v47067_v44, %v47067_v44  ;;  %v32402_v40 = vpop.f32.mrb[89].mxu1  ;;  %v47088_v2 = vpop.f32.mrb[90].mxu0 }
 0x4ee   : > { %43167 = vmatmul.mubr.msk.f32.vlgmr.msra.gmra.mrb[172].mxu0 %vm21825_vm11, %v23662_v26  ;;  %vm21828_vm12 = vcmp.lt.s32.totalorder %v21354_v52, 363791  ;;  %v23671_v54 = vcombine.high %v23669_v51, %v23669_v51  ;;  %38354 = vmatprep.subr.mxu1 %v25805_v43  ;;  %v21356_v3 = vadd.s32 %v45337_v20, %v20880_v45  ;;  %v31001_v15 = vadd.f32 %v46822_v47, %v30931_v17  ;;  %v32472_v37 = vpop.f32.mrb[91].mxu0  ;;  %v22044_v17 = vld [vmem:[%s44467_s4 + $0x2c8] sm:$0xff] }
 0x4ef   : > { %38285 = vmatpush1.xpose.msra.mxu0 %v47038_v53  ;;  %vm21827_vm13 = vcmp.lt.s32.totalorder %v21353_v29, 363791  ;;  %v23687_v24 = vcombine.high %v23679_v0, %v23679_v0  ;;  %v20879_v7 = vadd.s32 44544, %v45335_v18  ;;  %v20882_v9 = vadd.s32 44928, %v45335_v18  ;;  %v25336_v45 = vld [vmem:[%s44474_s20 + $0x5a0] sm:$0xff] }
 0x4f0   : > { %43168 = vmatprep.mubr.msk.f32.mxu1 %vm21828_vm12, %v23671_v54  ;;  %vm21830_vm14 = vcmp.lt.s32.totalorder %v21356_v3, 363791  ;;  %38424 = vmatprep.subr.mxu0 %v25806_v39  ;;  %v23672_v19 = vcombine.high %v22042_v25, %v22042_v25  ;;  %v20881_v23 = vadd.s32 44800, %v45335_v18  ;;  %v25807_v47 = vcombine.high %v47086_v28, %v47086_v28 }
 0x4f1   : > { %43169 = vmatmul.mubr.msk.f32.vlgmr.msra.gmra.mrb[172].mxu1 %vm21827_vm13, %v23669_v51  ;;  %43170 = vmatprep.mubr.msk.f32.mxu0 %vm21830_vm14, %v23687_v24  ;;  %v21355_v53 = vadd.s32 %v45337_v20, %v20879_v7  ;;  %v21358_v57 = vadd.s32 %v45337_v20, %v20882_v9  ;;  %v31071_v26 = vadd.f32 %v46836_v13, %v31001_v15  ;;  %v20884_v16 = vadd.s32 45184, %v45335_v18  ;;  %v47106_v46 = vpop.f32.mrb[90].mxu1 }
 0x4f2   : > { %38355 = vmatpush1.xpose.msra.mxu1 %v47056_v61  ;;  %v23686_v8 = vrot.slane %v23672_v19, %v45349_v32  ;;  %v21357_v48 = vadd.s32 %v45337_v20, %v20881_v23  ;;  %v23696_v62 = vrot.slane %v22043_v27, %v45349_v32  ;;  %v25808_v63 = vcombine.high %v47097_v55, %v47097_v55  ;;  %v32542_v35 = vpop.f32.mrb[91].mxu1  ;;  %v47114_v12 = vpop.f32.mrb[92].mxu0 }
 0x4f3   : > { %vm21829_vm15 = vcmp.lt.s32.totalorder %v21355_v53, 363791  ;;  %vm21832_vm0 = vcmp.lt.s32.totalorder %v21358_v57, 363791  ;;  %38494 = vmatprep.subr.mxu1 %v25807_v47  ;;  %v21360_v13 = vadd.s32 %v45337_v20, %v20884_v16  ;;  %v31141_v61 = vadd.f32 %v46852_v6, %v31071_v26  ;;  %v32612_v10 = vpop.f32.mrb[93].mxu0  ;;  %v22045_v53 = vld [vmem:[%s44467_s4 + $0x2d0] sm:$0xff] }
 0x4f4   : > { %43171 = vmatmul.mubr.msk.f32.vlgmr.msra.gmra.mrb[174].mxu0 %vm21829_vm15, %v23679_v0  ;;  %v23688_v25 = vcombine.high %v23686_v8, %v23686_v8  ;;  %vm21831_vm1 = vcmp.lt.s32.totalorder %v21357_v48, 363791  ;;  %v23704_v38 = vcombine.high %v23696_v62, %v23696_v62  ;;  %v20883_v4 = vadd.s32 45056, %v45335_v18  ;;  %v25338_v16 = vld [vmem:[%s44474_s20 + $0x5b0] sm:$0xff] }
 0x4f5   : > { %38425 = vmatpush1.xpose.msra.mxu0 %v47067_v44  ;;  %vm21834_vm2 = vcmp.lt.s32.totalorder %v21360_v13, 363791  ;;  %v20886_v43 = vadd.s32 45440, %v45335_v18  ;;  %v23689_v52 = vcombine.high %v22043_v27, %v22043_v27  ;;  %v20885_v51 = vadd.s32 45312, %v45335_v18  ;;  %v47127_v6 = vpop.f32.mrb[92].mxu1  ;;  %v47146_v27 = vld [vmem:[%s44474_s20 + $0x5a8] sm:$0xff] }
 0x4f6   : > { %43172 = vmatprep.mubr.msk.f32.mxu1 %vm21832_vm0, %v23688_v25  ;;  %43174 = vmatprep.mubr.msk.f32.mxu0 %vm21834_vm2, %v23704_v38  ;;  %v21359_v29 = vadd.s32 %v45337_v20, %v20883_v4  ;;  %v25809_v0 = vcombine.high %v47119_v22, %v47119_v22  ;;  %v31211_v44 = vadd.f32 %v46858_v1, %v31141_v61  ;;  %v20888_v39 = vadd.s32 45696, %v45335_v18  ;;  %v32682_v40 = vpop.f32.mrb[93].mxu1 }
 0x4f7   : > { %43173 = vmatmul.mubr.msk.f32.vlgmr.msra.gmra.mrb[174].mxu1 %vm21831_vm1, %v23686_v8  ;;  %38564 = vmatprep.subr.mxu0 %v25808_v63  ;;  %v21362_v54 = vadd.s32 %v45337_v20, %v20886_v43  ;;  %v23703_v3 = vrot.slane %v23689_v52, %v45349_v32  ;;  %v21361_v15 = vadd.s32 %v45337_v20, %v20885_v51  ;;  %v20887_v37 = vadd.s32 45568, %v45335_v18  ;;  %v47140_v24 = vpop.f32.mrb[94].mxu0  ;;  %v47171_v52 = vld [vmem:[%s44474_s20 + $0x5b8] sm:$0xff] }
 0x4f8   : > { %38495 = vmatpush1.xpose.msra.mxu1 %v47086_v28  ;;  %vm21833_vm3 = vcmp.lt.s32.totalorder %v21359_v29, 363791  ;;  %v21364_v1 = vadd.s32 %v45337_v20, %v20888_v39  ;;  %v23713_v7 = vrot.slane %v22044_v17, %v45349_v32  ;;  %v25810_v9 = vcombine.high %v25336_v45, %v25336_v45  ;;  %v32752_v19 = vpop.f32.mrb[95].mxu0  ;;  %v22046_v39 = vld [vmem:[%s44467_s4 + $0x2d8] sm:$0xff] }
 0x4f9   : > { %43175 = vmatmul.mubr.msk.f32.vlgmr.msra.gmra.mrb[176].mxu0 %vm21833_vm3, %v23696_v62  ;;  %vm21836_vm4 = vcmp.lt.s32.totalorder %v21362_v54, 363791  ;;  %v23705_v23 = vcombine.high %v23703_v3, %v23703_v3  ;;  %vm21835_vm5 = vcmp.lt.s32.totalorder %v21361_v15, 363791  ;;  %38634 = vmatprep.subr.mxu1 %v25809_v0  ;;  %v31281_v47 = vadd.f32 %v46880_v50, %v31211_v44  ;;  %v25340_v15 = vld [vmem:[%s44474_s20 + $0x5c0] sm:$0xff] }
 0x4fa   : > { %38565 = vmatpush1.xpose.msra.mxu0 %v47097_v55  ;;  %vm21838_vm6 = vcmp.lt.s32.totalorder %v21364_v1, 363791  ;;  %v23721_v28 = vcombine.high %v23713_v7, %v23713_v7  ;;  %v21363_v57 = vadd.s32 %v45337_v20, %v20887_v37  ;;  %v20890_v26 = vadd.s32 45952, %v45335_v18  ;;  %v47154_v8 = vpop.f32.mrb[94].mxu1 }
 0x4fb   : > { %43176 = vmatprep.mubr.msk.f32.mxu1 %vm21836_vm4, %v23705_v23  ;;  %38704 = vmatprep.subr.mxu0 %v25810_v9  ;;  %v23706_v48 = vcombine.high %v22044_v17, %v22044_v17  ;;  %v20889_v62 = vadd.s32 45824, %v45335_v18  ;;  %v25811_v50 = vcombine.high %v47146_v27, %v47146_v27  ;;  %v31351_v63 = vadd.f32 %v46886_v30, %v31281_v47  ;;  %v32822_v55 = vpop.f32.mrb[95].mxu1  ;;  %v47160_v35 = vpop.f32.mrb[96].mxu0 }
 0x4fc   : > { %43177 = vmatmul.mubr.msk.f32.vlgmr.msra.gmra.mrb[176].mxu1 %vm21835_vm5, %v23703_v3  ;;  %43178 = vmatprep.mubr.msk.f32.mxu0 %vm21838_vm6, %v23721_v28  ;;  %vm21837_vm7 = vcmp.lt.s32.totalorder %v21363_v57, 363791  ;;  %v21366_v13 = vadd.s32 %v45337_v20, %v20890_v26  ;;  %v20892_v61 = vadd.s32 46208, %v45335_v18  ;;  %v23730_v10 = vrot.slane %v22045_v53, %v45349_v32  ;;  %v32892_v25 = vpop.f32.mrb[97].mxu0  ;;  %v22047_v55 = vld [vmem:[%s44467_s4 + $0x2e0] sm:$0xff] }
 0x4fd   : > { %38635 = vmatpush1.xpose.msra.mxu1 %v47119_v22  ;;  %43179 = vmatmul.mubr.msk.f32.vlgmr.msra.gmra.mrb[178].mxu0 %vm21837_vm7, %v23713_v7  ;;  %v23720_v30 = vrot.slane %v23706_v48, %v45349_v32  ;;  %v21365_v38 = vadd.s32 %v45337_v20, %v20889_v62  ;;  %v25812_v4 = vcombine.high %v25338_v16, %v25338_v16  ;;  %v20891_v43 = vadd.s32 46080, %v45335_v18  ;;  %v47199_v48 = vld [vmem:[%s44474_s20 + $0x5c8] sm:$0xff] }
 0x4fe   : > { %vm21840_vm8 = vcmp.lt.s32.totalorder %v21366_v13, 363791  ;;  %38705 = vmatpush1.xpose.msra.mxu0 %v25336_v45  ;;  %38774 = vmatprep.subr.mxu1 %v25811_v50  ;;  %v21368_v51 = vadd.s32 %v45337_v20, %v20892_v61  ;;  %v23738_v17 = vcombine.high %v23730_v10, %v23730_v10  ;;  %v31421_v22 = vadd.f32 %v46905_v14, %v31351_v63 }
 0x4ff   : > { %v23722_v29 = vcombine.high %v23720_v30, %v23720_v30  ;;  %vm21839_vm9 = vcmp.lt.s32.totalorder %v21365_v38, 363791  ;;  %38844 = vmatprep.subr.mxu0 %v25812_v4  ;;  %v21367_v0 = vadd.s32 %v45337_v20, %v20891_v43  ;;  %v20894_v44 = vadd.s32 46464, %v45335_v18  ;;  %v47178_v40 = vpop.f32.mrb[96].mxu1 }
 0x500   : > { %vm21842_vm10 = vcmp.lt.s32.totalorder %v21368_v51, 363791  ;;  %v23723_v54 = vcombine.high %v22045_v53, %v22045_v53  ;;  %v20893_v45 = vadd.s32 46336, %v45335_v18  ;;  %v25813_v3 = vcombine.high %v47171_v52, %v47171_v52  ;;  %v32962_v37 = vpop.f32.mrb[97].mxu1  ;;  %v47184_v14 = vpop.f32.mrb[98].mxu0 }
 0x501   : > { %43180 = vmatprep.mubr.msk.f32.mxu1 %vm21840_vm8, %v23722_v29  ;;  %43182 = vmatprep.mubr.msk.f32.mxu0 %vm21842_vm10, %v23738_v17  ;;  %vm21841_vm11 = vcmp.lt.s32.totalorder %v21367_v0, 363791  ;;  %v21370_v1 = vadd.s32 %v45337_v20, %v20894_v44  ;;  %v31491_v7 = vadd.f32 %v46913_v56, %v31421_v22  ;;  %v20896_v9 = vadd.s32 46720, %v45335_v18  ;;  %v33032_v19 = vpop.f32.mrb[99].mxu0 }
 0x502   : > { %43181 = vmatmul.mubr.msk.f32.vlgmr.msra.gmra.mrb[178].mxu1 %vm21839_vm9, %v23720_v30  ;;  %43183 = vmatmul.mubr.msk.f32.vlgmr.msra.gmra.mrb[180].mxu0 %vm21841_vm11, %v23730_v10  ;;  %v23737_v23 = vrot.slane %v23723_v54, %v45349_v32  ;;  %v21369_v47 = vadd.s32 %v45337_v20, %v20893_v45  ;;  %v23747_v53 = vrot.slane %v22046_v39, %v45349_v32  ;;  %v20895_v28 = vadd.s32 46592, %v45335_v18  ;;  %v25342_v10 = vld [vmem:[%s44474_s20 + $0x5d0] sm:$0xff]  ;;  %v47225_v54 = vld [vmem:[%s44474_s20 + $0x5d8] sm:$0xff]  ;;  %v25344_v19 = vld [vmem:[%s44474_s20 + $0x5e0] sm:$0xff] }
 0x503   : > { %38775 = vmatpush1.xpose.msra.mxu1 %v47146_v27  ;;  %vm21844_vm12 = vcmp.lt.s32.totalorder %v21370_v1, 363791  ;;  %38845 = vmatpush1.xpose.msra.mxu0 %v25338_v16  ;;  %v21372_v56 = vadd.s32 %v45337_v20, %v20896_v9  ;;  %v25814_v57 = vcombine.high %v25340_v15, %v25340_v15  ;;  %v31561_v26 = vadd.f32 %v46928_v33, %v31491_v7 }
 0x504   : > { %v23739_v62 = vcombine.high %v23737_v23, %v23737_v23  ;;  %vm21843_vm13 = vcmp.lt.s32.totalorder %v21369_v47, 363791  ;;  %38914 = vmatprep.subr.mxu1 %v25813_v3  ;;  %v23755_v50 = vcombine.high %v23747_v53, %v23747_v53  ;;  %v21371_v63 = vadd.s32 %v45337_v20, %v20895_v28  ;;  %v47203_v13 = vpop.f32.mrb[98].mxu1 }
 0x505   : > { %vm21846_vm14 = vcmp.lt.s32.totalorder %v21372_v56, 363791  ;;  %38984 = vmatprep.subr.mxu0 %v25814_v57  ;;  %v20898_v27 = vadd.s32 46976, %v45335_v18  ;;  %v23740_v16 = vcombine.high %v22046_v39, %v22046_v39  ;;  %v20897_v61 = vadd.s32 46848, %v45335_v18  ;;  %v33102_v33 = vpop.f32.mrb[99].mxu1  ;;  %v47208_v25 = vpop.f32.mrb[100].mxu0 }
 0x506   : > { %43184 = vmatprep.mubr.msk.f32.mxu1 %vm21844_vm12, %v23739_v62  ;;  %43186 = vmatprep.mubr.msk.f32.mxu0 %vm21846_vm14, %v23755_v50  ;;  %vm21845_vm15 = vcmp.lt.s32.totalorder %v21371_v63, 363791  ;;  %v25815_v30 = vcombine.high %v47199_v48, %v47199_v48  ;;  %v31631_v38 = vadd.f32 %v46938_v11, %v31561_v26  ;;  %v20900_v4 = vadd.s32 47232, %v45335_v18  ;;  %v33172_v43 = vpop.f32.mrb[101].mxu0 }
 0x507   : > { %43185 = vmatmul.mubr.msk.f32.vlgmr.msra.gmra.mrb[180].mxu1 %vm21843_vm13, %v23737_v23  ;;  %43187 = vmatmul.mubr.msk.f32.vlgmr.msra.gmra.mrb[182].mxu0 %vm21845_vm15, %v23747_v53  ;;  %v21374_v51 = vadd.s32 %v45337_v20, %v20898_v27  ;;  %v23754_v17 = vrot.slane %v23740_v16, %v45349_v32  ;;  %v21373_v22 = vadd.s32 %v45337_v20, %v20897_v61  ;;  %v20899_v29 = vadd.s32 47104, %v45335_v18 }
 0x508   : > { %38915 = vmatpush1.xpose.msra.mxu1 %v47171_v52  ;;  %38985 = vmatpush1.xpose.msra.mxu0 %v25340_v15  ;;  %v21376_v11 = vadd.s32 %v45337_v20, %v20900_v4  ;;  %v23764_v0 = vrot.slane %v22047_v55, %v45349_v32  ;;  %v25816_v44 = vcombine.high %v25342_v10, %v25342_v10  ;;  %v20902_v39 = vadd.s32 47488, %v45335_v18  ;;  %v47227_v45 = vpop.f32.mrb[100].mxu1  ;;  %v22048_v52 = vld [vmem:[%s44467_s4 + $0x2e8] sm:$0xff] }
 0x509   : > { %vm21848_vm0 = vcmp.lt.s32.totalorder %v21374_v51, 363791  ;;  %v23756_v3 = vcombine.high %v23754_v17, %v23754_v17  ;;  %vm21847_vm1 = vcmp.lt.s32.totalorder %v21373_v22, 363791  ;;  %39054 = vmatprep.subr.mxu1 %v25815_v30  ;;  %v31701_v37 = vadd.f32 %v46953_v42, %v31631_v38  ;;  %v33242_v15 = vpop.f32.mrb[101].mxu1  ;;  %v25346_v22 = vld [vmem:[%s44474_s20 + $0x5f0] sm:$0xff] }
 0x50a   : > { %vm21850_vm2 = vcmp.lt.s32.totalorder %v21376_v11, 363791  ;;  %v23772_v1 = vcombine.high %v23764_v0, %v23764_v0  ;;  %39124 = vmatprep.subr.mxu0 %v25816_v44  ;;  %v21375_v7 = vadd.s32 %v45337_v20, %v20899_v29  ;;  %v21378_v9 = vadd.s32 %v45337_v20, %v20902_v39  ;;  %v47234_v23 = vpop.f32.mrb[102].mxu0  ;;  %v47272_v15 = vld [vmem:[%s44474_s20 + $0x5f8] sm:$0xff] }
 0x50b   : > { %43188 = vmatprep.mubr.msk.f32.mxu1 %vm21848_vm0, %v23756_v3  ;;  %v23757_v47 = vcombine.high %v22047_v55, %v22047_v55  ;;  %v20901_v53 = vadd.s32 47360, %v45335_v18  ;;  %v25817_v42 = vcombine.high %v47225_v54, %v47225_v54  ;;  %v31771_v28 = vadd.f32 %v46958_v41, %v31701_v37  ;;  %v33312_v56 = vpop.f32.mrb[103].mxu0  ;;  %v47248_v55 = vld [vmem:[%s44474_s20 + $0x5e8] sm:$0xff] }
 0x50c   : > { %43189 = vmatmul.mubr.msk.f32.vlgmr.msra.gmra.mrb[182].mxu1 %vm21847_vm1, %v23754_v17  ;;  %43190 = vmatprep.mubr.msk.f32.mxu0 %vm21850_vm2, %v23772_v1  ;;  %vm21849_vm3 = vcmp.lt.s32.totalorder %v21375_v7, 363791  ;;  %vm21852_vm4 = vcmp.lt.s32.totalorder %v21378_v9, 363791  ;;  %v20904_v57 = vadd.s32 47744, %v45335_v18  ;;  %v23781_v26 = vrot.slane %v22048_v52, %v45349_v32  ;;  %v22049_v17 = vld [vmem:[%s44467_s4 + $0x2f0] sm:$0xff] }
 0x50d   : > { %39055 = vmatpush1.xpose.msra.mxu1 %v47199_v48  ;;  %43191 = vmatmul.mubr.msk.f32.vlgmr.msra.gmra.mrb[184].mxu0 %vm21849_vm3, %v23764_v0  ;;  %v23771_v62 = vrot.slane %v23757_v47, %v45349_v32  ;;  %v21377_v50 = vadd.s32 %v45337_v20, %v20901_v53  ;;  %v25818_v63 = vcombine.high %v25344_v19, %v25344_v19  ;;  %v20903_v41 = vadd.s32 47616, %v45335_v18  ;;  %v47250_v27 = vpop.f32.mrb[102].mxu1 }
 0x50e   : > { %39125 = vmatpush1.xpose.msra.mxu0 %v25342_v10  ;;  %39194 = vmatprep.subr.mxu1 %v25817_v42  ;;  %v21380_v16 = vadd.s32 %v45337_v20, %v20904_v57  ;;  %v23789_v61 = vcombine.high %v23781_v26, %v23781_v26  ;;  %v31841_v48 = vadd.f32 %v46979_v5, %v31771_v28  ;;  %v20906_v33 = vadd.s32 48000, %v45335_v18  ;;  %v33382_v30 = vpop.f32.mrb[103].mxu1  ;;  %v47255_v38 = vpop.f32.mrb[104].mxu0 }
 0x50f   : > { %v23773_v4 = vcombine.high %v23771_v62, %v23771_v62  ;;  %vm21851_vm5 = vcmp.lt.s32.totalorder %v21377_v50, 363791  ;;  %39264 = vmatprep.subr.mxu0 %v25818_v63  ;;  %v21379_v43 = vadd.s32 %v45337_v20, %v20903_v41  ;;  %v23774_v51 = vcombine.high %v22048_v52, %v22048_v52  ;;  %v33452_v10 = vpop.f32.mrb[105].mxu0 }
 0x510   : > { %vm21854_vm6 = vcmp.lt.s32.totalorder %v21380_v16, 363791  ;;  %v21382_v29 = vadd.s32 %v45337_v20, %v20906_v33  ;;  %v20905_v5 = vadd.s32 47872, %v45335_v18  ;;  %v25819_v11 = vcombine.high %v47248_v55, %v47248_v55 }
 0x511   : > { %43192 = vmatprep.mubr.msk.f32.mxu1 %vm21852_vm4, %v23773_v4  ;;  %43194 = vmatprep.mubr.msk.f32.mxu0 %vm21854_vm6, %v23789_v61  ;;  %vm21853_vm7 = vcmp.lt.s32.totalorder %v21379_v43, 363791  ;;  %v23788_v0 = vrot.slane %v23774_v51, %v45349_v32  ;;  %v31911_v44 = vadd.f32 %v46982_v31, %v31841_v48  ;;  %v20908_v39 = vadd.s32 48256, %v45335_v18  ;;  %v47302_v4 = vld [vmem:[%s44474_s20 + $0x608] sm:$0xff] }
 0x512   : > { %43193 = vmatmul.mubr.msk.f32.vlgmr.msra.gmra.mrb[184].mxu1 %vm21851_vm5, %v23771_v62  ;;  %43195 = vmatmul.mubr.msk.f32.vlgmr.msra.gmra.mrb[186].mxu0 %vm21853_vm7, %v23781_v26  ;;  %vm21856_vm8 = vcmp.lt.s32.totalorder %v21382_v29, 363791  ;;  %v21381_v3 = vadd.s32 %v45337_v20, %v20905_v5  ;;  %v23798_v37 = vrot.slane %v22049_v17, %v45349_v32  ;;  %v25820_v52 = vcombine.high %v25346_v22, %v25346_v22  ;;  %v47274_v1 = vpop.f32.mrb[104].mxu1  ;;  %v22050_v26 = vld [vmem:[%s44467_s4 + $0x2f8] sm:$0xff] }
 0x513   : > { %39195 = vmatpush1.xpose.msra.mxu1 %v47225_v54  ;;  %v23790_v31 = vcombine.high %v23788_v0, %v23788_v0  ;;  %39265 = vmatpush1.xpose.msra.mxu0 %v25344_v19  ;;  %v21384_v7 = vadd.s32 %v45337_v20, %v20908_v39  ;;  %v31981_v9 = vadd.f32 %v47005_v60, %v31911_v44  ;;  %v20907_v47 = vadd.s32 48128, %v45335_v18  ;;  %v33522_v53 = vpop.f32.mrb[105].mxu1  ;;  %v47280_v42 = vpop.f32.mrb[106].mxu0  ;;  %v47285_v54 = vld [vmem:[%s44474_s20 + $0x600] sm:$0xff] }
 0x514   : > { %vm21855_vm9 = vcmp.lt.s32.totalorder %v21381_v3, 363791  ;;  %39334 = vmatprep.subr.mxu1 %v25819_v11  ;;  %v23806_v28 = vcombine.high %v23798_v37, %v23798_v37  ;;  %39404 = vmatprep.subr.mxu0 %v25820_v52  ;;  %v20910_v56 = vadd.s32 48512, %v45335_v18  ;;  %v23791_v57 = vcombine.high %v22049_v17, %v22049_v17  ;;  %v33592_v19 = vpop.f32.mrb[107].mxu0  ;;  %v22051_v11 = vld [vmem:[%s44467_s4 + $0x300] sm:$0xff] }
 0x515   : > { %43196 = vmatprep.mubr.msk.f32.mxu1 %vm21856_vm8, %v23790_v31  ;;  %vm21858_vm10 = vcmp.lt.s32.totalorder %v21384_v7, 363791  ;;  %v21383_v60 = vadd.s32 %v45337_v20, %v20907_v47  ;;  %v20909_v62 = vadd.s32 48384, %v45335_v18  ;;  %v25821_v50 = vcombine.high %v47272_v15, %v47272_v15 }
 0x516   : > { %43197 = vmatmul.mubr.msk.f32.vlgmr.msra.gmra.mrb[186].mxu1 %vm21855_vm9, %v23788_v0  ;;  %43198 = vmatprep.mubr.msk.f32.mxu0 %vm21858_vm10, %v23806_v28  ;;  %v21386_v63 = vadd.s32 %v45337_v20, %v20910_v56  ;;  %v23805_v41 = vrot.slane %v23791_v57, %v45349_v32  ;;  %v32051_v16 = vadd.f32 %v47009_v59, %v31981_v9  ;;  %v20912_v61 = vadd.s32 48768, %v45335_v18  ;;  %v47312_v0 = vld [vmem:[%s44474_s20 + $0x610] sm:$0xff]  ;;  %v47334_v57 = vld [vmem:[%s44474_s20 + $0x618] sm:$0xff] }
 0x517   : > { %39335 = vmatpush1.xpose.msra.mxu1 %v47248_v55  ;;  %vm21857_vm11 = vcmp.lt.s32.totalorder %v21383_v60, 363791  ;;  %v21385_v48 = vadd.s32 %v45337_v20, %v20909_v62  ;;  %v23815_v33 = vrot.slane %v22050_v26, %v45349_v32  ;;  %v25822_v30 = vcombine.high %v47285_v54, %v47285_v54  ;;  %v47304_v43 = vpop.f32.mrb[106].mxu1 }
 0x518   : > { %43199 = vmatmul.mubr.msk.f32.vlgmr.msra.gmra.mrb[188].mxu0 %vm21857_vm11, %v23798_v37  ;;  %vm21860_vm12 = vcmp.lt.s32.totalorder %v21386_v63, 363791  ;;  %v23807_v59 = vcombine.high %v23805_v41, %v23805_v41  ;;  %39474 = vmatprep.subr.mxu1 %v25821_v50  ;;  %v21388_v55 = vadd.s32 %v45337_v20, %v20912_v61  ;;  %v32121_v51 = vadd.f32 %v47021_v36, %v32051_v16  ;;  %v33662_v17 = vpop.f32.mrb[107].mxu1  ;;  %v22052_v16 = vld [vmem:[%s44467_s4 + $0x308] sm:$0xff] }
 0x519   : > { %39405 = vmatpush1.xpose.msra.mxu0 %v25346_v22  ;;  %vm21859_vm13 = vcmp.lt.s32.totalorder %v21385_v48, 363791  ;;  %v23823_v10 = vcombine.high %v23815_v33, %v23815_v33  ;;  %v20911_v29 = vadd.s32 48640, %v45335_v18  ;;  %v20914_v5 = vadd.s32 49024, %v45335_v18  ;;  %v47314_v44 = vpop.f32.mrb[108].mxu0  ;;  %v25352_v61 = vld [vmem:[%s44474_s20 + $0x620] sm:$0xff] }
 0x51a   : > { %43200 = vmatprep.mubr.msk.f32.mxu1 %vm21860_vm12, %v23807_v59  ;;  %vm21862_vm14 = vcmp.lt.s32.totalorder %v21388_v55, 363791  ;;  %39544 = vmatprep.subr.mxu0 %v25822_v30  ;;  %v23808_v39 = vcombine.high %v22050_v26, %v22050_v26  ;;  %v20913_v3 = vadd.s32 48896, %v45335_v18  ;;  %v25823_v36 = vcombine.high %v47302_v4, %v47302_v4  ;;  %v33732_v22 = vpop.f32.mrb[109].mxu0 }
 0x51b   : > { %43201 = vmatmul.mubr.msk.f32.vlgmr.msra.gmra.mrb[188].mxu1 %vm21859_vm13, %v23805_v41  ;;  %43202 = vmatprep.mubr.msk.f32.mxu0 %vm21862_vm14, %v23823_v10  ;;  %v21387_v37 = vadd.s32 %v45337_v20, %v20911_v29  ;;  %v21390_v52 = vadd.s32 %v45337_v20, %v20914_v5  ;;  %v32191_v31 = vadd.f32 %v47033_v21, %v32121_v51  ;;  %v20916_v7 = vadd.s32 49280, %v45335_v18  ;;  %v22053_v22 = vld [vmem:[%s44467_s4 + $0x310] sm:$0xff] }
 0x51c   : > { %39475 = vmatpush1.xpose.msra.mxu1 %v47272_v15  ;;  %v23822_v9 = vrot.slane %v23808_v39, %v45349_v32  ;;  %v21389_v47 = vadd.s32 %v45337_v20, %v20913_v3  ;;  %v23832_v53 = vrot.slane %v22051_v11, %v45349_v32  ;;  %v25824_v28 = vcombine.high %v47312_v0, %v47312_v0  ;;  %v47329_v56 = vpop.f32.mrb[108].mxu1 }
 0x51d   : > { %vm21861_vm15 = vcmp.lt.s32.totalorder %v21387_v37, 363791  ;;  %vm21864_vm0 = vcmp.lt.s32.totalorder %v21390_v52, 363791  ;;  %39614 = vmatprep.subr.mxu1 %v25823_v36  ;;  %v21392_v21 = vadd.s32 %v45337_v20, %v20916_v7  ;;  %v32261_v15 = vadd.f32 %v47048_v49, %v32191_v31  ;;  %v33802_v26 = vpop.f32.mrb[109].mxu1  ;;  %v25354_v7 = vld [vmem:[%s44474_s20 + $0x630] sm:$0xff] }
 0x51e   : > { %43203 = vmatmul.mubr.msk.f32.vlgmr.msra.gmra.mrb[190].mxu0 %vm21861_vm15, %v23815_v33  ;;  %v23824_v19 = vcombine.high %v23822_v9, %v23822_v9  ;;  %vm21863_vm1 = vcmp.lt.s32.totalorder %v21389_v47, 363791  ;;  %v23840_v60 = vcombine.high %v23832_v53, %v23832_v53  ;;  %v20915_v62 = vadd.s32 49152, %v45335_v18 }
 0x51f   : > { %39545 = vmatpush1.xpose.msra.mxu0 %v47285_v54  ;;  %vm21866_vm2 = vcmp.lt.s32.totalorder %v21392_v21, 363791  ;;  %v20918_v50 = vadd.s32 49536, %v45335_v18  ;;  %v23825_v63 = vcombine.high %v22051_v11, %v22051_v11  ;;  %v20917_v41 = vadd.s32 49408, %v45335_v18  ;;  %v47342_v49 = vpop.f32.mrb[110].mxu0  ;;  %v47359_v11 = vld [vmem:[%s44474_s20 + $0x628] sm:$0xff] }
 0x520   : > { %43204 = vmatprep.mubr.msk.f32.mxu1 %vm21864_vm0, %v23824_v19  ;;  %43206 = vmatprep.mubr.msk.f32.mxu0 %vm21866_vm2, %v23840_v60  ;;  %v21391_v48 = vadd.s32 %v45337_v20, %v20915_v62  ;;  %v25825_v33 = vcombine.high %v47334_v57, %v47334_v57  ;;  %v32331_v54 = vadd.f32 %v47058_v34, %v32261_v15  ;;  %v20920_v30 = vadd.s32 49792, %v45335_v18  ;;  %v33872_v59 = vpop.f32.mrb[111].mxu0 }
 0x521   : > { %43205 = vmatmul.mubr.msk.f32.vlgmr.msra.gmra.mrb[190].mxu1 %vm21863_vm1, %v23822_v9  ;;  %39684 = vmatprep.subr.mxu0 %v25824_v28  ;;  %v21394_v55 = vadd.s32 %v45337_v20, %v20918_v50  ;;  %v23839_v51 = vrot.slane %v23825_v63, %v45349_v32  ;;  %v21393_v17 = vadd.s32 %v45337_v20, %v20917_v41  ;;  %v20919_v10 = vadd.s32 49664, %v45335_v18  ;;  %v47384_v50 = vld [vmem:[%s44474_s20 + $0x638] sm:$0xff] }
 0x522   : > { %39615 = vmatpush1.xpose.msra.mxu1 %v47302_v4  ;;  %vm21865_vm3 = vcmp.lt.s32.totalorder %v21391_v48, 363791  ;;  %v21396_v34 = vadd.s32 %v45337_v20, %v20920_v30  ;;  %v23849_v29 = vrot.slane %v22052_v16, %v45349_v32  ;;  %v25826_v5 = vcombine.high %v25352_v61, %v25352_v61  ;;  %v47361_v39 = vpop.f32.mrb[110].mxu1 }
 0x523   : > { %43207 = vmatmul.mubr.msk.f32.vlgmr.msra.gmra.mrb[192].mxu0 %vm21865_vm3, %v23832_v53  ;;  %vm21868_vm4 = vcmp.lt.s32.totalorder %v21394_v55, 363791  ;;  %v23841_v3 = vcombine.high %v23839_v51, %v23839_v51  ;;  %vm21867_vm5 = vcmp.lt.s32.totalorder %v21393_v17, 363791  ;;  %39754 = vmatprep.subr.mxu1 %v25825_v33  ;;  %v32401_v36 = vadd.f32 %v47078_v58, %v32331_v54  ;;  %v33942_v4 = vpop.f32.mrb[111].mxu1  ;;  %v22054_v55 = vld [vmem:[%s44467_s4 + $0x318] sm:$0xff] }
 0x524   : > { %39685 = vmatpush1.xpose.msra.mxu0 %v47312_v0  ;;  %vm21870_vm6 = vcmp.lt.s32.totalorder %v21396_v34, 363791  ;;  %v23857_v37 = vcombine.high %v23849_v29, %v23849_v29  ;;  %v21395_v52 = vadd.s32 %v45337_v20, %v20919_v10  ;;  %v20922_v31 = vadd.s32 50048, %v45335_v18  ;;  %v47369_v9 = vpop.f32.mrb[112].mxu0 }
 0x525   : > { %43208 = vmatprep.mubr.msk.f32.mxu1 %vm21868_vm4, %v23841_v3  ;;  %39824 = vmatprep.subr.mxu0 %v25826_v5  ;;  %v23842_v47 = vcombine.high %v22052_v16, %v22052_v16  ;;  %v20921_v53 = vadd.s32 49920, %v45335_v18  ;;  %v25827_v58 = vcombine.high %v47359_v11, %v47359_v11  ;;  %v32471_v0 = vadd.f32 %v47088_v2, %v32401_v36  ;;  %v34012_v28 = vpop.f32.mrb[113].mxu0 }
 0x526   : > { %43209 = vmatmul.mubr.msk.f32.vlgmr.msra.gmra.mrb[192].mxu1 %vm21867_vm5, %v23839_v51  ;;  %43210 = vmatprep.mubr.msk.f32.mxu0 %vm21870_vm6, %v23857_v37  ;;  %vm21869_vm7 = vcmp.lt.s32.totalorder %v21395_v52, 363791  ;;  %v21398_v21 = vadd.s32 %v45337_v20, %v20922_v31  ;;  %v20924_v15 = vadd.s32 50304, %v45335_v18  ;;  %v23866_v26 = vrot.slane %v22053_v22, %v45349_v32  ;;  %v47412_v31 = vld [vmem:[%s44474_s20 + $0x648] sm:$0xff] }
 0x527   : > { %39755 = vmatpush1.xpose.msra.mxu1 %v47334_v57  ;;  %43211 = vmatmul.mubr.msk.f32.vlgmr.msra.gmra.mrb[194].mxu0 %vm21869_vm7, %v23849_v29  ;;  %v23856_v19 = vrot.slane %v23842_v47, %v45349_v32  ;;  %v21397_v60 = vadd.s32 %v45337_v20, %v20921_v53  ;;  %v25828_v62 = vcombine.high %v25354_v7, %v25354_v7  ;;  %v20923_v2 = vadd.s32 50176, %v45335_v18  ;;  %v47386_v63 = vpop.f32.mrb[112].mxu1 }
 0x528   : > { %vm21872_vm8 = vcmp.lt.s32.totalorder %v21398_v21, 363791  ;;  %39825 = vmatpush1.xpose.msra.mxu0 %v25352_v61  ;;  %39894 = vmatprep.subr.mxu1 %v25827_v58  ;;  %v21400_v41 = vadd.s32 %v45337_v20, %v20924_v15  ;;  %v23874_v57 = vcombine.high %v23866_v26, %v23866_v26  ;;  %v32541_v16 = vadd.f32 %v47106_v46, %v32471_v0  ;;  %v34082_v48 = vpop.f32.mrb[113].mxu1  ;;  %v47390_v33 = vpop.f32.mrb[114].mxu0  ;;  %v25356_v46 = vld [vmem:[%s44474_s20 + $0x640] sm:$0xff] }
 0x529   : > { %v23858_v54 = vcombine.high %v23856_v19, %v23856_v19  ;;  %vm21871_vm9 = vcmp.lt.s32.totalorder %v21397_v60, 363791  ;;  %39964 = vmatprep.subr.mxu0 %v25828_v62  ;;  %v21399_v30 = vadd.s32 %v45337_v20, %v20923_v2  ;;  %v20926_v59 = vadd.s32 50560, %v45335_v18  ;;  %v34152_v51 = vpop.f32.mrb[115].mxu0 }
 0x52a   : > { %vm21874_vm10 = vcmp.lt.s32.totalorder %v21400_v41, 363791  ;;  %v23859_v61 = vcombine.high %v22053_v22, %v22053_v22  ;;  %v20925_v17 = vadd.s32 50432, %v45335_v18  ;;  %v25829_v10 = vcombine.high %v47384_v50, %v47384_v50 }
 0x52b   : > { %43212 = vmatprep.mubr.msk.f32.mxu1 %vm21872_vm8, %v23858_v54  ;;  %43214 = vmatprep.mubr.msk.f32.mxu0 %vm21874_vm10, %v23874_v57  ;;  %vm21873_vm11 = vcmp.lt.s32.totalorder %v21399_v30, 363791  ;;  %v21402_v34 = vadd.s32 %v45337_v20, %v20926_v59  ;;  %v32611_v29 = vadd.f32 %v47114_v12, %v32541_v16  ;;  %v20928_v5 = vadd.s32 50816, %v45335_v18 }
 0x52c   : > { %43213 = vmatmul.mubr.msk.f32.vlgmr.msra.gmra.mrb[194].mxu1 %vm21871_vm9, %v23856_v19  ;;  %43215 = vmatmul.mubr.msk.f32.vlgmr.msra.gmra.mrb[196].mxu0 %vm21873_vm11, %v23866_v26  ;;  %v23873_v3 = vrot.slane %v23859_v61, %v45349_v32  ;;  %v21401_v36 = vadd.s32 %v45337_v20, %v20925_v17  ;;  %v23883_v22 = vrot.slane %v22054_v55, %v45349_v32  ;;  %v20927_v4 = vadd.s32 50688, %v45335_v18  ;;  %v22055_v26 = vld [vmem:[%s44467_s4 + $0x320] sm:$0xff]  ;;  %v25358_v19 = vld [vmem:[%s44474_s20 + $0x650] sm:$0xff] }
 0x52d   : > { %39895 = vmatpush1.xpose.msra.mxu1 %v47359_v11  ;;  %vm21876_vm12 = vcmp.lt.s32.totalorder %v21402_v34, 363791  ;;  %39965 = vmatpush1.xpose.msra.mxu0 %v25354_v7  ;;  %v21404_v37 = vadd.s32 %v45337_v20, %v20928_v5  ;;  %v25830_v12 = vcombine.high %v25356_v46, %v25356_v46  ;;  %v32681_v52 = vadd.f32 %v47127_v6, %v32611_v29  ;;  %v47414_v47 = vpop.f32.mrb[114].mxu1  ;;  %v47416_v53 = vpop.f32.mrb[116].mxu0 }
 0x52e   : > { %v23875_v58 = vcombine.high %v23873_v3, %v23873_v3  ;;  %vm21875_vm13 = vcmp.lt.s32.totalorder %v21401_v36, 363791  ;;  %40034 = vmatprep.subr.mxu1 %v25829_v10  ;;  %v23891_v0 = vcombine.high %v23883_v22, %v23883_v22  ;;  %v21403_v11 = vadd.s32 %v45337_v20, %v20927_v4  ;;  %v34222_v7 = vpop.f32.mrb[115].mxu1  ;;  %v34292_v28 = vpop.f32.mrb[117].mxu0  ;;  %v22056_v10 = vld [vmem:[%s44467_s4 + $0x328] sm:$0xff] }
 0x52f   : > { %vm21878_vm14 = vcmp.lt.s32.totalorder %v21404_v37, 363791  ;;  %40104 = vmatprep.subr.mxu0 %v25830_v12  ;;  %v20930_v6 = vadd.s32 51072, %v45335_v18  ;;  %v23876_v21 = vcombine.high %v22054_v55, %v22054_v55  ;;  %v20929_v15 = vadd.s32 50944, %v45335_v18  ;;  %v47438_v55 = vld [vmem:[%s44474_s20 + $0x658] sm:$0xff]  ;;  %v25360_v36 = vld [vmem:[%s44474_s20 + $0x660] sm:$0xff] }
 0x530   : > { %43216 = vmatprep.mubr.msk.f32.mxu1 %vm21876_vm12, %v23875_v58  ;;  %43218 = vmatprep.mubr.msk.f32.mxu0 %vm21878_vm14, %v23891_v0  ;;  %vm21877_vm15 = vcmp.lt.s32.totalorder %v21403_v11, 363791  ;;  %v25831_v60 = vcombine.high %v47412_v31, %v47412_v31  ;;  %v32751_v62 = vadd.f32 %v47140_v24, %v32681_v52  ;;  %v20932_v2 = vadd.s32 51328, %v45335_v18 }
 0x531   : > { %43217 = vmatmul.mubr.msk.f32.vlgmr.msra.gmra.mrb[196].mxu1 %vm21875_vm13, %v23873_v3  ;;  %43219 = vmatmul.mubr.msk.f32.vlgmr.msra.gmra.mrb[198].mxu0 %vm21877_vm15, %v23883_v22  ;;  %v21406_v41 = vadd.s32 %v45337_v20, %v20930_v6  ;;  %v23890_v57 = vrot.slane %v23876_v21, %v45349_v32  ;;  %v21405_v16 = vadd.s32 %v45337_v20, %v20929_v15  ;;  %v20931_v48 = vadd.s32 51200, %v45335_v18 }
 0x532   : > { %40035 = vmatpush1.xpose.msra.mxu1 %v47384_v50  ;;  %40105 = vmatpush1.xpose.msra.mxu0 %v25356_v46  ;;  %v21408_v54 = vadd.s32 %v45337_v20, %v20932_v2  ;;  %v23900_v24 = vrot.slane %v22055_v26, %v45349_v32  ;;  %v25832_v30 = vcombine.high %v25358_v19, %v25358_v19  ;;  %v20934_v59 = vadd.s32 51584, %v45335_v18  ;;  %v47440_v51 = vpop.f32.mrb[116].mxu1  ;;  %v47442_v61 = vpop.f32.mrb[118].mxu0 }
 0x533   : > { %vm21880_vm0 = vcmp.lt.s32.totalorder %v21406_v41, 363791  ;;  %v23892_v17 = vcombine.high %v23890_v57, %v23890_v57  ;;  %vm21879_vm1 = vcmp.lt.s32.totalorder %v21405_v16, 363791  ;;  %40174 = vmatprep.subr.mxu1 %v25831_v60  ;;  %v32821_v50 = vadd.f32 %v47154_v8, %v32751_v62  ;;  %v34362_v46 = vpop.f32.mrb[117].mxu1  ;;  %v34432_v34 = vpop.f32.mrb[119].mxu0  ;;  %v25362_v16 = vld [vmem:[%s44474_s20 + $0x670] sm:$0xff] }
 0x534   : > { %vm21882_vm2 = vcmp.lt.s32.totalorder %v21408_v54, 363791  ;;  %v23908_v29 = vcombine.high %v23900_v24, %v23900_v24  ;;  %40244 = vmatprep.subr.mxu0 %v25832_v30  ;;  %v21407_v5 = vadd.s32 %v45337_v20, %v20931_v48  ;;  %v21410_v3 = vadd.s32 %v45337_v20, %v20934_v59  ;;  %v47485_v46 = vld [vmem:[%s44474_s20 + $0x678] sm:$0xff] }
 0x535   : > { %43220 = vmatprep.mubr.msk.f32.mxu1 %vm21880_vm0, %v23892_v17  ;;  %v23893_v22 = vcombine.high %v22055_v26, %v22055_v26  ;;  %v20933_v4 = vadd.s32 51456, %v45335_v18  ;;  %v25833_v37 = vcombine.high %v47438_v55, %v47438_v55  ;;  %v32891_v8 = vadd.f32 %v47160_v35, %v32821_v50  ;;  %v47461_v35 = vld [vmem:[%s44474_s20 + $0x668] sm:$0xff] }
 0x536   : > { %43221 = vmatmul.mubr.msk.f32.vlgmr.msra.gmra.mrb[198].mxu1 %vm21879_vm1, %v23890_v57  ;;  %43222 = vmatprep.mubr.msk.f32.mxu0 %vm21882_vm2, %v23908_v29  ;;  %vm21881_vm3 = vcmp.lt.s32.totalorder %v21407_v5, 363791  ;;  %vm21884_vm4 = vcmp.lt.s32.totalorder %v21410_v3, 363791  ;;  %v20936_v12 = vadd.s32 51840, %v45335_v18  ;;  %v23917_v52 = vrot.slane %v22056_v10, %v45349_v32  ;;  %v22057_v57 = vld [vmem:[%s44467_s4 + $0x330] sm:$0xff] }
 0x537   : > { %40175 = vmatpush1.xpose.msra.mxu1 %v47412_v31  ;;  %43223 = vmatmul.mubr.msk.f32.vlgmr.msra.gmra.mrb[200].mxu0 %vm21881_vm3, %v23900_v24  ;;  %v23907_v58 = vrot.slane %v23893_v22, %v45349_v32  ;;  %v21409_v0 = vadd.s32 %v45337_v20, %v20933_v4  ;;  %v25834_v11 = vcombine.high %v25360_v36, %v25360_v36  ;;  %v20935_v7 = vadd.s32 51712, %v45335_v18  ;;  %v47463_v28 = vpop.f32.mrb[118].mxu1 }
 0x538   : > { %40245 = vmatpush1.xpose.msra.mxu0 %v25358_v19  ;;  %40314 = vmatprep.subr.mxu1 %v25833_v37  ;;  %v21412_v6 = vadd.s32 %v45337_v20, %v20936_v12  ;;  %v23925_v21 = vcombine.high %v23917_v52, %v23917_v52  ;;  %v32961_v31 = vadd.f32 %v47178_v40, %v32891_v8  ;;  %v20938_v15 = vadd.s32 52096, %v45335_v18  ;;  %v34502_v26 = vpop.f32.mrb[119].mxu1  ;;  %v47468_v60 = vpop.f32.mrb[120].mxu0  ;;  %v47498_v12 = vld [vmem:[%s44474_s20 + $0x680] sm:$0xff] }
 0x539   : > { %v23909_v62 = vcombine.high %v23907_v58, %v23907_v58  ;;  %vm21883_vm5 = vcmp.lt.s32.totalorder %v21409_v0, 363791  ;;  %40384 = vmatprep.subr.mxu0 %v25834_v11  ;;  %v21411_v2 = vadd.s32 %v45337_v20, %v20935_v7  ;;  %v23910_v41 = vcombine.high %v22056_v10, %v22056_v10  ;;  %v34572_v19 = vpop.f32.mrb[121].mxu0 }
 0x53a   : > { %vm21886_vm6 = vcmp.lt.s32.totalorder %v21412_v6, 363791  ;;  %v21414_v48 = vadd.s32 %v45337_v20, %v20938_v15  ;;  %v20937_v40 = vadd.s32 51968, %v45335_v18  ;;  %v25835_v54 = vcombine.high %v47461_v35, %v47461_v35 }
 0x53b   : > { %43224 = vmatprep.mubr.msk.f32.mxu1 %vm21884_vm4, %v23909_v62  ;;  %43226 = vmatprep.mubr.msk.f32.mxu0 %vm21886_vm6, %v23925_v21  ;;  %vm21885_vm7 = vcmp.lt.s32.totalorder %v21411_v2, 363791  ;;  %v23924_v24 = vrot.slane %v23910_v41, %v45349_v32  ;;  %v33031_v30 = vadd.f32 %v47184_v14, %v32961_v31  ;;  %v20940_v59 = vadd.s32 52352, %v45335_v18  ;;  %v47515_v62 = vld [vmem:[%s44474_s20 + $0x688] sm:$0xff] }
 0x53c   : > { %43225 = vmatmul.mubr.msk.f32.vlgmr.msra.gmra.mrb[200].mxu1 %vm21883_vm5, %v23907_v58  ;;  %43227 = vmatmul.mubr.msk.f32.vlgmr.msra.gmra.mrb[202].mxu0 %vm21885_vm7, %v23917_v52  ;;  %vm21888_vm8 = vcmp.lt.s32.totalorder %v21414_v48, 363791  ;;  %v21413_v17 = vadd.s32 %v45337_v20, %v20937_v40  ;;  %v23934_v50 = vrot.slane %v22057_v57, %v45349_v32  ;;  %v25836_v10 = vcombine.high %v25362_v16, %v25362_v16 }
 0x53d   : > { %40315 = vmatpush1.xpose.msra.mxu1 %v47438_v55  ;;  %v23926_v34 = vcombine.high %v23924_v24, %v23924_v24  ;;  %40385 = vmatpush1.xpose.msra.mxu0 %v25360_v36  ;;  %v21416_v14 = vadd.s32 %v45337_v20, %v20940_v59  ;;  %v33101_v29 = vadd.f32 %v47203_v13, %v33031_v30  ;;  %v20939_v5 = vadd.s32 52224, %v45335_v18  ;;  %v47491_v3 = vpop.f32.mrb[120].mxu1  ;;  %v47493_v22 = vpop.f32.mrb[122].mxu0  ;;  %v22058_v55 = vld [vmem:[%s44467_s4 + $0x338] sm:$0xff] }
 0x53e   : > { %vm21887_vm9 = vcmp.lt.s32.totalorder %v21413_v17, 363791  ;;  %40454 = vmatprep.subr.mxu1 %v25835_v54  ;;  %v23942_v4 = vcombine.high %v23934_v50, %v23934_v50  ;;  %40524 = vmatprep.subr.mxu0 %v25836_v10  ;;  %v20942_v37 = vadd.s32 52608, %v45335_v18  ;;  %v23927_v8 = vcombine.high %v22057_v57, %v22057_v57  ;;  %v34642_v36 = vpop.f32.mrb[121].mxu1  ;;  %v34712_v52 = vpop.f32.mrb[123].mxu0  ;;  %v22059_v54 = vld [vmem:[%s44467_s4 + $0x340] sm:$0xff] }
 0x53f   : > { %43228 = vmatprep.mubr.msk.f32.mxu1 %vm21888_vm8, %v23926_v34  ;;  %vm21890_vm10 = vcmp.lt.s32.totalorder %v21416_v14, 363791  ;;  %v21415_v13 = vadd.s32 %v45337_v20, %v20939_v5  ;;  %v20941_v58 = vadd.s32 52480, %v45335_v18  ;;  %v25837_v0 = vcombine.high %v47485_v46, %v47485_v46 }
 0x540   : > { %43229 = vmatmul.mubr.msk.f32.vlgmr.msra.gmra.mrb[202].mxu1 %vm21887_vm9, %v23924_v24  ;;  %43230 = vmatprep.mubr.msk.f32.mxu0 %vm21890_vm10, %v23942_v4  ;;  %v21418_v11 = vadd.s32 %v45337_v20, %v20942_v37  ;;  %v23941_v7 = vrot.slane %v23927_v8, %v45349_v32  ;;  %v33171_v6 = vadd.f32 %v47208_v25, %v33101_v29  ;;  %v20944_v21 = vadd.s32 52864, %v45335_v18  ;;  %v47525_v24 = vld [vmem:[%s44474_s20 + $0x690] sm:$0xff] }
 0x541   : > { %40455 = vmatpush1.xpose.msra.mxu1 %v47461_v35  ;;  %vm21889_vm11 = vcmp.lt.s32.totalorder %v21415_v13, 363791  ;;  %v21417_v31 = vadd.s32 %v45337_v20, %v20941_v58  ;;  %v23951_v15 = vrot.slane %v22058_v55, %v45349_v32  ;;  %v25838_v26 = vcombine.high %v47498_v12, %v47498_v12  ;;  %v47517_v2 = vpop.f32.mrb[122].mxu1 }
 0x542   : > { %43231 = vmatmul.mubr.msk.f32.vlgmr.msra.gmra.mrb[204].mxu0 %vm21889_vm11, %v23934_v50  ;;  %vm21892_vm12 = vcmp.lt.s32.totalorder %v21418_v11, 363791  ;;  %v23943_v25 = vcombine.high %v23941_v7, %v23941_v7  ;;  %40594 = vmatprep.subr.mxu1 %v25837_v0  ;;  %v21420_v35 = vadd.s32 %v45337_v20, %v20944_v21  ;;  %v33241_v41 = vadd.f32 %v47227_v45, %v33171_v6  ;;  %v34782_v57 = vpop.f32.mrb[123].mxu1  ;;  %v22060_v6 = vld [vmem:[%s44467_s4 + $0x348] sm:$0xff] }
 0x543   : > { %40525 = vmatpush1.xpose.msra.mxu0 %v25362_v16  ;;  %vm21891_vm13 = vcmp.lt.s32.totalorder %v21417_v31, 363791  ;;  %v23959_v19 = vcombine.high %v23951_v15, %v23951_v15  ;;  %v20943_v48 = vadd.s32 52736, %v45335_v18  ;;  %v20946_v40 = vadd.s32 53120, %v45335_v18  ;;  %v47527_v30 = vpop.f32.mrb[124].mxu0  ;;  %v25368_v21 = vld [vmem:[%s44474_s20 + $0x6a0] sm:$0xff] }
 0x544   : > { %43232 = vmatprep.mubr.msk.f32.mxu1 %vm21892_vm12, %v23943_v25  ;;  %vm21894_vm14 = vcmp.lt.s32.totalorder %v21420_v35, 363791  ;;  %40664 = vmatprep.subr.mxu0 %v25838_v26  ;;  %v23944_v59 = vcombine.high %v22058_v55, %v22058_v55  ;;  %v20945_v17 = vadd.s32 52992, %v45335_v18  ;;  %v25839_v45 = vcombine.high %v47515_v62, %v47515_v62  ;;  %v34852_v16 = vpop.f32.mrb[125].mxu0  ;;  %v47547_v55 = vld [vmem:[%s44474_s20 + $0x698] sm:$0xff] }
 0x545   : > { %43233 = vmatmul.mubr.msk.f32.vlgmr.msra.gmra.mrb[204].mxu1 %vm21891_vm13, %v23941_v7  ;;  %43234 = vmatprep.mubr.msk.f32.mxu0 %vm21894_vm14, %v23959_v19  ;;  %v21419_v50 = vadd.s32 %v45337_v20, %v20943_v48  ;;  %v21422_v10 = vadd.s32 %v45337_v20, %v20946_v40  ;;  %v33311_v34 = vadd.f32 %v47234_v23, %v33241_v41  ;;  %v20948_v14 = vadd.s32 53376, %v45335_v18  ;;  %v22061_v16 = vld [vmem:[%s44467_s4 + $0x350] sm:$0xff] }
 0x546   : > { %40595 = vmatpush1.xpose.msra.mxu1 %v47485_v46  ;;  %v23958_v29 = vrot.slane %v23944_v59, %v45349_v32  ;;  %v21421_v5 = vadd.s32 %v45337_v20, %v20945_v17  ;;  %v23968_v4 = vrot.slane %v22059_v54, %v45349_v32  ;;  %v25840_v37 = vcombine.high %v47525_v24, %v47525_v24  ;;  %v47542_v8 = vpop.f32.mrb[124].mxu1 }
 0x547   : > { %vm21893_vm15 = vcmp.lt.s32.totalorder %v21419_v50, 363791  ;;  %vm21896_vm0 = vcmp.lt.s32.totalorder %v21422_v10, 363791  ;;  %40734 = vmatprep.subr.mxu1 %v25839_v45  ;;  %v21424_v23 = vadd.s32 %v45337_v20, %v20948_v14  ;;  %v33381_v46 = vadd.f32 %v47250_v27, %v33311_v34  ;;  %v34922_v36 = vpop.f32.mrb[125].mxu1  ;;  %v25370_v14 = vld [vmem:[%s44474_s20 + $0x6b0] sm:$0xff] }
 0x548   : > { %43235 = vmatmul.mubr.msk.f32.vlgmr.msra.gmra.mrb[206].mxu0 %vm21893_vm15, %v23951_v15  ;;  %v23960_v52 = vcombine.high %v23958_v29, %v23958_v29  ;;  %vm21895_vm1 = vcmp.lt.s32.totalorder %v21421_v5, 363791  ;;  %v23976_v13 = vcombine.high %v23968_v4, %v23968_v4  ;;  %v20947_v58 = vadd.s32 53248, %v45335_v18 }
 0x549   : > { %40665 = vmatpush1.xpose.msra.mxu0 %v47498_v12  ;;  %vm21898_vm2 = vcmp.lt.s32.totalorder %v21424_v23, 363791  ;;  %v20950_v0 = vadd.s32 53632, %v45335_v18  ;;  %v23961_v11 = vcombine.high %v22059_v54, %v22059_v54  ;;  %v20949_v7 = vadd.s32 53504, %v45335_v18  ;;  %v47555_v27 = vpop.f32.mrb[126].mxu0  ;;  %v47572_v54 = vld [vmem:[%s44474_s20 + $0x6a8] sm:$0xff] }
 0x54a   : > { %43236 = vmatprep.mubr.msk.f32.mxu1 %vm21896_vm0, %v23960_v52  ;;  %43238 = vmatprep.mubr.msk.f32.mxu0 %vm21898_vm2, %v23976_v13  ;;  %v21423_v31 = vadd.s32 %v45337_v20, %v20947_v58  ;;  %v25841_v15 = vcombine.high %v47547_v55, %v47547_v55  ;;  %v33451_v12 = vadd.f32 %v47255_v38, %v33381_v46  ;;  %v20952_v26 = vadd.s32 53888, %v45335_v18  ;;  %v34992_v25 = vpop.f32.mrb[127].mxu0 }
 0x54b   : > { %43237 = vmatmul.mubr.msk.f32.vlgmr.msra.gmra.mrb[206].mxu1 %vm21895_vm1, %v23958_v29  ;;  %40804 = vmatprep.subr.mxu0 %v25840_v37  ;;  %v21426_v35 = vadd.s32 %v45337_v20, %v20950_v0  ;;  %v23975_v41 = vrot.slane %v23961_v11, %v45349_v32  ;;  %v21425_v57 = vadd.s32 %v45337_v20, %v20949_v7  ;;  %v20951_v19 = vadd.s32 53760, %v45335_v18  ;;  %v47597_v0 = vld [vmem:[%s44474_s20 + $0x6b8] sm:$0xff] }
 0x54c   : > { %40735 = vmatpush1.xpose.msra.mxu1 %v47515_v62  ;;  %vm21897_vm3 = vcmp.lt.s32.totalorder %v21423_v31, 363791  ;;  %v21428_v38 = vadd.s32 %v45337_v20, %v20952_v26  ;;  %v23985_v48 = vrot.slane %v22060_v6, %v45349_v32  ;;  %v25842_v40 = vcombine.high %v25368_v21, %v25368_v21  ;;  %v47574_v59 = vpop.f32.mrb[126].mxu1 }
 0x54d   : > { %43239 = vmatmul.mubr.msk.f32.vlgmr.msra.gmra.mrb[208].mxu0 %vm21897_vm3, %v23968_v4  ;;  %vm21900_vm4 = vcmp.lt.s32.totalorder %v21426_v35, 363791  ;;  %v23977_v17 = vcombine.high %v23975_v41, %v23975_v41  ;;  %vm21899_vm5 = vcmp.lt.s32.totalorder %v21425_v57, 363791  ;;  %40874 = vmatprep.subr.mxu1 %v25841_v15  ;;  %v33521_v45 = vadd.f32 %v47274_v1, %v33451_v12  ;;  %v35062_v62 = vpop.f32.mrb[127].mxu1  ;;  %v22062_v35 = vld [vmem:[%s44467_s4 + $0x358] sm:$0xff] }
 0x54e   : > { %40805 = vmatpush1.xpose.msra.mxu0 %v47525_v24  ;;  %vm21902_vm6 = vcmp.lt.s32.totalorder %v21428_v38, 363791  ;;  %v23993_v50 = vcombine.high %v23985_v48, %v23985_v48  ;;  %v21427_v10 = vadd.s32 %v45337_v20, %v20951_v19  ;;  %v20954_v34 = vadd.s32 54144, %v45335_v18  ;;  %v47582_v29 = vpop.f32.mrb[128].mxu0 }
 0x54f   : > { %43240 = vmatprep.mubr.msk.f32.mxu1 %vm21900_vm4, %v23977_v17  ;;  %40944 = vmatprep.subr.mxu0 %v25842_v40  ;;  %v23978_v5 = vcombine.high %v22060_v6, %v22060_v6  ;;  %v20953_v4 = vadd.s32 54016, %v45335_v18  ;;  %v25843_v1 = vcombine.high %v47572_v54, %v47572_v54  ;;  %v33591_v24 = vadd.f32 %v47280_v42, %v33521_v45  ;;  %v35132_v37 = vpop.f32.mrb[129].mxu0 }
 0x550   : > { %43241 = vmatmul.mubr.msk.f32.vlgmr.msra.gmra.mrb[208].mxu1 %vm21899_vm5, %v23975_v41  ;;  %43242 = vmatprep.mubr.msk.f32.mxu0 %vm21902_vm6, %v23993_v50  ;;  %vm21901_vm7 = vcmp.lt.s32.totalorder %v21427_v10, 363791  ;;  %v21430_v23 = vadd.s32 %v45337_v20, %v20954_v34  ;;  %v20956_v46 = vadd.s32 54400, %v45335_v18  ;;  %v24002_v36 = vrot.slane %v22061_v16, %v45349_v32  ;;  %v47625_v34 = vld [vmem:[%s44474_s20 + $0x6c8] sm:$0xff] }
 0x551   : > { %40875 = vmatpush1.xpose.msra.mxu1 %v47547_v55  ;;  %43243 = vmatmul.mubr.msk.f32.vlgmr.msra.gmra.mrb[210].mxu0 %vm21901_vm7, %v23985_v48  ;;  %v23992_v52 = vrot.slane %v23978_v5, %v45349_v32  ;;  %v21429_v13 = vadd.s32 %v45337_v20, %v20953_v4  ;;  %v25844_v58 = vcombine.high %v25370_v14, %v25370_v14  ;;  %v20955_v42 = vadd.s32 54272, %v45335_v18  ;;  %v47599_v11 = vpop.f32.mrb[128].mxu1 }
 0x552   : > { %vm21904_vm8 = vcmp.lt.s32.totalorder %v21430_v23, 363791  ;;  %40945 = vmatpush1.xpose.msra.mxu0 %v25368_v21  ;;  %41014 = vmatprep.subr.mxu1 %v25843_v1  ;;  %v21432_v7 = vadd.s32 %v45337_v20, %v20956_v46  ;;  %v24010_v55 = vcombine.high %v24002_v36, %v24002_v36  ;;  %v33661_v6 = vadd.f32 %v47304_v43, %v33591_v24  ;;  %v35202_v31 = vpop.f32.mrb[129].mxu1  ;;  %v47603_v15 = vpop.f32.mrb[130].mxu0  ;;  %v25372_v43 = vld [vmem:[%s44474_s20 + $0x6c0] sm:$0xff] }
 0x553   : > { %v23994_v12 = vcombine.high %v23992_v52, %v23992_v52  ;;  %vm21903_vm9 = vcmp.lt.s32.totalorder %v21429_v13, 363791  ;;  %41084 = vmatprep.subr.mxu0 %v25844_v58  ;;  %v21431_v26 = vadd.s32 %v45337_v20, %v20955_v42  ;;  %v20958_v25 = vadd.s32 54656, %v45335_v18  ;;  %v35272_v41 = vpop.f32.mrb[131].mxu0 }
 0x554   : > { %vm21906_vm10 = vcmp.lt.s32.totalorder %v21432_v7, 363791  ;;  %v23995_v21 = vcombine.high %v22061_v16, %v22061_v16  ;;  %v20957_v57 = vadd.s32 54528, %v45335_v18  ;;  %v25845_v19 = vcombine.high %v47597_v0, %v47597_v0 }
 0x555   : > { %43244 = vmatprep.mubr.msk.f32.mxu1 %vm21904_vm8, %v23994_v12  ;;  %43246 = vmatprep.mubr.msk.f32.mxu0 %vm21906_vm10, %v24010_v55  ;;  %vm21905_vm11 = vcmp.lt.s32.totalorder %v21431_v26, 363791  ;;  %v21434_v38 = vadd.s32 %v45337_v20, %v20958_v25  ;;  %v33731_v48 = vadd.f32 %v47314_v44, %v33661_v6  ;;  %v20960_v40 = vadd.s32 54912, %v45335_v18 }
 0x556   : > { %43245 = vmatmul.mubr.msk.f32.vlgmr.msra.gmra.mrb[210].mxu1 %vm21903_vm9, %v23992_v52  ;;  %43247 = vmatmul.mubr.msk.f32.vlgmr.msra.gmra.mrb[212].mxu0 %vm21905_vm11, %v24002_v36  ;;  %v24009_v17 = vrot.slane %v23995_v21, %v45349_v32  ;;  %v21433_v45 = vadd.s32 %v45337_v20, %v20957_v57  ;;  %v24019_v16 = vrot.slane %v22062_v35, %v45349_v32  ;;  %v20959_v62 = vadd.s32 54784, %v45335_v18  ;;  %v22063_v36 = vld [vmem:[%s44467_s4 + $0x360] sm:$0xff]  ;;  %v25374_v52 = vld [vmem:[%s44474_s20 + $0x6d0] sm:$0xff] }
 0x557   : > { %41015 = vmatpush1.xpose.msra.mxu1 %v47572_v54  ;;  %vm21908_vm12 = vcmp.lt.s32.totalorder %v21434_v38, 363791  ;;  %41085 = vmatpush1.xpose.msra.mxu0 %v25370_v14  ;;  %v21436_v50 = vadd.s32 %v45337_v20, %v20960_v40  ;;  %v25846_v44 = vcombine.high %v25372_v43, %v25372_v43  ;;  %v33801_v10 = vadd.f32 %v47329_v56, %v33731_v48  ;;  %v47627_v5 = vpop.f32.mrb[130].mxu1  ;;  %v47629_v4 = vpop.f32.mrb[132].mxu0 }
 0x558   : > { %v24011_v1 = vcombine.high %v24009_v17, %v24009_v17  ;;  %vm21907_vm13 = vcmp.lt.s32.totalorder %v21433_v45, 363791  ;;  %41154 = vmatprep.subr.mxu1 %v25845_v19  ;;  %v24027_v24 = vcombine.high %v24019_v16, %v24019_v16  ;;  %v21435_v54 = vadd.s32 %v45337_v20, %v20959_v62  ;;  %v35342_v14 = vpop.f32.mrb[131].mxu1  ;;  %v35412_v37 = vpop.f32.mrb[133].mxu0  ;;  %v22064_v19 = vld [vmem:[%s44467_s4 + $0x368] sm:$0xff] }
 0x559   : > { %vm21910_vm14 = vcmp.lt.s32.totalorder %v21436_v50, 363791  ;;  %41224 = vmatprep.subr.mxu0 %v25846_v44  ;;  %v20962_v56 = vadd.s32 55168, %v45335_v18  ;;  %v24012_v23 = vcombine.high %v22062_v35, %v22062_v35  ;;  %v20961_v46 = vadd.s32 55040, %v45335_v18  ;;  %v47651_v35 = vld [vmem:[%s44474_s20 + $0x6d8] sm:$0xff]  ;;  %v25376_v45 = vld [vmem:[%s44474_s20 + $0x6e0] sm:$0xff] }
 0x55a   : > { %43248 = vmatprep.mubr.msk.f32.mxu1 %vm21908_vm12, %v24011_v1  ;;  %43250 = vmatprep.mubr.msk.f32.mxu0 %vm21910_vm14, %v24027_v24  ;;  %vm21909_vm15 = vcmp.lt.s32.totalorder %v21435_v54, 363791  ;;  %v25847_v13 = vcombine.high %v47625_v34, %v47625_v34  ;;  %v33871_v58 = vadd.f32 %v47342_v49, %v33801_v10  ;;  %v20964_v42 = vadd.s32 55424, %v45335_v18 }
 0x55b   : > { %43249 = vmatmul.mubr.msk.f32.vlgmr.msra.gmra.mrb[212].mxu1 %vm21907_vm13, %v24009_v17  ;;  %43251 = vmatmul.mubr.msk.f32.vlgmr.msra.gmra.mrb[214].mxu0 %vm21909_vm15, %v24019_v16  ;;  %v21438_v7 = vadd.s32 %v45337_v20, %v20962_v56  ;;  %v24026_v55 = vrot.slane %v24012_v23, %v45349_v32  ;;  %v21437_v6 = vadd.s32 %v45337_v20, %v20961_v46  ;;  %v20963_v31 = vadd.s32 55296, %v45335_v18 }
 0x55c   : > { %41155 = vmatpush1.xpose.msra.mxu1 %v47597_v0  ;;  %41225 = vmatpush1.xpose.msra.mxu0 %v25372_v43  ;;  %v21440_v12 = vadd.s32 %v45337_v20, %v20964_v42  ;;  %v24036_v49 = vrot.slane %v22063_v36, %v45349_v32  ;;  %v25848_v26 = vcombine.high %v25374_v52, %v25374_v52  ;;  %v20966_v25 = vadd.s32 55680, %v45335_v18  ;;  %v47653_v41 = vpop.f32.mrb[132].mxu1  ;;  %v47655_v21 = vpop.f32.mrb[134].mxu0 }
 0x55d   : > { %vm21912_vm0 = vcmp.lt.s32.totalorder %v21438_v7, 363791  ;;  %v24028_v57 = vcombine.high %v24026_v55, %v24026_v55  ;;  %vm21911_vm1 = vcmp.lt.s32.totalorder %v21437_v6, 363791  ;;  %41294 = vmatprep.subr.mxu1 %v25847_v13  ;;  %v33941_v0 = vadd.f32 %v47361_v39, %v33871_v58  ;;  %v35482_v43 = vpop.f32.mrb[133].mxu1  ;;  %v35552_v38 = vpop.f32.mrb[135].mxu0  ;;  %v25378_v6 = vld [vmem:[%s44474_s20 + $0x6f0] sm:$0xff] }
 0x55e   : > { %vm21914_vm2 = vcmp.lt.s32.totalorder %v21440_v12, 363791  ;;  %v24044_v48 = vcombine.high %v24036_v49, %v24036_v49  ;;  %41364 = vmatprep.subr.mxu0 %v25848_v26  ;;  %v21439_v40 = vadd.s32 %v45337_v20, %v20963_v31  ;;  %v21442_v17 = vadd.s32 %v45337_v20, %v20966_v25  ;;  %v47698_v43 = vld [vmem:[%s44474_s20 + $0x6f8] sm:$0xff] }
 0x55f   : > { %43252 = vmatprep.mubr.msk.f32.mxu1 %vm21912_vm0, %v24028_v57  ;;  %v24029_v16 = vcombine.high %v22063_v36, %v22063_v36  ;;  %v20965_v62 = vadd.s32 55552, %v45335_v18  ;;  %v25849_v50 = vcombine.high %v47651_v35, %v47651_v35  ;;  %v34011_v39 = vadd.f32 %v47369_v9, %v33941_v0  ;;  %v47674_v9 = vld [vmem:[%s44474_s20 + $0x6e8] sm:$0xff] }
 0x560   : > { %43253 = vmatmul.mubr.msk.f32.vlgmr.msra.gmra.mrb[214].mxu1 %vm21911_vm1, %v24026_v55  ;;  %43254 = vmatprep.mubr.msk.f32.mxu0 %vm21914_vm2, %v24044_v48  ;;  %vm21913_vm3 = vcmp.lt.s32.totalorder %v21439_v40, 363791  ;;  %vm21916_vm4 = vcmp.lt.s32.totalorder %v21442_v17, 363791  ;;  %v20968_v44 = vadd.s32 55936, %v45335_v18  ;;  %v24053_v10 = vrot.slane %v22064_v19, %v45349_v32  ;;  %v22065_v55 = vld [vmem:[%s44467_s4 + $0x370] sm:$0xff] }
 0x561   : > { %41295 = vmatpush1.xpose.msra.mxu1 %v47625_v34  ;;  %43255 = vmatmul.mubr.msk.f32.vlgmr.msra.gmra.mrb[216].mxu0 %vm21913_vm3, %v24036_v49  ;;  %v24043_v1 = vrot.slane %v24029_v16, %v45349_v32  ;;  %v21441_v24 = vadd.s32 %v45337_v20, %v20965_v62  ;;  %v25850_v54 = vcombine.high %v25376_v45, %v25376_v45  ;;  %v20967_v14 = vadd.s32 55808, %v45335_v18  ;;  %v47676_v37 = vpop.f32.mrb[134].mxu1 }
 0x562   : > { %41365 = vmatpush1.xpose.msra.mxu0 %v25374_v52  ;;  %41434 = vmatprep.subr.mxu1 %v25849_v50  ;;  %v21444_v56 = vadd.s32 %v45337_v20, %v20968_v44  ;;  %v24061_v23 = vcombine.high %v24053_v10, %v24053_v10  ;;  %v34081_v34 = vadd.f32 %v47386_v63, %v34011_v39  ;;  %v20970_v46 = vadd.s32 56192, %v45335_v18  ;;  %v35622_v36 = vpop.f32.mrb[135].mxu1  ;;  %v47681_v13 = vpop.f32.mrb[136].mxu0  ;;  %v47711_v44 = vld [vmem:[%s44474_s20 + $0x700] sm:$0xff] }
 0x563   : > { %v24045_v58 = vcombine.high %v24043_v1, %v24043_v1  ;;  %vm21915_vm5 = vcmp.lt.s32.totalorder %v21441_v24, 363791  ;;  %41504 = vmatprep.subr.mxu0 %v25850_v54  ;;  %v21443_v42 = vadd.s32 %v45337_v20, %v20967_v14  ;;  %v24046_v7 = vcombine.high %v22064_v19, %v22064_v19  ;;  %v35692_v52 = vpop.f32.mrb[137].mxu0 }
 0x564   : > { %vm21918_vm6 = vcmp.lt.s32.totalorder %v21444_v56, 363791  ;;  %v21446_v31 = vadd.s32 %v45337_v20, %v20970_v46  ;;  %v20969_v63 = vadd.s32 56064, %v45335_v18  ;;  %v25851_v12 = vcombine.high %v47674_v9, %v47674_v9 }
 0x565   : > { %43256 = vmatprep.mubr.msk.f32.mxu1 %vm21916_vm4, %v24045_v58  ;;  %43258 = vmatprep.mubr.msk.f32.mxu0 %vm21918_vm6, %v24061_v23  ;;  %vm21917_vm7 = vcmp.lt.s32.totalorder %v21443_v42, 363791  ;;  %v24060_v49 = vrot.slane %v24046_v7, %v45349_v32  ;;  %v34151_v26 = vadd.f32 %v47390_v33, %v34081_v34  ;;  %v20972_v25 = vadd.s32 56448, %v45335_v18  ;;  %v47728_v58 = vld [vmem:[%s44474_s20 + $0x708] sm:$0xff] }
 0x566   : > { %43257 = vmatmul.mubr.msk.f32.vlgmr.msra.gmra.mrb[216].mxu1 %vm21915_vm5, %v24043_v1  ;;  %43259 = vmatmul.mubr.msk.f32.vlgmr.msra.gmra.mrb[218].mxu0 %vm21917_vm7, %v24053_v10  ;;  %vm21920_vm8 = vcmp.lt.s32.totalorder %v21446_v31, 363791  ;;  %v21445_v57 = vadd.s32 %v45337_v20, %v20969_v63  ;;  %v24070_v0 = vrot.slane %v22065_v55, %v45349_v32  ;;  %v25852_v19 = vcombine.high %v25378_v6, %v25378_v6 }
 0x567   : > { %41435 = vmatpush1.xpose.msra.mxu1 %v47651_v35  ;;  %v24062_v38 = vcombine.high %v24060_v49, %v24060_v49  ;;  %41505 = vmatpush1.xpose.msra.mxu0 %v25376_v45  ;;  %v21448_v33 = vadd.s32 %v45337_v20, %v20972_v25  ;;  %v34221_v48 = vadd.f32 %v47414_v47, %v34151_v26  ;;  %v20971_v40 = vadd.s32 56320, %v45335_v18  ;;  %v47704_v17 = vpop.f32.mrb[136].mxu1  ;;  %v47706_v16 = vpop.f32.mrb[138].mxu0  ;;  %v22066_v35 = vld [vmem:[%s44467_s4 + $0x378] sm:$0xff] }
 0x568   : > { %vm21919_vm9 = vcmp.lt.s32.totalorder %v21445_v57, 363791  ;;  %41574 = vmatprep.subr.mxu1 %v25851_v12  ;;  %v24078_v62 = vcombine.high %v24070_v0, %v24070_v0  ;;  %41644 = vmatprep.subr.mxu0 %v25852_v19  ;;  %v20974_v50 = vadd.s32 56704, %v45335_v18  ;;  %v24063_v39 = vcombine.high %v22065_v55, %v22065_v55  ;;  %v35762_v45 = vpop.f32.mrb[137].mxu1  ;;  %v35832_v10 = vpop.f32.mrb[139].mxu0  ;;  %v22067_v12 = vld [vmem:[%s44467_s4 + $0x380] sm:$0xff] }
 0x569   : > { %43260 = vmatprep.mubr.msk.f32.mxu1 %vm21920_vm8, %v24062_v38  ;;  %vm21922_vm10 = vcmp.lt.s32.totalorder %v21448_v33, 363791  ;;  %v21447_v47 = vadd.s32 %v45337_v20, %v20971_v40  ;;  %v20973_v1 = vadd.s32 56576, %v45335_v18  ;;  %v25853_v24 = vcombine.high %v47698_v43, %v47698_v43 }
 0x56a   : > { %43261 = vmatmul.mubr.msk.f32.vlgmr.msra.gmra.mrb[218].mxu1 %vm21919_vm9, %v24060_v49  ;;  %43262 = vmatprep.mubr.msk.f32.mxu0 %vm21922_vm10, %v24078_v62  ;;  %v21450_v54 = vadd.s32 %v45337_v20, %v20974_v50  ;;  %v24077_v14 = vrot.slane %v24063_v39, %v45349_v32  ;;  %v34291_v56 = vadd.f32 %v47416_v53, %v34221_v48  ;;  %v20976_v23 = vadd.s32 56960, %v45335_v18  ;;  %v47738_v49 = vld [vmem:[%s44474_s20 + $0x710] sm:$0xff] }
 0x56b   : > { %41575 = vmatpush1.xpose.msra.mxu1 %v47674_v9  ;;  %vm21921_vm11 = vcmp.lt.s32.totalorder %v21447_v47, 363791  ;;  %v21449_v34 = vadd.s32 %v45337_v20, %v20973_v1  ;;  %v24087_v46 = vrot.slane %v22066_v35, %v45349_v32  ;;  %v25854_v36 = vcombine.high %v47711_v44, %v47711_v44  ;;  %v47730_v42 = vpop.f32.mrb[138].mxu1 }
 0x56c   : > { %43263 = vmatmul.mubr.msk.f32.vlgmr.msra.gmra.mrb[220].mxu0 %vm21921_vm11, %v24070_v0  ;;  %vm21924_vm12 = vcmp.lt.s32.totalorder %v21450_v54, 363791  ;;  %v24079_v53 = vcombine.high %v24077_v14, %v24077_v14  ;;  %41714 = vmatprep.subr.mxu1 %v25853_v24  ;;  %v21452_v9 = vadd.s32 %v45337_v20, %v20976_v23  ;;  %v34361_v7 = vadd.f32 %v47440_v51, %v34291_v56  ;;  %v35902_v55 = vpop.f32.mrb[139].mxu1  ;;  %v22068_v56 = vld [vmem:[%s44467_s4 + $0x388] sm:$0xff] }
 0x56d   : > { %41645 = vmatpush1.xpose.msra.mxu0 %v25378_v6  ;;  %vm21923_vm13 = vcmp.lt.s32.totalorder %v21449_v34, 363791  ;;  %v24095_v52 = vcombine.high %v24087_v46, %v24087_v46  ;;  %v20975_v31 = vadd.s32 56832, %v45335_v18  ;;  %v20978_v63 = vadd.s32 57216, %v45335_v18  ;;  %v47740_v26 = vpop.f32.mrb[140].mxu0  ;;  %v25384_v23 = vld [vmem:[%s44474_s20 + $0x720] sm:$0xff] }
 0x56e   : > { %43264 = vmatprep.mubr.msk.f32.mxu1 %vm21924_vm12, %v24079_v53  ;;  %vm21926_vm14 = vcmp.lt.s32.totalorder %v21452_v9, 363791  ;;  %41784 = vmatprep.subr.mxu0 %v25854_v36  ;;  %v24080_v25 = vcombine.high %v22066_v35, %v22066_v35  ;;  %v20977_v57 = vadd.s32 57088, %v45335_v18  ;;  %v25855_v51 = vcombine.high %v47728_v58, %v47728_v58  ;;  %v35972_v6 = vpop.f32.mrb[141].mxu0  ;;  %v47760_v35 = vld [vmem:[%s44474_s20 + $0x718] sm:$0xff] }
 0x56f   : > { %43265 = vmatmul.mubr.msk.f32.vlgmr.msra.gmra.mrb[220].mxu1 %vm21923_vm13, %v24077_v14  ;;  %43266 = vmatprep.mubr.msk.f32.mxu0 %vm21926_vm14, %v24095_v52  ;;  %v21451_v0 = vadd.s32 %v45337_v20, %v20975_v31  ;;  %v21454_v19 = vadd.s32 %v45337_v20, %v20978_v63  ;;  %v34431_v38 = vadd.f32 %v47442_v61, %v34361_v7  ;;  %v20980_v33 = vadd.s32 57472, %v45335_v18  ;;  %v22069_v6 = vld [vmem:[%s44467_s4 + $0x390] sm:$0xff] }
 0x570   : > { %41715 = vmatpush1.xpose.msra.mxu1 %v47698_v43  ;;  %v24094_v48 = vrot.slane %v24080_v25, %v45349_v32  ;;  %v21453_v40 = vadd.s32 %v45337_v20, %v20977_v57  ;;  %v24104_v62 = vrot.slane %v22067_v12, %v45349_v32  ;;  %v25856_v50 = vcombine.high %v47738_v49, %v47738_v49  ;;  %v47755_v39 = vpop.f32.mrb[140].mxu1 }
 0x571   : > { %vm21925_vm15 = vcmp.lt.s32.totalorder %v21451_v0, 363791  ;;  %vm21928_vm0 = vcmp.lt.s32.totalorder %v21454_v19, 363791  ;;  %41854 = vmatprep.subr.mxu1 %v25855_v51  ;;  %v21456_v61 = vadd.s32 %v45337_v20, %v20980_v33  ;;  %v34501_v43 = vadd.f32 %v47463_v28, %v34431_v38  ;;  %v36042_v45 = vpop.f32.mrb[141].mxu1  ;;  %v25386_v33 = vld [vmem:[%s44474_s20 + $0x730] sm:$0xff] }
 0x572   : > { %43267 = vmatmul.mubr.msk.f32.vlgmr.msra.gmra.mrb[222].mxu0 %vm21925_vm15, %v24087_v46  ;;  %v24096_v10 = vcombine.high %v24094_v48, %v24094_v48  ;;  %vm21927_vm1 = vcmp.lt.s32.totalorder %v21453_v40, 363791  ;;  %v24112_v47 = vcombine.high %v24104_v62, %v24104_v62  ;;  %v20979_v1 = vadd.s32 57344, %v45335_v18 }
 0x573   : > { %41785 = vmatpush1.xpose.msra.mxu0 %v47711_v44  ;;  %vm21930_vm2 = vcmp.lt.s32.totalorder %v21456_v61, 363791  ;;  %v20982_v24 = vadd.s32 57728, %v45335_v18  ;;  %v24097_v54 = vcombine.high %v22067_v12, %v22067_v12  ;;  %v20981_v14 = vadd.s32 57600, %v45335_v18  ;;  %v47768_v28 = vpop.f32.mrb[142].mxu0  ;;  %v47785_v12 = vld [vmem:[%s44474_s20 + $0x728] sm:$0xff] }
 0x574   : > { %43268 = vmatprep.mubr.msk.f32.mxu1 %vm21928_vm0, %v24096_v10  ;;  %43270 = vmatprep.mubr.msk.f32.mxu0 %vm21930_vm2, %v24112_v47  ;;  %v21455_v34 = vadd.s32 %v45337_v20, %v20979_v1  ;;  %v25857_v46 = vcombine.high %v47760_v35, %v47760_v35  ;;  %v34571_v44 = vadd.f32 %v47468_v60, %v34501_v43  ;;  %v20984_v36 = vadd.s32 57984, %v45335_v18  ;;  %v36112_v53 = vpop.f32.mrb[143].mxu0 }
 0x575   : > { %43269 = vmatmul.mubr.msk.f32.vlgmr.msra.gmra.mrb[222].mxu1 %vm21927_vm1, %v24094_v48  ;;  %41924 = vmatprep.subr.mxu0 %v25856_v50  ;;  %v21458_v9 = vadd.s32 %v45337_v20, %v20982_v24  ;;  %v24111_v7 = vrot.slane %v24097_v54, %v45349_v32  ;;  %v21457_v55 = vadd.s32 %v45337_v20, %v20981_v14  ;;  %v20983_v52 = vadd.s32 57856, %v45335_v18  ;;  %v47810_v24 = vld [vmem:[%s44474_s20 + $0x738] sm:$0xff] }
 0x576   : > { %41855 = vmatpush1.xpose.msra.mxu1 %v47728_v58  ;;  %vm21929_vm3 = vcmp.lt.s32.totalorder %v21455_v34, 363791  ;;  %v21460_v60 = vadd.s32 %v45337_v20, %v20984_v36  ;;  %v24121_v31 = vrot.slane %v22068_v56, %v45349_v32  ;;  %v25858_v63 = vcombine.high %v25384_v23, %v25384_v23  ;;  %v47787_v25 = vpop.f32.mrb[142].mxu1 }
 0x577   : > { %43271 = vmatmul.mubr.msk.f32.vlgmr.msra.gmra.mrb[224].mxu0 %vm21929_vm3, %v24104_v62  ;;  %vm21932_vm4 = vcmp.lt.s32.totalorder %v21458_v9, 363791  ;;  %v24113_v57 = vcombine.high %v24111_v7, %v24111_v7  ;;  %vm21931_vm5 = vcmp.lt.s32.totalorder %v21457_v55, 363791  ;;  %41994 = vmatprep.subr.mxu1 %v25857_v46  ;;  %v34641_v51 = vadd.f32 %v47491_v3, %v34571_v44  ;;  %v36182_v58 = vpop.f32.mrb[143].mxu1  ;;  %v22070_v9 = vld [vmem:[%s44467_s4 + $0x398] sm:$0xff] }
 0x578   : > { %41925 = vmatpush1.xpose.msra.mxu0 %v47738_v49  ;;  %vm21934_vm6 = vcmp.lt.s32.totalorder %v21460_v60, 363791  ;;  %v24129_v0 = vcombine.high %v24121_v31, %v24121_v31  ;;  %v21459_v19 = vadd.s32 %v45337_v20, %v20983_v52  ;;  %v20986_v38 = vadd.s32 58240, %v45335_v18  ;;  %v47795_v48 = vpop.f32.mrb[144].mxu0 }
 0x579   : > { %43272 = vmatprep.mubr.msk.f32.mxu1 %vm21932_vm4, %v24113_v57  ;;  %42064 = vmatprep.subr.mxu0 %v25858_v63  ;;  %v24114_v40 = vcombine.high %v22068_v56, %v22068_v56  ;;  %v20985_v62 = vadd.s32 58112, %v45335_v18  ;;  %v25859_v3 = vcombine.high %v47785_v12, %v47785_v12  ;;  %v34711_v49 = vadd.f32 %v47493_v22, %v34641_v51  ;;  %v36252_v50 = vpop.f32.mrb[145].mxu0 }
 0x57a   : > { %43273 = vmatmul.mubr.msk.f32.vlgmr.msra.gmra.mrb[224].mxu1 %vm21931_vm5, %v24111_v7  ;;  %43274 = vmatprep.mubr.msk.f32.mxu0 %vm21934_vm6, %v24129_v0  ;;  %vm21933_vm7 = vcmp.lt.s32.totalorder %v21459_v19, 363791  ;;  %v21462_v61 = vadd.s32 %v45337_v20, %v20986_v38  ;;  %v20988_v43 = vadd.s32 58496, %v45335_v18  ;;  %v24138_v45 = vrot.slane %v22069_v6, %v45349_v32  ;;  %v47838_v38 = vld [vmem:[%s44474_s20 + $0x748] sm:$0xff] }
 0x57b   : > { %41995 = vmatpush1.xpose.msra.mxu1 %v47760_v35  ;;  %43275 = vmatmul.mubr.msk.f32.vlgmr.msra.gmra.mrb[226].mxu0 %vm21933_vm7, %v24121_v31  ;;  %v24128_v10 = vrot.slane %v24114_v40, %v45349_v32  ;;  %v21461_v47 = vadd.s32 %v45337_v20, %v20985_v62  ;;  %v25860_v1 = vcombine.high %v25386_v33, %v25386_v33  ;;  %v20987_v22 = vadd.s32 58368, %v45335_v18  ;;  %v47812_v54 = vpop.f32.mrb[144].mxu1 }
 0x57c   : > { %vm21936_vm8 = vcmp.lt.s32.totalorder %v21462_v61, 363791  ;;  %42065 = vmatpush1.xpose.msra.mxu0 %v25384_v23  ;;  %42134 = vmatprep.subr.mxu1 %v25859_v3  ;;  %v21464_v14 = vadd.s32 %v45337_v20, %v20988_v43  ;;  %v24146_v35 = vcombine.high %v24138_v45, %v24138_v45  ;;  %v34781_v56 = vadd.f32 %v47517_v2, %v34711_v49  ;;  %v36322_v34 = vpop.f32.mrb[145].mxu1  ;;  %v47816_v46 = vpop.f32.mrb[146].mxu0  ;;  %v25388_v2 = vld [vmem:[%s44474_s20 + $0x740] sm:$0xff] }
 0x57d   : > { %v24130_v44 = vcombine.high %v24128_v10, %v24128_v10  ;;  %vm21935_vm9 = vcmp.lt.s32.totalorder %v21461_v47, 363791  ;;  %42204 = vmatprep.subr.mxu0 %v25860_v1  ;;  %v21463_v36 = vadd.s32 %v45337_v20, %v20987_v22  ;;  %v20990_v53 = vadd.s32 58752, %v45335_v18  ;;  %v36392_v7 = vpop.f32.mrb[147].mxu0 }
 0x57e   : > { %vm21938_vm10 = vcmp.lt.s32.totalorder %v21464_v14, 363791  ;;  %v24131_v23 = vcombine.high %v22069_v6, %v22069_v6  ;;  %v20989_v55 = vadd.s32 58624, %v45335_v18  ;;  %v25861_v52 = vcombine.high %v47810_v24, %v47810_v24 }
 0x57f   : > { %43276 = vmatprep.mubr.msk.f32.mxu1 %vm21936_vm8, %v24130_v44  ;;  %43278 = vmatprep.mubr.msk.f32.mxu0 %vm21938_vm10, %v24146_v35  ;;  %vm21937_vm11 = vcmp.lt.s32.totalorder %v21463_v36, 363791  ;;  %v21466_v60 = vadd.s32 %v45337_v20, %v20990_v53  ;;  %v34851_v31 = vadd.f32 %v47527_v30, %v34781_v56  ;;  %v20992_v63 = vadd.s32 59008, %v45335_v18 }
 0x580   : > { %43277 = vmatmul.mubr.msk.f32.vlgmr.msra.gmra.mrb[226].mxu1 %vm21935_vm9, %v24128_v10  ;;  %43279 = vmatmul.mubr.msk.f32.vlgmr.msra.gmra.mrb[228].mxu0 %vm21937_vm11, %v24138_v45  ;;  %v24145_v57 = vrot.slane %v24131_v23, %v45349_v32  ;;  %v21465_v51 = vadd.s32 %v45337_v20, %v20989_v55  ;;  %v24155_v6 = vrot.slane %v22070_v9, %v45349_v32  ;;  %v20991_v58 = vadd.s32 58880, %v45335_v18  ;;  %v22071_v45 = vld [vmem:[%s44467_s4 + $0x3a0] sm:$0xff]  ;;  %v25390_v10 = vld [vmem:[%s44474_s20 + $0x750] sm:$0xff] }
 0x581   : > { %42135 = vmatpush1.xpose.msra.mxu1 %v47785_v12  ;;  %vm21940_vm12 = vcmp.lt.s32.totalorder %v21466_v60, 363791  ;;  %42205 = vmatpush1.xpose.msra.mxu0 %v25386_v33  ;;  %v21468_v0 = vadd.s32 %v45337_v20, %v20992_v63  ;;  %v25862_v30 = vcombine.high %v25388_v2, %v25388_v2  ;;  %v34921_v19 = vadd.f32 %v47542_v8, %v34851_v31  ;;  %v47840_v40 = vpop.f32.mrb[146].mxu1  ;;  %v47842_v62 = vpop.f32.mrb[148].mxu0 }
 0x582   : > { %v24147_v3 = vcombine.high %v24145_v57, %v24145_v57  ;;  %vm21939_vm13 = vcmp.lt.s32.totalorder %v21465_v51, 363791  ;;  %42274 = vmatprep.subr.mxu1 %v25861_v52  ;;  %v24163_v49 = vcombine.high %v24155_v6, %v24155_v6  ;;  %v21467_v12 = vadd.s32 %v45337_v20, %v20991_v58  ;;  %v36462_v33 = vpop.f32.mrb[147].mxu1  ;;  %v36532_v50 = vpop.f32.mrb[149].mxu0  ;;  %v22072_v52 = vld [vmem:[%s44467_s4 + $0x3a8] sm:$0xff] }
 0x583   : > { %vm21942_vm14 = vcmp.lt.s32.totalorder %v21468_v0, 363791  ;;  %42344 = vmatprep.subr.mxu0 %v25862_v30  ;;  %v20994_v8 = vadd.s32 59264, %v45335_v18  ;;  %v24148_v61 = vcombine.high %v22070_v9, %v22070_v9  ;;  %v20993_v43 = vadd.s32 59136, %v45335_v18  ;;  %v47864_v9 = vld [vmem:[%s44474_s20 + $0x758] sm:$0xff]  ;;  %v25392_v51 = vld [vmem:[%s44474_s20 + $0x760] sm:$0xff] }
 0x584   : > { %43280 = vmatprep.mubr.msk.f32.mxu1 %vm21940_vm12, %v24147_v3  ;;  %43282 = vmatprep.mubr.msk.f32.mxu0 %vm21942_vm14, %v24163_v49  ;;  %vm21941_vm15 = vcmp.lt.s32.totalorder %v21467_v12, 363791  ;;  %v25863_v47 = vcombine.high %v47838_v38, %v47838_v38  ;;  %v34991_v1 = vadd.f32 %v47555_v27, %v34921_v19  ;;  %v20996_v22 = vadd.s32 59520, %v45335_v18 }
 0x585   : > { %43281 = vmatmul.mubr.msk.f32.vlgmr.msra.gmra.mrb[228].mxu1 %vm21939_vm13, %v24145_v57  ;;  %43283 = vmatmul.mubr.msk.f32.vlgmr.msra.gmra.mrb[230].mxu0 %vm21941_vm15, %v24155_v6  ;;  %v21470_v14 = vadd.s32 %v45337_v20, %v20994_v8  ;;  %v24162_v35 = vrot.slane %v24148_v61, %v45349_v32  ;;  %v21469_v56 = vadd.s32 %v45337_v20, %v20993_v43  ;;  %v20995_v34 = vadd.s32 59392, %v45335_v18 }
 0x586   : > { %42275 = vmatpush1.xpose.msra.mxu1 %v47810_v24  ;;  %42345 = vmatpush1.xpose.msra.mxu0 %v25388_v2  ;;  %v21472_v44 = vadd.s32 %v45337_v20, %v20996_v22  ;;  %v24172_v27 = vrot.slane %v22071_v45, %v45349_v32  ;;  %v25864_v36 = vcombine.high %v25390_v10, %v25390_v10  ;;  %v20998_v53 = vadd.s32 59776, %v45335_v18  ;;  %v47866_v7 = vpop.f32.mrb[148].mxu1  ;;  %v47868_v23 = vpop.f32.mrb[150].mxu0 }
 0x587   : > { %vm21944_vm0 = vcmp.lt.s32.totalorder %v21470_v14, 363791  ;;  %v24164_v55 = vcombine.high %v24162_v35, %v24162_v35  ;;  %vm21943_vm1 = vcmp.lt.s32.totalorder %v21469_v56, 363791  ;;  %42414 = vmatprep.subr.mxu1 %v25863_v47  ;;  %v35061_v24 = vadd.f32 %v47574_v59, %v34991_v1  ;;  %v36602_v2 = vpop.f32.mrb[149].mxu1  ;;  %v36672_v60 = vpop.f32.mrb[151].mxu0 }
 0x588   : > { %vm21946_vm2 = vcmp.lt.s32.totalorder %v21472_v44, 363791  ;;  %v24180_v31 = vcombine.high %v24172_v27, %v24172_v27  ;;  %42484 = vmatprep.subr.mxu0 %v25864_v36  ;;  %v21471_v63 = vadd.s32 %v45337_v20, %v20995_v34  ;;  %v21474_v57 = vadd.s32 %v45337_v20, %v20998_v53 }
 0x589   : > { %43284 = vmatprep.mubr.msk.f32.mxu1 %vm21944_vm0, %v24164_v55  ;;  %v24165_v6 = vcombine.high %v22071_v45, %v22071_v45  ;;  %v20997_v58 = vadd.s32 59648, %v45335_v18  ;;  %v25865_v0 = vcombine.high %v47864_v9, %v47864_v9  ;;  %v35131_v59 = vadd.f32 %v47582_v29, %v35061_v24  ;;  %v42821_v29 = vld.sshfl [vmem:[%s44467_s4 + $0x3b0] sm:$0x33 pattern:$0x76325410] }
 0x58a   : > { %43285 = vmatmul.mubr.msk.f32.vlgmr.msra.gmra.mrb[230].mxu1 %vm21943_vm1, %v24162_v35  ;;  %43286 = vmatprep.mubr.msk.f32.mxu0 %vm21946_vm2, %v24180_v31  ;;  %vm21945_vm3 = vcmp.lt.s32.totalorder %v21471_v63, 363791  ;;  %vm21948_vm4 = vcmp.lt.s32.totalorder %v21474_v57, 363791  ;;  %v21000_v30 = vadd.s32 60032, %v45335_v18  ;;  %v24189_v19 = vrot.slane %v22072_v52, %v45349_v32 }
 0x58b   : > { %42415 = vmatpush1.xpose.msra.mxu1 %v47838_v38  ;;  %43287 = vmatmul.mubr.msk.f32.vlgmr.msra.gmra.mrb[232].mxu0 %vm21945_vm3, %v24172_v27  ;;  %v24179_v3 = vrot.slane %v24165_v6, %v45349_v32  ;;  %v21473_v49 = vadd.s32 %v45337_v20, %v20997_v58  ;;  %v25866_v12 = vcombine.high %v25392_v51, %v25392_v51  ;;  %v20999_v33 = vadd.s32 59904, %v45335_v18  ;;  %v47887_v50 = vpop.f32.mrb[150].mxu1 }
 0x58c   : > { %42485 = vmatpush1.xpose.msra.mxu0 %v25390_v10  ;;  %42554 = vmatprep.subr.mxu1 %v25865_v0  ;;  %v21476_v8 = vadd.s32 %v45337_v20, %v21000_v30  ;;  %v24197_v61 = vcombine.high %v24189_v19, %v24189_v19  ;;  %v35201_v43 = vadd.f32 %v47599_v11, %v35131_v59  ;;  %v21002_v38 = vadd.s32 60288, %v45335_v18  ;;  %v36742_v45 = vpop.f32.mrb[151].mxu1  ;;  %v47892_v47 = vpop.f32.mrb[152].mxu0 }
 0x58d   : > { %v24181_v1 = vcombine.high %v24179_v3, %v24179_v3  ;;  %vm21947_vm5 = vcmp.lt.s32.totalorder %v21473_v49, 363791  ;;  %42624 = vmatprep.subr.mxu0 %v25866_v12  ;;  %v21475_v22 = vadd.s32 %v45337_v20, %v20999_v33  ;;  %v24182_v14 = vcombine.high %v22072_v52, %v22072_v52  ;;  %v36812_v35 = vpop.f32.mrb[153].mxu0 }
 0x58e   : > { %vm21950_vm6 = vcmp.lt.s32.totalorder %v21476_v8, 363791  ;;  %v21478_v10 = vadd.s32 %v45337_v20, %v21002_v38  ;;  %v21001_v56 = vadd.s32 60160, %v45335_v18  ;;  %v35271_v34 = vadd.f32 %v47603_v15, %v35201_v43 }
 0x58f   : > { %43288 = vmatprep.mubr.msk.f32.mxu1 %vm21948_vm4, %v24181_v1  ;;  %43290 = vmatprep.mubr.msk.f32.mxu0 %vm21950_vm6, %v24197_v61  ;;  %vm21949_vm7 = vcmp.lt.s32.totalorder %v21475_v22, 363791  ;;  %v24196_v11 = vrot.slane %v24182_v14, %v45349_v32  ;;  %v21004_v44 = vadd.s32 60544, %v45335_v18  ;;  %v24206_v27 = vcombine.high %v42821_v29, %v42821_v29 }
 0x590   : > { %43289 = vmatmul.mubr.msk.f32.vlgmr.msra.gmra.mrb[232].mxu1 %vm21947_vm5, %v24179_v3  ;;  %43291 = vmatmul.mubr.msk.f32.vlgmr.msra.gmra.mrb[234].mxu0 %vm21949_vm7, %v24189_v19  ;;  %vm21952_vm8 = vcmp.lt.s32.totalorder %v21478_v10, 363791  ;;  %v21477_v36 = vadd.s32 %v45337_v20, %v21001_v56  ;;  %v35341_v53 = vadd.f32 %v47627_v5, %v35271_v34  ;;  %v21003_v55 = vadd.s32 60416, %v45335_v18 }
 0x591   : > { %42555 = vmatpush1.xpose.msra.mxu1 %v47864_v9  ;;  %v24198_v15 = vcombine.high %v24196_v11, %v24196_v11  ;;  %42625 = vmatpush1.xpose.msra.mxu0 %v25392_v51  ;;  %v21480_v24 = vadd.s32 %v45337_v20, %v21004_v44  ;;  %v47906_v52 = vpop.f32.mrb[152].mxu1  ;;  %v47908_v32 = vpop.f32.mrb[154].mxu0  ;;  %vm42695_vm12 = vcmask 25600  }
 0x592   : > { %vm21951_vm9 = vcmp.lt.s32.totalorder %v21477_v36, 363791  ;;  %v21479_v2 = vadd.s32 %v45337_v20, %v21003_v55  ;;  %v35411_v60 = vadd.f32 %v47629_v4, %v35341_v53  ;;  %v36882_v31 = vpop.f32.mrb[153].mxu1  ;;  %v36952_v63 = vpop.f32.mrb[155].mxu0 }
 0x593   : > { %43292 = vmatprep.mubr.msk.f32.mxu1 %vm21952_vm8, %v24198_v15  ;;  %vm21954_vm10 = vcmp.lt.s32.totalorder %v21480_v24, 363791 }
 0x594   : > { %43293 = vmatmul.mubr.msk.f32.vlgmr.msra.gmra.mrb[234].mxu1 %vm21951_vm9, %v24196_v11  ;;  %43294 = vmatprep.mubr.msk.f32.mxu0 %vm21954_vm10, %v24206_v27  ;;  %vm21953_vm11 = vcmp.lt.s32.totalorder %v21479_v2, 363791  ;;  %v35481_v18 = vadd.f32 %v47653_v41, %v35411_v60 }
 0x595   : > { %43295 = vmatmul.mubr.msk.f32.vlgmr.msra.gmra.mrb[236].mxu0 %vm21953_vm11, %v42821_v29  ;;  %v37020_v5 = vpop.f32.mrb[154].mxu1 }
 0x596   : > { %v35551_v9 = vadd.f32 %v47655_v21, %v35481_v18  ;;  %v37022_v57 = vpop.f32.mrb[155].mxu1 }
 0x597   : > { %v37090_v51 = vpop.f32.mrb[156].mxu0 }
 0x598   : > { %v35621_v6 = vadd.f32 %v47676_v37, %v35551_v9  ;;  %v37092_v20 = vpop.f32.mrb[157].mxu0 }
 0x59a   : > { %v35691_v4 = vadd.f32 %v47681_v13, %v35621_v6  ;;  %v37160_v58 = vpop.f32.mrb[156].mxu1 }
 0x59b   : > { %v37162_v0 = vpop.f32.mrb[157].mxu1 }
 0x59c   : > { %v35761_v59 = vadd.f32 %v47704_v17, %v35691_v4 }
 0x59d   : > { %v37230_v30 = vpop.f32.mrb[158].mxu0 }
 0x59e   : > { %v35831_v19 = vadd.f32 %v47706_v16, %v35761_v59  ;;  %v37232_v3 = vpop.f32.mrb[159].mxu0 }
 0x5a0   : > { %v35901_v41 = vadd.f32 %v47730_v42, %v35831_v19  ;;  %v37300_v49 = vpop.f32.mrb[158].mxu1 }
 0x5a1   : > { %v37302_v12 = vpop.f32.mrb[159].mxu1 }
 0x5a2   : > { %v35971_v21 = vadd.f32 %v47740_v26, %v35901_v41  ;;  %v37370_v33 = vpop.f32.mrb[160].mxu0 }
 0x5a3   : > { %v37372_v29 = vpop.f32.mrb[161].mxu0 }
 0x5a4   : > { %v36041_v37 = vadd.f32 %v47755_v39, %v35971_v21 }
 0x5a5   : > { %v37440_v8 = vpop.f32.mrb[160].mxu1 }
 0x5a6   : > { %v36111_v13 = vadd.f32 %v47768_v28, %v36041_v37  ;;  %v37442_v61 = vpop.f32.mrb[161].mxu1  ;;  %v37510_v43 = vpop.f32.mrb[162].mxu0 }
 0x5a7   : > { %v37512_v17 = vpop.f32.mrb[163].mxu0 }
 0x5a8   : > { %v36181_v38 = vadd.f32 %v47787_v25, %v36111_v13 }
 0x5aa   : > { %v36251_v16 = vadd.f32 %v47795_v48, %v36181_v38 }
 0x5ab   : > { %v37580_v45 = vpop.f32.mrb[162].mxu1  ;;  %v37650_v42 = vpop.f32.mrb[164].mxu0 }
 0x5ac   : > { %v36321_v1 = vadd.f32 %v47812_v54, %v36251_v16  ;;  %v37582_v22 = vpop.f32.mrb[163].mxu1  ;;  %v37652_v26 = vpop.f32.mrb[165].mxu0 }
 0x5ae   : > { %v36391_v14 = vadd.f32 %v47816_v46, %v36321_v1 }
 0x5b0   : > { %v36461_v39 = vadd.f32 %v47840_v40, %v36391_v14  ;;  %v37720_v35 = vpop.f32.mrb[164].mxu1  ;;  %v37790_v10 = vpop.f32.mrb[166].mxu0 }
 0x5b1   : > { %v37722_v28 = vpop.f32.mrb[165].mxu1  ;;  %v37792_v56 = vpop.f32.mrb[167].mxu0 }
 0x5b2   : > { %v36531_v34 = vadd.f32 %v47842_v62, %v36461_v39 }
 0x5b4   : > { %v36601_v25 = vadd.f32 %v47866_v7, %v36531_v34 }
 0x5b5   : > { %v37860_v11 = vpop.f32.mrb[166].mxu1 }
 0x5b6   : > { %v36671_v48 = vadd.f32 %v47868_v23, %v36601_v25  ;;  %v37862_v44 = vpop.f32.mrb[167].mxu1  ;;  %v37930_v27 = vpop.f32.mrb[168].mxu0 }
 0x5b7   : > { %v37932_v54 = vpop.f32.mrb[169].mxu0 }
 0x5b8   : > { %v36741_v36 = vadd.f32 %v47887_v50, %v36671_v48 }
 0x5ba   : > { %v36811_v46 = vadd.f32 %v47892_v47, %v36741_v36 }
 0x5bb   : > { %v38000_v53 = vpop.f32.mrb[168].mxu1  ;;  %v38070_v40 = vpop.f32.mrb[170].mxu0 }
 0x5bc   : > { %v36881_v55 = vadd.f32 %v47906_v52, %v36811_v46  ;;  %v38002_v15 = vpop.f32.mrb[169].mxu1  ;;  %v38072_v24 = vpop.f32.mrb[171].mxu0 }
 0x5be   : > { %v36951_v62 = vadd.f32 %v47908_v32, %v36881_v55 }
 0x5bf   : > { %v38140_v2 = vpop.f32.mrb[170].mxu1 }
 0x5c0   : > { %v37021_v7 = vadd.f32 %v37020_v5, %v36951_v62  ;;  %v38142_v60 = vpop.f32.mrb[171].mxu1 }
 0x5c1   : > { %v38210_v31 = vpop.f32.mrb[172].mxu0 }
 0x5c2   : > { %v37091_v23 = vadd.f32 %v37090_v51, %v37021_v7  ;;  %v38212_v63 = vpop.f32.mrb[173].mxu0 }
 0x5c4   : > { %v37161_v18 = vadd.f32 %v37160_v58, %v37091_v23  ;;  %v38280_v9 = vpop.f32.mrb[172].mxu1 }
 0x5c5   : > { %v38282_v57 = vpop.f32.mrb[173].mxu1 }
 0x5c6   : > { %v37231_v50 = vadd.f32 %v37230_v30, %v37161_v18 }
 0x5c7   : > { %v38350_v6 = vpop.f32.mrb[174].mxu0 }
 0x5c8   : > { %v37301_v47 = vadd.f32 %v37300_v49, %v37231_v50  ;;  %v38352_v20 = vpop.f32.mrb[175].mxu0 }
 0x5ca   : > { %v37371_v4 = vadd.f32 %v37370_v33, %v37301_v47  ;;  %v38420_v0 = vpop.f32.mrb[174].mxu1 }
 0x5cb   : > { %v38422_v52 = vpop.f32.mrb[175].mxu1 }
 0x5cc   : > { %v37441_v59 = vadd.f32 %v37440_v8, %v37371_v4  ;;  %v38490_v19 = vpop.f32.mrb[176].mxu0 }
 0x5cd   : > { %v38492_v3 = vpop.f32.mrb[177].mxu0 }
 0x5ce   : > { %v37511_v32 = vadd.f32 %v37510_v43, %v37441_v59 }
 0x5cf   : > { %v38560_v41 = vpop.f32.mrb[176].mxu1 }
 0x5d0   : > { %v37581_v5 = vadd.f32 %v37580_v45, %v37511_v32  ;;  %v38562_v12 = vpop.f32.mrb[177].mxu1  ;;  %v38630_v21 = vpop.f32.mrb[178].mxu0 }
 0x5d1   : > { %v38632_v51 = vpop.f32.mrb[179].mxu0 }
 0x5d2   : > { %v37651_v29 = vadd.f32 %v37650_v42, %v37581_v5 }
 0x5d4   : > { %v37721_v58 = vadd.f32 %v37720_v35, %v37651_v29 }
 0x5d5   : > { %v38700_v37 = vpop.f32.mrb[178].mxu1  ;;  %v38770_v13 = vpop.f32.mrb[180].mxu0 }
 0x5d6   : > { %v37791_v30 = vadd.f32 %v37790_v10, %v37721_v58  ;;  %v38702_v61 = vpop.f32.mrb[179].mxu1  ;;  %v38772_v49 = vpop.f32.mrb[181].mxu0 }
 0x5d8   : > { %v37861_v17 = vadd.f32 %v37860_v11, %v37791_v30 }
 0x5da   : > { %v37931_v33 = vadd.f32 %v37930_v27, %v37861_v17  ;;  %v38840_v38 = vpop.f32.mrb[180].mxu1  ;;  %v38910_v16 = vpop.f32.mrb[182].mxu0 }
 0x5db   : > { %v38842_v8 = vpop.f32.mrb[181].mxu1  ;;  %v38912_v1 = vpop.f32.mrb[183].mxu0 }
 0x5dc   : > { %v38001_v22 = vadd.f32 %v38000_v53, %v37931_v33 }
 0x5de   : > { %v38071_v43 = vadd.f32 %v38070_v40, %v38001_v22 }
 0x5df   : > { %v38980_v26 = vpop.f32.mrb[182].mxu1 }
 0x5e0   : > { %v38141_v45 = vadd.f32 %v38140_v2, %v38071_v43  ;;  %v38982_v14 = vpop.f32.mrb[183].mxu1  ;;  %v39050_v39 = vpop.f32.mrb[184].mxu0 }
 0x5e1   : > { %v39052_v28 = vpop.f32.mrb[185].mxu0 }
 0x5e2   : > { %v38211_v42 = vadd.f32 %v38210_v31, %v38141_v45 }
 0x5e4   : > { %v38281_v35 = vadd.f32 %v38280_v9, %v38211_v42 }
 0x5e5   : > { %v39120_v56 = vpop.f32.mrb[184].mxu1  ;;  %v39190_v34 = vpop.f32.mrb[186].mxu0 }
 0x5e6   : > { %v38351_v10 = vadd.f32 %v38350_v6, %v38281_v35  ;;  %v39122_v25 = vpop.f32.mrb[185].mxu1  ;;  %v39192_v48 = vpop.f32.mrb[187].mxu0 }
 0x5e8   : > { %v38421_v11 = vadd.f32 %v38420_v0, %v38351_v10 }
 0x5e9   : > { %v39260_v44 = vpop.f32.mrb[186].mxu1 }
 0x5ea   : > { %v38491_v27 = vadd.f32 %v38490_v19, %v38421_v11  ;;  %v39262_v54 = vpop.f32.mrb[187].mxu1 }
 0x5eb   : > { %v39330_v36 = vpop.f32.mrb[188].mxu0 }
 0x5ec   : > { %v38561_v46 = vadd.f32 %v38560_v41, %v38491_v27  ;;  %v39332_v53 = vpop.f32.mrb[189].mxu0 }
 0x5ee   : > { %v38631_v40 = vadd.f32 %v38630_v21, %v38561_v46  ;;  %v39400_v55 = vpop.f32.mrb[188].mxu1 }
 0x5ef   : > { %v39402_v15 = vpop.f32.mrb[189].mxu1 }
 0x5f0   : > { %v38701_v24 = vadd.f32 %v38700_v37, %v38631_v40 }
 0x5f1   : > { %v39470_v62 = vpop.f32.mrb[190].mxu0 }
 0x5f2   : > { %v38771_v2 = vadd.f32 %v38770_v13, %v38701_v24  ;;  %v39472_v7 = vpop.f32.mrb[191].mxu0 }
 0x5f4   : > { %v38841_v60 = vadd.f32 %v38840_v38, %v38771_v2  ;;  %v39540_v31 = vpop.f32.mrb[190].mxu1 }
 0x5f5   : > { %v39542_v23 = vpop.f32.mrb[191].mxu1 }
 0x5f6   : > { %v38911_v63 = vadd.f32 %v38910_v16, %v38841_v60  ;;  %v39610_v18 = vpop.f32.mrb[192].mxu0 }
 0x5f7   : > { %v39612_v9 = vpop.f32.mrb[193].mxu0 }
 0x5f8   : > { %v38981_v57 = vadd.f32 %v38980_v26, %v38911_v63 }
 0x5f9   : > { %v39680_v50 = vpop.f32.mrb[192].mxu1 }
 0x5fa   : > { %v39051_v6 = vadd.f32 %v39050_v39, %v38981_v57  ;;  %v39682_v47 = vpop.f32.mrb[193].mxu1  ;;  %v39750_v20 = vpop.f32.mrb[194].mxu0 }
 0x5fb   : > { %v39752_v4 = vpop.f32.mrb[195].mxu0 }
 0x5fc   : > { %v39121_v0 = vadd.f32 %v39120_v56, %v39051_v6 }
 0x5fe   : > { %v39191_v52 = vadd.f32 %v39190_v34, %v39121_v0 }
 0x5ff   : > { %v39820_v59 = vpop.f32.mrb[194].mxu1  ;;  %v39890_v19 = vpop.f32.mrb[196].mxu0 }
 0x600   : > { %v39261_v3 = vadd.f32 %v39260_v44, %v39191_v52  ;;  %v39822_v32 = vpop.f32.mrb[195].mxu1  ;;  %v39892_v41 = vpop.f32.mrb[197].mxu0 }
 0x602   : > { %v39331_v5 = vadd.f32 %v39330_v36, %v39261_v3 }
 0x604   : > { %v39401_v12 = vadd.f32 %v39400_v55, %v39331_v5  ;;  %v39960_v21 = vpop.f32.mrb[196].mxu1  ;;  %v40030_v51 = vpop.f32.mrb[198].mxu0 }
 0x605   : > { %v39962_v29 = vpop.f32.mrb[197].mxu1  ;;  %v40032_v58 = vpop.f32.mrb[199].mxu0 }
 0x606   : > { %v39471_v37 = vadd.f32 %v39470_v62, %v39401_v12 }
 0x608   : > { %v39541_v13 = vadd.f32 %v39540_v31, %v39471_v37 }
 0x609   : > { %v40100_v30 = vpop.f32.mrb[198].mxu1 }
 0x60a   : > { %v39611_v61 = vadd.f32 %v39610_v18, %v39541_v13  ;;  %v40102_v49 = vpop.f32.mrb[199].mxu1  ;;  %v40170_v17 = vpop.f32.mrb[200].mxu0 }
 0x60b   : > { %v40172_v33 = vpop.f32.mrb[201].mxu0 }
 0x60c   : > { %v39681_v38 = vadd.f32 %v39680_v50, %v39611_v61 }
 0x60e   : > { %v39751_v16 = vadd.f32 %v39750_v20, %v39681_v38 }
 0x60f   : > { %v40240_v8 = vpop.f32.mrb[200].mxu1  ;;  %v40310_v1 = vpop.f32.mrb[202].mxu0 }
 0x610   : > { %v39821_v22 = vadd.f32 %v39820_v59, %v39751_v16  ;;  %v40242_v43 = vpop.f32.mrb[201].mxu1  ;;  %v40312_v26 = vpop.f32.mrb[203].mxu0 }
 0x612   : > { %v39891_v45 = vadd.f32 %v39890_v19, %v39821_v22 }
 0x613   : > { %v40380_v14 = vpop.f32.mrb[202].mxu1 }
 0x614   : > { %v39961_v39 = vadd.f32 %v39960_v21, %v39891_v45  ;;  %v40382_v28 = vpop.f32.mrb[203].mxu1 }
 0x615   : > { %v40450_v42 = vpop.f32.mrb[204].mxu0 }
 0x616   : > { %v40031_v35 = vadd.f32 %v40030_v51, %v39961_v39  ;;  %v40452_v56 = vpop.f32.mrb[205].mxu0 }
 0x618   : > { %v40101_v34 = vadd.f32 %v40100_v30, %v40031_v35  ;;  %v40520_v10 = vpop.f32.mrb[204].mxu1 }
 0x619   : > { %v40522_v25 = vpop.f32.mrb[205].mxu1 }
 0x61a   : > { %v40171_v48 = vadd.f32 %v40170_v17, %v40101_v34 }
 0x61b   : > { %v40590_v11 = vpop.f32.mrb[206].mxu0 }
 0x61c   : > { %v40241_v44 = vadd.f32 %v40240_v8, %v40171_v48  ;;  %v40592_v27 = vpop.f32.mrb[207].mxu0 }
 0x61e   : > { %v40311_v54 = vadd.f32 %v40310_v1, %v40241_v44  ;;  %v40660_v36 = vpop.f32.mrb[206].mxu1 }
 0x61f   : > { %v40662_v46 = vpop.f32.mrb[207].mxu1 }
 0x620   : > { %v40381_v53 = vadd.f32 %v40380_v14, %v40311_v54  ;;  %v40730_v40 = vpop.f32.mrb[208].mxu0 }
 0x621   : > { %v40732_v55 = vpop.f32.mrb[209].mxu0 }
 0x622   : > { %v40451_v15 = vadd.f32 %v40450_v42, %v40381_v53 }
 0x623   : > { %v40800_v24 = vpop.f32.mrb[208].mxu1 }
 0x624   : > { %v40521_v62 = vadd.f32 %v40520_v10, %v40451_v15  ;;  %v40802_v2 = vpop.f32.mrb[209].mxu1  ;;  %v40870_v7 = vpop.f32.mrb[210].mxu0 }
 0x625   : > { %v40872_v60 = vpop.f32.mrb[211].mxu0 }
 0x626   : > { %v40591_v31 = vadd.f32 %v40590_v11, %v40521_v62 }
 0x628   : > { %v40661_v23 = vadd.f32 %v40660_v36, %v40591_v31 }
 0x629   : > { %v40940_v63 = vpop.f32.mrb[210].mxu1  ;;  %v41010_v18 = vpop.f32.mrb[212].mxu0 }
 0x62a   : > { %v40731_v9 = vadd.f32 %v40730_v40, %v40661_v23  ;;  %v40942_v57 = vpop.f32.mrb[211].mxu1  ;;  %v41012_v50 = vpop.f32.mrb[213].mxu0 }
 0x62c   : > { %v40801_v6 = vadd.f32 %v40800_v24, %v40731_v9 }
 0x62e   : > { %v40871_v47 = vadd.f32 %v40870_v7, %v40801_v6  ;;  %v41080_v20 = vpop.f32.mrb[212].mxu1  ;;  %v41150_v4 = vpop.f32.mrb[214].mxu0 }
 0x62f   : > { %v41082_v0 = vpop.f32.mrb[213].mxu1  ;;  %v41152_v52 = vpop.f32.mrb[215].mxu0 }
 0x630   : > { %v40941_v59 = vadd.f32 %v40940_v63, %v40871_v47 }
 0x632   : > { %v41011_v19 = vadd.f32 %v41010_v18, %v40941_v59 }
 0x633   : > { %v41220_v3 = vpop.f32.mrb[214].mxu1 }
 0x634   : > { %v41081_v32 = vadd.f32 %v41080_v20, %v41011_v19  ;;  %v41222_v41 = vpop.f32.mrb[215].mxu1  ;;  %v41290_v5 = vpop.f32.mrb[216].mxu0 }
 0x635   : > { %v41292_v12 = vpop.f32.mrb[217].mxu0  ;;  %v25155_v41 = vld [vmem:[#allocation2] sm:$0x3] }
 0x636   : > { %v41151_v21 = vadd.f32 %v41150_v4, %v41081_v32 }
 0x638   : > { %v41221_v51 = vadd.f32 %v41220_v3, %v41151_v21 }
 0x639   : > { %v41360_v29 = vpop.f32.mrb[216].mxu1  ;;  %v41430_v58 = vpop.f32.mrb[218].mxu0 }
 0x63a   : > { %v41291_v37 = vadd.f32 %v41290_v5, %v41221_v51  ;;  %v41362_v13 = vpop.f32.mrb[217].mxu1  ;;  %v41432_v30 = vpop.f32.mrb[219].mxu0 }
 0x63c   : > { %v41361_v61 = vadd.f32 %v41360_v29, %v41291_v37 }
 0x63d   : > { %v41500_v49 = vpop.f32.mrb[218].mxu1 }
 0x63e   : > { %v41431_v17 = vadd.f32 %v41430_v58, %v41361_v61  ;;  %v41502_v33 = vpop.f32.mrb[219].mxu1 }
 0x63f   : > { %v41570_v38 = vpop.f32.mrb[220].mxu0 }
 0x640   : > { %v41501_v16 = vadd.f32 %v41500_v49, %v41431_v17  ;;  %v41572_v8 = vpop.f32.mrb[221].mxu0 }
 0x642   : > { %v41571_v1 = vadd.f32 %v41570_v38, %v41501_v16  ;;  %v41640_v22 = vpop.f32.mrb[220].mxu1 }
 0x643   : > { %v41642_v43 = vpop.f32.mrb[221].mxu1 }
 0x644   : > { %v41641_v26 = vadd.f32 %v41640_v22, %v41571_v1 }
 0x645   : > { %v41710_v45 = vpop.f32.mrb[222].mxu0 }
 0x646   : > { %v41711_v14 = vadd.f32 %v41710_v45, %v41641_v26  ;;  %v41712_v39 = vpop.f32.mrb[223].mxu0 }
 0x648   : > { %v41780_v28 = vpop.f32.mrb[222].mxu1 }
 0x649   : > { %v41781_v42 = vadd.f32 %v41780_v28, %v41711_v14  ;;  %v41782_v35 = vpop.f32.mrb[223].mxu1 }
 0x64a   : > { %v41850_v56 = vpop.f32.mrb[224].mxu0 }
 0x64b   : > { %v41851_v34 = vadd.f32 %v41850_v56, %v41781_v42  ;;  %v41852_v10 = vpop.f32.mrb[225].mxu0 }
 0x64d   : > { %v41920_v25 = vpop.f32.mrb[224].mxu1 }
 0x64e   : > { %v41921_v48 = vadd.f32 %v41920_v25, %v41851_v34  ;;  %v41922_v11 = vpop.f32.mrb[225].mxu1  ;;  %v41990_v44 = vpop.f32.mrb[226].mxu0 }
 0x64f   : > { %v41992_v27 = vpop.f32.mrb[227].mxu0 }
 0x650   : > { %v41991_v54 = vadd.f32 %v41990_v44, %v41921_v48 }
 0x653   : > { %v42060_v36 = vpop.f32.mrb[226].mxu1  ;;  %v42130_v46 = vpop.f32.mrb[228].mxu0 }
 0x654   : > { %v42061_v53 = vadd.f32 %v42060_v36, %v41991_v54  ;;  %v42062_v40 = vpop.f32.mrb[227].mxu1  ;;  %v42132_v55 = vpop.f32.mrb[229].mxu0 }
 0x656   : > { %v42131_v15 = vadd.f32 %v42130_v46, %v42061_v53 }
 0x658   : > { %v42200_v24 = vpop.f32.mrb[228].mxu1  ;;  %v42270_v62 = vpop.f32.mrb[230].mxu0 }
 0x659   : > { %v42201_v2 = vadd.f32 %v42200_v24, %v42131_v15  ;;  %v42202_v7 = vpop.f32.mrb[229].mxu1  ;;  %v42272_v60 = vpop.f32.mrb[231].mxu0 }
 0x65b   : > { %v42271_v31 = vadd.f32 %v42270_v62, %v42201_v2 }
 0x65d   : > { %v42340_v23 = vpop.f32.mrb[230].mxu1 }
 0x65e   : > { %v42341_v63 = vadd.f32 %v42340_v23, %v42271_v31  ;;  %v42342_v18 = vpop.f32.mrb[231].mxu1  ;;  %v42410_v9 = vpop.f32.mrb[232].mxu0 }
 0x65f   : > { %v42412_v57 = vpop.f32.mrb[233].mxu0 }
 0x660   : > { %v42411_v50 = vadd.f32 %v42410_v9, %v42341_v63 }
 0x663   : > { %v42480_v6 = vpop.f32.mrb[232].mxu1  ;;  %v42550_v47 = vpop.f32.mrb[234].mxu0 }
 0x664   : > { %v42481_v20 = vadd.f32 %v42480_v6, %v42411_v50  ;;  %v42482_v4 = vpop.f32.mrb[233].mxu1  ;;  %v42552_v0 = vpop.f32.mrb[235].mxu0 }
 0x666   : > { %v42551_v52 = vadd.f32 %v42550_v47, %v42481_v20 }
 0x667   : > { %v42620_v59 = vpop.f32.mrb[234].mxu1 }
 0x668   : > { %v42621_v19 = vadd.f32 %v42620_v59, %v42551_v52  ;;  %v42622_v3 = vpop.f32.mrb[235].mxu1  ;;  %v42690_v32 = vpop.f32.mrb[236].mxu0 }
 0x669   : > { %v42692_v5 = vpop.f32.mrb[237].mxu0 }
 0x66a   : > { %v42691_v12 = vadd.f32 %v42690_v32, %v42621_v19 }
 0x66c   : > { %v42694_v21 = vadd.f32 %v42691_v12, %v25155_v41 }
 0x66e   : > { %42696 = vst.msk [vmem:[#allocation2] sm:$0x3] %vm42695_vm12, %v42694_v21 }
 0x66f PF: > { %p43296_p6 = scmp.ne.s32.totalorder %s44243_s15, 2 }
 0x670   : > { %vm42702_vm13 = vcmask (!%p43296_p6), 25600  }
 0x671   : > { %42700 = sbr.rel (%p43296_p6) target bundleno = 1656 (0x678), region = 52 }
 0x675   : > { %v42701_v51 = vld [vmem:[#allocation2] sm:$0x3] (!%p43296_p6) }
 0x676   : > { %42703 = vst.msk [vmem:[%s44489_s25] sm:$0x3] (!%p43296_p6), %vm42702_vm13, %v42701_v51 }
 0x678 PF: > { %s18_s19 = sadd.s32 1, %s44259_s19   ;;  %s47987_s8 = sld [smem:[#allocation9_spill]] }
 0x679   : > { %p15_p8 = scmp.ge.s32.totalorder %s18_s19, 8   ;;  %s47988_s29 = sld [smem:[#allocation10_spill]] }
 0x67a   : > { %s47989_s9 = smov %s44223_s10  ;;  %s47990_s10 = smov %s44227_s11 }
 0x67b   : > { %s47991_s11 = smov %s44396_s12  ;;  %s47992_s12 = smov %s44235_s13 }
 0x67c   : > { %s47993_s13 = smov %s44239_s14  ;;  %s47994_s14 = smov %s44399_s22 }
 0x67d   : > { %s47995_s15 = smov %s44251_s17  ;;  %s47996_s16 = smov %s44255_s18 }
 0x67e   : > { %s47997_s17 = smov %s47987_s8  ;;  %17 = sbr.rel (!%p15_p8) target bundleno = 9 (0x9), region = 97 }
 0x67f   : > { %s47998_s18 = smov %s47988_s29 }
 0x685   :  { %42723 = vsyncpa [#allocation4], 1 }
 0x686   :  { %42725 = vsyncpa [#allocation4 + $0x1], 1 }
 0x687   :  { %42726 = vsyncpa [#allocation6], 1 }
 0x688   :  { %42728 = vsyncpa [#allocation6 + $0x1], 1 }

</bundles_post_ra>
